<compile_context>
chip_gen: v5e
topology: v5e:2x2
jax: 0.10.0
libtpu: 0.0.40
codegen_flags: <defaults>
</compile_context>

<pallas_src>
import functools

import numpy as np

import jax
import jax.numpy as jnp
from jax.experimental import pallas as pl
from jax.experimental.pallas import tpu as pltpu


# ----------------------------------------------------------------------------
# Fused kernel: one batch element per grid step.
#
# Localization activations use an (H, W*C) "rows" layout (lane index = w*C + c); the 3x3
# convs are row-shift matmuls + precomputed banded weight matrices, the 2x2 max-pools are
# (even/odd row selection matmuls + max) for rows and (lane roll by C + even-column
# selection matmul) for columns.  The sampling image uses a (C*W, H) layout so H is the
# contraction axis of the y-interpolation matmul, and the result is written lane-dense as
# (C, H*W).
# ----------------------------------------------------------------------------

def st_kernel(x_ref, img_ref,
              sdy1_ref, m1_ref, b1_ref, pr1_ref, pc1_ref,
              sdy2_ref, m2_ref, b2_ref, pr2_ref,
              wp_ref, fc1b_ref, fc2w_ref, fc2b_ref,
              bix_ref, biy_ref, csum_ref,
              out_ref, theta_ref, *, H, W, C):
    f32 = jnp.float32
    HW = H * W

    # ---------------- localization: conv1 (3->16) + ReLU ----------------
    x1 = x_ref[0]                                                     # (32, 96)
    acc = None
    for kh in range(3):
        xs = jnp.dot(sdy1_ref[kh], x1, preferred_element_type=f32)    # (32, 96) row shift
        part = jnp.dot(xs, m1_ref[kh], preferred_element_type=f32)    # (32, 512)
        acc = part if acc is None else acc + part
    y1 = jnp.maximum(acc + b1_ref[...], 0.0)                          # (32, 512)

    # ---- 2x2 max-pool #1 -> (16, 256) ----
    # rows: even/odd selection matmuls (tiny constants) + max
    vr = jnp.maximum(jnp.dot(pr1_ref[0], y1, preferred_element_type=f32),
                     jnp.dot(pr1_ref[1], y1, preferred_element_type=f32))   # (16, 512)
    # cols: lane roll by C1=16 (XLU, free) + single even-column selection matmul
    vc = jnp.maximum(vr, pltpu.roll(vr, shift=vr.shape[1] - 16, axis=1))
    p1 = jnp.dot(vc, pc1_ref[...], preferred_element_type=f32)              # (16, 256)

    # ---------------- conv2 (16->32) + ReLU ----------------
    acc2 = None
    for kh in range(3):
        xs = jnp.dot(sdy2_ref[kh], p1, preferred_element_type=f32)    # (16, 256)
        part = jnp.dot(xs, m2_ref[kh], preferred_element_type=f32)    # (16, 512)
        acc2 = part if acc2 is None else acc2 + part
    y2 = jnp.maximum(acc2 + b2_ref[...], 0.0)                         # (16, 512)

    # ---- 2x2 max-pool #2: rows compacted, columns max'ed but left dilated ----
    # (the column compaction is absorbed into the fc1 weights -> no pc2 constant at all)
    vr2 = jnp.maximum(jnp.dot(pr2_ref[0], y2, preferred_element_type=f32),
                      jnp.dot(pr2_ref[1], y2, preferred_element_type=f32))  # (8, 512)
    vc2 = jnp.maximum(vr2, pltpu.roll(vr2, shift=vr2.shape[1] - 32, axis=1))  # (8, 512)

    # ---- fc1 (2048 -> 32): 8 independent (1,512)@(512,32) partials, tree-summed ----
    parts = [jnp.dot(vc2[r:r + 1, :], wp_ref[r], preferred_element_type=f32)
             for r in range(8)]
    h = fc1b_ref[...] + (((parts[0] + parts[1]) + (parts[2] + parts[3]))
                         + ((parts[4] + parts[5]) + (parts[6] + parts[7])))
    h = jnp.maximum(h, 0.0)                                           # (1, 32)

    # ---- fc2 (32 -> 6): theta ----
    theta = jnp.dot(h, fc2w_ref[...], preferred_element_type=f32) + fc2b_ref[...]  # (1, 6)
    theta_ref[0] = theta

    # ---------------- affine_grid + bilinear grid_sample (align_corners=True) ----------
    # Un-normalized pixel coordinates straight from theta via a tiny basis matmul
    # (no scalar extraction, no in-kernel integer div/mod).
    ix = jnp.dot(theta, bix_ref[...], preferred_element_type=f32) + (0.5 * (W - 1))  # (1, HW)
    iy = jnp.dot(theta, biy_ref[...], preferred_element_type=f32) + (0.5 * (H - 1))  # (1, HW)

    x0f = jnp.floor(ix)
    y0f = jnp.floor(iy)
    wx1 = ix - x0f
    wx0 = 1.0 - wx1
    wy1 = iy - y0f
    wy0 = 1.0 - wy1

    # y-interpolation: one (C*W, H) @ (H, HW) matmul does it for every image column.
    row_f = jax.lax.broadcasted_iota(jnp.int32, (H, HW), 0).astype(f32)
    rsel = ((row_f == y0f).astype(f32) * wy0
            + (row_f == (y0f + 1.0)).astype(f32) * wy1)               # (H, HW)
    img = img_ref[0]                                                  # (C*W, H)
    m = jnp.dot(img, rsel, preferred_element_type=f32)                # (C*W, HW)

    # x-interpolation: (W, HW) weighted column mask, replicated over channels, then a
    # per-channel summing matmul.  Out-of-bounds corners fall out with zero weight.
    col_f = jax.lax.broadcasted_iota(jnp.int32, (W, HW), 0).astype(f32)
    csel = ((col_f == x0f).astype(f32) * wx0
            + (col_f == (x0f + 1.0)).astype(f32) * wx1)               # (W, HW)
    cmask = jnp.concatenate([csel] * C, axis=0)                       # (C*W, HW)

    out_ref[0] = jnp.dot(csum_ref[...], m * cmask, preferred_element_type=f32)  # (C, HW)


# ----------------------------------------------------------------------------
# pallas_call wrapper
# ----------------------------------------------------------------------------

CONST_ORDER = ["sdy1", "m1", "b1row", "pr1", "pc1e",
               "sdy2", "m2", "b2row", "pr2",
               "wp", "fc1b", "fc2wT", "fc2b",
               "bix", "biy", "csum"]


def _const_spec(arr):
    ndim = arr.ndim
    idx_map = lambda b, _n=ndim: (0,) * _n
    try:
        # Constants never change across the grid -> single-buffer them.
        return pl.BlockSpec(arr.shape, idx_map, pipeline_mode=pl.Buffered(1))
    except TypeError:
        return pl.BlockSpec(arr.shape, idx_map)


def spatial_transformer_forward(x_nchw, params):
    """x_nchw: (B, 3, 32, 32) float32.  Returns (x_trans (B,3,32,32), theta (B,2,3))."""
    B, C, H, W = x_nchw.shape
    HW = H * W

    # Layout plumbing only (XLA transposes outside the kernel):
    #   localization rows: (H, W*C) with lane index w*C + c
    #   sampling image   : (C*W, H) so H is the y-interp contraction axis
    x_rows = jnp.transpose(x_nchw, (0, 2, 3, 1)).reshape(B, H, W * C)
    img_t = jnp.transpose(x_nchw, (0, 1, 3, 2)).reshape(B, C * W, H)

    consts = [params[k] for k in CONST_ORDER]
    kern = functools.partial(st_kernel, H=H, W=W, C=C)

    in_specs = [pl.BlockSpec((1, H, W * C), lambda b: (b, 0, 0)),
                pl.BlockSpec((1, C * W, H), lambda b: (b, 0, 0))]
    in_specs += [_const_spec(a) for a in consts]
    out_specs = [pl.BlockSpec((1, C, HW), lambda b: (b, 0, 0)),
                 pl.BlockSpec((1, 1, 6), lambda b: (b, 0, 0))]
    out_shapes = (jax.ShapeDtypeStruct((B, C, HW), jnp.float32),
                  jax.ShapeDtypeStruct((B, 1, 6), jnp.float32))

    x_flat, theta = pl.pallas_call(
        kern,
        out_shape=out_shapes,
        grid=(B,),
        in_specs=in_specs,
        out_specs=out_specs,
        compiler_params=pltpu.CompilerParams(dimension_semantics=("parallel",)),
    )(x_rows, img_t, *consts)

    return x_flat.reshape(B, C, H, W), theta.reshape(B, 2, 3)


# ----------------------------------------------------------------------------
# One-time parameter restructuring (plain numpy, outside jit)
# ----------------------------------------------------------------------------

def _row_shift_mats(H):
    S = np.zeros((3, H, H), np.float32)
    for kh in range(3):
        dy = kh - 1
        for h in range(H):
            hp = h + dy
            if 0 <= hp < H:
                S[kh, h, hp] = 1.0
    return S


def _band_mats(weight, W):
    # weight: (Cout, Cin, 3, 3) PyTorch layout -> 3 banded (W*Cin, W*Cout) matrices.
    Cout, Cin, _, _ = weight.shape
    M = np.zeros((3, W * Cin, W * Cout), np.float32)
    for kh in range(3):
        for kw in range(3):
            dx = kw - 1
            tap = weight[:, :, kh, kw].T                       # (Cin, Cout)
            for w in range(W):
                wp = w + dx
                if 0 <= wp < W:
                    M[kh, wp * Cin:(wp + 1) * Cin, w * Cout:(w + 1) * Cout] = tap
    return M


def _pool_row_mats(H):
    Ho = H // 2
    P = np.zeros((2, Ho, H), np.float32)
    P[0, np.arange(Ho), 2 * np.arange(Ho)] = 1.0
    P[1, np.arange(Ho), 2 * np.arange(Ho) + 1] = 1.0
    return P


def _even_col_select(W, C):
    # selects lanes (2*wo)*C + c  ->  wo*C + c    (odd columns handled by a lane roll)
    Wo = W // 2
    P = np.zeros((W * C, Wo * C), np.float32)
    for wo in range(Wo):
        for c in range(C):
            P[(2 * wo) * C + c, wo * C + c] = 1.0
    return P


def _fc1_weights(wf1):
    # wf1: (32, 32*8*8) with PyTorch (c, h, w) flatten order.  Re-lay it out so row ho of
    # the *dilated* (8, 512) pooled map (lane = w2*32 + c, valid only at even w2)
    # contracts directly; odd-w2 rows are zero (pool2 column compaction absorbed here).
    wf1r = wf1.reshape(32, 32, 8, 8)                           # (j, c, h, w)
    wp = np.zeros((8, 16, 32, 32), np.float32)                 # (h, w2, c, j)
    wp[:, 0::2, :, :] = np.transpose(wf1r, (2, 3, 1, 0))       # (h, wo, c, j) -> even w2
    return wp.reshape(8, 512, 32)


def _grid_basis(H, W):
    # ix = theta @ Bix + 0.5*(W-1);  iy = theta @ Biy + 0.5*(H-1)   (align_corners=True)
    HW = H * W
    q = np.arange(HW)
    w = q % W
    h = q // W
    xs = -1.0 + 2.0 * w / (W - 1)
    ys = -1.0 + 2.0 * h / (H - 1)
    ax = 0.5 * (W - 1)
    ay = 0.5 * (H - 1)
    Bix = np.zeros((6, HW), np.float32)
    Biy = np.zeros((6, HW), np.float32)
    Bix[0] = ax * xs
    Bix[1] = ax * ys
    Bix[2] = ax
    Biy[3] = ay * xs
    Biy[4] = ay * ys
    Biy[5] = ay
    return Bix, Biy


def _chan_sum(C, W):
    M = np.zeros((C, C * W), np.float32)
    for c in range(C):
        M[c, c * W:(c + 1) * W] = 1.0
    return M


def build_kernel_params(w1, b1, w2, b2, wf1, bf1, wf2, bf2):
    # Fixed geometry of the module: 3x32x32 input, two /2 pools, Linear(32*8*8).
    H1 = W1 = 32
    H2 = W2 = 16
    C1 = 16
    bix, biy = _grid_basis(32, 32)
    p = {
        "sdy1": _row_shift_mats(H1),
        "m1": _band_mats(w1, W1),
        "b1row": np.tile(b1, W1)[None, :],
        "pr1": _pool_row_mats(H1),
        "pc1e": _even_col_select(W1, C1),
        "sdy2": _row_shift_mats(H2),
        "m2": _band_mats(w2, W2),
        "b2row": np.tile(b2, W2)[None, :],
        "pr2": _pool_row_mats(H2),
        "wp": _fc1_weights(wf1),
        "fc1b": bf1[None, :],
        "fc2wT": wf2.T,
        "fc2b": bf2[None, :],
        "bix": bix,
        "biy": biy,
        "csum": _chan_sum(3, 32),
    }
    return {k: jnp.asarray(v, jnp.float32) for k, v in p.items()}


def init_module_weights(key):
    ks = jax.random.split(key, 6)
    w1 = 0.10 * jax.random.normal(ks[0], (16, 3, 3, 3), jnp.float32)   # (Cout,Cin,kh,kw)
    b1 = 0.10 * jax.random.normal(ks[1], (16,), jnp.float32)
    w2 = 0.05 * jax.random.normal(ks[2], (32, 16, 3, 3), jnp.float32)
    b2 = 0.05 * jax.random.normal(ks[3], (32,), jnp.float32)
    wf1 = 0.02 * jax.random.normal(ks[4], (32, 32 * 8 * 8), jnp.float32)
    bf1 = 0.02 * jax.random.normal(ks[5], (32,), jnp.float32)
    wf2 = np.zeros((6, 32), np.float32)                                 # zeroed in __init__
    bf2 = np.array([1, 0, 0, 0, 1, 0], np.float32)                      # identity affine bias
    return [np.asarray(a) for a in (w1, b1, w2, b2, wf1, bf1)] + [wf2, bf2]


# ----------------------------------------------------------------------------
# Pure-JAX reference of the PyTorch module (for validation only)
# ----------------------------------------------------------------------------

def reference_forward(x, w1, b1, w2, b2, wf1, bf1, wf2, bf2):
    dn = ("NCHW", "OIHW", "NCHW")
    y = jax.lax.conv_general_dilated(x, jnp.asarray(w1), (1, 1), ((1, 1), (1, 1)),
                                     dimension_numbers=dn)
    y = jax.nn.relu(y + jnp.asarray(b1)[None, :, None, None])
    y = jax.lax.reduce_window(y, -jnp.inf, jax.lax.max, (1, 1, 2, 2), (1, 1, 2, 2), "VALID")
    y = jax.lax.conv_general_dilated(y, jnp.asarray(w2), (1, 1), ((1, 1), (1, 1)),
                                     dimension_numbers=dn)
    y = jax.nn.relu(y + jnp.asarray(b2)[None, :, None, None])
    y = jax.lax.reduce_window(y, -jnp.inf, jax.lax.max, (1, 1, 2, 2), (1, 1, 2, 2), "VALID")
    flat = y.reshape(y.shape[0], -1)
    h = jax.nn.relu(flat @ jnp.asarray(wf1).T + jnp.asarray(bf1))
    theta = h @ jnp.asarray(wf2).T + jnp.asarray(bf2)                  # (B, 6)

    B, C, H, W = x.shape
    yy, xx = jnp.meshgrid(jnp.linspace(-1.0, 1.0, H), jnp.linspace(-1.0, 1.0, W),
                          indexing="ij")                               # (H, W)
    t = theta.reshape(B, 2, 3)
    gx = (t[:, 0, 0][:, None, None] * xx[None] + t[:, 0, 1][:, None, None] * yy[None]
          + t[:, 0, 2][:, None, None])
    gy = (t[:, 1, 0][:, None, None] * xx[None] + t[:, 1, 1][:, None, None] * yy[None]
          + t[:, 1, 2][:, None, None])
    px = (gx + 1.0) * (W - 1) / 2.0
    py = (gy + 1.0) * (H - 1) / 2.0

    def sample_one(img, pxi, pyi):
        x0 = jnp.floor(pxi)
        y0 = jnp.floor(pyi)
        wx1 = pxi - x0
        wy1 = pyi - y0
        flat_img = img.reshape(C, H * W)

        def tap(yi, xi, wgt):
            valid = ((yi >= 0) & (yi < H) & (xi >= 0) & (xi < W)).astype(img.dtype)
            yc = jnp.clip(yi, 0, H - 1).astype(jnp.int32)
            xc = jnp.clip(xi, 0, W - 1).astype(jnp.int32)
            v = flat_img[:, (yc * W + xc).reshape(-1)].reshape(C, H, W)
            return v * (valid * wgt)[None]

        return (tap(y0, x0, (1 - wx1) * (1 - wy1)) + tap(y0, x0 + 1, wx1 * (1 - wy1))
                + tap(y0 + 1, x0, (1 - wx1) * wy1) + tap(y0 + 1, x0 + 1, wx1 * wy1))

    out = jax.vmap(sample_one)(x, px, py)
    return out, theta.reshape(B, 2, 3)


# ----------------------------------------------------------------------------

if __name__ == "__main__":
    key = jax.random.PRNGKey(0)
    k_x, k_w, k_f2 = jax.random.split(key, 3)
    # The module's Linear(32*8*8) after two /2 pools fixes the input to 3x32x32.
    x = jax.random.normal(k_x, (2, 3, 32, 32), jnp.float32)
    weights = init_module_weights(k_w)
    params = build_kernel_params(*weights)

    fwd = jax.jit(lambda inp: spatial_transformer_forward(inp, params))
    x_trans, theta = fwd(x)
    jax.block_until_ready((x_trans, theta))
    assert x_trans.shape == (2, 3, 32, 32) and theta.shape == (2, 2, 3)

    # fc2 is zero-initialized with an identity bias (as in the PyTorch __init__), so theta
    # must be the identity transform and grid_sample must reproduce the input.
    ident = jnp.tile(jnp.array([[1.0, 0.0, 0.0], [0.0, 1.0, 0.0]], jnp.float32), (2, 1, 1))
    assert jnp.allclose(theta, ident, atol=1e-5)
    assert jnp.allclose(x_trans, x, atol=5e-3)

    # Cross-check the full forward against a pure-JAX reference with a non-trivial fc2
    # (exercises the whole conv/pool/fc localization path and non-identity sampling).
    w1, b1, w2, b2, wf1, bf1, _, bf2 = weights
    wf2_nz = np.asarray(0.05 * jax.random.normal(k_f2, (6, 32), jnp.float32))
    params_nz = build_kernel_params(w1, b1, w2, b2, wf1, bf1, wf2_nz, bf2)
    fwd_nz = jax.jit(lambda inp: spatial_transformer_forward(inp, params_nz))
    x_trans_nz, theta_nz = fwd_nz(x)
    x_want, theta_want = reference_forward(x, w1, b1, w2, b2, wf1, bf1, wf2_nz, bf2)
    jax.block_until_ready((x_trans_nz, theta_nz, x_want, theta_want))
    assert jnp.allclose(theta_nz, theta_want, atol=1e-3)
    assert jnp.allclose(x_trans_nz, x_want, atol=5e-3, rtol=1e-3)

    print("KERNEL_OK")
</pallas_src>

<mosaic_0001>
module attributes {stable_mosaic.version = 11 : i64} {
  func.func @st_kernel(%arg0: i32, %arg1: memref<1x32x96xf32, #tpu.memory_space<vmem>>, %arg2: memref<1x96x32xf32, #tpu.memory_space<vmem>>, %arg3: memref<3x32x32xf32, #tpu.memory_space<vmem>>, %arg4: memref<3x96x512xf32, #tpu.memory_space<vmem>>, %arg5: memref<1x512xf32, #tpu.memory_space<vmem>>, %arg6: memref<2x16x32xf32, #tpu.memory_space<vmem>>, %arg7: memref<512x256xf32, #tpu.memory_space<vmem>>, %arg8: memref<3x16x16xf32, #tpu.memory_space<vmem>>, %arg9: memref<3x256x512xf32, #tpu.memory_space<vmem>>, %arg10: memref<1x512xf32, #tpu.memory_space<vmem>>, %arg11: memref<2x8x16xf32, #tpu.memory_space<vmem>>, %arg12: memref<8x512x32xf32, #tpu.memory_space<vmem>>, %arg13: memref<1x32xf32, #tpu.memory_space<vmem>>, %arg14: memref<32x6xf32, #tpu.memory_space<vmem>>, %arg15: memref<1x6xf32, #tpu.memory_space<vmem>>, %arg16: memref<6x1024xf32, #tpu.memory_space<vmem>>, %arg17: memref<6x1024xf32, #tpu.memory_space<vmem>>, %arg18: memref<3x96xf32, #tpu.memory_space<vmem>>, %arg19: memref<1x3x1024xf32, #tpu.memory_space<vmem>>, %arg20: memref<1x1x6xf32, #tpu.memory_space<vmem>>) attributes {dimension_semantics = [#tpu.dimension_semantics<parallel>], iteration_bounds = array<i64: 2>, scalar_prefetch = 0 : i64, scratch_operands = 0 : i64, tpu.core_type = #tpu.core_type<tc>, window_params = [{transform_indices = @transform_0, window_bounds = array<i64: 1, 32, 96>}, {transform_indices = @transform_1, window_bounds = array<i64: 1, 96, 32>}, {pipeline_mode = #tpu.pipeline_mode<synchronous>, transform_indices = @transform_2, window_bounds = array<i64: 3, 32, 32>}, {pipeline_mode = #tpu.pipeline_mode<synchronous>, transform_indices = @transform_3, window_bounds = array<i64: 3, 96, 512>}, {pipeline_mode = #tpu.pipeline_mode<synchronous>, transform_indices = @transform_4, window_bounds = array<i64: 1, 512>}, {pipeline_mode = #tpu.pipeline_mode<synchronous>, transform_indices = @transform_5, window_bounds = array<i64: 2, 16, 32>}, {pipeline_mode = #tpu.pipeline_mode<synchronous>, transform_indices = @transform_6, window_bounds = array<i64: 512, 256>}, {pipeline_mode = #tpu.pipeline_mode<synchronous>, transform_indices = @transform_7, window_bounds = array<i64: 3, 16, 16>}, {pipeline_mode = #tpu.pipeline_mode<synchronous>, transform_indices = @transform_8, window_bounds = array<i64: 3, 256, 512>}, {pipeline_mode = #tpu.pipeline_mode<synchronous>, transform_indices = @transform_9, window_bounds = array<i64: 1, 512>}, {pipeline_mode = #tpu.pipeline_mode<synchronous>, transform_indices = @transform_10, window_bounds = array<i64: 2, 8, 16>}, {pipeline_mode = #tpu.pipeline_mode<synchronous>, transform_indices = @transform_11, window_bounds = array<i64: 8, 512, 32>}, {pipeline_mode = #tpu.pipeline_mode<synchronous>, transform_indices = @transform_12, window_bounds = array<i64: 1, 32>}, {pipeline_mode = #tpu.pipeline_mode<synchronous>, transform_indices = @transform_13, window_bounds = array<i64: 32, 6>}, {pipeline_mode = #tpu.pipeline_mode<synchronous>, transform_indices = @transform_14, window_bounds = array<i64: 1, 6>}, {pipeline_mode = #tpu.pipeline_mode<synchronous>, transform_indices = @transform_15, window_bounds = array<i64: 6, 1024>}, {pipeline_mode = #tpu.pipeline_mode<synchronous>, transform_indices = @transform_16, window_bounds = array<i64: 6, 1024>}, {pipeline_mode = #tpu.pipeline_mode<synchronous>, transform_indices = @transform_17, window_bounds = array<i64: 3, 96>}, {transform_indices = @transform_18, window_bounds = array<i64: 1, 3, 1024>}, {transform_indices = @transform_19, window_bounds = array<i64: 1, 1, 6>}]} {
    %c0 = arith.constant 0 : index
    %c0_0 = arith.constant 0 : index
    %c0_1 = arith.constant 0 : index
    %0 = vector.load %arg1[%c0, %c0_0, %c0_1] : memref<1x32x96xf32, #tpu.memory_space<vmem>>, vector<1x32x96xf32>
    %1 = vector.shape_cast %0 : vector<1x32x96xf32> to vector<32x96xf32>
    %c0_2 = arith.constant 0 : index
    %c0_3 = arith.constant 0 : index
    %c0_4 = arith.constant 0 : index
    %2 = vector.load %arg3[%c0_2, %c0_3, %c0_4] : memref<3x32x32xf32, #tpu.memory_space<vmem>>, vector<1x32x32xf32>
    %3 = vector.shape_cast %2 : vector<1x32x32xf32> to vector<32x32xf32>
    %cst = arith.constant dense<0.000000e+00> : vector<32x96xf32>
    %4 = tpu.matmul %3, %1, %cst {dimension_numbers = #tpu.dot_dimension_numbers<[1], [0], [0], [1], [0, 0, 1, 1], [], []>} : vector<32x32xf32>, vector<32x96xf32>, vector<32x96xf32> -> vector<32x96xf32>
    %c0_5 = arith.constant 0 : index
    %c0_6 = arith.constant 0 : index
    %c0_7 = arith.constant 0 : index
    %5 = vector.load %arg4[%c0_5, %c0_6, %c0_7] : memref<3x96x512xf32, #tpu.memory_space<vmem>>, vector<1x96x512xf32>
    %6 = vector.shape_cast %5 : vector<1x96x512xf32> to vector<96x512xf32>
    %cst_8 = arith.constant dense<0.000000e+00> : vector<32x512xf32>
    %7 = tpu.matmul %4, %6, %cst_8 {dimension_numbers = #tpu.dot_dimension_numbers<[1], [0], [0], [1], [0, 0, 1, 1], [], []>} : vector<32x96xf32>, vector<96x512xf32>, vector<32x512xf32> -> vector<32x512xf32>
    %c1 = arith.constant 1 : index
    %c0_9 = arith.constant 0 : index
    %c0_10 = arith.constant 0 : index
    %8 = vector.load %arg3[%c1, %c0_9, %c0_10] : memref<3x32x32xf32, #tpu.memory_space<vmem>>, vector<1x32x32xf32>
    %9 = vector.shape_cast %8 : vector<1x32x32xf32> to vector<32x32xf32>
    %cst_11 = arith.constant dense<0.000000e+00> : vector<32x96xf32>
    %10 = tpu.matmul %9, %1, %cst_11 {dimension_numbers = #tpu.dot_dimension_numbers<[1], [0], [0], [1], [0, 0, 1, 1], [], []>} : vector<32x32xf32>, vector<32x96xf32>, vector<32x96xf32> -> vector<32x96xf32>
    %c1_12 = arith.constant 1 : index
    %c0_13 = arith.constant 0 : index
    %c0_14 = arith.constant 0 : index
    %11 = vector.load %arg4[%c1_12, %c0_13, %c0_14] : memref<3x96x512xf32, #tpu.memory_space<vmem>>, vector<1x96x512xf32>
    %12 = vector.shape_cast %11 : vector<1x96x512xf32> to vector<96x512xf32>
    %cst_15 = arith.constant dense<0.000000e+00> : vector<32x512xf32>
    %13 = tpu.matmul %10, %12, %cst_15 {dimension_numbers = #tpu.dot_dimension_numbers<[1], [0], [0], [1], [0, 0, 1, 1], [], []>} : vector<32x96xf32>, vector<96x512xf32>, vector<32x512xf32> -> vector<32x512xf32>
    %14 = arith.addf %7, %13 : vector<32x512xf32>
    %c2 = arith.constant 2 : index
    %c0_16 = arith.constant 0 : index
    %c0_17 = arith.constant 0 : index
    %15 = vector.load %arg3[%c2, %c0_16, %c0_17] : memref<3x32x32xf32, #tpu.memory_space<vmem>>, vector<1x32x32xf32>
    %16 = vector.shape_cast %15 : vector<1x32x32xf32> to vector<32x32xf32>
    %cst_18 = arith.constant dense<0.000000e+00> : vector<32x96xf32>
    %17 = tpu.matmul %16, %1, %cst_18 {dimension_numbers = #tpu.dot_dimension_numbers<[1], [0], [0], [1], [0, 0, 1, 1], [], []>} : vector<32x32xf32>, vector<32x96xf32>, vector<32x96xf32> -> vector<32x96xf32>
    %c2_19 = arith.constant 2 : index
    %c0_20 = arith.constant 0 : index
    %c0_21 = arith.constant 0 : index
    %18 = vector.load %arg4[%c2_19, %c0_20, %c0_21] : memref<3x96x512xf32, #tpu.memory_space<vmem>>, vector<1x96x512xf32>
    %19 = vector.shape_cast %18 : vector<1x96x512xf32> to vector<96x512xf32>
    %cst_22 = arith.constant dense<0.000000e+00> : vector<32x512xf32>
    %20 = tpu.matmul %17, %19, %cst_22 {dimension_numbers = #tpu.dot_dimension_numbers<[1], [0], [0], [1], [0, 0, 1, 1], [], []>} : vector<32x96xf32>, vector<96x512xf32>, vector<32x512xf32> -> vector<32x512xf32>
    %21 = arith.addf %14, %20 : vector<32x512xf32>
    %c0_23 = arith.constant 0 : index
    %c0_24 = arith.constant 0 : index
    %22 = vector.load %arg5[%c0_23, %c0_24] : memref<1x512xf32, #tpu.memory_space<vmem>>, vector<1x512xf32>
    %23 = vector.broadcast %22 : vector<1x512xf32> to vector<32x512xf32>
    %24 = arith.addf %21, %23 : vector<32x512xf32>
    %cst_25 = arith.constant 0.000000e+00 : f32
    %25 = vector.broadcast %cst_25 : f32 to vector<32x512xf32>
    %26 = arith.maximumf %24, %25 : vector<32x512xf32>
    %c0_26 = arith.constant 0 : index
    %c0_27 = arith.constant 0 : index
    %c0_28 = arith.constant 0 : index
    %27 = vector.load %arg6[%c0_26, %c0_27, %c0_28] : memref<2x16x32xf32, #tpu.memory_space<vmem>>, vector<1x16x32xf32>
    %28 = vector.shape_cast %27 : vector<1x16x32xf32> to vector<16x32xf32>
    %cst_29 = arith.constant dense<0.000000e+00> : vector<16x512xf32>
    %29 = tpu.matmul %28, %26, %cst_29 {dimension_numbers = #tpu.dot_dimension_numbers<[1], [0], [0], [1], [0, 0, 1, 1], [], []>} : vector<16x32xf32>, vector<32x512xf32>, vector<16x512xf32> -> vector<16x512xf32>
    %c1_30 = arith.constant 1 : index
    %c0_31 = arith.constant 0 : index
    %c0_32 = arith.constant 0 : index
    %30 = vector.load %arg6[%c1_30, %c0_31, %c0_32] : memref<2x16x32xf32, #tpu.memory_space<vmem>>, vector<1x16x32xf32>
    %31 = vector.shape_cast %30 : vector<1x16x32xf32> to vector<16x32xf32>
    %cst_33 = arith.constant dense<0.000000e+00> : vector<16x512xf32>
    %32 = tpu.matmul %31, %26, %cst_33 {dimension_numbers = #tpu.dot_dimension_numbers<[1], [0], [0], [1], [0, 0, 1, 1], [], []>} : vector<16x32xf32>, vector<32x512xf32>, vector<16x512xf32> -> vector<16x512xf32>
    %33 = arith.maximumf %29, %32 : vector<16x512xf32>
    %c496_i32 = arith.constant 496 : i32
    %34 = tpu.dynamic_rotate %33 by %c496_i32 dim 1 : vector<16x512xf32>, i32 -> vector<16x512xf32>
    %35 = arith.maximumf %33, %34 : vector<16x512xf32>
    %c0_34 = arith.constant 0 : index
    %c0_35 = arith.constant 0 : index
    %36 = vector.load %arg7[%c0_34, %c0_35] : memref<512x256xf32, #tpu.memory_space<vmem>>, vector<512x256xf32>
    %cst_36 = arith.constant dense<0.000000e+00> : vector<16x256xf32>
    %37 = tpu.matmul %35, %36, %cst_36 {dimension_numbers = #tpu.dot_dimension_numbers<[1], [0], [0], [1], [0, 0, 1, 1], [], []>} : vector<16x512xf32>, vector<512x256xf32>, vector<16x256xf32> -> vector<16x256xf32>
    %c0_37 = arith.constant 0 : index
    %c0_38 = arith.constant 0 : index
    %c0_39 = arith.constant 0 : index
    %38 = vector.load %arg8[%c0_37, %c0_38, %c0_39] : memref<3x16x16xf32, #tpu.memory_space<vmem>>, vector<1x16x16xf32>
    %39 = vector.shape_cast %38 : vector<1x16x16xf32> to vector<16x16xf32>
    %cst_40 = arith.constant dense<0.000000e+00> : vector<16x256xf32>
    %40 = tpu.matmul %39, %37, %cst_40 {dimension_numbers = #tpu.dot_dimension_numbers<[1], [0], [0], [1], [0, 0, 1, 1], [], []>} : vector<16x16xf32>, vector<16x256xf32>, vector<16x256xf32> -> vector<16x256xf32>
    %c0_41 = arith.constant 0 : index
    %c0_42 = arith.constant 0 : index
    %c0_43 = arith.constant 0 : index
    %41 = vector.load %arg9[%c0_41, %c0_42, %c0_43] : memref<3x256x512xf32, #tpu.memory_space<vmem>>, vector<1x256x512xf32>
    %42 = vector.shape_cast %41 : vector<1x256x512xf32> to vector<256x512xf32>
    %cst_44 = arith.constant dense<0.000000e+00> : vector<16x512xf32>
    %43 = tpu.matmul %40, %42, %cst_44 {dimension_numbers = #tpu.dot_dimension_numbers<[1], [0], [0], [1], [0, 0, 1, 1], [], []>} : vector<16x256xf32>, vector<256x512xf32>, vector<16x512xf32> -> vector<16x512xf32>
    %c1_45 = arith.constant 1 : index
    %c0_46 = arith.constant 0 : index
    %c0_47 = arith.constant 0 : index
    %44 = vector.load %arg8[%c1_45, %c0_46, %c0_47] : memref<3x16x16xf32, #tpu.memory_space<vmem>>, vector<1x16x16xf32>
    %45 = vector.shape_cast %44 : vector<1x16x16xf32> to vector<16x16xf32>
    %cst_48 = arith.constant dense<0.000000e+00> : vector<16x256xf32>
    %46 = tpu.matmul %45, %37, %cst_48 {dimension_numbers = #tpu.dot_dimension_numbers<[1], [0], [0], [1], [0, 0, 1, 1], [], []>} : vector<16x16xf32>, vector<16x256xf32>, vector<16x256xf32> -> vector<16x256xf32>
    %c1_49 = arith.constant 1 : index
    %c0_50 = arith.constant 0 : index
    %c0_51 = arith.constant 0 : index
    %47 = vector.load %arg9[%c1_49, %c0_50, %c0_51] : memref<3x256x512xf32, #tpu.memory_space<vmem>>, vector<1x256x512xf32>
    %48 = vector.shape_cast %47 : vector<1x256x512xf32> to vector<256x512xf32>
    %cst_52 = arith.constant dense<0.000000e+00> : vector<16x512xf32>
    %49 = tpu.matmul %46, %48, %cst_52 {dimension_numbers = #tpu.dot_dimension_numbers<[1], [0], [0], [1], [0, 0, 1, 1], [], []>} : vector<16x256xf32>, vector<256x512xf32>, vector<16x512xf32> -> vector<16x512xf32>
    %50 = arith.addf %43, %49 : vector<16x512xf32>
    %c2_53 = arith.constant 2 : index
    %c0_54 = arith.constant 0 : index
    %c0_55 = arith.constant 0 : index
    %51 = vector.load %arg8[%c2_53, %c0_54, %c0_55] : memref<3x16x16xf32, #tpu.memory_space<vmem>>, vector<1x16x16xf32>
    %52 = vector.shape_cast %51 : vector<1x16x16xf32> to vector<16x16xf32>
    %cst_56 = arith.constant dense<0.000000e+00> : vector<16x256xf32>
    %53 = tpu.matmul %52, %37, %cst_56 {dimension_numbers = #tpu.dot_dimension_numbers<[1], [0], [0], [1], [0, 0, 1, 1], [], []>} : vector<16x16xf32>, vector<16x256xf32>, vector<16x256xf32> -> vector<16x256xf32>
    %c2_57 = arith.constant 2 : index
    %c0_58 = arith.constant 0 : index
    %c0_59 = arith.constant 0 : index
    %54 = vector.load %arg9[%c2_57, %c0_58, %c0_59] : memref<3x256x512xf32, #tpu.memory_space<vmem>>, vector<1x256x512xf32>
    %55 = vector.shape_cast %54 : vector<1x256x512xf32> to vector<256x512xf32>
    %cst_60 = arith.constant dense<0.000000e+00> : vector<16x512xf32>
    %56 = tpu.matmul %53, %55, %cst_60 {dimension_numbers = #tpu.dot_dimension_numbers<[1], [0], [0], [1], [0, 0, 1, 1], [], []>} : vector<16x256xf32>, vector<256x512xf32>, vector<16x512xf32> -> vector<16x512xf32>
    %57 = arith.addf %50, %56 : vector<16x512xf32>
    %c0_61 = arith.constant 0 : index
    %c0_62 = arith.constant 0 : index
    %58 = vector.load %arg10[%c0_61, %c0_62] : memref<1x512xf32, #tpu.memory_space<vmem>>, vector<1x512xf32>
    %59 = vector.broadcast %58 : vector<1x512xf32> to vector<16x512xf32>
    %60 = arith.addf %57, %59 : vector<16x512xf32>
    %cst_63 = arith.constant 0.000000e+00 : f32
    %61 = vector.broadcast %cst_63 : f32 to vector<16x512xf32>
    %62 = arith.maximumf %60, %61 : vector<16x512xf32>
    %c0_64 = arith.constant 0 : index
    %c0_65 = arith.constant 0 : index
    %c0_66 = arith.constant 0 : index
    %63 = vector.load %arg11[%c0_64, %c0_65, %c0_66] : memref<2x8x16xf32, #tpu.memory_space<vmem>>, vector<1x8x16xf32>
    %64 = vector.shape_cast %63 : vector<1x8x16xf32> to vector<8x16xf32>
    %cst_67 = arith.constant dense<0.000000e+00> : vector<8x512xf32>
    %65 = tpu.matmul %64, %62, %cst_67 {dimension_numbers = #tpu.dot_dimension_numbers<[1], [0], [0], [1], [0, 0, 1, 1], [], []>} : vector<8x16xf32>, vector<16x512xf32>, vector<8x512xf32> -> vector<8x512xf32>
    %c1_68 = arith.constant 1 : index
    %c0_69 = arith.constant 0 : index
    %c0_70 = arith.constant 0 : index
    %66 = vector.load %arg11[%c1_68, %c0_69, %c0_70] : memref<2x8x16xf32, #tpu.memory_space<vmem>>, vector<1x8x16xf32>
    %67 = vector.shape_cast %66 : vector<1x8x16xf32> to vector<8x16xf32>
    %cst_71 = arith.constant dense<0.000000e+00> : vector<8x512xf32>
    %68 = tpu.matmul %67, %62, %cst_71 {dimension_numbers = #tpu.dot_dimension_numbers<[1], [0], [0], [1], [0, 0, 1, 1], [], []>} : vector<8x16xf32>, vector<16x512xf32>, vector<8x512xf32> -> vector<8x512xf32>
    %69 = arith.maximumf %65, %68 : vector<8x512xf32>
    %c480_i32 = arith.constant 480 : i32
    %70 = tpu.dynamic_rotate %69 by %c480_i32 dim 1 : vector<8x512xf32>, i32 -> vector<8x512xf32>
    %71 = arith.maximumf %69, %70 : vector<8x512xf32>
    %72 = vector.extract_strided_slice %71 {offsets = [0, 0], sizes = [1, 512], strides = [1, 1]} : vector<8x512xf32> to vector<1x512xf32>
    %c0_72 = arith.constant 0 : index
    %c0_73 = arith.constant 0 : index
    %c0_74 = arith.constant 0 : index
    %73 = vector.load %arg12[%c0_72, %c0_73, %c0_74] : memref<8x512x32xf32, #tpu.memory_space<vmem>>, vector<1x512x32xf32>
    %74 = vector.shape_cast %73 : vector<1x512x32xf32> to vector<512x32xf32>
    %cst_75 = arith.constant dense<0.000000e+00> : vector<1x32xf32>
    %75 = tpu.matmul %72, %74, %cst_75 {dimension_numbers = #tpu.dot_dimension_numbers<[1], [0], [0], [1], [0, 0, 1, 1], [], []>} : vector<1x512xf32>, vector<512x32xf32>, vector<1x32xf32> -> vector<1x32xf32>
    %76 = vector.extract_strided_slice %71 {offsets = [1, 0], sizes = [1, 512], strides = [1, 1]} : vector<8x512xf32> to vector<1x512xf32>
    %c1_76 = arith.constant 1 : index
    %c0_77 = arith.constant 0 : index
    %c0_78 = arith.constant 0 : index
    %77 = vector.load %arg12[%c1_76, %c0_77, %c0_78] : memref<8x512x32xf32, #tpu.memory_space<vmem>>, vector<1x512x32xf32>
    %78 = vector.shape_cast %77 : vector<1x512x32xf32> to vector<512x32xf32>
    %cst_79 = arith.constant dense<0.000000e+00> : vector<1x32xf32>
    %79 = tpu.matmul %76, %78, %cst_79 {dimension_numbers = #tpu.dot_dimension_numbers<[1], [0], [0], [1], [0, 0, 1, 1], [], []>} : vector<1x512xf32>, vector<512x32xf32>, vector<1x32xf32> -> vector<1x32xf32>
    %80 = vector.extract_strided_slice %71 {offsets = [2, 0], sizes = [1, 512], strides = [1, 1]} : vector<8x512xf32> to vector<1x512xf32>
    %c2_80 = arith.constant 2 : index
    %c0_81 = arith.constant 0 : index
    %c0_82 = arith.constant 0 : index
    %81 = vector.load %arg12[%c2_80, %c0_81, %c0_82] : memref<8x512x32xf32, #tpu.memory_space<vmem>>, vector<1x512x32xf32>
    %82 = vector.shape_cast %81 : vector<1x512x32xf32> to vector<512x32xf32>
    %cst_83 = arith.constant dense<0.000000e+00> : vector<1x32xf32>
    %83 = tpu.matmul %80, %82, %cst_83 {dimension_numbers = #tpu.dot_dimension_numbers<[1], [0], [0], [1], [0, 0, 1, 1], [], []>} : vector<1x512xf32>, vector<512x32xf32>, vector<1x32xf32> -> vector<1x32xf32>
    %84 = vector.extract_strided_slice %71 {offsets = [3, 0], sizes = [1, 512], strides = [1, 1]} : vector<8x512xf32> to vector<1x512xf32>
    %c3 = arith.constant 3 : index
    %c0_84 = arith.constant 0 : index
    %c0_85 = arith.constant 0 : index
    %85 = vector.load %arg12[%c3, %c0_84, %c0_85] : memref<8x512x32xf32, #tpu.memory_space<vmem>>, vector<1x512x32xf32>
    %86 = vector.shape_cast %85 : vector<1x512x32xf32> to vector<512x32xf32>
    %cst_86 = arith.constant dense<0.000000e+00> : vector<1x32xf32>
    %87 = tpu.matmul %84, %86, %cst_86 {dimension_numbers = #tpu.dot_dimension_numbers<[1], [0], [0], [1], [0, 0, 1, 1], [], []>} : vector<1x512xf32>, vector<512x32xf32>, vector<1x32xf32> -> vector<1x32xf32>
    %88 = vector.extract_strided_slice %71 {offsets = [4, 0], sizes = [1, 512], strides = [1, 1]} : vector<8x512xf32> to vector<1x512xf32>
    %c4 = arith.constant 4 : index
    %c0_87 = arith.constant 0 : index
    %c0_88 = arith.constant 0 : index
    %89 = vector.load %arg12[%c4, %c0_87, %c0_88] : memref<8x512x32xf32, #tpu.memory_space<vmem>>, vector<1x512x32xf32>
    %90 = vector.shape_cast %89 : vector<1x512x32xf32> to vector<512x32xf32>
    %cst_89 = arith.constant dense<0.000000e+00> : vector<1x32xf32>
    %91 = tpu.matmul %88, %90, %cst_89 {dimension_numbers = #tpu.dot_dimension_numbers<[1], [0], [0], [1], [0, 0, 1, 1], [], []>} : vector<1x512xf32>, vector<512x32xf32>, vector<1x32xf32> -> vector<1x32xf32>
    %92 = vector.extract_strided_slice %71 {offsets = [5, 0], sizes = [1, 512], strides = [1, 1]} : vector<8x512xf32> to vector<1x512xf32>
    %c5 = arith.constant 5 : index
    %c0_90 = arith.constant 0 : index
    %c0_91 = arith.constant 0 : index
    %93 = vector.load %arg12[%c5, %c0_90, %c0_91] : memref<8x512x32xf32, #tpu.memory_space<vmem>>, vector<1x512x32xf32>
    %94 = vector.shape_cast %93 : vector<1x512x32xf32> to vector<512x32xf32>
    %cst_92 = arith.constant dense<0.000000e+00> : vector<1x32xf32>
    %95 = tpu.matmul %92, %94, %cst_92 {dimension_numbers = #tpu.dot_dimension_numbers<[1], [0], [0], [1], [0, 0, 1, 1], [], []>} : vector<1x512xf32>, vector<512x32xf32>, vector<1x32xf32> -> vector<1x32xf32>
    %96 = vector.extract_strided_slice %71 {offsets = [6, 0], sizes = [1, 512], strides = [1, 1]} : vector<8x512xf32> to vector<1x512xf32>
    %c6 = arith.constant 6 : index
    %c0_93 = arith.constant 0 : index
    %c0_94 = arith.constant 0 : index
    %97 = vector.load %arg12[%c6, %c0_93, %c0_94] : memref<8x512x32xf32, #tpu.memory_space<vmem>>, vector<1x512x32xf32>
    %98 = vector.shape_cast %97 : vector<1x512x32xf32> to vector<512x32xf32>
    %cst_95 = arith.constant dense<0.000000e+00> : vector<1x32xf32>
    %99 = tpu.matmul %96, %98, %cst_95 {dimension_numbers = #tpu.dot_dimension_numbers<[1], [0], [0], [1], [0, 0, 1, 1], [], []>} : vector<1x512xf32>, vector<512x32xf32>, vector<1x32xf32> -> vector<1x32xf32>
    %100 = vector.extract_strided_slice %71 {offsets = [7, 0], sizes = [1, 512], strides = [1, 1]} : vector<8x512xf32> to vector<1x512xf32>
    %c7 = arith.constant 7 : index
    %c0_96 = arith.constant 0 : index
    %c0_97 = arith.constant 0 : index
    %101 = vector.load %arg12[%c7, %c0_96, %c0_97] : memref<8x512x32xf32, #tpu.memory_space<vmem>>, vector<1x512x32xf32>
    %102 = vector.shape_cast %101 : vector<1x512x32xf32> to vector<512x32xf32>
    %cst_98 = arith.constant dense<0.000000e+00> : vector<1x32xf32>
    %103 = tpu.matmul %100, %102, %cst_98 {dimension_numbers = #tpu.dot_dimension_numbers<[1], [0], [0], [1], [0, 0, 1, 1], [], []>} : vector<1x512xf32>, vector<512x32xf32>, vector<1x32xf32> -> vector<1x32xf32>
    %c0_99 = arith.constant 0 : index
    %c0_100 = arith.constant 0 : index
    %104 = vector.load %arg13[%c0_99, %c0_100] : memref<1x32xf32, #tpu.memory_space<vmem>>, vector<1x32xf32>
    %105 = arith.addf %75, %79 : vector<1x32xf32>
    %106 = arith.addf %83, %87 : vector<1x32xf32>
    %107 = arith.addf %105, %106 : vector<1x32xf32>
    %108 = arith.addf %91, %95 : vector<1x32xf32>
    %109 = arith.addf %99, %103 : vector<1x32xf32>
    %110 = arith.addf %108, %109 : vector<1x32xf32>
    %111 = arith.addf %107, %110 : vector<1x32xf32>
    %112 = arith.addf %104, %111 : vector<1x32xf32>
    %cst_101 = arith.constant 0.000000e+00 : f32
    %113 = vector.broadcast %cst_101 : f32 to vector<1x32xf32>
    %114 = arith.maximumf %112, %113 : vector<1x32xf32>
    %c0_102 = arith.constant 0 : index
    %c0_103 = arith.constant 0 : index
    %115 = vector.load %arg14[%c0_102, %c0_103] : memref<32x6xf32, #tpu.memory_space<vmem>>, vector<32x6xf32>
    %cst_104 = arith.constant dense<0.000000e+00> : vector<1x6xf32>
    %116 = tpu.matmul %114, %115, %cst_104 {dimension_numbers = #tpu.dot_dimension_numbers<[1], [0], [0], [1], [0, 0, 1, 1], [], []>} : vector<1x32xf32>, vector<32x6xf32>, vector<1x6xf32> -> vector<1x6xf32>
    %c0_105 = arith.constant 0 : index
    %c0_106 = arith.constant 0 : index
    %117 = vector.load %arg15[%c0_105, %c0_106] : memref<1x6xf32, #tpu.memory_space<vmem>>, vector<1x6xf32>
    %118 = arith.addf %116, %117 : vector<1x6xf32>
    %c0_107 = arith.constant 0 : index
    %c0_108 = arith.constant 0 : index
    %c0_109 = arith.constant 0 : index
    %119 = vector.load %arg20[%c0_107, %c0_108, %c0_109] : memref<1x1x6xf32, #tpu.memory_space<vmem>>, vector<1x1x6xf32>
    %120 = vector.shape_cast %119 : vector<1x1x6xf32> to vector<1x6xf32>
    %121 = vector.shape_cast %118 : vector<1x6xf32> to vector<1x1x6xf32>
    tpu.vector_store %arg20[%c0_107, %c0_108, %c0_109], %121 {strides = array<i32>} : memref<1x1x6xf32, #tpu.memory_space<vmem>>, vector<1x1x6xf32>,
    %c0_110 = arith.constant 0 : index
    %c0_111 = arith.constant 0 : index
    %122 = vector.load %arg16[%c0_110, %c0_111] : memref<6x1024xf32, #tpu.memory_space<vmem>>, vector<6x1024xf32>
    %cst_112 = arith.constant dense<0.000000e+00> : vector<1x1024xf32>
    %123 = tpu.matmul %118, %122, %cst_112 {dimension_numbers = #tpu.dot_dimension_numbers<[1], [0], [0], [1], [0, 0, 1, 1], [], []>} : vector<1x6xf32>, vector<6x1024xf32>, vector<1x1024xf32> -> vector<1x1024xf32>
    %cst_113 = arith.constant 1.550000e+01 : f32
    %124 = vector.broadcast %cst_113 : f32 to vector<1x1024xf32>
    %125 = arith.addf %123, %124 : vector<1x1024xf32>
    %c0_114 = arith.constant 0 : index
    %c0_115 = arith.constant 0 : index
    %126 = vector.load %arg17[%c0_114, %c0_115] : memref<6x1024xf32, #tpu.memory_space<vmem>>, vector<6x1024xf32>
    %cst_116 = arith.constant dense<0.000000e+00> : vector<1x1024xf32>
    %127 = tpu.matmul %118, %126, %cst_116 {dimension_numbers = #tpu.dot_dimension_numbers<[1], [0], [0], [1], [0, 0, 1, 1], [], []>} : vector<1x6xf32>, vector<6x1024xf32>, vector<1x1024xf32> -> vector<1x1024xf32>
    %cst_117 = arith.constant 1.550000e+01 : f32
    %128 = vector.broadcast %cst_117 : f32 to vector<1x1024xf32>
    %129 = arith.addf %127, %128 : vector<1x1024xf32>
    %130 = math.floor %125 : vector<1x1024xf32>
    %131 = math.floor %129 : vector<1x1024xf32>
    %132 = arith.subf %125, %130 : vector<1x1024xf32>
    %cst_118 = arith.constant 1.000000e+00 : f32
    %133 = vector.broadcast %cst_118 : f32 to vector<1x1024xf32>
    %134 = arith.subf %133, %132 : vector<1x1024xf32>
    %135 = arith.subf %129, %131 : vector<1x1024xf32>
    %cst_119 = arith.constant 1.000000e+00 : f32
    %136 = vector.broadcast %cst_119 : f32 to vector<1x1024xf32>
    %137 = arith.subf %136, %135 : vector<1x1024xf32>
    %138 = tpu.iota {dimensions = array<i32: 0>} : vector<32x1024xi32>
    %139 = arith.sitofp %138 : vector<32x1024xi32> to vector<32x1024xf32>
    %140 = vector.broadcast %131 : vector<1x1024xf32> to vector<32x1024xf32>
    %141 = arith.cmpf oeq, %139, %140 : vector<32x1024xf32>
    %142 = arith.extui %141 : vector<32x1024xi1> to vector<32x1024xi32>
    %143 = arith.sitofp %142 : vector<32x1024xi32> to vector<32x1024xf32>
    %144 = vector.broadcast %137 : vector<1x1024xf32> to vector<32x1024xf32>
    %145 = arith.mulf %143, %144 : vector<32x1024xf32>
    %cst_120 = arith.constant 1.000000e+00 : f32
    %146 = vector.broadcast %cst_120 : f32 to vector<1x1024xf32>
    %147 = arith.addf %131, %146 : vector<1x1024xf32>
    %148 = vector.broadcast %147 : vector<1x1024xf32> to vector<32x1024xf32>
    %149 = arith.cmpf oeq, %139, %148 : vector<32x1024xf32>
    %150 = arith.extui %149 : vector<32x1024xi1> to vector<32x1024xi32>
    %151 = arith.sitofp %150 : vector<32x1024xi32> to vector<32x1024xf32>
    %152 = vector.broadcast %135 : vector<1x1024xf32> to vector<32x1024xf32>
    %153 = arith.mulf %151, %152 : vector<32x1024xf32>
    %154 = arith.addf %145, %153 : vector<32x1024xf32>
    %c0_121 = arith.constant 0 : index
    %c0_122 = arith.constant 0 : index
    %c0_123 = arith.constant 0 : index
    %155 = vector.load %arg2[%c0_121, %c0_122, %c0_123] : memref<1x96x32xf32, #tpu.memory_space<vmem>>, vector<1x96x32xf32>
    %156 = vector.shape_cast %155 : vector<1x96x32xf32> to vector<96x32xf32>
    %cst_124 = arith.constant dense<0.000000e+00> : vector<96x1024xf32>
    %157 = tpu.matmul %156, %154, %cst_124 {dimension_numbers = #tpu.dot_dimension_numbers<[1], [0], [0], [1], [0, 0, 1, 1], [], []>} : vector<96x32xf32>, vector<32x1024xf32>, vector<96x1024xf32> -> vector<96x1024xf32>
    %158 = tpu.iota {dimensions = array<i32: 0>} : vector<32x1024xi32>
    %159 = arith.sitofp %158 : vector<32x1024xi32> to vector<32x1024xf32>
    %160 = vector.broadcast %130 : vector<1x1024xf32> to vector<32x1024xf32>
    %161 = arith.cmpf oeq, %159, %160 : vector<32x1024xf32>
    %162 = arith.extui %161 : vector<32x1024xi1> to vector<32x1024xi32>
    %163 = arith.sitofp %162 : vector<32x1024xi32> to vector<32x1024xf32>
    %164 = vector.broadcast %134 : vector<1x1024xf32> to vector<32x1024xf32>
    %165 = arith.mulf %163, %164 : vector<32x1024xf32>
    %cst_125 = arith.constant 1.000000e+00 : f32
    %166 = vector.broadcast %cst_125 : f32 to vector<1x1024xf32>
    %167 = arith.addf %130, %166 : vector<1x1024xf32>
    %168 = vector.broadcast %167 : vector<1x1024xf32> to vector<32x1024xf32>
    %169 = arith.cmpf oeq, %159, %168 : vector<32x1024xf32>
    %170 = arith.extui %169 : vector<32x1024xi1> to vector<32x1024xi32>
    %171 = arith.sitofp %170 : vector<32x1024xi32> to vector<32x1024xf32>
    %172 = vector.broadcast %132 : vector<1x1024xf32> to vector<32x1024xf32>
    %173 = arith.mulf %171, %172 : vector<32x1024xf32>
    %174 = arith.addf %165, %173 : vector<32x1024xf32>
    %175 = tpu.concatenate %174, %174, %174 in 0 : vector<32x1024xf32>, vector<32x1024xf32>, vector<32x1024xf32> -> vector<96x1024xf32>
    %c0_126 = arith.constant 0 : index
    %c0_127 = arith.constant 0 : index
    %176 = vector.load %arg18[%c0_126, %c0_127] : memref<3x96xf32, #tpu.memory_space<vmem>>, vector<3x96xf32>
    %177 = arith.mulf %157, %175 : vector<96x1024xf32>
    %cst_128 = arith.constant dense<0.000000e+00> : vector<3x1024xf32>
    %178 = tpu.matmul %176, %177, %cst_128 {dimension_numbers = #tpu.dot_dimension_numbers<[1], [0], [0], [1], [0, 0, 1, 1], [], []>} : vector<3x96xf32>, vector<96x1024xf32>, vector<3x1024xf32> -> vector<3x1024xf32>
    %c0_129 = arith.constant 0 : index
    %c0_130 = arith.constant 0 : index
    %c0_131 = arith.constant 0 : index
    %179 = vector.load %arg19[%c0_129, %c0_130, %c0_131] : memref<1x3x1024xf32, #tpu.memory_space<vmem>>, vector<1x3x1024xf32>
    %180 = vector.shape_cast %179 : vector<1x3x1024xf32> to vector<3x1024xf32>
    %181 = vector.shape_cast %178 : vector<3x1024xf32> to vector<1x3x1024xf32>
    tpu.vector_store %arg19[%c0_129, %c0_130, %c0_131], %181 {strides = array<i32>} : memref<1x3x1024xf32, #tpu.memory_space<vmem>>, vector<1x3x1024xf32>,
    return
  }
  func.func @transform_0(%arg0: i32) -> (i32, i32, i32) {
    %c0_i32 = arith.constant 0 : i32
    %c0_i32_0 = arith.constant 0 : i32
    %c0_i32_1 = arith.constant 0 : i32
    return %arg0, %c0_i32, %c0_i32_0 : i32, i32, i32
  }
  func.func @transform_1(%arg0: i32) -> (i32, i32, i32) {
    %c0_i32 = arith.constant 0 : i32
    %c0_i32_0 = arith.constant 0 : i32
    %c0_i32_1 = arith.constant 0 : i32
    return %arg0, %c0_i32, %c0_i32_0 : i32, i32, i32
  }
  func.func @transform_2(%arg0: i32) -> (i32, i32, i32) {
    %c0_i32 = arith.constant 0 : i32
    %c0_i32_0 = arith.constant 0 : i32
    %c0_i32_1 = arith.constant 0 : i32
    %c0_i32_2 = arith.constant 0 : i32
    return %c0_i32, %c0_i32_0, %c0_i32_1 : i32, i32, i32
  }
  func.func @transform_3(%arg0: i32) -> (i32, i32, i32) {
    %c0_i32 = arith.constant 0 : i32
    %c0_i32_0 = arith.constant 0 : i32
    %c0_i32_1 = arith.constant 0 : i32
    %c0_i32_2 = arith.constant 0 : i32
    return %c0_i32, %c0_i32_0, %c0_i32_1 : i32, i32, i32
  }
  func.func @transform_4(%arg0: i32) -> (i32, i32) {
    %c0_i32 = arith.constant 0 : i32
    %c0_i32_0 = arith.constant 0 : i32
    %c0_i32_1 = arith.constant 0 : i32
    return %c0_i32, %c0_i32_0 : i32, i32
  }
  func.func @transform_5(%arg0: i32) -> (i32, i32, i32) {
    %c0_i32 = arith.constant 0 : i32
    %c0_i32_0 = arith.constant 0 : i32
    %c0_i32_1 = arith.constant 0 : i32
    %c0_i32_2 = arith.constant 0 : i32
    return %c0_i32, %c0_i32_0, %c0_i32_1 : i32, i32, i32
  }
  func.func @transform_6(%arg0: i32) -> (i32, i32) {
    %c0_i32 = arith.constant 0 : i32
    %c0_i32_0 = arith.constant 0 : i32
    %c0_i32_1 = arith.constant 0 : i32
    return %c0_i32, %c0_i32_0 : i32, i32
  }
  func.func @transform_7(%arg0: i32) -> (i32, i32, i32) {
    %c0_i32 = arith.constant 0 : i32
    %c0_i32_0 = arith.constant 0 : i32
    %c0_i32_1 = arith.constant 0 : i32
    %c0_i32_2 = arith.constant 0 : i32
    return %c0_i32, %c0_i32_0, %c0_i32_1 : i32, i32, i32
  }
  func.func @transform_8(%arg0: i32) -> (i32, i32, i32) {
    %c0_i32 = arith.constant 0 : i32
    %c0_i32_0 = arith.constant 0 : i32
    %c0_i32_1 = arith.constant 0 : i32
    %c0_i32_2 = arith.constant 0 : i32
    return %c0_i32, %c0_i32_0, %c0_i32_1 : i32, i32, i32
  }
  func.func @transform_9(%arg0: i32) -> (i32, i32) {
    %c0_i32 = arith.constant 0 : i32
    %c0_i32_0 = arith.constant 0 : i32
    %c0_i32_1 = arith.constant 0 : i32
    return %c0_i32, %c0_i32_0 : i32, i32
  }
  func.func @transform_10(%arg0: i32) -> (i32, i32, i32) {
    %c0_i32 = arith.constant 0 : i32
    %c0_i32_0 = arith.constant 0 : i32
    %c0_i32_1 = arith.constant 0 : i32
    %c0_i32_2 = arith.constant 0 : i32
    return %c0_i32, %c0_i32_0, %c0_i32_1 : i32, i32, i32
  }
  func.func @transform_11(%arg0: i32) -> (i32, i32, i32) {
    %c0_i32 = arith.constant 0 : i32
    %c0_i32_0 = arith.constant 0 : i32
    %c0_i32_1 = arith.constant 0 : i32
    %c0_i32_2 = arith.constant 0 : i32
    return %c0_i32, %c0_i32_0, %c0_i32_1 : i32, i32, i32
  }
  func.func @transform_12(%arg0: i32) -> (i32, i32) {
    %c0_i32 = arith.constant 0 : i32
    %c0_i32_0 = arith.constant 0 : i32
    %c0_i32_1 = arith.constant 0 : i32
    return %c0_i32, %c0_i32_0 : i32, i32
  }
  func.func @transform_13(%arg0: i32) -> (i32, i32) {
    %c0_i32 = arith.constant 0 : i32
    %c0_i32_0 = arith.constant 0 : i32
    %c0_i32_1 = arith.constant 0 : i32
    return %c0_i32, %c0_i32_0 : i32, i32
  }
  func.func @transform_14(%arg0: i32) -> (i32, i32) {
    %c0_i32 = arith.constant 0 : i32
    %c0_i32_0 = arith.constant 0 : i32
    %c0_i32_1 = arith.constant 0 : i32
    return %c0_i32, %c0_i32_0 : i32, i32
  }
  func.func @transform_15(%arg0: i32) -> (i32, i32) {
    %c0_i32 = arith.constant 0 : i32
    %c0_i32_0 = arith.constant 0 : i32
    %c0_i32_1 = arith.constant 0 : i32
    return %c0_i32, %c0_i32_0 : i32, i32
  }
  func.func @transform_16(%arg0: i32) -> (i32, i32) {
    %c0_i32 = arith.constant 0 : i32
    %c0_i32_0 = arith.constant 0 : i32
    %c0_i32_1 = arith.constant 0 : i32
    return %c0_i32, %c0_i32_0 : i32, i32
  }
  func.func @transform_17(%arg0: i32) -> (i32, i32) {
    %c0_i32 = arith.constant 0 : i32
    %c0_i32_0 = arith.constant 0 : i32
    %c0_i32_1 = arith.constant 0 : i32
    return %c0_i32, %c0_i32_0 : i32, i32
  }
  func.func @transform_18(%arg0: i32) -> (i32, i32, i32) {
    %c0_i32 = arith.constant 0 : i32
    %c0_i32_0 = arith.constant 0 : i32
    %c0_i32_1 = arith.constant 0 : i32
    return %arg0, %c0_i32, %c0_i32_0 : i32, i32, i32
  }
  func.func @transform_19(%arg0: i32) -> (i32, i32, i32) {
    %c0_i32 = arith.constant 0 : i32
    %c0_i32_0 = arith.constant 0 : i32
    %c0_i32_1 = arith.constant 0 : i32
    return %arg0, %c0_i32, %c0_i32_0 : i32, i32, i32
  }
}

</mosaic_0001>

<bundles_post_ra>
// kernel: _lambda_.1
= control target key start
LH: loop header
LB: loop body
LE: loop exit
PB: predicated region body
PF: predicated region fallthrough
CT: control target
= control target key end

     0   :  { %s10068_s0 = inlined_call_operand.vmem [shape: f32[2,32,96], index: 0, kind: input, shape index: {}]   ;;  %s10069_s1 = inlined_call_operand.vmem [shape: f32[2,96,32], index: 1, kind: input, shape index: {}]   ;;  %s10070_s2 = inlined_call_operand.hbm [shape: f32[3,32,32], index: 2, kind: input, shape index: {}]   ;;  %s10071_s3 = inlined_call_operand.hbm [shape: f32[3,96,512], index: 3, kind: input, shape index: {}]   ;;  %s10072_s4 = inlined_call_operand.hbm [shape: f32[1,512], index: 4, kind: input, shape index: {}]   ;;  %s10073_s5 = inlined_call_operand.hbm [shape: f32[2,16,32], index: 5, kind: input, shape index: {}]   ;;  %s10074_s6 = inlined_call_operand.hbm [shape: f32[512,256], index: 6, kind: input, shape index: {}]   ;;  %s10075_s7 = inlined_call_operand.hbm [shape: f32[3,16,16], index: 7, kind: input, shape index: {}]   ;;  %s10076_s8 = inlined_call_operand.hbm [shape: f32[3,256,512], index: 8, kind: input, shape index: {}]   ;;  %s10077_s9 = inlined_call_operand.hbm [shape: f32[1,512], index: 9, kind: input, shape index: {}]   ;;  %s10078_s10 = inlined_call_operand.hbm [shape: f32[2,8,16], index: 10, kind: input, shape index: {}]   ;;  %s10079_s11 = inlined_call_operand.hbm [shape: f32[8,512,32], index: 11, kind: input, shape index: {}]   ;;  %s10080_s12 = inlined_call_operand.hbm [shape: f32[1,32], index: 12, kind: input, shape index: {}]   ;;  %s10081_s13 = inlined_call_operand.vmem [shape: f32[32,6], index: 13, kind: input, shape index: {}]   ;;  %s10082_s14 = inlined_call_operand.hbm [shape: f32[1,6], index: 14, kind: input, shape index: {}]   ;;  %s10083_s15 = inlined_call_operand.hbm [shape: f32[6,1024], index: 15, kind: input, shape index: {}]   ;;  %s10084_s16 = inlined_call_operand.hbm [shape: f32[6,1024], index: 16, kind: input, shape index: {}]   ;;  %s10085_s17 = inlined_call_operand.hbm [shape: f32[3,96], index: 17, kind: input, shape index: {}]   ;;  %s10086_s18 = inlined_call_operand.vmem [shape: f32[2,3,1024], index: 18, kind: output, shape index: {0}]   ;;  %s10087_s19 = inlined_call_operand.vmem [shape: f32[2,1,6], index: 19, kind: output, shape index: {1}]  }
   0x1   :  { %10092 = sst [smem:[#allocation50_spill]] %s10068_s0 }
   0x2   :  { %10093 = sst [smem:[#allocation51_spill]] %s10069_s1 }
   0x3   :  { %10094 = sst [smem:[#allocation52_spill]] %s10070_s2 }
   0x4   :  { %10095 = sst [smem:[#allocation53_spill]] %s10071_s3 }
   0x5   :  { %10096 = sst [smem:[#allocation54_spill]] %s10073_s5 }
   0x6   :  { %10097 = sst [smem:[#allocation55_spill]] %s10075_s7 }
   0x7   :  { %10098 = sst [smem:[#allocation56_spill]] %s10086_s18 }
   0x8   :  { %10099 = sst [smem:[#allocation57_spill]] %s10087_s19 }
   0x9   :  { %25 = vsyncpa [#allocation3], 0 }
   0xa   :  { %26 = vsyncpa [#allocation5], 0 }
   0xb   :  { %27 = vsyncpa [#allocation8], 0 }
   0xc   :  { %28 = vsyncpa [#allocation11], 0 }
   0xd   :  { %29 = vsyncpa [#allocation14], 0 }
   0xe   :  { %30 = vsyncpa [#allocation17], 0 }
   0xf   :  { %31 = vsyncpa [#allocation20], 0 }
  0x10   :  { %32 = vsyncpa [#allocation23], 0  ;;  %s8049_s0 = smov 0  }
  0x11 LB: > { %10100 = sst [smem:[#allocation33_spill]] %s7923_s0  ;;  %s8058_s22 = sadd.s32 4294967295, %s7923_s0   ;;  %s7923_s0 = sphi %s8049_s0, %s38_s0  }
  0x12   : > { %s10101_s21 = sld [smem:[#allocation53_spill]]  ;;  %p6833_p0 = scmp.ge.s32.totalorder %s7923_s0, 1 }
  0x13   : > { %p483_p1 = scmp.lt.s32.totalorder %s7923_s0, 3  ;;  %p7343_p2 = scmp.eq.s32.totalorder %s8058_s22, 0 }
  0x14   : > { %s7925_s23 = smov [#allocation4]   ;;  %s10104_s5 = sld [smem:[#allocation54_spill]] }
  0x15   : > { %p8063_p3 = pnand %p6833_p0, %p483_p1  ;;  %s510_s24 = sshll.u32 %s7925_s23, 4  ;;  %s511_s24 = int_to_ptr.vmem [resolvable:$true] %s510_s24 }
  0x16   : > { %s7926_s28 = smov [#allocation7]   ;;  %s10089_s30 = smov 512  }
  0x17   : > { %p7297_p4 = pneg %p8063_p3  ;;  %s536_s29 = sshll.u32 %s7926_s28, 4  ;;  %s537_s29 = int_to_ptr.vmem [resolvable:$true] %s536_s29 }
  0x18   : > { %s508_s1 = sshll.u32 %s10101_s21, 4  ;;  %s10090_s20 = smov 32   ;;  %s509_s1 = int_to_ptr.hbm [resolvable:$true] %s508_s1 }
  0x19   : > { %p8071_p5 = pnand %p7343_p2, %p7297_p4  ;;  %s10105_s7 = sld [smem:[#allocation55_spill]] }
  0x1a   : > { %s534_s27 = sshll.u32 %s10104_s5, 4  ;;  %s10091_s3 = smov 128   ;;  %s535_s27 = int_to_ptr.hbm [resolvable:$true] %s534_s27 }
  0x1b   : > { %7303 = dma.hbm_to_vmem [thread:$0]  (!%p8071_p5), %s509_s1, 18432, %s511_s24, [#allocation5], %s10089_s30, %s10089_s30, %s10090_s20  }
  0x1c   : > { %s7930_s26 = smov 8   ;;  %s7931_s28 = smov [#allocation10]  }
  0x1d   : > { %7309 = dma.hbm_to_vmem [thread:$0]  (!%p8071_p5), %s535_s27, 512, %s537_s29, [#allocation8], %s10091_s3, %s10091_s3, %s7930_s26  }
  0x1e   : > { %s564_s5 = sshll.u32 %s7931_s28, 4  ;;  %s591_s1 = sshll.u32 %s10077_s9, 4  ;;  %s565_s5 = int_to_ptr.vmem [resolvable:$true] %s564_s5  ;;  %s592_s1 = int_to_ptr.hbm [resolvable:$true] %s591_s1 }
  0x1f   : > { %s562_s0 = sshll.u32 %s10105_s7, 4  ;;  %s616_s23 = sshll.u32 %s10079_s11, 4  ;;  %s563_s0 = int_to_ptr.hbm [resolvable:$true] %s562_s0  ;;  %s617_s23 = int_to_ptr.hbm [resolvable:$true] %s616_s23 }
  0x20   : > { %7315 = dma.hbm_to_vmem [thread:$0]  (!%p8071_p5), %s563_s0, 768, %s565_s5, [#allocation11], %s10091_s3, %s10091_s3, %s7930_s26  }
  0x21   : > { %s7932_s27 = smov [#allocation13]   ;;  %s7933_s18 = smov [#allocation16]  }
  0x22   : > { %s593_s29 = sshll.u32 %s7932_s27, 4  ;;  %s618_s19 = sshll.u32 %s7933_s18, 4  ;;  %s594_s29 = int_to_ptr.vmem [resolvable:$true] %s593_s29  ;;  %s619_s19 = int_to_ptr.vmem [resolvable:$true] %s618_s19 }
  0x23   : > { %7321 = dma.hbm_to_vmem [thread:$0]  (!%p8071_p5), %s592_s1, 64, %s594_s29, [#allocation14]  }
  0x24   : > { %s646_s20 = sshll.u32 %s10082_s14, 4  ;;  %s670_s24 = sshll.u32 %s10084_s16, 4  ;;  %s647_s20 = int_to_ptr.hbm [resolvable:$true] %s646_s20  ;;  %s671_s24 = int_to_ptr.hbm [resolvable:$true] %s670_s24 }
  0x25   : > { %7327 = dma.hbm_to_vmem [thread:$0]  (!%p8071_p5), %s617_s23, 65536, %s619_s19, [#allocation17], %s10091_s3, %s10091_s3, %s7930_s26  }
  0x26   : > { %s7934_s21 = smov [#allocation19]   ;;  %s7935_s30 = smov [#allocation22]  }
  0x27   : > { %s648_s1 = sshll.u32 %s7934_s21, 4  ;;  %s672_s27 = sshll.u32 %s7935_s30, 4  ;;  %s649_s1 = int_to_ptr.vmem [resolvable:$true] %s648_s1  ;;  %s673_s27 = int_to_ptr.vmem [resolvable:$true] %s672_s27 }
  0x28   : > { %7333 = dma.hbm_to_vmem [thread:$0]  (!%p8071_p5), %s647_s20, 16, %s649_s1, [#allocation20]  }
  0x29   : > { %s10106_s28 = sld [smem:[#allocation52_spill]]  ;;  %s523_s5 = sshll.u32 %s10072_s4, 4  ;;  %s524_s5 = int_to_ptr.hbm [resolvable:$true] %s523_s5 }
  0x2a   : > { %7339 = dma.hbm_to_vmem [thread:$0]  (!%p8071_p5), %s671_s24, 1024, %s673_s27, [#allocation23]  }
  0x2b   : > { %s7936_s0 = smov [#allocation2]   ;;  %s7937_s20 = smov [#allocation6]  }
  0x2c   : > { %s496_s21 = sshll.u32 %s7936_s0, 4  ;;  %s525_s1 = sshll.u32 %s7937_s20, 4  ;;  %s497_s21 = int_to_ptr.vmem [resolvable:$true] %s496_s21  ;;  %s526_s1 = int_to_ptr.vmem [resolvable:$true] %s525_s1 }
  0x2d   : > { %s548_s24 = sshll.u32 %s10074_s6, 4  ;;  %s7938_s27 = smov [#allocation9]   ;;  %s549_s24 = int_to_ptr.hbm [resolvable:$true] %s548_s24 }
  0x2e   : > { %7306 = dma.hbm_to_vmem [thread:$0]  (!%p8071_p5), %s524_s5, 64, %s526_s1, [#allocation5]  }
  0x2f   : > { %s494_s7 = sshll.u32 %s10106_s28, 4  ;;  %s550_s18 = sshll.u32 %s7938_s27, 4  ;;  %s495_s7 = int_to_ptr.hbm [resolvable:$true] %s494_s7  ;;  %s551_s18 = int_to_ptr.vmem [resolvable:$true] %s550_s18 }
  0x30   : > { %7300 = dma.hbm_to_vmem [thread:$0]  (!%p8071_p5), %s495_s7, 1536, %s497_s21, [#allocation3], %s10091_s3, %s10091_s3, %s7930_s26  }
  0x31   : > { %s576_s19 = sshll.u32 %s10076_s8, 4  ;;  %s7939_s7 = smov 256   ;;  %s577_s19 = int_to_ptr.hbm [resolvable:$true] %s576_s19 }
  0x32   : > { %s7940_s0 = smov 16   ;;  %s7941_s21 = smov [#allocation12]  }
  0x33   : > { %7312 = dma.hbm_to_vmem [thread:$0]  (!%p8071_p5), %s549_s24, 16384, %s551_s18, [#allocation8], %s7939_s7, %s7939_s7, %s7940_s0  }
  0x34   : > { %s578_s20 = sshll.u32 %s7941_s21, 4  ;;  %s602_s5 = sshll.u32 %s10078_s10, 4  ;;  %s579_s20 = int_to_ptr.vmem [resolvable:$true] %s578_s20  ;;  %s603_s5 = int_to_ptr.hbm [resolvable:$true] %s602_s5 }
  0x35   : > { %s10107_s1 = smov 32   ;;  %s10108_s27 = smov 512  }
  0x36   : > { %7318 = dma.hbm_to_vmem [thread:$0]  (!%p8071_p5), %s577_s19, 49152, %s579_s20, [#allocation11], %s10108_s27, %s10108_s27, %s10107_s1  }
  0x37   : > { %s631_s3 = sshll.u32 %s10080_s12, 4  ;;  %s7942_s24 = smov [#allocation15]   ;;  %s632_s3 = int_to_ptr.hbm [resolvable:$true] %s631_s3 }
  0x38   : > { %s604_s18 = sshll.u32 %s7942_s24, 4  ;;  %s10109_s7 = smov 128   ;;  %s605_s18 = int_to_ptr.vmem [resolvable:$true] %s604_s18 }
  0x39   : > { %7324 = dma.hbm_to_vmem [thread:$0]  (!%p8071_p5), %s603_s5, 256, %s605_s18, [#allocation14], %s10109_s7, %s10109_s7, %s7930_s26  }
  0x3a   : > { %s7943_s0 = smov [#allocation18]   ;;  %s658_s19 = sshll.u32 %s10083_s15, 4  ;;  %s659_s19 = int_to_ptr.hbm [resolvable:$true] %s658_s19 }
  0x3b   : > { %s633_s21 = sshll.u32 %s7943_s0, 4  ;;  %s682_s27 = sshll.u32 %s10085_s17, 4  ;;  %s634_s21 = int_to_ptr.vmem [resolvable:$true] %s633_s21  ;;  %s683_s27 = int_to_ptr.hbm [resolvable:$true] %s682_s27 }
  0x3c   : > { %7330 = dma.hbm_to_vmem [thread:$0]  (!%p8071_p5), %s632_s3, 16, %s634_s21, [#allocation17]  }
  0x3d   : > { %s7944_s28 = smov [#allocation21]   ;;  %s7945_s26 = smov [#allocation24]  }
  0x3e   : > { %s660_s23 = sshll.u32 %s7944_s28, 4  ;;  %s684_s5 = sshll.u32 %s7945_s26, 4  ;;  %s661_s23 = int_to_ptr.vmem [resolvable:$true] %s660_s23  ;;  %s685_s5 = int_to_ptr.vmem [resolvable:$true] %s684_s5 }
  0x3f   : > { %7336 = dma.hbm_to_vmem [thread:$0]  (!%p8071_p5), %s659_s19, 1024, %s661_s23, [#allocation20]  }
  0x40   : > { %7342 = dma.hbm_to_vmem [thread:$0]  (!%p8071_p5), %s683_s27, 64, %s685_s5, [#allocation23]  }
  0x41   : > { %713 = sbr.rel (%p8063_p3) target bundleno = 2972 (0xb9c), region = 92 }
  0x46   : > { %7890 = dma.done.wait (%p7343_p2), [#allocation3], 1536  }
  0x47   : > { %7892 = vsyncadd (%p7343_p2), [#allocation3], 4294965760 }
  0x48   : > { %7894 = dma.done.wait (%p7343_p2), [#allocation5], 18496  }
  0x49   : > { %7896 = vsyncadd (%p7343_p2), [#allocation5], 4294948800 }
  0x4a   : > { %7898 = dma.done.wait (%p7343_p2), [#allocation8], 16896  }
  0x4b   : > { %7900 = vsyncadd (%p7343_p2), [#allocation8], 4294950400 }
  0x4c   : > { %7902 = dma.done.wait (%p7343_p2), [#allocation11], 49920  }
  0x4d   : > { %7904 = vsyncadd (%p7343_p2), [#allocation11], 4294917376 }
  0x4e   : > { %7906 = dma.done.wait (%p7343_p2), [#allocation14], 320  }
  0x4f   : > { %7908 = vsyncadd (%p7343_p2), [#allocation14], 4294966976 }
  0x50   : > { %7910 = dma.done.wait (%p7343_p2), [#allocation17], 65552  }
  0x51   : > { %7912 = vsyncadd (%p7343_p2), [#allocation17], 4294901744 }
  0x52   : > { %7914 = dma.done.wait (%p7343_p2), [#allocation20], 1040  }
  0x53   : > { %7916 = vsyncadd (%p7343_p2), [#allocation20], 4294966256 }
  0x54   : > { %7918 = dma.done.wait (%p7343_p2), [#allocation23], 1088  }
  0x55   : > { %7920 = vsyncadd (%p7343_p2), [#allocation23], 4294966208  ;;  %p848_p6 = scmp.lt.s32.totalorder %s8058_s22, 1  ;;  %s10110_s24 = sld [smem:[#allocation50_spill]]  ;;  %v1055_v4 = vld [vmem:[#allocation4 + $0x2e0] sm:$0xff]  ;;  %v1056_v5 = vld [vmem:[#allocation4 + $0x2e8] sm:$0xff] }
  0x56   : > { %vm874_vm0 = vcmask 261120   ;;  %v965_v6 = vld [vmem:[#allocation2 + $0x20] sm:$0xff]  ;;  %1076 = vmatpush.msra.mxu2 %v1055_v4  ;;  %1105 = vmatpush.msra.mxu3 %v1056_v5  ;;  %v1057_v8 = vld [vmem:[#allocation4 + $0x2f0] sm:$0xff]  ;;  %v1058_v9 = vld [vmem:[#allocation4 + $0x2f8] sm:$0xff]  ;;  %vm1059_vm1 = vcmask 785408   ;;  %s7946_s7 = smov 112  }
  0x57   : > { %s10162_s22 = smov (!%p848_p6, %s8058_s22), 1  ;;  %v870_v7 = vld [vmem:[#allocation2] sm:$0xff]  ;;  %v1052_v11 = vld [vmem:[#allocation4 + $0x2c8] sm:$0xff]  ;;  %v1053_v12 = vld [vmem:[#allocation4 + $0x2d0] sm:$0xff]  ;;  %vm2155_vm3 = vcmask 130048   ;;  %s7947_s0 = smov 96  }
  0x58   : > { %s7234_s2 = sshll.u32 %s10162_s22, 5  ;;  %v1051_v10 = vld [vmem:[#allocation4 + $0x2c0] sm:$0xff]  ;;  %v1054_v13 = vld [vmem:[#allocation4 + $0x2d8] sm:$0xff]  ;;  %v1048_v15 = vld [vmem:[#allocation4 + $0x2a8] sm:$0xff]  ;;  %1106 = vmatpush.msra.mxu3 %v1052_v11  ;;  %vm4747_vm5 = vcmask 1045504   ;;  %s10111_s5 = sld [smem:[#allocation57_spill]] }
  0x59   : > { %v1047_v14 = vld [vmem:[#allocation4 + $0x2a0] sm:$0xff]  ;;  %1077 = vmatpush.msra.mxu2 %v1051_v10  ;;  %v1049_v16 = vld [vmem:[#allocation4 + $0x2b0] sm:$0xff]  ;;  %v1050_v17 = vld [vmem:[#allocation4 + $0x2b8] sm:$0xff]  ;;  %vm4733_vm6 = vcmask 40960   ;;  %vm4743_vm7 = vcmask 48128   ;;  %s7236_s3 = smul.u32 96, %s10162_s22 }
  0x5a   : > { %v1043_v18 = vld [vmem:[#allocation4 + $0x280] sm:$0xff]  ;;  %v1044_v19 = vld [vmem:[#allocation4 + $0x288] sm:$0xff]  ;;  %1107 = vmatpush.msra.mxu3 %v1048_v15  ;;  %v1045_v20 = vld [vmem:[#allocation4 + $0x290] sm:$0xff]  ;;  %s10159_s29 = sld [smem:[#allocation56_spill]] }
  0x5b   : > { %s852_s18 = scalar_lea.vmem %s10110_s24, %s7234_s2  ;;  %1078 = vmatpush.msra.mxu2 %v1047_v14  ;;  %v1046_v21 = vld [vmem:[#allocation4 + $0x298] sm:$0xff]  ;;  %v966_v22 = vld [vmem:[#allocation2 + $0x28] sm:$0xff]  ;;  %v1039_v24 = vld [vmem:[#allocation4 + $0x260] sm:$0xff] }
  0x5c   : > { %v8212_v0 = vld [vmem:[%s852_s18 + $0x18] sm:$0xff]  ;;  %v8214_v1 = vld [vmem:[%s852_s18 + $0x10] sm:$0xff]  ;;  %v8218_v2 = vld [vmem:[%s852_s18 + $0x8] sm:$0xff]  ;;  %1108 = vmatpush.msra.mxu3 %v1044_v19 }
  0x5d   : > { %993 = vmatpush.msra.mxu1 %v8212_v0  ;;  %899 = vmatpush.msra.mxu0 %v8212_v0  ;;  %v8222_v3 = vld [vmem:[%s852_s18] sm:$0xff]  ;;  %v871_v23 = vld [vmem:[#allocation2 + $0x8] sm:$0xff]  ;;  %v1041_v26 = vld [vmem:[#allocation4 + $0x270] sm:$0xff] }
  0x5e   : > { %1079 = vmatpush.msra.mxu2 %v1043_v18  ;;  %v1040_v25 = vld [vmem:[#allocation4 + $0x268] sm:$0xff]  ;;  %v1042_v27 = vld [vmem:[#allocation4 + $0x278] sm:$0xff]  ;;  %v1035_v28 = vld [vmem:[#allocation4 + $0x240] sm:$0xff]  ;;  %s865_s25 = scalar_lea.vmem %s10111_s5, %s10162_s22 }
  0x5f   : > { %994 = vmatpush.msra.mxu1 %v8214_v1  ;;  %900 = vmatpush.msra.mxu0 %v8214_v1  ;;  %v1036_v29 = vld [vmem:[#allocation4 + $0x248] sm:$0xff]  ;;  %v1037_v30 = vld [vmem:[#allocation4 + $0x250] sm:$0xff]  ;;  %v1038_v31 = vld [vmem:[#allocation4 + $0x258] sm:$0xff] }
  0x60   : > { %1080 = vmatpush.msra.mxu2 %v1039_v24  ;;  %1109 = vmatpush.msra.mxu3 %v1040_v25  ;;  %v1031_v32 = vld [vmem:[#allocation4 + $0x220] sm:$0xff]  ;;  %v1032_v33 = vld [vmem:[#allocation4 + $0x228] sm:$0xff]  ;;  %v1033_v34 = vld [vmem:[#allocation4 + $0x230] sm:$0xff]  ;;  %s862_s19 = scalar_lea.vmem %s10159_s29, %s7234_s2 }
  0x61   : > { %995 = vmatpush.msra.mxu1 %v8218_v2  ;;  %901 = vmatpush.msra.mxu0 %v8218_v2  ;;  %v1034_v35 = vld [vmem:[#allocation4 + $0x238] sm:$0xff]  ;;  %v1027_v36 = vld [vmem:[#allocation4 + $0x200] sm:$0xff]  ;;  %v1028_v37 = vld [vmem:[#allocation4 + $0x208] sm:$0xff] }
  0x62   : > { %1081 = vmatpush.msra.mxu2 %v1035_v28  ;;  %1110 = vmatpush.msra.mxu3 %v1036_v29  ;;  %v967_v38 = vld [vmem:[#allocation2 + $0x30] sm:$0xff]  ;;  %v1030_v41 = vld [vmem:[#allocation4 + $0x218] sm:$0xff]  ;;  %v1023_v42 = vld [vmem:[#allocation4 + $0x1e0] sm:$0xff] }
  0x63   : > { %996 = vmatpush.msra.mxu1 %v8222_v3  ;;  %902 = vmatpush.msra.mxu0 %v8222_v3  ;;  %v872_v39 = vld [vmem:[#allocation2 + $0x10] sm:$0xff]  ;;  %v1024_v43 = vld [vmem:[#allocation4 + $0x1e8] sm:$0xff]  ;;  %v1026_v45 = vld [vmem:[#allocation4 + $0x1f8] sm:$0xff] }
  0x64   : > { %6875 = vmatmul.msk.f32.vlgmr.msra.gmra.mxu1 %vm874_vm0, %v965_v6  ;;  %6871 = vmatmul.msk.f32.vlgmr.msra.gmra.mxu0 %vm874_vm0, %v870_v7  ;;  %v1029_v40 = vld [vmem:[#allocation4 + $0x210] sm:$0xff]  ;;  %v1019_v46 = vld [vmem:[#allocation4 + $0x1c0] sm:$0xff]  ;;  %v1020_v47 = vld [vmem:[#allocation4 + $0x1c8] sm:$0xff] }
  0x65   : > { %1134 = vmatpush.msrb.mxu0 %v1057_v8  ;;  %1163 = vmatpush.msrb.mxu1 %v1058_v9  ;;  %v1025_v44 = vld [vmem:[#allocation4 + $0x1f0] sm:$0xff]  ;;  %v1022_v49 = vld [vmem:[#allocation4 + $0x1d8] sm:$0xff]  ;;  %v1015_v50 = vld [vmem:[#allocation4 + $0x1a0] sm:$0xff] }
  0x66   : > { %1082 = vmatpush.msra.mxu2 %v1031_v32  ;;  %1111 = vmatpush.msra.mxu3 %v1032_v33  ;;  %v1021_v48 = vld [vmem:[#allocation4 + $0x1d0] sm:$0xff]  ;;  %v1016_v51 = vld [vmem:[#allocation4 + $0x1a8] sm:$0xff]  ;;  %v1018_v53 = vld [vmem:[#allocation4 + $0x1b8] sm:$0xff] }
  0x67   : > { %1135 = vmatpush.msrb.mxu0 %v1053_v12  ;;  %1164 = vmatpush.msrb.mxu1 %v1054_v13  ;;  %v1017_v52 = vld [vmem:[#allocation4 + $0x1b0] sm:$0xff]  ;;  %v968_v54 = vld [vmem:[#allocation2 + $0x38] sm:$0xff]  ;;  %v1011_v56 = vld [vmem:[#allocation4 + $0x180] sm:$0xff] }
  0x68   : > { %1083 = vmatpush.msra.mxu2 %v1027_v36  ;;  %1112 = vmatpush.msra.mxu3 %v1028_v37  ;;  %v873_v55 = vld [vmem:[#allocation2 + $0x18] sm:$0xff]  ;;  %v1012_v57 = vld [vmem:[#allocation4 + $0x188] sm:$0xff]  ;;  %v1013_v58 = vld [vmem:[#allocation4 + $0x190] sm:$0xff] }
  0x69   : > { %1136 = vmatpush.msrb.mxu0 %v1049_v16  ;;  %1165 = vmatpush.msrb.mxu1 %v1050_v17  ;;  %v1014_v59 = vld [vmem:[#allocation4 + $0x198] sm:$0xff]  ;;  %v960_v60 = vld [vmem:[#allocation4 + $0x160] sm:$0xff]  ;;  %v961_v61 = vld [vmem:[#allocation4 + $0x168] sm:$0xff] }
  0x6a   : > { %1084 = vmatpush.msra.mxu2 %v1023_v42  ;;  %1113 = vmatpush.msra.mxu3 %v1024_v43  ;;  %v962_v62 = vld [vmem:[#allocation4 + $0x170] sm:$0xff]  ;;  %v963_v63 = vld [vmem:[#allocation4 + $0x178] sm:$0xff]  ;;  %v956_v4 = vld [vmem:[#allocation4 + $0x140] sm:$0xff] }
  0x6b   : > { %1137 = vmatpush.msrb.mxu0 %v1045_v20  ;;  %1166 = vmatpush.msrb.mxu1 %v1046_v21  ;;  %v957_v5 = vld [vmem:[#allocation4 + $0x148] sm:$0xff]  ;;  %v958_v6 = vld [vmem:[#allocation4 + $0x150] sm:$0xff]  ;;  %v959_v7 = vld [vmem:[#allocation4 + $0x158] sm:$0xff] }
  0x6c   : > { %6876 = vmatmul.msk.f32.gmra.mxu1 %vm874_vm0, %v966_v22  ;;  %6872 = vmatmul.msk.f32.gmra.mxu0 %vm874_vm0, %v871_v23  ;;  %v952_v8 = vld [vmem:[#allocation4 + $0x120] sm:$0xff]  ;;  %v953_v9 = vld [vmem:[#allocation4 + $0x128] sm:$0xff]  ;;  %v954_v10 = vld [vmem:[#allocation4 + $0x130] sm:$0xff] }
  0x6d   : > { %1138 = vmatpush.msrb.mxu0 %v1041_v26  ;;  %1167 = vmatpush.msrb.mxu1 %v1042_v27  ;;  %v955_v11 = vld [vmem:[#allocation4 + $0x138] sm:$0xff]  ;;  %v948_v12 = vld [vmem:[#allocation4 + $0x100] sm:$0xff]  ;;  %v949_v13 = vld [vmem:[#allocation4 + $0x108] sm:$0xff] }
  0x6e   : > { %1085 = vmatpush.msra.mxu2 %v1019_v46  ;;  %1114 = vmatpush.msra.mxu3 %v1020_v47  ;;  %v950_v14 = vld [vmem:[#allocation4 + $0x110] sm:$0xff]  ;;  %v951_v15 = vld [vmem:[#allocation4 + $0x118] sm:$0xff]  ;;  %v944_v16 = vld [vmem:[#allocation4 + $0xe0] sm:$0xff] }
  0x6f   : > { %1139 = vmatpush.msrb.mxu0 %v1037_v30  ;;  %1168 = vmatpush.msrb.mxu1 %v1038_v31  ;;  %v945_v17 = vld [vmem:[#allocation4 + $0xe8] sm:$0xff]  ;;  %v946_v18 = vld [vmem:[#allocation4 + $0xf0] sm:$0xff]  ;;  %v947_v19 = vld [vmem:[#allocation4 + $0xf8] sm:$0xff] }
  0x70   : > { %1086 = vmatpush.msra.mxu2 %v1015_v50  ;;  %1115 = vmatpush.msra.mxu3 %v1016_v51  ;;  %v940_v20 = vld [vmem:[#allocation4 + $0xc0] sm:$0xff]  ;;  %v941_v21 = vld [vmem:[#allocation4 + $0xc8] sm:$0xff]  ;;  %v942_v22 = vld [vmem:[#allocation4 + $0xd0] sm:$0xff] }
  0x71   : > { %1140 = vmatpush.msrb.mxu0 %v1033_v34  ;;  %1169 = vmatpush.msrb.mxu1 %v1034_v35  ;;  %v943_v23 = vld [vmem:[#allocation4 + $0xd8] sm:$0xff]  ;;  %v936_v24 = vld [vmem:[#allocation4 + $0xa0] sm:$0xff]  ;;  %v937_v25 = vld [vmem:[#allocation4 + $0xa8] sm:$0xff] }
  0x72   : > { %1087 = vmatpush.msra.mxu2 %v1011_v56  ;;  %1116 = vmatpush.msra.mxu3 %v1012_v57  ;;  %v938_v26 = vld [vmem:[#allocation4 + $0xb0] sm:$0xff]  ;;  %v939_v27 = vld [vmem:[#allocation4 + $0xb8] sm:$0xff]  ;;  %v932_v28 = vld [vmem:[#allocation4 + $0x80] sm:$0xff] }
  0x73   : > { %1141 = vmatpush.msrb.mxu0 %v1029_v40  ;;  %1170 = vmatpush.msrb.mxu1 %v1030_v41  ;;  %v933_v29 = vld [vmem:[#allocation4 + $0x88] sm:$0xff]  ;;  %v934_v30 = vld [vmem:[#allocation4 + $0x90] sm:$0xff]  ;;  %v935_v31 = vld [vmem:[#allocation4 + $0x98] sm:$0xff] }
  0x74   : > { %6877 = vmatmul.msk.f32.gmra.mxu1 %vm874_vm0, %v967_v38  ;;  %6873 = vmatmul.msk.f32.gmra.mxu0 %vm874_vm0, %v872_v39  ;;  %v928_v32 = vld [vmem:[#allocation4 + $0x60] sm:$0xff]  ;;  %v929_v33 = vld [vmem:[#allocation4 + $0x68] sm:$0xff]  ;;  %v930_v34 = vld [vmem:[#allocation4 + $0x70] sm:$0xff] }
  0x75   : > { %1142 = vmatpush.msrb.mxu0 %v1025_v44  ;;  %1171 = vmatpush.msrb.mxu1 %v1026_v45  ;;  %v931_v35 = vld [vmem:[#allocation4 + $0x78] sm:$0xff]  ;;  %v924_v36 = vld [vmem:[#allocation4 + $0x40] sm:$0xff]  ;;  %v925_v37 = vld [vmem:[#allocation4 + $0x48] sm:$0xff] }
  0x76   : > { %1204 = vmatpush.msrb.mxu2 %v960_v60  ;;  %1233 = vmatpush.msrb.mxu3 %v961_v61  ;;  %v926_v38 = vld [vmem:[#allocation4 + $0x50] sm:$0xff]  ;;  %v927_v39 = vld [vmem:[#allocation4 + $0x58] sm:$0xff]  ;;  %v920_v40 = vld [vmem:[#allocation4 + $0x20] sm:$0xff] }
  0x77   : > { %1143 = vmatpush.msrb.mxu0 %v1021_v48  ;;  %1172 = vmatpush.msrb.mxu1 %v1022_v49  ;;  %v921_v41 = vld [vmem:[#allocation4 + $0x28] sm:$0xff]  ;;  %v922_v42 = vld [vmem:[#allocation4 + $0x30] sm:$0xff]  ;;  %v923_v43 = vld [vmem:[#allocation4 + $0x38] sm:$0xff] }
  0x78   : > { %1205 = vmatpush.msrb.mxu2 %v956_v4  ;;  %1234 = vmatpush.msrb.mxu3 %v957_v5  ;;  %v916_v45 = vld [vmem:[#allocation4] sm:$0xff]  ;;  %v917_v46 = vld [vmem:[#allocation4 + $0x8] sm:$0xff]  ;;  %v918_v47 = vld [vmem:[#allocation4 + $0x10] sm:$0xff] }
  0x79   : > { %1144 = vmatpush.msrb.mxu0 %v1017_v52  ;;  %1173 = vmatpush.msrb.mxu1 %v1018_v53  ;;  %v919_v48 = vld [vmem:[#allocation4 + $0x18] sm:$0xff]  ;;  %v1317_v52 = vld [vmem:[#allocation2 + $0x40] sm:$0xff]  ;;  %v1318_v53 = vld [vmem:[#allocation2 + $0x48] sm:$0xff] }
  0x7a   : > { %1206 = vmatpush.msrb.mxu2 %v952_v8  ;;  %1235 = vmatpush.msrb.mxu3 %v953_v9  ;;  %v1409_v60 = vld [vmem:[#allocation4 + $0x470] sm:$0xff]  ;;  %v1410_v61 = vld [vmem:[#allocation4 + $0x478] sm:$0xff] }
  0x7b   : > { %1145 = vmatpush.msrb.mxu0 %v1013_v58  ;;  %1174 = vmatpush.msrb.mxu1 %v1014_v59  ;;  %v1407_v58 = vld [vmem:[#allocation4 + $0x460] sm:$0xff]  ;;  %v1408_v59 = vld [vmem:[#allocation4 + $0x468] sm:$0xff]  ;;  %v1405_v4 = vld [vmem:[#allocation4 + $0x450] sm:$0xff] }
  0x7c   : > { %6878 = vmatmul.msk.f32.gmra.mxu1 %vm874_vm0, %v968_v54  ;;  %6874 = vmatmul.msk.f32.gmra.mxu0 %vm874_vm0, %v873_v55  ;;  %v1319_v54 = vld [vmem:[#allocation2 + $0x50] sm:$0xff]  ;;  %v1320_v55 = vld [vmem:[#allocation2 + $0x58] sm:$0xff] }
  0x7d   : > { %1262 = vmatpush.msra.mxu0 %v962_v62  ;;  %1291 = vmatpush.msra.mxu1 %v963_v63  ;;  %v1403_v62 = vld [vmem:[#allocation4 + $0x440] sm:$0xff]  ;;  %v1404_v63 = vld [vmem:[#allocation4 + $0x448] sm:$0xff]  ;;  %v1406_v5 = vld [vmem:[#allocation4 + $0x458] sm:$0xff] }
  0x7e   : > { %1207 = vmatpush.msrb.mxu2 %v948_v12  ;;  %1236 = vmatpush.msrb.mxu3 %v949_v13  ;;  %v1401_v8 = vld [vmem:[#allocation4 + $0x430] sm:$0xff]  ;;  %v1402_v9 = vld [vmem:[#allocation4 + $0x438] sm:$0xff]  ;;  %v1396_v12 = vld [vmem:[#allocation4 + $0x408] sm:$0xff] }
  0x7f   : > { %1263 = vmatpush.msra.mxu0 %v958_v6  ;;  %1292 = vmatpush.msra.mxu1 %v959_v7  ;;  %v1399_v6 = vld [vmem:[#allocation4 + $0x420] sm:$0xff]  ;;  %v1400_v7 = vld [vmem:[#allocation4 + $0x428] sm:$0xff]  ;;  %v1397_v13 = vld [vmem:[#allocation4 + $0x410] sm:$0xff] }
  0x80   : > { %1208 = vmatpush.msrb.mxu2 %v944_v16  ;;  %1237 = vmatpush.msrb.mxu3 %v945_v17  ;;  %v1392_v16 = vld [vmem:[#allocation4 + $0x3e8] sm:$0xff]  ;;  %v1393_v17 = vld [vmem:[#allocation4 + $0x3f0] sm:$0xff] }
  0x81   : > { %1264 = vmatpush.msra.mxu0 %v954_v10  ;;  %1293 = vmatpush.msra.mxu1 %v955_v11  ;;  %v1395_v11 = vld [vmem:[#allocation4 + $0x400] sm:$0xff] }
  0x82   : > { %1209 = vmatpush.msrb.mxu2 %v940_v20  ;;  %1238 = vmatpush.msrb.mxu3 %v941_v21  ;;  %v1388_v20 = vld [vmem:[#allocation4 + $0x3c8] sm:$0xff]  ;;  %v1389_v21 = vld [vmem:[#allocation4 + $0x3d0] sm:$0xff] }
  0x83   : > { %1265 = vmatpush.msra.mxu0 %v950_v14  ;;  %1294 = vmatpush.msra.mxu1 %v951_v15  ;;  %v1398_v14 = vld [vmem:[#allocation4 + $0x418] sm:$0xff]  ;;  %v1391_v15 = vld [vmem:[#allocation4 + $0x3e0] sm:$0xff] }
  0x84   : > { %1210 = vmatpush.msrb.mxu2 %v936_v24  ;;  %1239 = vmatpush.msrb.mxu3 %v937_v25  ;;  %v1384_v24 = vld [vmem:[#allocation4 + $0x3a8] sm:$0xff]  ;;  %v1385_v25 = vld [vmem:[#allocation4 + $0x3b0] sm:$0xff] }
  0x85   : > { %1266 = vmatpush.msra.mxu0 %v946_v18  ;;  %1295 = vmatpush.msra.mxu1 %v947_v19  ;;  %v1394_v18 = vld [vmem:[#allocation4 + $0x3f8] sm:$0xff]  ;;  %v1387_v19 = vld [vmem:[#allocation4 + $0x3c0] sm:$0xff] }
  0x86   : > { %1211 = vmatpush.msrb.mxu2 %v932_v28  ;;  %1240 = vmatpush.msrb.mxu3 %v933_v29  ;;  %v1379_v28 = vld [vmem:[#allocation4 + $0x380] sm:$0xff]  ;;  %v1380_v29 = vld [vmem:[#allocation4 + $0x388] sm:$0xff] }
  0x87   : > { %1267 = vmatpush.msra.mxu0 %v942_v22  ;;  %1296 = vmatpush.msra.mxu1 %v943_v23  ;;  %v1390_v22 = vld [vmem:[#allocation4 + $0x3d8] sm:$0xff]  ;;  %v1383_v23 = vld [vmem:[#allocation4 + $0x3a0] sm:$0xff] }
  0x88   : > { %1212 = vmatpush.msrb.mxu2 %v928_v32  ;;  %1241 = vmatpush.msrb.mxu3 %v929_v33  ;;  %v1375_v32 = vld [vmem:[#allocation4 + $0x360] sm:$0xff]  ;;  %v1376_v33 = vld [vmem:[#allocation4 + $0x368] sm:$0xff] }
  0x89   : > { %1268 = vmatpush.msra.mxu0 %v938_v26  ;;  %1297 = vmatpush.msra.mxu1 %v939_v27  ;;  %v1386_v26 = vld [vmem:[#allocation4 + $0x3b8] sm:$0xff] }
  0x8a   : > { %1213 = vmatpush.msrb.mxu2 %v924_v36  ;;  %1242 = vmatpush.msrb.mxu3 %v925_v37  ;;  %v1371_v36 = vld [vmem:[#allocation4 + $0x340] sm:$0xff]  ;;  %v1372_v37 = vld [vmem:[#allocation4 + $0x348] sm:$0xff] }
  0x8b   : > { %1269 = vmatpush.msra.mxu0 %v934_v30  ;;  %1298 = vmatpush.msra.mxu1 %v935_v31  ;;  %v1381_v30 = vld [vmem:[#allocation4 + $0x390] sm:$0xff]  ;;  %v1382_v31 = vld [vmem:[#allocation4 + $0x398] sm:$0xff] }
  0x8c   : > { %1214 = vmatpush.msrb.mxu2 %v920_v40  ;;  %1243 = vmatpush.msrb.mxu3 %v921_v41  ;;  %v1367_v40 = vld [vmem:[#allocation4 + $0x320] sm:$0xff]  ;;  %v1368_v41 = vld [vmem:[#allocation4 + $0x328] sm:$0xff] }
  0x8d   : > { %1270 = vmatpush.msra.mxu0 %v930_v34  ;;  %1299 = vmatpush.msra.mxu1 %v931_v35  ;;  %v1377_v34 = vld [vmem:[#allocation4 + $0x370] sm:$0xff]  ;;  %v1378_v35 = vld [vmem:[#allocation4 + $0x378] sm:$0xff] }
  0x8e   : > { %1215 = vmatpush.msrb.mxu2 %v916_v45  ;;  %1244 = vmatpush.msrb.mxu3 %v917_v46  ;;  %v1363_v45 = vld [vmem:[#allocation4 + $0x300] sm:$0xff]  ;;  %v1364_v46 = vld [vmem:[#allocation4 + $0x308] sm:$0xff] }
  0x8f   : > { %1271 = vmatpush.msra.mxu0 %v926_v38  ;;  %1300 = vmatpush.msra.mxu1 %v927_v39  ;;  %v1373_v38 = vld [vmem:[#allocation4 + $0x350] sm:$0xff]  ;;  %v1374_v39 = vld [vmem:[#allocation4 + $0x358] sm:$0xff] }
  0x91   : > { %1272 = vmatpush.msra.mxu0 %v922_v42  ;;  %1301 = vmatpush.msra.mxu1 %v923_v43  ;;  %v1369_v42 = vld [vmem:[#allocation4 + $0x330] sm:$0xff]  ;;  %v1370_v43 = vld [vmem:[#allocation4 + $0x338] sm:$0xff] }
  0x93   : > { %1273 = vmatpush.msra.mxu0 %v918_v47  ;;  %1302 = vmatpush.msra.mxu1 %v919_v48  ;;  %v1365_v47 = vld [vmem:[#allocation4 + $0x310] sm:$0xff]  ;;  %v1366_v48 = vld [vmem:[#allocation4 + $0x318] sm:$0xff] }
  0xe1   : > { %v998_v44 = vpop.f32.mrf.mxu1 }
  0xe2   : > { %6879 = vmatmul.msk.f32.vlgmr.msra.gmra.mxu2 %vm1059_vm1, %v998_v44  ;;  %6883 = vmatmul.msk.f32.vlgmr.msra.gmra.mxu3 %vm1059_vm1, %v998_v44 }
  0xe3   : > { %6887 = vmatmul.msk.f32.vlgmr.msrb.gmra.mxu0 %vm1059_vm1, %v998_v44  ;;  %6891 = vmatmul.msk.f32.vlgmr.msrb.gmra.mxu1 %vm1059_vm1, %v998_v44 }
  0xe4   : > { %1345 = vmatpush.msra.mxu2 %v8212_v0  ;;  %1427 = vmatpush.msra.mxu3 %v1407_v58 }
  0xe5   : > { %1456 = vmatpush.msrb.mxu0 %v1408_v59  ;;  %1485 = vmatpush.msrb.mxu1 %v1409_v60 }
  0xe6   : > { %1346 = vmatpush.msra.mxu2 %v8214_v1  ;;  %v904_v1 = vpop.f32.mrf.mxu0  ;;  %1428 = vmatpush.msra.mxu3 %v1403_v62 }
  0xe7   : > { %1457 = vmatpush.msrb.mxu0 %v1404_v63  ;;  %1486 = vmatpush.msrb.mxu1 %v1405_v4 }
  0xe8   : > { %1347 = vmatpush.msra.mxu2 %v8218_v2  ;;  %1429 = vmatpush.msra.mxu3 %v1399_v6 }
  0xe9   : > { %v1001_v49 = vpop.f32.mrf.mxu1  ;;  %1458 = vmatpush.msrb.mxu0 %v1400_v7  ;;  %1487 = vmatpush.msrb.mxu1 %v1401_v8 }
  0xea   : > { %6880 = vmatmul.msk.f32.gmra.mxu2 %vm1059_vm1, %v1001_v49  ;;  %6884 = vmatmul.msk.f32.gmra.mxu3 %vm1059_vm1, %v1001_v49 }
  0xeb   : > { %6888 = vmatmul.msk.f32.gmra.mxu0 %vm1059_vm1, %v1001_v49  ;;  %6892 = vmatmul.msk.f32.gmra.mxu1 %vm1059_vm1, %v1001_v49 }
  0xec   : > { %1348 = vmatpush.msra.mxu2 %v8222_v3  ;;  %1430 = vmatpush.msra.mxu3 %v1395_v11 }
  0xed   : > { %1459 = vmatpush.msrb.mxu0 %v1396_v12  ;;  %1488 = vmatpush.msrb.mxu1 %v1397_v13 }
  0xee   : > { %v907_v2 = vpop.f32.mrf.mxu0  ;;  %1431 = vmatpush.msra.mxu3 %v1391_v15 }
  0xef   : > { %1460 = vmatpush.msrb.mxu0 %v1392_v16  ;;  %1489 = vmatpush.msrb.mxu1 %v1393_v17 }
  0xf0   : > { %1432 = vmatpush.msra.mxu3 %v1387_v19 }
  0xf1   : > { %v1004_v50 = vpop.f32.mrf.mxu1  ;;  %1461 = vmatpush.msrb.mxu0 %v1388_v20  ;;  %1490 = vmatpush.msrb.mxu1 %v1389_v21 }
  0xf2   : > { %6881 = vmatmul.msk.f32.gmra.mxu2 %vm1059_vm1, %v1004_v50  ;;  %6885 = vmatmul.msk.f32.gmra.mxu3 %vm1059_vm1, %v1004_v50 }
  0xf3   : > { %6889 = vmatmul.msk.f32.gmra.mxu0 %vm1059_vm1, %v1004_v50  ;;  %6893 = vmatmul.msk.f32.gmra.mxu1 %vm1059_vm1, %v1004_v50 }
  0xf4   : > { %1433 = vmatpush.msra.mxu3 %v1383_v23  ;;  %1462 = vmatpush.msrb.mxu0 %v1384_v24 }
  0xf5   : > { %1491 = vmatpush.msrb.mxu1 %v1385_v25 }
  0xf6   : > { %v910_v3 = vpop.f32.mrf.mxu0  ;;  %1434 = vmatpush.msra.mxu3 %v1379_v28  ;;  %1463 = vmatpush.msrb.mxu0 %v1380_v29 }
  0xf7   : > { %1492 = vmatpush.msrb.mxu1 %v1381_v30 }
  0xf8   : > { %1435 = vmatpush.msra.mxu3 %v1375_v32  ;;  %1464 = vmatpush.msrb.mxu0 %v1376_v33  ;;  %v8328_v32 = vld [vmem:[#allocation6] sm:$0xf] }
  0xf9   : > { %v1007_v0 = vpop.f32.mrf.mxu1  ;;  %1493 = vmatpush.msrb.mxu1 %v1377_v34 }
  0xfa   : > { %6882 = vmatmul.msk.f32.gmra.mxu2 %vm1059_vm1, %v1007_v0  ;;  %6886 = vmatmul.msk.f32.gmra.mxu3 %vm1059_vm1, %v1007_v0 }
  0xfb   : > { %6890 = vmatmul.msk.f32.gmra.mxu0 %vm1059_vm1, %v1007_v0  ;;  %6894 = vmatmul.msk.f32.gmra.mxu1 %vm1059_vm1, %v1007_v0 }
  0xfc   : > { %1436 = vmatpush.msra.mxu3 %v1371_v36  ;;  %1465 = vmatpush.msrb.mxu0 %v1372_v37 }
  0xfd   : > { %1494 = vmatpush.msrb.mxu1 %v1373_v38 }
  0xfe   : > { %v913_v51 = vpop.f32.mrf.mxu0  ;;  %1437 = vmatpush.msra.mxu3 %v1367_v40  ;;  %1466 = vmatpush.msrb.mxu0 %v1368_v41 }
  0xff   : > { %1495 = vmatpush.msrb.mxu1 %v1369_v42 }
 0x100   : > { %1438 = vmatpush.msra.mxu3 %v1363_v45  ;;  %1467 = vmatpush.msrb.mxu0 %v1364_v46 }
 0x101   : > { %1496 = vmatpush.msrb.mxu1 %v1365_v47 }
 0x102   : > { %6895 = vmatmul.msk.f32.vlgmr.msrb.gmra.mxu2 %vm1059_vm1, %v904_v1  ;;  %6899 = vmatmul.msk.f32.vlgmr.msrb.gmra.mxu3 %vm1059_vm1, %v904_v1 }
 0x103   : > { %6903 = vmatmul.msk.f32.vlgmr.msra.gmra.mxu0 %vm1059_vm1, %v904_v1  ;;  %6907 = vmatmul.msk.f32.vlgmr.msra.gmra.mxu1 %vm1059_vm1, %v904_v1 }
 0x104   : > { %1514 = vmatpush.msrb.mxu2 %v1410_v61 }
 0x106   : > { %1515 = vmatpush.msrb.mxu2 %v1406_v5 }
 0x108   : > { %1516 = vmatpush.msrb.mxu2 %v1402_v9 }
 0x10a   : > { %6896 = vmatmul.msk.f32.gmra.mxu2 %vm1059_vm1, %v907_v2  ;;  %6900 = vmatmul.msk.f32.gmra.mxu3 %vm1059_vm1, %v907_v2 }
 0x10b   : > { %6904 = vmatmul.msk.f32.gmra.mxu0 %vm1059_vm1, %v907_v2  ;;  %6908 = vmatmul.msk.f32.gmra.mxu1 %vm1059_vm1, %v907_v2 }
 0x10c   : > { %1517 = vmatpush.msrb.mxu2 %v1398_v14 }
 0x10e   : > { %1518 = vmatpush.msrb.mxu2 %v1394_v18 }
 0x110   : > { %1519 = vmatpush.msrb.mxu2 %v1390_v22 }
 0x112   : > { %6897 = vmatmul.msk.f32.gmra.mxu2 %vm1059_vm1, %v910_v3  ;;  %6901 = vmatmul.msk.f32.gmra.mxu3 %vm1059_vm1, %v910_v3 }
 0x113   : > { %6905 = vmatmul.msk.f32.gmra.mxu0 %vm1059_vm1, %v910_v3  ;;  %6909 = vmatmul.msk.f32.gmra.mxu1 %vm1059_vm1, %v910_v3 }
 0x114   : > { %1520 = vmatpush.msrb.mxu2 %v1386_v26 }
 0x116   : > { %1521 = vmatpush.msrb.mxu2 %v1382_v31 }
 0x118   : > { %1522 = vmatpush.msrb.mxu2 %v1378_v35 }
 0x11a   : > { %6898 = vmatmul.msk.f32.gmra.mxu2 %vm1059_vm1, %v913_v51  ;;  %6902 = vmatmul.msk.f32.gmra.mxu3 %vm1059_vm1, %v913_v51 }
 0x11b   : > { %6906 = vmatmul.msk.f32.gmra.mxu0 %vm1059_vm1, %v913_v51  ;;  %6910 = vmatmul.msk.f32.gmra.mxu1 %vm1059_vm1, %v913_v51 }
 0x11c   : > { %1523 = vmatpush.msrb.mxu2 %v1374_v39 }
 0x11e   : > { %1524 = vmatpush.msrb.mxu2 %v1370_v43  ;;  %v1558_v43 = vperm.slane %v8328_v32, 1 }
 0x120   : > { %1525 = vmatpush.msrb.mxu2 %v1366_v48 }
 0x122   : > { %6911 = vmatmul.msk.f32.vlgmr.msra.gmra.mxu2 %vm874_vm0, %v1317_v52 }
 0x12a   : > { %6912 = vmatmul.msk.f32.gmra.mxu2 %vm874_vm0, %v1318_v53 }
 0x132   : > { %6913 = vmatmul.msk.f32.gmra.mxu2 %vm874_vm0, %v1319_v54 }
 0x13a   : > { %6914 = vmatmul.msk.f32.gmra.mxu2 %vm874_vm0, %v1320_v55 }
 0x160   : > { %v1147_v52 = vpop.f32.mrf.mxu0  ;;  %v8308_v53 = vpop.f32.mrf.mxu1 }
 0x165   : > { %v8276_v56 = vpop.f32.mrf.mxu2  ;;  %v1118_v54 = vpop.f32.mrf.mxu3 }
 0x168   : > { %v1150_v55 = vpop.f32.mrf.mxu0  ;;  %v8310_v58 = vpop.f32.mrf.mxu1 }
 0x16d   : > { %v8278_v57 = vpop.f32.mrf.mxu2  ;;  %v1121_v59 = vpop.f32.mrf.mxu3 }
 0x170   : > { %v1153_v60 = vpop.f32.mrf.mxu0  ;;  %v8312_v61 = vpop.f32.mrf.mxu1 }
 0x175   : > { %v8280_v10 = vpop.f32.mrf.mxu2  ;;  %v1124_v62 = vpop.f32.mrf.mxu3 }
 0x178   : > { %v1156_v63 = vpop.f32.mrf.mxu0  ;;  %v8314_v4 = vpop.f32.mrf.mxu1 }
 0x17d   : > { %v8282_v27 = vpop.f32.mrf.mxu2  ;;  %v1127_v5 = vpop.f32.mrf.mxu3 }
 0x180   : > { %v1275_v6 = vpop.f32.mrf.mxu0  ;;  %v8316_v7 = vpop.f32.mrf.mxu1 }
 0x181   : > { %v1276_v48 = vadd.f32 %v1275_v6, %v1147_v52 }
 0x185   : > { %v8284_v44 = vpop.f32.mrf.mxu2  ;;  %v1246_v8 = vpop.f32.mrf.mxu3 }
 0x186   : > { %v1247_v42 = vadd.f32 %v1246_v8, %v1118_v54 }
 0x188   : > { %v1278_v9 = vpop.f32.mrf.mxu0  ;;  %v8318_v11 = vpop.f32.mrf.mxu1 }
 0x189   : > { %v1279_v37 = vadd.f32 %v1278_v9, %v1150_v55  ;;  %v1557_v9 = vperm.slane %v8328_v32, 0 }
 0x18d   : > { %v8286_v49 = vpop.f32.mrf.mxu2  ;;  %v1249_v12 = vpop.f32.mrf.mxu3 }
 0x18e   : > { %v1250_v34 = vadd.f32 %v1249_v12, %v1121_v59  ;;  %v1221_v6 = vadd.f32 %v8286_v49, %v8278_v57 }
 0x190   : > { %v1281_v13 = vpop.f32.mrf.mxu0  ;;  %v8320_v14 = vpop.f32.mrf.mxu1 }
 0x191   : > { %v1282_v31 = vadd.f32 %v1281_v13, %v1153_v60 }
 0x195   : > { %v8288_v50 = vpop.f32.mrf.mxu2  ;;  %v1252_v15 = vpop.f32.mrf.mxu3 }
 0x196   : > { %v1253_v30 = vadd.f32 %v1252_v15, %v1124_v62  ;;  %v1224_v54 = vadd.f32 %v8288_v50, %v8280_v10 }
 0x198   : > { %v1284_v16 = vpop.f32.mrf.mxu0  ;;  %v1313_v17 = vpop.f32.mrf.mxu1 }
 0x199   : > { %v1285_v38 = vadd.f32 %v1284_v16, %v1156_v63 }
 0x19d   : > { %v8290_v0 = vpop.f32.mrf.mxu2  ;;  %v1255_v18 = vpop.f32.mrf.mxu3 }
 0x19e   : > { %v1256_v35 = vadd.f32 %v1255_v18, %v1127_v5  ;;  %v1227_v5 = vadd.f32 %v8290_v0, %v8282_v27  ;;  %v1218_v0 = vadd.f32 %v8284_v44, %v8276_v56  ;;  %v1597_v44 = vld [vmem:[#allocation7] sm:$0xff] }
 0x1a5   : > { %v1350_v1 = vpop.f32.mrf.mxu2 }
 0x1a6   : > { %6915 = vmatmul.msk.f32.vlgmr.msra.gmra.mxu3 %vm1059_vm1, %v1350_v1  ;;  %6919 = vmatmul.msk.f32.vlgmr.msrb.gmra.mxu0 %vm1059_vm1, %v1350_v1 }
 0x1a7   : > { %6923 = vmatmul.msk.f32.vlgmr.msrb.gmra.mxu1 %vm1059_vm1, %v1350_v1  ;;  %6927 = vmatmul.msk.f32.vlgmr.msrb.gmra.mxu2 %vm1059_vm1, %v1350_v1  ;;  %v1559_v1 = vperm.slane %v8328_v32, 2 }
 0x1ad   : > { %v1353_v2 = vpop.f32.mrf.mxu2 }
 0x1ae   : > { %6916 = vmatmul.msk.f32.gmra.mxu3 %vm1059_vm1, %v1353_v2  ;;  %6920 = vmatmul.msk.f32.gmra.mxu0 %vm1059_vm1, %v1353_v2 }
 0x1af   : > { %6924 = vmatmul.msk.f32.gmra.mxu1 %vm1059_vm1, %v1353_v2  ;;  %6928 = vmatmul.msk.f32.gmra.mxu2 %vm1059_vm1, %v1353_v2 }
 0x1b5   : > { %v1356_v3 = vpop.f32.mrf.mxu2 }
 0x1b6   : > { %6917 = vmatmul.msk.f32.gmra.mxu3 %vm1059_vm1, %v1356_v3  ;;  %6921 = vmatmul.msk.f32.gmra.mxu0 %vm1059_vm1, %v1356_v3 }
 0x1b7   : > { %6925 = vmatmul.msk.f32.gmra.mxu1 %vm1059_vm1, %v1356_v3  ;;  %6929 = vmatmul.msk.f32.gmra.mxu2 %vm1059_vm1, %v1356_v3 }
 0x1bd   : > { %v1359_v51 = vpop.f32.mrf.mxu2 }
 0x1be   : > { %6918 = vmatmul.msk.f32.gmra.mxu3 %vm1059_vm1, %v1359_v51  ;;  %6922 = vmatmul.msk.f32.gmra.mxu0 %vm1059_vm1, %v1359_v51 }
 0x1bf   : > { %6926 = vmatmul.msk.f32.gmra.mxu1 %vm1059_vm1, %v1359_v51  ;;  %6930 = vmatmul.msk.f32.gmra.mxu2 %vm1059_vm1, %v1359_v51 }
 0x223   : > { %v1469_v19 = vpop.f32.mrf.mxu0 }
 0x224   : > { %v1498_v20 = vpop.f32.mrf.mxu1  ;;  %v1540_v51 = vadd.f32 %v1469_v19, %v1247_v42 }
 0x225   : > { %v1541_v60 = vadd.f32 %v1498_v20, %v1276_v48 }
 0x226   : > { %v8345_v16 = vadd.f32 %v1558_v43, %v1540_v51  ;;  %v1933_v51 = vld [vmem:[#allocation9 + $0x2e0] sm:$0xff] }
 0x227   : > { %v1567_v50 = vadd.f32 %v1559_v1, %v1541_v60 }
 0x229   : > { %v8322_v21 = vpop.f32.mrf.mxu3  ;;  %v1583_v56 = vmax.f32 %v1567_v50, 0.0 }
 0x22a   : > { %v8324_v22 = vpop.f32.mrf.mxu2 }
 0x22b   : > { %v1472_v23 = vpop.f32.mrf.mxu0 }
 0x22c   : > { %v1501_v24 = vpop.f32.mrf.mxu1  ;;  %v1544_v45 = vadd.f32 %v1472_v23, %v1250_v34  ;;  %v1314_v23 = vadd.f32 %v1313_v17, %v8314_v4  ;;  %v1308_v17 = vadd.f32 %v8318_v11, %v8310_v58 }
 0x22d   : > { %v1545_v2 = vadd.f32 %v1501_v24, %v1279_v37 }
 0x22e   : > { %v8340_v8 = vadd.f32 %v1558_v43, %v1544_v45 }
 0x22f   : > { %v1571_v12 = vadd.f32 %v1559_v1, %v1545_v2 }
 0x230   : > { %v1586_v20 = vmax.f32 %v8340_v8, 0.0 }
 0x231   : > { %v1443_v25 = vpop.f32.mrf.mxu3 }
 0x232   : > { %v8326_v26 = vpop.f32.mrf.mxu2  ;;  %v1543_v57 = vadd.f32 %v1443_v25, %v1221_v6  ;;  %v1311_v25 = vadd.f32 %v8320_v14, %v8312_v61  ;;  %v1698_v61 = vld [vmem:[#allocation7 + $0x10] sm:$0xff]  ;;  %v1305_v14 = vadd.f32 %v8316_v7, %v8308_v53  ;;  %v1598_v53 = vld [vmem:[#allocation7 + $0x8] sm:$0xff]  ;;  %v1965_v6 = vld [vmem:[#allocation9 + $0x3e0] sm:$0xff] }
 0x233   : > { %v1475_v28 = vpop.f32.mrf.mxu0  ;;  %v1546_v58 = vadd.f32 %v8326_v26, %v1308_v17  ;;  %v1857_v17 = vld [vmem:[#allocation9 + $0x80] sm:$0xff] }
 0x234   : > { %v1504_v29 = vpop.f32.mrf.mxu1  ;;  %v1548_v36 = vadd.f32 %v1475_v28, %v1253_v30  ;;  %v1587_v28 = vmax.f32 %v1571_v12, 0.0  ;;  %v1569_v34 = vadd.f32 %v1557_v9, %v1543_v57  ;;  %v1867_v12 = vld [vmem:[#allocation9 + $0xd0] sm:$0xff]  ;;  %v1925_v57 = vld [vmem:[#allocation9 + $0x2a0] sm:$0xff] }
 0x235   : > { %v1549_v39 = vadd.f32 %v1504_v29, %v1282_v31  ;;  %v1539_v29 = vadd.f32 %v8322_v21, %v1218_v0  ;;  %v1895_v0 = vld [vmem:[#allocation9 + $0x1b0] sm:$0xff] }
 0x236   : > { %v8334_v59 = vadd.f32 %v1558_v43, %v1548_v36 }
 0x237   : > { %v1575_v62 = vadd.f32 %v1559_v1, %v1549_v39  ;;  %v1565_v21 = vadd.f32 %v1557_v9, %v1539_v29 }
 0x238   : > { %v1590_v10 = vmax.f32 %v8334_v59, 0.0  ;;  %v1871_v59 = vld [vmem:[#allocation9 + $0xf0] sm:$0xff] }
 0x239   : > { %v1446_v33 = vpop.f32.mrf.mxu3  ;;  %v1591_v27 = vmax.f32 %v1575_v62, 0.0  ;;  %v1931_v62 = vld [vmem:[#allocation9 + $0x2d0] sm:$0xff] }
 0x23a   : > { %v8330_v40 = vpop.f32.mrf.mxu2  ;;  %v1547_v18 = vadd.f32 %v1446_v33, %v1224_v54  ;;  %v1582_v33 = vmax.f32 %v8345_v16, 0.0  ;;  %v1869_v54 = vld [vmem:[#allocation9 + $0xe0] sm:$0xff] }
 0x23b   : > { %v1478_v41 = vpop.f32.mrf.mxu0  ;;  %v1550_v36 = vadd.f32 %v8330_v40, %v1311_v25  ;;  %v1581_v40 = vmax.f32 %v1565_v21, 0.0  ;;  %v1865_v16 = vld [vmem:[#allocation9 + $0xc0] sm:$0xff]  ;;  %v1955_v25 = vld [vmem:[#allocation9 + $0x390] sm:$0xff] }
 0x23c   : > { %v1552_v46 = vadd.f32 %v1478_v41, %v1256_v35  ;;  %v1507_v47 = vpop.f32.mrf.mxu1  ;;  %v1573_v30 = vadd.f32 %v1557_v9, %v1547_v18  ;;  %v1560_v35 = vperm.slane %v8328_v32, 3  ;;  %v1542_v32 = vadd.f32 %v8324_v22, %v1305_v14  ;;  %v1699_v22 = vld [vmem:[#allocation7 + $0x18] sm:$0xff]  ;;  %v1897_v18 = vld [vmem:[#allocation9 + $0x1c0] sm:$0xff] }
 0x23d   : > { %v1553_v3 = vadd.f32 %v1507_v47, %v1285_v38  ;;  %v1585_v38 = vmax.f32 %v1569_v34, 0.0  ;;  %v1917_v14 = vld [vmem:[#allocation9 + $0x260] sm:$0xff] }
 0x23e   : > { %v1578_v55 = vadd.f32 %v1558_v43, %v1552_v46  ;;  %v1589_v37 = vmax.f32 %v1573_v30, 0.0  ;;  %v1576_v39 = vadd.f32 %v1560_v35, %v1550_v36  ;;  %v1572_v41 = vadd.f32 %v1560_v35, %v1546_v58  ;;  %v1859_v30 = vld [vmem:[#allocation9 + $0x90] sm:$0xff]  ;;  %v1889_v36 = vld [vmem:[#allocation9 + $0x180] sm:$0xff] }
 0x23f   : > { %v1579_v63 = vadd.f32 %v1559_v1, %v1553_v3  ;;  %v1568_v7 = vadd.f32 %v1560_v35, %v1542_v32  ;;  %v1935_v3 = vld [vmem:[#allocation9 + $0x2f0] sm:$0xff]  ;;  %v1853_v32 = vld [vmem:[#allocation9 + $0x60] sm:$0xff] }
 0x240   : > { %v1594_v52 = vmax.f32 %v1578_v55, 0.0  ;;  %v1592_v26 = vmax.f32 %v1576_v39, 0.0  ;;  %v1588_v43 = vmax.f32 %v1572_v41, 0.0  ;;  %v1903_v55 = vld [vmem:[#allocation9 + $0x1f0] sm:$0xff] }
 0x241   : > { %v1595_v13 = vmax.f32 %v1579_v63, 0.0  ;;  %v1449_v15 = vpop.f32.mrf.mxu3  ;;  %v1584_v45 = vmax.f32 %v1568_v7, 0.0  ;;  %v1967_v63 = vld [vmem:[#allocation9 + $0x3f0] sm:$0xff]  ;;  %v1949_v7 = vld [vmem:[#allocation9 + $0x360] sm:$0xff] }
 0x242   : > { %v1551_v19 = vadd.f32 %v1449_v15, %v1227_v5  ;;  %1640 = vmatpush.msra.mxu0 %v1594_v52  ;;  %v1536_v24 = vpop.f32.mrf.mxu2  ;;  %v1963_v15 = vld [vmem:[#allocation9 + $0x3d0] sm:$0xff] }
 0x243   : > { %1663 = vmatpush.msra.mxu1 %v1595_v13  ;;  %1764 = vmatpush.msra.mxu2 %v1595_v13  ;;  %v1554_v4 = vadd.f32 %v1536_v24, %v1314_v23  ;;  %v1899_v13 = vld [vmem:[#allocation9 + $0x1d0] sm:$0xff]  ;;  %v1893_v23 = vld [vmem:[#allocation9 + $0x1a0] sm:$0xff] }
 0x244   : > { %v1577_v49 = vadd.f32 %v1557_v9, %v1551_v19  ;;  %1641 = vmatpush.msra.mxu0 %v1590_v10  ;;  %v1929_v9 = vld [vmem:[#allocation9 + $0x2c0] sm:$0xff]  ;;  %v1927_v19 = vld [vmem:[#allocation9 + $0x2b0] sm:$0xff] }
 0x245   : > { %1664 = vmatpush.msra.mxu1 %v1591_v27  ;;  %1765 = vmatpush.msra.mxu2 %v1591_v27  ;;  %v1580_v11 = vadd.f32 %v1560_v35, %v1554_v4  ;;  %v1863_v27 = vld [vmem:[#allocation9 + $0xb0] sm:$0xff] }
 0x246   : > { %v1593_v31 = vmax.f32 %v1577_v49, 0.0  ;;  %1642 = vmatpush.msra.mxu0 %v1586_v20  ;;  %v1959_v49 = vld [vmem:[#allocation9 + $0x3b0] sm:$0xff] }
 0x247   : > { %1665 = vmatpush.msra.mxu1 %v1587_v28  ;;  %1766 = vmatpush.msra.mxu2 %v1587_v28  ;;  %v1596_v42 = vmax.f32 %v1580_v11, 0.0  ;;  %v1923_v24 = vld [vmem:[#allocation9 + $0x290] sm:$0xff]  ;;  %v1957_v28 = vld [vmem:[#allocation9 + $0x3a0] sm:$0xff] }
 0x248   : > { %1617 = vmatpush.msrb.mxu3 %v1593_v31  ;;  %1643 = vmatpush.msra.mxu0 %v1582_v33  ;;  %v1919_v35 = vld [vmem:[#allocation9 + $0x270] sm:$0xff] }
 0x249   : > { %1666 = vmatpush.msra.mxu1 %v1583_v56  ;;  %1767 = vmatpush.msra.mxu2 %v1583_v56  ;;  %v1887_v58 = vld [vmem:[#allocation9 + $0x170] sm:$0xff] }
 0x24a   : > { %6933 = vmatmul.msk.f32.vlgmr.msra.gmra.mxu0 %vm874_vm0, %v1597_v44  ;;  %6935 = vmatmul.msk.f32.vlgmr.msra.gmra.mxu1 %vm874_vm0, %v1597_v44  ;;  %v1915_v41 = vld [vmem:[#allocation9 + $0x250] sm:$0xff] }
 0x24b   : > { %1718 = vmatpush.msrb.mxu0 %v1593_v31  ;;  %1741 = vmatpush.msrb.mxu1 %v1594_v52  ;;  %v1901_v52 = vld [vmem:[#allocation9 + $0x1e0] sm:$0xff]  ;;  %v1891_v31 = vld [vmem:[#allocation9 + $0x190] sm:$0xff] }
 0x24c   : > { %1618 = vmatpush.msrb.mxu3 %v1589_v37  ;;  %6943 = vmatmul.msk.f32.vlgmr.msra.gmra.mxu2 %vm874_vm0, %v1698_v61 }
 0x24d   : > { %1719 = vmatpush.msrb.mxu0 %v1589_v37  ;;  %1742 = vmatpush.msrb.mxu1 %v1590_v10  ;;  %v1961_v10 = vld [vmem:[#allocation9 + $0x3c0] sm:$0xff] }
 0x24e   : > { %1619 = vmatpush.msrb.mxu3 %v1585_v38  ;;  %2015 = vmatpush.msrb.mxu2 %v1935_v3  ;;  %v1953_v37 = vld [vmem:[#allocation9 + $0x380] sm:$0xff]  ;;  %v1947_v3 = vld [vmem:[#allocation9 + $0x350] sm:$0xff] }
 0x24f   : > { %1720 = vmatpush.msrb.mxu0 %v1585_v38  ;;  %1743 = vmatpush.msrb.mxu1 %v1586_v20  ;;  %v1861_v20 = vld [vmem:[#allocation9 + $0xa0] sm:$0xff]  ;;  %v1951_v38 = vld [vmem:[#allocation9 + $0x370] sm:$0xff] }
 0x250   : > { %1620 = vmatpush.msrb.mxu3 %v1581_v40  ;;  %2016 = vmatpush.msrb.mxu2 %v1933_v51 }
 0x251   : > { %6931 = vmatmul.msk.f32.vlgmr.msrb.gmra.mxu3 %vm874_vm0, %v1597_v44  ;;  %1721 = vmatpush.msrb.mxu0 %v1581_v40 }
 0x252   : > { %1686 = vmatpush.msra.mxu3 %v1596_v42  ;;  %1744 = vmatpush.msrb.mxu1 %v1582_v33 }
 0x253   : > { %6934 = vmatmul.msk.f32.gmra.mxu0 %vm874_vm0, %v1598_v53  ;;  %6936 = vmatmul.msk.f32.gmra.mxu1 %vm874_vm0, %v1598_v53 }
 0x254   : > { %1687 = vmatpush.msra.mxu3 %v1592_v26  ;;  %6944 = vmatmul.msk.f32.gmra.mxu2 %vm874_vm0, %v1699_v22 }
 0x255   : > { %1969 = vmatpush.msra.mxu0 %v1871_v59  ;;  %1992 = vmatpush.msra.mxu1 %v1903_v55  ;;  %v1849_v55 = vld [vmem:[#allocation9 + $0x40] sm:$0xff] }
 0x256   : > { %1688 = vmatpush.msra.mxu3 %v1588_v43  ;;  %2017 = vmatpush.msrb.mxu2 %v1931_v62  ;;  %v1881_v62 = vld [vmem:[#allocation9 + $0x140] sm:$0xff] }
 0x257   : > { %1970 = vmatpush.msra.mxu0 %v1869_v54  ;;  %1993 = vmatpush.msra.mxu1 %v1901_v52  ;;  %v1945_v54 = vld [vmem:[#allocation9 + $0x340] sm:$0xff] }
 0x258   : > { %1689 = vmatpush.msra.mxu3 %v1584_v45  ;;  %2018 = vmatpush.msrb.mxu2 %v1929_v9  ;;  %v1907_v9 = vld [vmem:[#allocation9 + $0x210] sm:$0xff] }
 0x259   : > { %6932 = vmatmul.msk.f32.gmra.mxu3 %vm874_vm0, %v1598_v53  ;;  %1971 = vmatpush.msra.mxu0 %v1867_v12  ;;  %v1943_v12 = vld [vmem:[#allocation9 + $0x330] sm:$0xff] }
 0x25a   : > { %1787 = vmatpush.msrb.mxu3 %v1596_v42  ;;  %1994 = vmatpush.msra.mxu1 %v1899_v13  ;;  %v1885_v42 = vld [vmem:[#allocation9 + $0x160] sm:$0xff] }
 0x25b   : > { %6939 = vmatmul.msk.f32.vlgmr.msrb.gmra.mxu0 %vm874_vm0, %v1698_v61  ;;  %6941 = vmatmul.msk.f32.vlgmr.msrb.gmra.mxu1 %vm874_vm0, %v1698_v61  ;;  %v1845_v13 = vld [vmem:[#allocation9 + $0x20] sm:$0xff] }
 0x25c   : > { %1788 = vmatpush.msrb.mxu3 %v1592_v26  ;;  %1972 = vmatpush.msra.mxu0 %v1865_v16  ;;  %v1851_v26 = vld [vmem:[#allocation9 + $0x50] sm:$0xff]  ;;  %v1905_v16 = vld [vmem:[#allocation9 + $0x200] sm:$0xff] }
 0x25d   : > { %1995 = vmatpush.msra.mxu1 %v1897_v18  ;;  %2019 = vmatpush.msrb.mxu2 %v1927_v19  ;;  %v1941_v18 = vld [vmem:[#allocation9 + $0x320] sm:$0xff]  ;;  %v1936_v19 = vld [vmem:[#allocation9 + $0x2f8] sm:$0xff] }
 0x25e   : > { %1789 = vmatpush.msrb.mxu3 %v1588_v43  ;;  %1973 = vmatpush.msra.mxu0 %v1863_v27  ;;  %v1939_v27 = vld [vmem:[#allocation9 + $0x310] sm:$0xff] }
 0x25f   : > { %1996 = vmatpush.msra.mxu1 %v1895_v0  ;;  %2020 = vmatpush.msrb.mxu2 %v1925_v57  ;;  %v1841_v0 = vld [vmem:[#allocation9] sm:$0xff] }
 0x260   : > { %1790 = vmatpush.msrb.mxu3 %v1584_v45  ;;  %1974 = vmatpush.msra.mxu0 %v1861_v20  ;;  %v1913_v45 = vld [vmem:[#allocation9 + $0x240] sm:$0xff] }
 0x261   : > { %6937 = vmatmul.msk.f32.vlgmr.msra.gmra.mxu3 %vm874_vm0, %v1597_v44  ;;  %v1921_v44 = vld [vmem:[#allocation9 + $0x280] sm:$0xff]  ;;  %1997 = vmatpush.msra.mxu1 %v1893_v23  ;;  %v1872_v23 = vld [vmem:[#allocation9 + $0xf8] sm:$0xff] }
 0x262   : > { %2038 = vmatpush.msra.mxu3 %v1967_v63  ;;  %2021 = vmatpush.msrb.mxu2 %v1923_v24  ;;  %v1909_v63 = vld [vmem:[#allocation9 + $0x220] sm:$0xff]  ;;  %v1904_v24 = vld [vmem:[#allocation9 + $0x1f8] sm:$0xff] }
 0x263   : > { %6940 = vmatmul.msk.f32.gmra.mxu0 %vm874_vm0, %v1699_v22  ;;  %6942 = vmatmul.msk.f32.gmra.mxu1 %vm874_vm0, %v1699_v22  ;;  %v1873_v57 = vld [vmem:[#allocation9 + $0x100] sm:$0xff] }
 0x264   : > { %2039 = vmatpush.msra.mxu3 %v1965_v6  ;;  %1975 = vmatpush.msra.mxu0 %v1859_v30  ;;  %v1937_v20 = vld [vmem:[#allocation9 + $0x300] sm:$0xff]  ;;  %v1928_v30 = vld [vmem:[#allocation9 + $0x2b8] sm:$0xff] }
 0x265   : > { %1998 = vmatpush.msra.mxu1 %v1891_v31  ;;  %2022 = vmatpush.msrb.mxu2 %v1921_v44  ;;  %v1870_v31 = vld [vmem:[#allocation9 + $0xe8] sm:$0xff] }
 0x266   : > { %2040 = vmatpush.msra.mxu3 %v1963_v15  ;;  %1976 = vmatpush.msra.mxu0 %v1857_v17  ;;  %v1877_v15 = vld [vmem:[#allocation9 + $0x120] sm:$0xff]  ;;  %v1902_v44 = vld [vmem:[#allocation9 + $0x1e8] sm:$0xff]  ;;  %v1900_v17 = vld [vmem:[#allocation9 + $0x1d8] sm:$0xff] }
 0x267   : > { %2023 = vmatpush.msrb.mxu2 %v1919_v35  ;;  %1999 = vmatpush.msra.mxu1 %v1889_v36  ;;  %v1964_v35 = vld [vmem:[#allocation9 + $0x3d8] sm:$0xff]  ;;  %v1866_v36 = vld [vmem:[#allocation9 + $0xc8] sm:$0xff] }
 0x268   : > { %2041 = vmatpush.msra.mxu3 %v1961_v10  ;;  %v1875_v10 = vld [vmem:[#allocation9 + $0x110] sm:$0xff] }
 0x269   : > { %6938 = vmatmul.msk.f32.gmra.mxu3 %vm874_vm0, %v1598_v53  ;;  %2024 = vmatpush.msrb.mxu2 %v1917_v14  ;;  %v1962_v14 = vld [vmem:[#allocation9 + $0x3c8] sm:$0xff] }
 0x26a   : > { %2042 = vmatpush.msra.mxu3 %v1959_v49  ;;  %2000 = vmatpush.msra.mxu1 %v1887_v58  ;;  %v1932_v49 = vld [vmem:[#allocation9 + $0x2d8] sm:$0xff] }
 0x26b   : > { %2025 = vmatpush.msrb.mxu2 %v1915_v41  ;;  %v1864_v58 = vld [vmem:[#allocation9 + $0xb8] sm:$0xff]  ;;  %v1862_v41 = vld [vmem:[#allocation9 + $0xa8] sm:$0xff] }
 0x26c   : > { %2043 = vmatpush.msra.mxu3 %v1957_v28  ;;  %2001 = vmatpush.msra.mxu1 %v1885_v42  ;;  %v1930_v28 = vld [vmem:[#allocation9 + $0x2c8] sm:$0xff] }
 0x26d   : > { %2026 = vmatpush.msrb.mxu2 %v1913_v45  ;;  %v1894_v42 = vld [vmem:[#allocation9 + $0x1a8] sm:$0xff]  ;;  %v1892_v45 = vld [vmem:[#allocation9 + $0x198] sm:$0xff] }
 0x26e   : > { %2044 = vmatpush.msra.mxu3 %v1955_v25  ;;  %v1926_v25 = vld [vmem:[#allocation9 + $0x2a8] sm:$0xff] }
 0x270   : > { %2045 = vmatpush.msra.mxu3 %v1953_v37  ;;  %v1898_v37 = vld [vmem:[#allocation9 + $0x1c8] sm:$0xff] }
 0x271   : > { %6945 = vmatmul.msk.f32.vlgmr.msrb.gmra.mxu3 %vm874_vm0, %v1698_v61  ;;  %v1855_v61 = vld [vmem:[#allocation9 + $0x70] sm:$0xff] }
 0x272   : > { %1977 = vmatpush.msra.mxu0 %v1855_v61  ;;  %2046 = vmatpush.msra.mxu3 %v1951_v38  ;;  %v1922_v61 = vld [vmem:[#allocation9 + $0x288] sm:$0xff]  ;;  %v1920_v38 = vld [vmem:[#allocation9 + $0x278] sm:$0xff] }
 0x274   : > { %1978 = vmatpush.msra.mxu0 %v1853_v32  ;;  %2047 = vmatpush.msra.mxu3 %v1949_v7  ;;  %v1960_v32 = vld [vmem:[#allocation9 + $0x3b8] sm:$0xff]  ;;  %v1958_v7 = vld [vmem:[#allocation9 + $0x3a8] sm:$0xff] }
 0x276   : > { %1979 = vmatpush.msra.mxu0 %v1851_v26  ;;  %2048 = vmatpush.msra.mxu3 %v1947_v3  ;;  %v1860_v26 = vld [vmem:[#allocation9 + $0x98] sm:$0xff]  ;;  %v1914_v3 = vld [vmem:[#allocation9 + $0x248] sm:$0xff] }
 0x278   : > { %1980 = vmatpush.msra.mxu0 %v1849_v55  ;;  %2049 = vmatpush.msra.mxu3 %v1945_v54  ;;  %v1888_v55 = vld [vmem:[#allocation9 + $0x178] sm:$0xff]  ;;  %v1854_v54 = vld [vmem:[#allocation9 + $0x68] sm:$0xff] }
 0x279   : > { %6946 = vmatmul.msk.f32.gmra.mxu3 %vm874_vm0, %v1699_v22 }
 0x27a   : > { %2050 = vmatpush.msra.mxu3 %v1943_v12  ;;  %v1852_v12 = vld [vmem:[#allocation9 + $0x58] sm:$0xff] }
 0x27c   : > { %2051 = vmatpush.msra.mxu3 %v1941_v18  ;;  %v1850_v18 = vld [vmem:[#allocation9 + $0x48] sm:$0xff] }
 0x27e   : > { %2052 = vmatpush.msra.mxu3 %v1939_v27  ;;  %v1944_v27 = vld [vmem:[#allocation9 + $0x338] sm:$0xff] }
 0x280   : > { %2053 = vmatpush.msra.mxu3 %v1937_v20  ;;  %v1942_v20 = vld [vmem:[#allocation9 + $0x328] sm:$0xff] }
 0x2c7   : > { %v8384_v48 = vpop.f32.mrf.mxu0  ;;  %v1668_v1 = vpop.f32.mrf.mxu1 }
 0x2cf   : > { %v1769_v50 = vpop.f32.mrf.mxu2 }
 0x2d0   : > { %v8386_v60 = vpop.f32.mrf.mxu0  ;;  %v8388_v5 = vpop.f32.mrf.mxu1  ;;  %v8392_v33 = vmax.f32 %v1668_v1, %v1769_v50  ;;  %v1934_v50 = vld [vmem:[#allocation9 + $0x2e8] sm:$0xff] }
 0x2d4   : > { %v8380_v46 = vpop.f32.mrf.mxu3 }
 0x2d7   : > { %v1772_v11 = vpop.f32.mrf.mxu2 }
 0x2d8   : > { %v1723_v34 = vpop.f32.mrf.mxu0  ;;  %v1746_v4 = vpop.f32.mrf.mxu1  ;;  %v8406_v22 = vmax.f32 %v8388_v5, %v1772_v11  ;;  %v1847_v5 = vld [vmem:[#allocation9 + $0x30] sm:$0xff]  ;;  %v1896_v11 = vld [vmem:[#allocation9 + $0x1b8] sm:$0xff] }
 0x2d9   : > { %v8400_v39 = vmax.f32 %v8380_v46, %v1723_v34  ;;  %v8403_v40 = vmax.f32 %v8384_v48, %v1746_v4  ;;  %v1883_v46 = vld [vmem:[#allocation9 + $0x150] sm:$0xff]  ;;  %1981 = vmatpush.msra.mxu0 %v1847_v5  ;;  %v1966_v34 = vld [vmem:[#allocation9 + $0x3e8] sm:$0xff]  ;;  %v1868_v4 = vld [vmem:[#allocation9 + $0xd8] sm:$0xff] }
 0x2da   : > { %2002 = vmatpush.msra.mxu1 %v1883_v46  ;;  %v1916_v46 = vld [vmem:[#allocation9 + $0x258] sm:$0xff]  ;;  %v1886_v5 = vld [vmem:[#allocation9 + $0x168] sm:$0xff] }
 0x2db   : > { %v7410_v48 = vpack.i.bf16 %v8403_v40, %v8400_v39  ;;  %1982 = vmatpush.msra.mxu0 %v1845_v13  ;;  %v1884_v13 = vld [vmem:[#allocation9 + $0x158] sm:$0xff] }
 0x2dc   : > { %v8382_v47 = vpop.f32.mrf.mxu3  ;;  %2003 = vmatpush.msra.mxu1 %v1881_v62  ;;  %v1912_v62 = vld [vmem:[#allocation9 + $0x238] sm:$0xff] }
 0x2e0   : > { %v1726_v51 = vpop.f32.mrf.mxu0  ;;  %v1749_v59 = vpop.f32.mrf.mxu1 }
 0x2e1   : > { %v8418_v52 = vmax.f32 %v8382_v47, %v1726_v51  ;;  %v8421_v6 = vmax.f32 %v8386_v60, %v1749_v59  ;;  %v1843_v60 = vld [vmem:[#allocation9 + $0x10] sm:$0xff]  ;;  %v1954_v51 = vld [vmem:[#allocation9 + $0x388] sm:$0xff]  ;;  %v1856_v59 = vld [vmem:[#allocation9 + $0x78] sm:$0xff] }
 0x2e2   : > { %1983 = vmatpush.msra.mxu0 %v1843_v60  ;;  %v1946_v60 = vld [vmem:[#allocation9 + $0x348] sm:$0xff] }
 0x2e3   : > { %v7420_v47 = vpack.i.bf16 %v8421_v6, %v8418_v52 }
 0x2e4   : > { %v1691_v2 = vpop.f32.mrf.mxu3  ;;  %1984 = vmatpush.msra.mxu0 %v1841_v0  ;;  %v1822_v0 = vlaneseq }
 0x2e6   : > { %2061 = vmatpush.msrb.mxu0 %v1872_v23  ;;  %v1844_v23 = vld [vmem:[#allocation9 + $0x18] sm:$0xff] }
 0x2e8   : > { %2062 = vmatpush.msrb.mxu0 %v1870_v31  ;;  %v8427_v31 = vand.u32 127, %v1822_v0 }
 0x2ea   : > { %2063 = vmatpush.msrb.mxu0 %v1868_v4  ;;  %vm1824_vm2 = vcmp.lt.s32.totalorder %v8427_v31, 112  ;;  %vm3471_vm4 = vcmp.lt.s32.totalorder %v8427_v31, 96 }
 0x2ec   : > { %v8390_v8 = vpop.f32.mrf.mxu3  ;;  %2064 = vmatpush.msrb.mxu0 %v1866_v36 }
 0x2ee   : > { %2065 = vmatpush.msrb.mxu0 %v1864_v58 }
 0x2f0   : > { %2066 = vmatpush.msrb.mxu0 %v1862_v41 }
 0x2f2   : > { %2067 = vmatpush.msrb.mxu0 %v1860_v26 }
 0x2f4   : > { %v1792_v29 = vpop.f32.mrf.mxu3 }
 0x2f5   : > { %v8394_v56 = vmax.f32 %v1691_v2, %v1792_v29  ;;  %v1911_v2 = vld [vmem:[#allocation9 + $0x230] sm:$0xff]  ;;  %v1968_v29 = vld [vmem:[#allocation9 + $0x3f8] sm:$0xff] }
 0x2f6   : > { %2027 = vmatpush.msrb.mxu2 %v1911_v2  ;;  %2130 = vmatpush.msrb.mxu3 %v1968_v29  ;;  %v1890_v2 = vld [vmem:[#allocation9 + $0x188] sm:$0xff] }
 0x2f7   : > { %v7405_v21 = vpack.i.bf16 %v8394_v56, %v8392_v33  ;;  %v1842_v29 = vld [vmem:[#allocation9 + $0x8] sm:$0xff] }
 0x2f8   : > { %2028 = vmatpush.msrb.mxu2 %v1909_v63  ;;  %2131 = vmatpush.msrb.mxu3 %v1966_v34  ;;  %v1952_v63 = vld [vmem:[#allocation9 + $0x378] sm:$0xff] }
 0x2f9   : > { %7406 = vrot.lane.b32.xlu0 %v7405_v21, %s7946_s7  ;;  %v1924_v21 = vld [vmem:[#allocation9 + $0x298] sm:$0xff] }
 0x2fa   : > { %2029 = vmatpush.msrb.mxu2 %v1907_v9  ;;  %2132 = vmatpush.msrb.mxu3 %v1964_v35  ;;  %v1950_v9 = vld [vmem:[#allocation9 + $0x368] sm:$0xff] }
 0x2fc   : > { %v1795_v53 = vpop.f32.mrf.mxu3  ;;  %2030 = vmatpush.msrb.mxu2 %v1905_v16  ;;  %2133 = vmatpush.msrb.mxu3 %v1962_v14  ;;  %v1948_v16 = vld [vmem:[#allocation9 + $0x358] sm:$0xff] }
 0x2fd   : > { %v8409_v43 = vmax.f32 %v8390_v8, %v1795_v53  ;;  %v1879_v8 = vld [vmem:[#allocation9 + $0x130] sm:$0xff]  ;;  %v1918_v53 = vld [vmem:[#allocation9 + $0x268] sm:$0xff] }
 0x2fe   : > { %2004 = vmatpush.msra.mxu1 %v1879_v8  ;;  %2107 = vmatpush.msra.mxu2 %v1936_v19  ;;  %v1910_v8 = vld [vmem:[#allocation9 + $0x228] sm:$0xff] }
 0x2ff   : > { %v7415_v1 = vpack.i.bf16 %v8409_v43, %v8406_v22  ;;  %2134 = vmatpush.msrb.mxu3 %v1960_v32  ;;  %v1882_v19 = vld [vmem:[#allocation9 + $0x148] sm:$0xff] }
 0x300   : > { %2005 = vmatpush.msra.mxu1 %v1877_v15  ;;  %2108 = vmatpush.msra.mxu2 %v1934_v50  ;;  %v1908_v15 = vld [vmem:[#allocation9 + $0x218] sm:$0xff] }
 0x301   : > { %7416 = vrot.lane.b32.xlu1 %v7415_v1, %s7946_s7  ;;  %7411 = vrot.lane.b32.xlu0 %v7410_v48, %s7946_s7  ;;  %v1956_v48 = vld [vmem:[#allocation9 + $0x398] sm:$0xff]  ;;  %v1858_v1 = vld [vmem:[#allocation9 + $0x88] sm:$0xff] }
 0x302   : > { %2006 = vmatpush.msra.mxu1 %v1875_v10  ;;  %2109 = vmatpush.msra.mxu2 %v1932_v49  ;;  %v1848_v10 = vld [vmem:[#allocation9 + $0x38] sm:$0xff]  ;;  %v1878_v49 = vld [vmem:[#allocation9 + $0x128] sm:$0xff] }
 0x303   : > { %2135 = vmatpush.msrb.mxu3 %v1958_v7  ;;  %2068 = vmatpush.msrb.mxu0 %v1858_v1  ;;  %v1880_v50 = vld [vmem:[#allocation9 + $0x138] sm:$0xff] }
 0x304   : > { %2007 = vmatpush.msra.mxu1 %v1873_v57  ;;  %2110 = vmatpush.msra.mxu2 %v1930_v28  ;;  %v1846_v57 = vld [vmem:[#allocation9 + $0x28] sm:$0xff]  ;;  %v1940_v28 = vld [vmem:[#allocation9 + $0x318] sm:$0xff] }
 0x305   : > { %2136 = vmatpush.msrb.mxu3 %v1956_v48  ;;  %2069 = vmatpush.msrb.mxu0 %v1856_v59 }
 0x306   : > { %2084 = vmatpush.msrb.mxu1 %v1904_v24  ;;  %2111 = vmatpush.msra.mxu2 %v1928_v30  ;;  %v1876_v24 = vld [vmem:[#allocation9 + $0x118] sm:$0xff]  ;;  %v1874_v30 = vld [vmem:[#allocation9 + $0x108] sm:$0xff] }
 0x307   : > { %2137 = vmatpush.msrb.mxu3 %v1954_v51  ;;  %2070 = vmatpush.msrb.mxu0 %v1854_v54 }
 0x308   : > { %2085 = vmatpush.msrb.mxu1 %v1902_v44  ;;  %2112 = vmatpush.msra.mxu2 %v1926_v25  ;;  %v1938_v44 = vld [vmem:[#allocation9 + $0x308] sm:$0xff] }
 0x309   : > { %7421 = vrot.lane.b32.xlu1 %v7420_v47, %s7946_s7  ;;  %2138 = vmatpush.msrb.mxu3 %v1952_v63  ;;  %v1906_v47 = vld [vmem:[#allocation9 + $0x208] sm:$0xff]  ;;  %s10116_s7 = sld [smem:[#allocation51_spill]] }
 0x30a   : > { %2086 = vmatpush.msrb.mxu1 %v1900_v17  ;;  %2113 = vmatpush.msra.mxu2 %v1924_v21 }
 0x30b   : > { %2139 = vmatpush.msrb.mxu3 %v1950_v9  ;;  %2071 = vmatpush.msrb.mxu0 %v1852_v12 }
 0x30c   : > { %2087 = vmatpush.msrb.mxu1 %v1898_v37  ;;  %2114 = vmatpush.msra.mxu2 %v1922_v61 }
 0x30d   : > { %2140 = vmatpush.msrb.mxu3 %v1948_v16  ;;  %2072 = vmatpush.msrb.mxu0 %v1850_v18  ;;  %v2153_v16 = vld [vmem:[#allocation10] sm:$0xff] }
 0x30e   : > { %2088 = vmatpush.msrb.mxu1 %v1896_v11  ;;  %2115 = vmatpush.msra.mxu2 %v1920_v38 }
 0x30f   : > { %2141 = vmatpush.msrb.mxu3 %v1946_v60  ;;  %2073 = vmatpush.msrb.mxu0 %v1848_v10  ;;  %v2448_v60 = vld [vmem:[#allocation12 + $0x5c0] sm:$0xff]  ;;  %v2449_v10 = vld [vmem:[#allocation12 + $0x5c8] sm:$0xff] }
 0x310   : > { %2089 = vmatpush.msrb.mxu1 %v1894_v42  ;;  %2116 = vmatpush.msra.mxu2 %v1918_v53 }
 0x311   : > { %2142 = vmatpush.msrb.mxu3 %v1944_v27  ;;  %2074 = vmatpush.msrb.mxu0 %v1846_v57  ;;  %v2444_v27 = vld [vmem:[#allocation12 + $0x5a0] sm:$0xff]  ;;  %v2445_v57 = vld [vmem:[#allocation12 + $0x5a8] sm:$0xff] }
 0x312   : > { %2090 = vmatpush.msrb.mxu1 %v1892_v45  ;;  %2117 = vmatpush.msra.mxu2 %v1916_v46 }
 0x313   : > { %2143 = vmatpush.msrb.mxu3 %v1942_v20  ;;  %2075 = vmatpush.msrb.mxu0 %v1844_v23  ;;  %v2440_v23 = vld [vmem:[#allocation12 + $0x580] sm:$0xff] }
 0x314   : > { %2091 = vmatpush.msrb.mxu1 %v1890_v2  ;;  %2118 = vmatpush.msra.mxu2 %v1914_v3 }
 0x315   : > { %2144 = vmatpush.msrb.mxu3 %v1940_v28  ;;  %2076 = vmatpush.msrb.mxu0 %v1842_v29  ;;  %v8464_v29 = vld [vmem:[#allocation10 + $0x18] sm:$0xff] }
 0x316   : > { %2092 = vmatpush.msrb.mxu1 %v1888_v55  ;;  %2119 = vmatpush.msra.mxu2 %v1912_v62 }
 0x317   : > { %2145 = vmatpush.msrb.mxu3 %v1938_v44  ;;  %v2436_v44 = vld [vmem:[#allocation12 + $0x560] sm:$0xff] }
 0x318   : > { %2093 = vmatpush.msrb.mxu1 %v1886_v5  ;;  %2120 = vmatpush.msra.mxu2 %v1910_v8 }
 0x31a   : > { %2094 = vmatpush.msrb.mxu1 %v1884_v13  ;;  %2121 = vmatpush.msra.mxu2 %v1908_v15  ;;  %v2337_v15 = vld [vmem:[#allocation10 + $0x10] sm:$0xff] }
 0x31c   : > { %2095 = vmatpush.msrb.mxu1 %v1882_v19  ;;  %2122 = vmatpush.msra.mxu2 %v1906_v47  ;;  %v2452_v19 = vld [vmem:[#allocation12 + $0x5e0] sm:$0xff]  ;;  %v2453_v47 = vld [vmem:[#allocation12 + $0x5e8] sm:$0xff] }
 0x31e   : > { %2096 = vmatpush.msrb.mxu1 %v1880_v50 }
 0x320   : > { %2097 = vmatpush.msrb.mxu1 %v1878_v49 }
 0x322   : > { %2098 = vmatpush.msrb.mxu1 %v1876_v24  ;;  %v2441_v24 = vld [vmem:[#allocation12 + $0x588] sm:$0xff] }
 0x324   : > { %2099 = vmatpush.msrb.mxu1 %v1874_v30  ;;  %v8466_v30 = vld [vmem:[#allocation10 + $0x8] sm:$0xff] }
 0x36b   : > { %v7407_v25 = vpop.permute.xlu0 %7406 }
 0x36c   : > { %v7409_v34 = vunpack.i.h.bf16 %v7407_v25  ;;  %v7408_v4 = vunpack.i.l.bf16 %v7407_v25  ;;  %v2437_v25 = vld [vmem:[#allocation12 + $0x568] sm:$0xff] }
 0x36e   : > { %v1825_v17 = vsel %vm1824_vm2, %v7408_v4, %v7409_v34 }
 0x36f   : > { %v1835_v21 = vmax.f32 %v8392_v33, %v1825_v17  ;;  %v2432_v17 = vld [vmem:[#allocation12 + $0x540] sm:$0xff] }
 0x371   : > { %2031 = vmatmul.f32.vlgmr.msrb.gmra.mxu2 %v1835_v21 }
 0x373   : > { %v7417_v35 = vpop.permute.xlu1 %7416  ;;  %v7412_v36 = vpop.permute.xlu0 %7411 }
 0x374   : > { %v7419_v37 = vunpack.i.h.bf16 %v7417_v35  ;;  %v7418_v61 = vunpack.i.l.bf16 %v7417_v35  ;;  %v7414_v14 = vunpack.i.h.bf16 %v7412_v36  ;;  %v7413_v58 = vunpack.i.l.bf16 %v7412_v36 }
 0x376   : > { %v1827_v11 = vsel %vm1824_vm2, %v7414_v14, %v7408_v4  ;;  %v1829_v38 = vsel %vm1824_vm2, %v7413_v58, %v7414_v14  ;;  %v1831_v32 = vsel %vm1824_vm2, %v7409_v34, %v7413_v58  ;;  %v1826_v41 = vsel %vm1824_vm2, %v7418_v61, %v7419_v37  ;;  %v2428_v14 = vld [vmem:[#allocation12 + $0x520] sm:$0xff]  ;;  %v2429_v58 = vld [vmem:[#allocation12 + $0x528] sm:$0xff] }
 0x377   : > { %v1834_v33 = vmax.f32 %v8403_v40, %v1827_v11  ;;  %v1833_v42 = vmax.f32 %v8400_v39, %v1829_v38  ;;  %v1836_v53 = vmax.f32 %v8394_v56, %v1831_v32  ;;  %v1839_v7 = vmax.f32 %v8406_v22, %v1826_v41  ;;  %v2424_v38 = vld [vmem:[#allocation12 + $0x500] sm:$0xff]  ;;  %v2425_v32 = vld [vmem:[#allocation12 + $0x508] sm:$0xff] }
 0x378   : > { %v2516_v41 = vld [vmem:[#allocation12 + $0x7e0] sm:$0xff] }
 0x379   : > { %1985 = vmatmul.f32.vlgmr.msra.gmra.mxu0 %v1833_v42  ;;  %2008 = vmatmul.f32.vlgmr.msra.gmra.mxu1 %v1834_v33 }
 0x37a   : > { %2034 = vmatmul.f32.gmra.mxu2 %v1839_v7  ;;  %2054 = vmatmul.f32.vlgmr.msra.gmra.mxu3 %v1836_v53 }
 0x37b   : > { %v7422_v26 = vpop.permute.xlu1 %7421 }
 0x37c   : > { %v7424_v45 = vunpack.i.h.bf16 %v7422_v26  ;;  %v7423_v46 = vunpack.i.l.bf16 %v7422_v26  ;;  %v2513_v26 = vld [vmem:[#allocation12 + $0x7c8] sm:$0xff] }
 0x37e   : > { %v1830_v48 = vsel %vm1824_vm2, %v7423_v46, %v7424_v45  ;;  %v1828_v1 = vsel %vm1824_vm2, %v7424_v45, %v7418_v61  ;;  %v1832_v39 = vsel %vm1824_vm2, %v7419_v37, %v7423_v46  ;;  %v2416_v45 = vld [vmem:[#allocation12 + $0x4c0] sm:$0xff]  ;;  %v2417_v46 = vld [vmem:[#allocation12 + $0x4c8] sm:$0xff] }
 0x37f   : > { %v1837_v56 = vmax.f32 %v8418_v52, %v1830_v48  ;;  %v1838_v40 = vmax.f32 %v8421_v6, %v1828_v1  ;;  %v1840_v22 = vmax.f32 %v8409_v43, %v1832_v39  ;;  %v2508_v48 = vld [vmem:[#allocation12 + $0x7a0] sm:$0xff]  ;;  %v2509_v1 = vld [vmem:[#allocation12 + $0x7a8] sm:$0xff] }
 0x380   : > { %v2412_v39 = vld [vmem:[#allocation12 + $0x4a0] sm:$0xff] }
 0x381   : > { %1988 = vmatmul.f32.gmra.mxu0 %v1837_v56  ;;  %2011 = vmatmul.f32.gmra.mxu1 %v1838_v40 }
 0x382   : > { %2057 = vmatmul.f32.gmra.mxu3 %v1840_v22  ;;  %2123 = vmatmul.f32.vlgmr.msra.gmra.mxu2 %v1835_v21  ;;  %v2433_v21 = vld [vmem:[#allocation12 + $0x548] sm:$0xff] }
 0x389   : > { %2077 = vmatmul.f32.vlgmr.msrb.gmra.mxu0 %v1833_v42  ;;  %2100 = vmatmul.f32.vlgmr.msrb.gmra.mxu1 %v1834_v33  ;;  %v2517_v33 = vld [vmem:[#allocation12 + $0x7e8] sm:$0xff]  ;;  %v2420_v42 = vld [vmem:[#allocation12 + $0x4e0] sm:$0xff] }
 0x38a   : > { %2126 = vmatmul.f32.gmra.mxu2 %v1839_v7  ;;  %2146 = vmatmul.f32.vlgmr.msrb.gmra.mxu3 %v1836_v53  ;;  %v2421_v53 = vld [vmem:[#allocation12 + $0x4e8] sm:$0xff]  ;;  %v2512_v7 = vld [vmem:[#allocation12 + $0x7c0] sm:$0xff] }
 0x391   : > { %2080 = vmatmul.f32.gmra.mxu0 %v1837_v56  ;;  %2103 = vmatmul.f32.gmra.mxu1 %v1838_v40  ;;  %v2413_v56 = vld [vmem:[#allocation12 + $0x4a8] sm:$0xff]  ;;  %v2408_v40 = vld [vmem:[#allocation12 + $0x480] sm:$0xff] }
 0x392   : > { %2149 = vmatmul.f32.gmra.mxu3 %v1840_v22  ;;  %v2504_v22 = vld [vmem:[#allocation12 + $0x780] sm:$0xff] }
 0x3f4   : > { %v2032_v2 = vpop.f32.mrf.mxu2 }
 0x3f6   : > { %v1986_v3 = vpop.f32.mrf.mxu0  ;;  %v2009_v51 = vpop.f32.mrf.mxu1 }
 0x3f7   : > { %v2010_v43 = vadd.f32 %v2009_v51, %v1986_v3  ;;  %v2505_v3 = vld [vmem:[#allocation12 + $0x788] sm:$0xff]  ;;  %v2404_v51 = vld [vmem:[#allocation12 + $0x460] sm:$0xff] }
 0x3f9   : > { %v2033_v5 = vadd.f32 %v2032_v2, %v2010_v43  ;;  %v2409_v2 = vld [vmem:[#allocation12 + $0x488] sm:$0xff] }
 0x3fa   : > { %v2401_v43 = vld [vmem:[#allocation12 + $0x448] sm:$0xff] }
 0x3fd   : > { %v2055_v59 = vpop.f32.mrf.mxu3  ;;  %v2035_v6 = vpop.f32.mrf.mxu2 }
 0x3fe   : > { %v1989_v52 = vpop.f32.mrf.mxu0  ;;  %v2012_v55 = vpop.f32.mrf.mxu1  ;;  %v8456_v13 = vadd.f32 %v2055_v59, %v2033_v5  ;;  %v2500_v59 = vld [vmem:[#allocation12 + $0x760] sm:$0xff] }
 0x3ff   : > { %v2013_v62 = vadd.f32 %v2012_v55, %v1989_v52  ;;  %v2405_v52 = vld [vmem:[#allocation12 + $0x468] sm:$0xff]  ;;  %v2492_v5 = vld [vmem:[#allocation12 + $0x720] sm:$0xff] }
 0x400   : > { %v2501_v55 = vld [vmem:[#allocation12 + $0x768] sm:$0xff] }
 0x401   : > { %v2036_v63 = vadd.f32 %v2035_v6, %v2013_v62  ;;  %v2400_v6 = vld [vmem:[#allocation12 + $0x440] sm:$0xff] }
 0x402   : > { %v2496_v62 = vld [vmem:[#allocation12 + $0x740] sm:$0xff] }
 0x405   : > { %v2058_v54 = vpop.f32.mrf.mxu3  ;;  %v2124_v18 = vpop.f32.mrf.mxu2 }
 0x406   : > { %v8454_v8 = vadd.f32 %v2058_v54, %v2036_v63  ;;  %v2078_v9 = vpop.f32.mrf.mxu0  ;;  %v2101_v12 = vpop.f32.mrf.mxu1  ;;  %v2497_v63 = vld [vmem:[#allocation12 + $0x748] sm:$0xff]  ;;  %v2396_v54 = vld [vmem:[#allocation12 + $0x420] sm:$0xff] }
 0x407   : > { %v2102_v34 = vadd.f32 %v2101_v12, %v2078_v9  ;;  %v2397_v9 = vld [vmem:[#allocation12 + $0x428] sm:$0xff] }
 0x408   : > { %2176 = vmatpush.msra.mxu0 %v8454_v8  ;;  %2359 = vmatpush.msrb.mxu2 %v8454_v8  ;;  %v2493_v12 = vld [vmem:[#allocation12 + $0x728] sm:$0xff] }
 0x409   : > { %v2125_v37 = vadd.f32 %v2124_v18, %v2102_v34  ;;  %v2393_v18 = vld [vmem:[#allocation12 + $0x408] sm:$0xff] }
 0x40a   : > { %2177 = vmatpush.msra.mxu0 %v8456_v13  ;;  %2360 = vmatpush.msrb.mxu2 %v8456_v13  ;;  %v2473_v34 = vld [vmem:[#allocation12 + $0x688] sm:$0xff] }
 0x40b   : > { %6951 = vmatmul.msk.f32.vlgmr.msrb.gmra.mxu2 %vm2155_vm3, %v2337_v15  ;;  %6947 = vmatmul.msk.f32.vlgmr.msra.gmra.mxu0 %vm2155_vm3, %v2153_v16 }
 0x40c   : > { %2520 = vmatpush.msrb.mxu0 %v2452_v19  ;;  %2566 = vmatpush.msra.mxu2 %v2453_v47  ;;  %v2489_v19 = vld [vmem:[#allocation12 + $0x708] sm:$0xff]  ;;  %v2454_v47 = vld [vmem:[#allocation12 + $0x5f0] sm:$0xff] }
 0x40d   : > { %v2147_v50 = vpop.f32.mrf.mxu3  ;;  %v2127_v4 = vpop.f32.mrf.mxu2 }
 0x40e   : > { %v2081_v49 = vpop.f32.mrf.mxu0  ;;  %v2104_v20 = vpop.f32.mrf.mxu1  ;;  %2521 = vmatpush.msrb.mxu0 %v2448_v60  ;;  %2567 = vmatpush.msra.mxu2 %v2449_v10  ;;  %v8474_v11 = vadd.f32 %v2147_v50, %v2125_v37  ;;  %v2455_v60 = vld [vmem:[#allocation12 + $0x5f8] sm:$0xff]  ;;  %v2484_v10 = vld [vmem:[#allocation12 + $0x6e0] sm:$0xff]  ;;  %v2485_v50 = vld [vmem:[#allocation12 + $0x6e8] sm:$0xff] }
 0x40f   : > { %v2105_v28 = vadd.f32 %v2104_v20, %v2081_v49  ;;  %v2480_v49 = vld [vmem:[#allocation12 + $0x6c0] sm:$0xff]  ;;  %v2481_v20 = vld [vmem:[#allocation12 + $0x6c8] sm:$0xff]  ;;  %v2435_v37 = vld [vmem:[#allocation12 + $0x558] sm:$0xff] }
 0x410   : > { %2522 = vmatpush.msrb.mxu0 %v2444_v27  ;;  %2568 = vmatpush.msra.mxu2 %v2445_v57  ;;  %v2450_v27 = vld [vmem:[#allocation12 + $0x5d0] sm:$0xff]  ;;  %v2451_v57 = vld [vmem:[#allocation12 + $0x5d8] sm:$0xff] }
 0x411   : > { %v2128_v35 = vadd.f32 %v2127_v4, %v2105_v28  ;;  %v2476_v28 = vld [vmem:[#allocation12 + $0x6a0] sm:$0xff]  ;;  %v2438_v4 = vld [vmem:[#allocation12 + $0x570] sm:$0xff] }
 0x412   : > { %2523 = vmatpush.msrb.mxu0 %v2440_v23  ;;  %2569 = vmatpush.msra.mxu2 %v2441_v24  ;;  %v2446_v23 = vld [vmem:[#allocation12 + $0x5b0] sm:$0xff]  ;;  %v2447_v24 = vld [vmem:[#allocation12 + $0x5b8] sm:$0xff] }
 0x413   : > { %6952 = vmatmul.msk.f32.gmra.mxu2 %vm2155_vm3, %v8464_v29  ;;  %6948 = vmatmul.msk.f32.gmra.mxu0 %vm2155_vm3, %v8466_v30 }
 0x414   : > { %2524 = vmatpush.msrb.mxu0 %v2436_v44  ;;  %2570 = vmatpush.msra.mxu2 %v2437_v25  ;;  %v2443_v44 = vld [vmem:[#allocation12 + $0x598] sm:$0xff]  ;;  %v2472_v25 = vld [vmem:[#allocation12 + $0x680] sm:$0xff] }
 0x415   : > { %v2150_v36 = vpop.f32.mrf.mxu3 }
 0x416   : > { %v8472_v61 = vadd.f32 %v2150_v36, %v2128_v35  ;;  %2525 = vmatpush.msrb.mxu0 %v2432_v17  ;;  %2571 = vmatpush.msra.mxu2 %v2433_v21  ;;  %v2439_v17 = vld [vmem:[#allocation12 + $0x578] sm:$0xff]  ;;  %v2468_v21 = vld [vmem:[#allocation12 + $0x660] sm:$0xff]  ;;  %v2469_v35 = vld [vmem:[#allocation12 + $0x668] sm:$0xff] }
 0x417   : > { %v2434_v36 = vld [vmem:[#allocation12 + $0x550] sm:$0xff] }
 0x418   : > { %2199 = vmatpush.msra.mxu1 %v8472_v61  ;;  %2382 = vmatpush.msra.mxu3 %v8472_v61 }
 0x419   : > { %2526 = vmatpush.msrb.mxu0 %v2428_v14  ;;  %2572 = vmatpush.msra.mxu2 %v2429_v58  ;;  %v2464_v14 = vld [vmem:[#allocation12 + $0x640] sm:$0xff]  ;;  %v2465_v58 = vld [vmem:[#allocation12 + $0x648] sm:$0xff] }
 0x41a   : > { %2200 = vmatpush.msra.mxu1 %v8474_v11  ;;  %2383 = vmatpush.msra.mxu3 %v8474_v11 }
 0x41b   : > { %6953 = vmatmul.msk.f32.vlgmr.msra.gmra.mxu3 %vm2155_vm3, %v2337_v15  ;;  %6949 = vmatmul.msk.f32.vlgmr.msra.gmra.mxu1 %vm2155_vm3, %v2153_v16  ;;  %v2392_v15 = vld [vmem:[#allocation12 + $0x400] sm:$0xff] }
 0x41c   : > { %2527 = vmatpush.msrb.mxu0 %v2424_v38  ;;  %2573 = vmatpush.msra.mxu2 %v2425_v32  ;;  %v2488_v16 = vld [vmem:[#allocation12 + $0x700] sm:$0xff]  ;;  %v2430_v38 = vld [vmem:[#allocation12 + $0x530] sm:$0xff]  ;;  %v2431_v32 = vld [vmem:[#allocation12 + $0x538] sm:$0xff] }
 0x41d   : > { %2543 = vmatpush.msrb.mxu1 %v2516_v41  ;;  %2589 = vmatpush.msrb.mxu3 %v2517_v33  ;;  %v2460_v41 = vld [vmem:[#allocation12 + $0x620] sm:$0xff]  ;;  %v2461_v33 = vld [vmem:[#allocation12 + $0x628] sm:$0xff] }
 0x41e   : > { %2528 = vmatpush.msrb.mxu0 %v2420_v42  ;;  %2574 = vmatpush.msra.mxu2 %v2421_v53  ;;  %v2426_v42 = vld [vmem:[#allocation12 + $0x510] sm:$0xff]  ;;  %v2427_v53 = vld [vmem:[#allocation12 + $0x518] sm:$0xff] }
 0x41f   : > { %2544 = vmatpush.msrb.mxu1 %v2512_v7  ;;  %2590 = vmatpush.msrb.mxu3 %v2513_v26  ;;  %v2456_v7 = vld [vmem:[#allocation12 + $0x600] sm:$0xff]  ;;  %v2457_v26 = vld [vmem:[#allocation12 + $0x608] sm:$0xff] }
 0x420   : > { %2529 = vmatpush.msrb.mxu0 %v2416_v45  ;;  %2575 = vmatpush.msra.mxu2 %v2417_v46  ;;  %v2422_v45 = vld [vmem:[#allocation12 + $0x4f0] sm:$0xff] }
 0x421   : > { %2545 = vmatpush.msrb.mxu1 %v2508_v48  ;;  %2591 = vmatpush.msrb.mxu3 %v2509_v1  ;;  %v2518_v46 = vld [vmem:[#allocation12 + $0x7f0] sm:$0xff]  ;;  %v2423_v48 = vld [vmem:[#allocation12 + $0x4f8] sm:$0xff] }
 0x422   : > { %2530 = vmatpush.msrb.mxu0 %v2412_v39  ;;  %2576 = vmatpush.msra.mxu2 %v2413_v56  ;;  %v2519_v1 = vld [vmem:[#allocation12 + $0x7f8] sm:$0xff]  ;;  %v2418_v39 = vld [vmem:[#allocation12 + $0x4d0] sm:$0xff] }
 0x423   : > { %6954 = vmatmul.msk.f32.gmra.mxu3 %vm2155_vm3, %v8464_v29  ;;  %6950 = vmatmul.msk.f32.gmra.mxu1 %vm2155_vm3, %v8466_v30  ;;  %v2477_v29 = vld [vmem:[#allocation12 + $0x6a8] sm:$0xff]  ;;  %v2442_v30 = vld [vmem:[#allocation12 + $0x590] sm:$0xff] }
 0x424   : > { %2531 = vmatpush.msrb.mxu0 %v2408_v40  ;;  %2546 = vmatpush.msrb.mxu1 %v2504_v22  ;;  %v2514_v56 = vld [vmem:[#allocation12 + $0x7d0] sm:$0xff]  ;;  %v2419_v40 = vld [vmem:[#allocation12 + $0x4d8] sm:$0xff] }
 0x425   : > { %2577 = vmatpush.msra.mxu2 %v2409_v2  ;;  %2592 = vmatpush.msrb.mxu3 %v2505_v3  ;;  %v2515_v22 = vld [vmem:[#allocation12 + $0x7d8] sm:$0xff]  ;;  %v2414_v2 = vld [vmem:[#allocation12 + $0x4b0] sm:$0xff] }
 0x426   : > { %2532 = vmatpush.msrb.mxu0 %v2404_v51  ;;  %2547 = vmatpush.msrb.mxu1 %v2500_v59  ;;  %v2510_v3 = vld [vmem:[#allocation12 + $0x7b0] sm:$0xff]  ;;  %v2415_v51 = vld [vmem:[#allocation12 + $0x4b8] sm:$0xff] }
 0x427   : > { %2578 = vmatpush.msra.mxu2 %v2405_v52  ;;  %2593 = vmatpush.msrb.mxu3 %v2501_v55  ;;  %v2511_v59 = vld [vmem:[#allocation12 + $0x7b8] sm:$0xff]  ;;  %v2410_v52 = vld [vmem:[#allocation12 + $0x490] sm:$0xff] }
 0x428   : > { %2533 = vmatpush.msrb.mxu0 %v2400_v6  ;;  %2548 = vmatpush.msrb.mxu1 %v2496_v62  ;;  %v2506_v55 = vld [vmem:[#allocation12 + $0x790] sm:$0xff]  ;;  %v2411_v6 = vld [vmem:[#allocation12 + $0x498] sm:$0xff] }
 0x429   : > { %2579 = vmatpush.msra.mxu2 %v2401_v43  ;;  %2594 = vmatpush.msrb.mxu3 %v2497_v63  ;;  %v2507_v62 = vld [vmem:[#allocation12 + $0x798] sm:$0xff]  ;;  %v2406_v43 = vld [vmem:[#allocation12 + $0x470] sm:$0xff] }
 0x42a   : > { %2534 = vmatpush.msrb.mxu0 %v2396_v54  ;;  %2549 = vmatpush.msrb.mxu1 %v2492_v5  ;;  %v2502_v63 = vld [vmem:[#allocation12 + $0x770] sm:$0xff]  ;;  %v2407_v54 = vld [vmem:[#allocation12 + $0x478] sm:$0xff] }
 0x42b   : > { %2580 = vmatpush.msra.mxu2 %v2397_v9  ;;  %2595 = vmatpush.msrb.mxu3 %v2493_v12  ;;  %v2503_v5 = vld [vmem:[#allocation12 + $0x778] sm:$0xff]  ;;  %v2402_v9 = vld [vmem:[#allocation12 + $0x450] sm:$0xff] }
 0x42c   : > { %2535 = vmatpush.msrb.mxu0 %v2392_v15  ;;  %2550 = vmatpush.msrb.mxu1 %v2488_v16  ;;  %v2498_v12 = vld [vmem:[#allocation12 + $0x750] sm:$0xff]  ;;  %v2403_v15 = vld [vmem:[#allocation12 + $0x458] sm:$0xff] }
 0x42d   : > { %2581 = vmatpush.msra.mxu2 %v2393_v18  ;;  %2596 = vmatpush.msrb.mxu3 %v2489_v19  ;;  %v2499_v16 = vld [vmem:[#allocation12 + $0x758] sm:$0xff]  ;;  %v2398_v18 = vld [vmem:[#allocation12 + $0x430] sm:$0xff] }
 0x42e   : > { %2612 = vmatpush.msra.mxu0 %v2454_v47  ;;  %2551 = vmatpush.msrb.mxu1 %v2484_v10  ;;  %v2494_v19 = vld [vmem:[#allocation12 + $0x730] sm:$0xff]  ;;  %v2399_v47 = vld [vmem:[#allocation12 + $0x438] sm:$0xff] }
 0x42f   : > { %2658 = vmatpush.msrb.mxu2 %v2455_v60  ;;  %2597 = vmatpush.msrb.mxu3 %v2485_v50  ;;  %v2495_v60 = vld [vmem:[#allocation12 + $0x738] sm:$0xff]  ;;  %v2394_v10 = vld [vmem:[#allocation12 + $0x410] sm:$0xff] }
 0x430   : > { %2613 = vmatpush.msra.mxu0 %v2450_v27  ;;  %2552 = vmatpush.msrb.mxu1 %v2480_v49  ;;  %v2490_v50 = vld [vmem:[#allocation12 + $0x710] sm:$0xff]  ;;  %v2395_v27 = vld [vmem:[#allocation12 + $0x418] sm:$0xff] }
 0x431   : > { %2659 = vmatpush.msrb.mxu2 %v2451_v57  ;;  %2598 = vmatpush.msrb.mxu3 %v2481_v20  ;;  %v2491_v57 = vld [vmem:[#allocation12 + $0x718] sm:$0xff]  ;;  %v2486_v49 = vld [vmem:[#allocation12 + $0x6f0] sm:$0xff] }
 0x432   : > { %2614 = vmatpush.msra.mxu0 %v2446_v23  ;;  %2553 = vmatpush.msrb.mxu1 %v2476_v28  ;;  %v2487_v20 = vld [vmem:[#allocation12 + $0x6f8] sm:$0xff]  ;;  %v2482_v23 = vld [vmem:[#allocation12 + $0x6d0] sm:$0xff] }
 0x433   : > { %2660 = vmatpush.msrb.mxu2 %v2447_v24  ;;  %2599 = vmatpush.msrb.mxu3 %v2477_v29  ;;  %v2483_v24 = vld [vmem:[#allocation12 + $0x6d8] sm:$0xff]  ;;  %v2478_v28 = vld [vmem:[#allocation12 + $0x6b0] sm:$0xff] }
 0x434   : > { %2615 = vmatpush.msra.mxu0 %v2442_v30  ;;  %2554 = vmatpush.msrb.mxu1 %v2472_v25  ;;  %v2479_v29 = vld [vmem:[#allocation12 + $0x6b8] sm:$0xff]  ;;  %v2474_v30 = vld [vmem:[#allocation12 + $0x690] sm:$0xff] }
 0x435   : > { %2661 = vmatpush.msrb.mxu2 %v2443_v44  ;;  %2600 = vmatpush.msrb.mxu3 %v2473_v34  ;;  %v2475_v44 = vld [vmem:[#allocation12 + $0x698] sm:$0xff]  ;;  %v2470_v25 = vld [vmem:[#allocation12 + $0x670] sm:$0xff] }
 0x436   : > { %2616 = vmatpush.msra.mxu0 %v2438_v4  ;;  %2555 = vmatpush.msrb.mxu1 %v2468_v21  ;;  %v2471_v34 = vld [vmem:[#allocation12 + $0x678] sm:$0xff]  ;;  %v2466_v4 = vld [vmem:[#allocation12 + $0x650] sm:$0xff] }
 0x437   : > { %2662 = vmatpush.msrb.mxu2 %v2439_v17  ;;  %2601 = vmatpush.msrb.mxu3 %v2469_v35  ;;  %v2467_v17 = vld [vmem:[#allocation12 + $0x658] sm:$0xff]  ;;  %v2462_v21 = vld [vmem:[#allocation12 + $0x630] sm:$0xff] }
 0x438   : > { %2617 = vmatpush.msra.mxu0 %v2434_v36  ;;  %2556 = vmatpush.msrb.mxu1 %v2464_v14  ;;  %v2463_v35 = vld [vmem:[#allocation12 + $0x638] sm:$0xff]  ;;  %v2458_v36 = vld [vmem:[#allocation12 + $0x610] sm:$0xff]  ;;  %v2268_v14 = vld [vmem:[#allocation12 + $0x1e0] sm:$0xff] }
 0x439   : > { %2663 = vmatpush.msrb.mxu2 %v2435_v37  ;;  %2602 = vmatpush.msrb.mxu3 %v2465_v58  ;;  %v2459_v37 = vld [vmem:[#allocation12 + $0x618] sm:$0xff]  ;;  %v2269_v58 = vld [vmem:[#allocation12 + $0x1e8] sm:$0xff] }
 0x43a   : > { %2618 = vmatpush.msra.mxu0 %v2430_v38  ;;  %2557 = vmatpush.msrb.mxu1 %v2460_v41  ;;  %v2265_v41 = vld [vmem:[#allocation12 + $0x1c8] sm:$0xff] }
 0x43b   : > { %2664 = vmatpush.msrb.mxu2 %v2431_v32  ;;  %2603 = vmatpush.msrb.mxu3 %v2461_v33  ;;  %v2264_v32 = vld [vmem:[#allocation12 + $0x1c0] sm:$0xff] }
 0x43c   : > { %2619 = vmatpush.msra.mxu0 %v2426_v42  ;;  %2558 = vmatpush.msrb.mxu1 %v2456_v7  ;;  %v2260_v33 = vld [vmem:[#allocation12 + $0x1a0] sm:$0xff]  ;;  %v2261_v42 = vld [vmem:[#allocation12 + $0x1a8] sm:$0xff] }
 0x43d   : > { %2665 = vmatpush.msrb.mxu2 %v2427_v53  ;;  %2604 = vmatpush.msrb.mxu3 %v2457_v26  ;;  %v2256_v53 = vld [vmem:[#allocation12 + $0x180] sm:$0xff]  ;;  %v2257_v7 = vld [vmem:[#allocation12 + $0x188] sm:$0xff] }
 0x43e   : > { %2620 = vmatpush.msra.mxu0 %v2422_v45  ;;  %2635 = vmatpush.msra.mxu1 %v2518_v46  ;;  %v2252_v26 = vld [vmem:[#allocation12 + $0x160] sm:$0xff]  ;;  %v2253_v45 = vld [vmem:[#allocation12 + $0x168] sm:$0xff] }
 0x43f   : > { %2666 = vmatpush.msrb.mxu2 %v2423_v48  ;;  %2681 = vmatpush.msra.mxu3 %v2519_v1  ;;  %v2248_v48 = vld [vmem:[#allocation12 + $0x140] sm:$0xff]  ;;  %v2249_v1 = vld [vmem:[#allocation12 + $0x148] sm:$0xff] }
 0x440   : > { %2621 = vmatpush.msra.mxu0 %v2418_v39  ;;  %2636 = vmatpush.msra.mxu1 %v2514_v56  ;;  %v2244_v39 = vld [vmem:[#allocation12 + $0x120] sm:$0xff]  ;;  %v2245_v56 = vld [vmem:[#allocation12 + $0x128] sm:$0xff] }
 0x441   : > { %2667 = vmatpush.msrb.mxu2 %v2419_v40  ;;  %2682 = vmatpush.msra.mxu3 %v2515_v22  ;;  %v2240_v40 = vld [vmem:[#allocation12 + $0x100] sm:$0xff]  ;;  %v2241_v22 = vld [vmem:[#allocation12 + $0x108] sm:$0xff] }
 0x442   : > { %2622 = vmatpush.msra.mxu0 %v2414_v2  ;;  %2637 = vmatpush.msra.mxu1 %v2510_v3  ;;  %v2236_v3 = vld [vmem:[#allocation12 + $0xe0] sm:$0xff] }
 0x443   : > { %2668 = vmatpush.msrb.mxu2 %v2415_v51  ;;  %2683 = vmatpush.msra.mxu3 %v2511_v59  ;;  %v2332_v51 = vld [vmem:[#allocation12 + $0x3e0] sm:$0xff]  ;;  %v2237_v59 = vld [vmem:[#allocation12 + $0xe8] sm:$0xff] }
 0x444   : > { %2623 = vmatpush.msra.mxu0 %v2410_v52  ;;  %2638 = vmatpush.msra.mxu1 %v2506_v55  ;;  %v2333_v52 = vld [vmem:[#allocation12 + $0x3e8] sm:$0xff]  ;;  %v2232_v55 = vld [vmem:[#allocation12 + $0xc0] sm:$0xff] }
 0x445   : > { %2669 = vmatpush.msrb.mxu2 %v2411_v6  ;;  %2684 = vmatpush.msra.mxu3 %v2507_v62  ;;  %v2328_v6 = vld [vmem:[#allocation12 + $0x3c0] sm:$0xff]  ;;  %v2233_v62 = vld [vmem:[#allocation12 + $0xc8] sm:$0xff] }
 0x446   : > { %2624 = vmatpush.msra.mxu0 %v2406_v43  ;;  %2639 = vmatpush.msra.mxu1 %v2502_v63  ;;  %v2329_v43 = vld [vmem:[#allocation12 + $0x3c8] sm:$0xff]  ;;  %v2228_v63 = vld [vmem:[#allocation12 + $0xa0] sm:$0xff] }
 0x447   : > { %2670 = vmatpush.msrb.mxu2 %v2407_v54  ;;  %2685 = vmatpush.msra.mxu3 %v2503_v5  ;;  %v2324_v54 = vld [vmem:[#allocation12 + $0x3a0] sm:$0xff]  ;;  %v2229_v5 = vld [vmem:[#allocation12 + $0xa8] sm:$0xff] }
 0x448   : > { %2625 = vmatpush.msra.mxu0 %v2402_v9  ;;  %2640 = vmatpush.msra.mxu1 %v2498_v12  ;;  %v2325_v9 = vld [vmem:[#allocation12 + $0x3a8] sm:$0xff]  ;;  %v2224_v12 = vld [vmem:[#allocation12 + $0x80] sm:$0xff] }
 0x449   : > { %2671 = vmatpush.msrb.mxu2 %v2403_v15  ;;  %2686 = vmatpush.msra.mxu3 %v2499_v16  ;;  %v2320_v15 = vld [vmem:[#allocation12 + $0x380] sm:$0xff]  ;;  %v2225_v16 = vld [vmem:[#allocation12 + $0x88] sm:$0xff] }
 0x44a   : > { %2626 = vmatpush.msra.mxu0 %v2398_v18  ;;  %2641 = vmatpush.msra.mxu1 %v2494_v19  ;;  %v2321_v18 = vld [vmem:[#allocation12 + $0x388] sm:$0xff] }
 0x44b   : > { %2672 = vmatpush.msrb.mxu2 %v2399_v47  ;;  %2687 = vmatpush.msra.mxu3 %v2495_v60  ;;  %v2220_v47 = vld [vmem:[#allocation12 + $0x60] sm:$0xff] }
 0x44c   : > { %2627 = vmatpush.msra.mxu0 %v2394_v10  ;;  %2642 = vmatpush.msra.mxu1 %v2490_v50  ;;  %v2316_v60 = vld [vmem:[#allocation12 + $0x360] sm:$0xff]  ;;  %v2221_v10 = vld [vmem:[#allocation12 + $0x68] sm:$0xff] }
 0x44d   : > { %2673 = vmatpush.msrb.mxu2 %v2395_v27  ;;  %2688 = vmatpush.msra.mxu3 %v2491_v57  ;;  %v2317_v50 = vld [vmem:[#allocation12 + $0x368] sm:$0xff]  ;;  %v2216_v27 = vld [vmem:[#allocation12 + $0x40] sm:$0xff] }
 0x44e   : > { %2643 = vmatpush.msra.mxu1 %v2486_v49  ;;  %v2312_v57 = vld [vmem:[#allocation12 + $0x340] sm:$0xff]  ;;  %v2217_v49 = vld [vmem:[#allocation12 + $0x48] sm:$0xff] }
 0x44f   : > { %2689 = vmatpush.msra.mxu3 %v2487_v20  ;;  %v2313_v20 = vld [vmem:[#allocation12 + $0x348] sm:$0xff] }
 0x450   : > { %2644 = vmatpush.msra.mxu1 %v2482_v23  ;;  %v2212_v23 = vld [vmem:[#allocation12 + $0x20] sm:$0xff] }
 0x451   : > { %2690 = vmatpush.msra.mxu3 %v2483_v24  ;;  %v2308_v24 = vld [vmem:[#allocation12 + $0x320] sm:$0xff] }
 0x452   : > { %2645 = vmatpush.msra.mxu1 %v2478_v28  ;;  %v2213_v28 = vld [vmem:[#allocation12 + $0x28] sm:$0xff] }
 0x453   : > { %2691 = vmatpush.msra.mxu3 %v2479_v29  ;;  %v2309_v29 = vld [vmem:[#allocation12 + $0x328] sm:$0xff] }
 0x454   : > { %2646 = vmatpush.msra.mxu1 %v2474_v30  ;;  %v2208_v30 = vld [vmem:[#allocation12] sm:$0xff] }
 0x455   : > { %2692 = vmatpush.msra.mxu3 %v2475_v44  ;;  %v2304_v44 = vld [vmem:[#allocation12 + $0x300] sm:$0xff] }
 0x456   : > { %2647 = vmatpush.msra.mxu1 %v2470_v25  ;;  %v2209_v25 = vld [vmem:[#allocation12 + $0x8] sm:$0xff] }
 0x457   : > { %2693 = vmatpush.msra.mxu3 %v2471_v34  ;;  %v2305_v34 = vld [vmem:[#allocation12 + $0x308] sm:$0xff] }
 0x458   : > { %2648 = vmatpush.msra.mxu1 %v2466_v4  ;;  %v2270_v4 = vld [vmem:[#allocation12 + $0x1f0] sm:$0xff] }
 0x459   : > { %2694 = vmatpush.msra.mxu3 %v2467_v17  ;;  %v2271_v17 = vld [vmem:[#allocation12 + $0x1f8] sm:$0xff] }
 0x45a   : > { %2649 = vmatpush.msra.mxu1 %v2462_v21 }
 0x45b   : > { %2695 = vmatpush.msra.mxu3 %v2463_v35  ;;  %v2300_v35 = vld [vmem:[#allocation12 + $0x2e0] sm:$0xff] }
 0x45c   : > { %2650 = vmatpush.msra.mxu1 %v2458_v36  ;;  %v2301_v36 = vld [vmem:[#allocation12 + $0x2e8] sm:$0xff] }
 0x45d   : > { %2696 = vmatpush.msra.mxu3 %v2459_v37  ;;  %v2266_v37 = vld [vmem:[#allocation12 + $0x1d0] sm:$0xff] }
 0x488   : > { %v8494_v21 = vpop.f32.mrf.mxu0 }
 0x48e   : > { %v2362_v38 = vpop.f32.mrf.mxu2 }
 0x48f   : > { %2536 = vmatmul.f32.vlgmr.msrb.gmra.mxu0 %v2362_v38  ;;  %2582 = vmatmul.f32.vlgmr.msra.gmra.mxu2 %v2362_v38 }
 0x490   : > { %2704 = vmatpush.msrb.mxu0 %v2268_v14  ;;  %2750 = vmatpush.msra.mxu2 %v2269_v58  ;;  %v2267_v14 = vld [vmem:[#allocation12 + $0x1d8] sm:$0xff]  ;;  %v2296_v58 = vld [vmem:[#allocation12 + $0x2c0] sm:$0xff] }
 0x492   : > { %2705 = vmatpush.msrb.mxu0 %v2264_v32  ;;  %2751 = vmatpush.msra.mxu2 %v2265_v41  ;;  %v2262_v32 = vld [vmem:[#allocation12 + $0x1b0] sm:$0xff]  ;;  %v2263_v41 = vld [vmem:[#allocation12 + $0x1b8] sm:$0xff] }
 0x494   : > { %2706 = vmatpush.msrb.mxu0 %v2260_v33  ;;  %2752 = vmatpush.msra.mxu2 %v2261_v42  ;;  %v2292_v33 = vld [vmem:[#allocation12 + $0x2a0] sm:$0xff]  ;;  %v2293_v42 = vld [vmem:[#allocation12 + $0x2a8] sm:$0xff] }
 0x496   : > { %2707 = vmatpush.msrb.mxu0 %v2256_v53  ;;  %2753 = vmatpush.msra.mxu2 %v2257_v7  ;;  %v2365_v46 = vpop.f32.mrf.mxu2  ;;  %v2258_v53 = vld [vmem:[#allocation12 + $0x190] sm:$0xff]  ;;  %v2259_v7 = vld [vmem:[#allocation12 + $0x198] sm:$0xff] }
 0x497   : > { %2539 = vmatmul.f32.gmra.mxu0 %v2365_v46  ;;  %2585 = vmatmul.f32.gmra.mxu2 %v2365_v46 }
 0x498   : > { %2708 = vmatpush.msrb.mxu0 %v2252_v26  ;;  %2754 = vmatpush.msra.mxu2 %v2253_v45  ;;  %v2288_v26 = vld [vmem:[#allocation12 + $0x280] sm:$0xff]  ;;  %v2289_v45 = vld [vmem:[#allocation12 + $0x288] sm:$0xff] }
 0x49a   : > { %2709 = vmatpush.msrb.mxu0 %v2248_v48  ;;  %2755 = vmatpush.msra.mxu2 %v2249_v1  ;;  %v2255_v48 = vld [vmem:[#allocation12 + $0x178] sm:$0xff]  ;;  %v8500_v1 = vpop.f32.mrf.mxu0 }
 0x49c   : > { %2710 = vmatpush.msrb.mxu0 %v2244_v39  ;;  %2756 = vmatpush.msra.mxu2 %v2245_v56  ;;  %v2284_v39 = vld [vmem:[#allocation12 + $0x260] sm:$0xff]  ;;  %v2285_v56 = vld [vmem:[#allocation12 + $0x268] sm:$0xff] }
 0x49e   : > { %2711 = vmatpush.msrb.mxu0 %v2240_v40  ;;  %2757 = vmatpush.msra.mxu2 %v2241_v22  ;;  %v8486_v2 = vpop.f32.mrf.mxu3  ;;  %v2250_v40 = vld [vmem:[#allocation12 + $0x150] sm:$0xff]  ;;  %v2251_v22 = vld [vmem:[#allocation12 + $0x158] sm:$0xff] }
 0x49f   : > { %2559 = vmatmul.f32.vlgmr.msrb.gmra.mxu1 %v8486_v2  ;;  %2605 = vmatmul.f32.vlgmr.msrb.gmra.mxu3 %v8486_v2 }
 0x4a0   : > { %2628 = vmatmul.f32.vlgmr.msra.gmra.mxu0 %v2362_v38  ;;  %2674 = vmatmul.f32.vlgmr.msrb.gmra.mxu2 %v2362_v38  ;;  %v2297_v38 = vld [vmem:[#allocation12 + $0x2c8] sm:$0xff] }
 0x4a1   : > { %2712 = vmatpush.msrb.mxu0 %v2236_v3  ;;  %2727 = vmatpush.msrb.mxu1 %v2332_v51  ;;  %v2281_v3 = vld [vmem:[#allocation12 + $0x248] sm:$0xff]  ;;  %v2246_v51 = vld [vmem:[#allocation12 + $0x130] sm:$0xff] }
 0x4a2   : > { %2758 = vmatpush.msra.mxu2 %v2237_v59  ;;  %2773 = vmatpush.msrb.mxu3 %v2333_v52  ;;  %v2247_v59 = vld [vmem:[#allocation12 + $0x138] sm:$0xff]  ;;  %v2276_v52 = vld [vmem:[#allocation12 + $0x220] sm:$0xff] }
 0x4a3   : > { %2713 = vmatpush.msrb.mxu0 %v2232_v55  ;;  %2728 = vmatpush.msrb.mxu1 %v2328_v6  ;;  %v2277_v55 = vld [vmem:[#allocation12 + $0x228] sm:$0xff]  ;;  %v2242_v6 = vld [vmem:[#allocation12 + $0x110] sm:$0xff] }
 0x4a4   : > { %2759 = vmatpush.msra.mxu2 %v2233_v62  ;;  %2774 = vmatpush.msrb.mxu3 %v2329_v43  ;;  %v2243_v62 = vld [vmem:[#allocation12 + $0x118] sm:$0xff]  ;;  %v2272_v43 = vld [vmem:[#allocation12 + $0x200] sm:$0xff] }
 0x4a5   : > { %2714 = vmatpush.msrb.mxu0 %v2228_v63  ;;  %2729 = vmatpush.msrb.mxu1 %v2324_v54  ;;  %v2273_v63 = vld [vmem:[#allocation12 + $0x208] sm:$0xff]  ;;  %v2238_v54 = vld [vmem:[#allocation12 + $0xf0] sm:$0xff] }
 0x4a6   : > { %2760 = vmatpush.msra.mxu2 %v2229_v5  ;;  %2775 = vmatpush.msrb.mxu3 %v2325_v9  ;;  %v8490_v19 = vpop.f32.mrf.mxu3  ;;  %v2334_v5 = vld [vmem:[#allocation12 + $0x3f0] sm:$0xff]  ;;  %v8506_v9 = vpop.f32.mrf.mxu1 }
 0x4a7   : > { %2715 = vmatpush.msrb.mxu0 %v2224_v12  ;;  %2730 = vmatpush.msrb.mxu1 %v2320_v15  ;;  %v2239_v12 = vld [vmem:[#allocation12 + $0xf8] sm:$0xff] }
 0x4a8   : > { %2761 = vmatpush.msra.mxu2 %v2225_v16  ;;  %2776 = vmatpush.msrb.mxu3 %v2321_v18  ;;  %v2335_v15 = vld [vmem:[#allocation12 + $0x3f8] sm:$0xff]  ;;  %v2234_v16 = vld [vmem:[#allocation12 + $0xd0] sm:$0xff] }
 0x4a9   : > { %2562 = vmatmul.f32.gmra.mxu1 %v8490_v19  ;;  %2608 = vmatmul.f32.gmra.mxu3 %v8490_v19  ;;  %v2330_v18 = vld [vmem:[#allocation12 + $0x3d0] sm:$0xff] }
 0x4aa   : > { %2631 = vmatmul.f32.gmra.mxu0 %v2365_v46  ;;  %2677 = vmatmul.f32.gmra.mxu2 %v2365_v46  ;;  %v2254_v46 = vld [vmem:[#allocation12 + $0x170] sm:$0xff] }
 0x4ab   : > { %2716 = vmatpush.msrb.mxu0 %v2220_v47  ;;  %2731 = vmatpush.msrb.mxu1 %v2316_v60  ;;  %v2331_v47 = vld [vmem:[#allocation12 + $0x3d8] sm:$0xff]  ;;  %v2230_v60 = vld [vmem:[#allocation12 + $0xb0] sm:$0xff] }
 0x4ac   : > { %2762 = vmatpush.msra.mxu2 %v2221_v10  ;;  %2777 = vmatpush.msrb.mxu3 %v2317_v50  ;;  %v2326_v10 = vld [vmem:[#allocation12 + $0x3b0] sm:$0xff]  ;;  %v2231_v50 = vld [vmem:[#allocation12 + $0xb8] sm:$0xff] }
 0x4ad   : > { %2717 = vmatpush.msrb.mxu0 %v2216_v27  ;;  %2732 = vmatpush.msrb.mxu1 %v2312_v57  ;;  %v2327_v27 = vld [vmem:[#allocation12 + $0x3b8] sm:$0xff]  ;;  %v2226_v57 = vld [vmem:[#allocation12 + $0x90] sm:$0xff] }
 0x4ae   : > { %2763 = vmatpush.msra.mxu2 %v2217_v49  ;;  %2778 = vmatpush.msrb.mxu3 %v2313_v20  ;;  %v2322_v49 = vld [vmem:[#allocation12 + $0x390] sm:$0xff]  ;;  %v2227_v20 = vld [vmem:[#allocation12 + $0x98] sm:$0xff] }
 0x4af   : > { %2718 = vmatpush.msrb.mxu0 %v2212_v23  ;;  %2733 = vmatpush.msrb.mxu1 %v2308_v24  ;;  %v2323_v23 = vld [vmem:[#allocation12 + $0x398] sm:$0xff]  ;;  %v2222_v24 = vld [vmem:[#allocation12 + $0x70] sm:$0xff] }
 0x4b0   : > { %2764 = vmatpush.msra.mxu2 %v2213_v28  ;;  %2779 = vmatpush.msrb.mxu3 %v2309_v29  ;;  %v2318_v28 = vld [vmem:[#allocation12 + $0x370] sm:$0xff]  ;;  %v2223_v29 = vld [vmem:[#allocation12 + $0x78] sm:$0xff] }
 0x4b1   : > { %2719 = vmatpush.msrb.mxu0 %v2208_v30  ;;  %2734 = vmatpush.msrb.mxu1 %v2304_v44  ;;  %v2319_v30 = vld [vmem:[#allocation12 + $0x378] sm:$0xff]  ;;  %v8510_v44 = vpop.f32.mrf.mxu1 }
 0x4b2   : > { %2765 = vmatpush.msra.mxu2 %v2209_v25  ;;  %2780 = vmatpush.msrb.mxu3 %v2305_v34  ;;  %v2218_v25 = vld [vmem:[#allocation12 + $0x50] sm:$0xff] }
 0x4b3   : > { %2796 = vmatpush.msra.mxu0 %v2270_v4  ;;  %2651 = vmatmul.f32.vlgmr.msra.gmra.mxu1 %v8486_v2  ;;  %v2314_v34 = vld [vmem:[#allocation12 + $0x350] sm:$0xff]  ;;  %v2219_v4 = vld [vmem:[#allocation12 + $0x58] sm:$0xff] }
 0x4b4   : > { %2842 = vmatpush.msrb.mxu2 %v2271_v17  ;;  %2697 = vmatmul.f32.vlgmr.msra.gmra.mxu3 %v8486_v2  ;;  %v2280_v2 = vld [vmem:[#allocation12 + $0x240] sm:$0xff]  ;;  %v2315_v17 = vld [vmem:[#allocation12 + $0x358] sm:$0xff] }
 0x4b5   : > { %2720 = vmatmul.f32.vlgmr.msrb.gmra.mxu0 %v8494_v21  ;;  %2735 = vmatpush.msrb.mxu1 %v2300_v35  ;;  %v2214_v35 = vld [vmem:[#allocation12 + $0x30] sm:$0xff] }
 0x4b6   : > { %2766 = vmatmul.f32.vlgmr.msra.gmra.mxu2 %v8494_v21  ;;  %2781 = vmatpush.msrb.mxu3 %v2301_v36  ;;  %v2310_v36 = vld [vmem:[#allocation12 + $0x330] sm:$0xff] }
 0x4b7   : > { %2797 = vmatpush.msra.mxu0 %v2266_v37  ;;  %2843 = vmatpush.msrb.mxu2 %v2267_v14  ;;  %v2215_v37 = vld [vmem:[#allocation12 + $0x38] sm:$0xff] }
 0x4b8   : > { %2736 = vmatpush.msrb.mxu1 %v2296_v58  ;;  %2782 = vmatpush.msrb.mxu3 %v2297_v38  ;;  %v2311_v14 = vld [vmem:[#allocation12 + $0x338] sm:$0xff]  ;;  %v2210_v58 = vld [vmem:[#allocation12 + $0x10] sm:$0xff] }
 0x4b9   : > { %2798 = vmatpush.msra.mxu0 %v2262_v32  ;;  %2844 = vmatpush.msrb.mxu2 %v2263_v41  ;;  %v2306_v38 = vld [vmem:[#allocation12 + $0x310] sm:$0xff]  ;;  %v2211_v32 = vld [vmem:[#allocation12 + $0x18] sm:$0xff] }
 0x4ba   : > { %2737 = vmatpush.msrb.mxu1 %v2292_v33  ;;  %2783 = vmatpush.msrb.mxu3 %v2293_v42  ;;  %v2307_v41 = vld [vmem:[#allocation12 + $0x318] sm:$0xff]  ;;  %v2302_v33 = vld [vmem:[#allocation12 + $0x2f0] sm:$0xff] }
 0x4bb   : > { %2799 = vmatpush.msra.mxu0 %v2258_v53  ;;  %2845 = vmatpush.msrb.mxu2 %v2259_v7  ;;  %v2303_v42 = vld [vmem:[#allocation12 + $0x2f8] sm:$0xff]  ;;  %v2298_v53 = vld [vmem:[#allocation12 + $0x2d0] sm:$0xff] }
 0x4bc   : > { %2738 = vmatpush.msrb.mxu1 %v2288_v26  ;;  %2784 = vmatpush.msrb.mxu3 %v2289_v45  ;;  %v2299_v7 = vld [vmem:[#allocation12 + $0x2d8] sm:$0xff]  ;;  %v2294_v26 = vld [vmem:[#allocation12 + $0x2b0] sm:$0xff] }
 0x4bd   : > { %2800 = vmatpush.msra.mxu0 %v2254_v46  ;;  %2846 = vmatpush.msrb.mxu2 %v2255_v48  ;;  %v2295_v45 = vld [vmem:[#allocation12 + $0x2b8] sm:$0xff]  ;;  %v2290_v46 = vld [vmem:[#allocation12 + $0x290] sm:$0xff] }
 0x4be   : > { %2654 = vmatmul.f32.gmra.mxu1 %v8490_v19  ;;  %2700 = vmatmul.f32.gmra.mxu3 %v8490_v19  ;;  %v2235_v19 = vld [vmem:[#allocation12 + $0xd8] sm:$0xff] }
 0x4bf   : > { %2723 = vmatmul.f32.gmra.mxu0 %v8500_v1  ;;  %2739 = vmatpush.msrb.mxu1 %v2284_v39  ;;  %v2291_v48 = vld [vmem:[#allocation12 + $0x298] sm:$0xff]  ;;  %v2286_v39 = vld [vmem:[#allocation12 + $0x270] sm:$0xff] }
 0x4c0   : > { %2769 = vmatmul.f32.gmra.mxu2 %v8500_v1  ;;  %2785 = vmatpush.msrb.mxu3 %v2285_v56  ;;  %v2287_v56 = vld [vmem:[#allocation12 + $0x278] sm:$0xff] }
 0x4c1   : > { %2801 = vmatpush.msra.mxu0 %v2250_v40  ;;  %2847 = vmatpush.msrb.mxu2 %v2251_v22  ;;  %v2279_v40 = vld [vmem:[#allocation12 + $0x238] sm:$0xff]  ;;  %v2274_v22 = vld [vmem:[#allocation12 + $0x210] sm:$0xff] }
 0x4c2   : > { %2740 = vmatpush.msrb.mxu1 %v2280_v2  ;;  %2786 = vmatpush.msrb.mxu3 %v2281_v3  ;;  %v2275_v2 = vld [vmem:[#allocation12 + $0x218] sm:$0xff]  ;;  %v2889_v3 = vld [vmem:[#allocation10 + $0x20] sm:$0xff] }
 0x4c3   : > { %2802 = vmatpush.msra.mxu0 %v2246_v51  ;;  %2848 = vmatpush.msrb.mxu2 %v2247_v59  ;;  %v3004_v51 = vld [vmem:[#allocation12 + $0x9e0] sm:$0xff]  ;;  %v3005_v59 = vld [vmem:[#allocation12 + $0x9e8] sm:$0xff] }
 0x4c4   : > { %2741 = vmatpush.msrb.mxu1 %v2276_v52  ;;  %2787 = vmatpush.msrb.mxu3 %v2277_v55  ;;  %v3000_v52 = vld [vmem:[#allocation12 + $0x9c0] sm:$0xff]  ;;  %v3001_v55 = vld [vmem:[#allocation12 + $0x9c8] sm:$0xff] }
 0x4c5   : > { %2803 = vmatpush.msra.mxu0 %v2242_v6  ;;  %2849 = vmatpush.msrb.mxu2 %v2243_v62  ;;  %v2997_v6 = vld [vmem:[#allocation12 + $0x9a8] sm:$0xff] }
 0x4c6   : > { %2742 = vmatpush.msrb.mxu1 %v2272_v43  ;;  %2788 = vmatpush.msrb.mxu3 %v2273_v63  ;;  %v2993_v62 = vld [vmem:[#allocation12 + $0x988] sm:$0xff]  ;;  %v2988_v63 = vld [vmem:[#allocation12 + $0x960] sm:$0xff] }
 0x4c7   : > { %2804 = vmatpush.msra.mxu0 %v2238_v54  ;;  %2850 = vmatpush.msrb.mxu2 %v2239_v12  ;;  %v2989_v54 = vld [vmem:[#allocation12 + $0x968] sm:$0xff]  ;;  %v2980_v12 = vld [vmem:[#allocation12 + $0x920] sm:$0xff] }
 0x4c8   : > { %2819 = vmatpush.msra.mxu1 %v2334_v5  ;;  %2865 = vmatpush.msra.mxu3 %v2335_v15  ;;  %v2984_v5 = vld [vmem:[#allocation12 + $0x940] sm:$0xff]  ;;  %v2981_v15 = vld [vmem:[#allocation12 + $0x928] sm:$0xff] }
 0x4c9   : > { %2743 = vmatmul.f32.vlgmr.msrb.gmra.mxu1 %v8506_v9  ;;  %2789 = vmatmul.f32.vlgmr.msrb.gmra.mxu3 %v8506_v9 }
 0x4ca   : > { %2805 = vmatpush.msra.mxu0 %v2234_v16  ;;  %2820 = vmatpush.msra.mxu1 %v2330_v18  ;;  %v2976_v16 = vld [vmem:[#allocation12 + $0x900] sm:$0xff]  ;;  %v2977_v18 = vld [vmem:[#allocation12 + $0x908] sm:$0xff] }
 0x4cb   : > { %2851 = vmatpush.msrb.mxu2 %v2235_v19  ;;  %2866 = vmatpush.msra.mxu3 %v2331_v47  ;;  %v2972_v47 = vld [vmem:[#allocation12 + $0x8e0] sm:$0xff] }
 0x4cc   : > { %2806 = vmatpush.msra.mxu0 %v2230_v60  ;;  %2821 = vmatpush.msra.mxu1 %v2326_v10  ;;  %v3068_v60 = vld [vmem:[#allocation12 + $0xbe0] sm:$0xff]  ;;  %v2973_v10 = vld [vmem:[#allocation12 + $0x8e8] sm:$0xff] }
 0x4cd   : > { %2852 = vmatpush.msrb.mxu2 %v2231_v50  ;;  %2867 = vmatpush.msra.mxu3 %v2327_v27  ;;  %v3069_v50 = vld [vmem:[#allocation12 + $0xbe8] sm:$0xff]  ;;  %v2968_v27 = vld [vmem:[#allocation12 + $0x8c0] sm:$0xff] }
 0x4ce   : > { %2807 = vmatpush.msra.mxu0 %v2226_v57  ;;  %2822 = vmatpush.msra.mxu1 %v2322_v49  ;;  %v3064_v57 = vld [vmem:[#allocation12 + $0xbc0] sm:$0xff]  ;;  %v2969_v49 = vld [vmem:[#allocation12 + $0x8c8] sm:$0xff] }
 0x4cf   : > { %2853 = vmatpush.msrb.mxu2 %v2227_v20  ;;  %2868 = vmatpush.msra.mxu3 %v2323_v23  ;;  %v3065_v20 = vld [vmem:[#allocation12 + $0xbc8] sm:$0xff]  ;;  %v2964_v23 = vld [vmem:[#allocation12 + $0x8a0] sm:$0xff] }
 0x4d0   : > { %2808 = vmatpush.msra.mxu0 %v2222_v24  ;;  %2823 = vmatpush.msra.mxu1 %v2318_v28  ;;  %v3060_v24 = vld [vmem:[#allocation12 + $0xba0] sm:$0xff]  ;;  %v2965_v28 = vld [vmem:[#allocation12 + $0x8a8] sm:$0xff] }
 0x4d1   : > { %2854 = vmatpush.msrb.mxu2 %v2223_v29  ;;  %2869 = vmatpush.msra.mxu3 %v2319_v30  ;;  %v3061_v29 = vld [vmem:[#allocation12 + $0xba8] sm:$0xff] }
 0x4d2   : > { %2746 = vmatmul.f32.gmra.mxu1 %v8510_v44  ;;  %2792 = vmatmul.f32.gmra.mxu3 %v8510_v44 }
 0x4d3   : > { %2809 = vmatpush.msra.mxu0 %v2218_v25  ;;  %2824 = vmatpush.msra.mxu1 %v2314_v34  ;;  %v3056_v25 = vld [vmem:[#allocation12 + $0xb80] sm:$0xff]  ;;  %v2961_v34 = vld [vmem:[#allocation12 + $0x888] sm:$0xff] }
 0x4d4   : > { %2855 = vmatpush.msrb.mxu2 %v2219_v4  ;;  %2870 = vmatpush.msra.mxu3 %v2315_v17  ;;  %v3057_v4 = vld [vmem:[#allocation12 + $0xb88] sm:$0xff] }
 0x4d5   : > { %2810 = vmatpush.msra.mxu0 %v2214_v35  ;;  %2825 = vmatpush.msra.mxu1 %v2310_v36  ;;  %v2956_v35 = vld [vmem:[#allocation12 + $0x860] sm:$0xff] }
 0x4d6   : > { %2856 = vmatpush.msrb.mxu2 %v2215_v37  ;;  %2871 = vmatpush.msra.mxu3 %v2311_v14  ;;  %v3052_v36 = vld [vmem:[#allocation12 + $0xb60] sm:$0xff]  ;;  %v2957_v37 = vld [vmem:[#allocation12 + $0x868] sm:$0xff] }
 0x4d7   : > { %2811 = vmatpush.msra.mxu0 %v2210_v58  ;;  %2826 = vmatpush.msra.mxu1 %v2306_v38  ;;  %v3053_v14 = vld [vmem:[#allocation12 + $0xb68] sm:$0xff]  ;;  %v2952_v58 = vld [vmem:[#allocation12 + $0x840] sm:$0xff] }
 0x4d8   : > { %2857 = vmatpush.msrb.mxu2 %v2211_v32  ;;  %2872 = vmatpush.msra.mxu3 %v2307_v41  ;;  %v3048_v38 = vld [vmem:[#allocation12 + $0xb40] sm:$0xff]  ;;  %v2953_v32 = vld [vmem:[#allocation12 + $0x848] sm:$0xff] }
 0x4d9   : > { %2812 = vmatmul.f32.vlgmr.msra.gmra.mxu0 %v8494_v21  ;;  %2858 = vmatmul.f32.vlgmr.msrb.gmra.mxu2 %v8494_v21  ;;  %v2283_v21 = vld [vmem:[#allocation12 + $0x258] sm:$0xff]  ;;  %v3049_v41 = vld [vmem:[#allocation12 + $0xb48] sm:$0xff] }
 0x4da   : > { %2911 = vmatpush.msrb.mxu0 %v8454_v8  ;;  %2827 = vmatpush.msra.mxu1 %v2302_v33  ;;  %v2282_v8 = vld [vmem:[#allocation12 + $0x250] sm:$0xff]  ;;  %v2948_v33 = vld [vmem:[#allocation12 + $0x820] sm:$0xff] }
 0x4db   : > { %2873 = vmatpush.msra.mxu3 %v2303_v42  ;;  %3072 = vmatpush.msra.mxu2 %v3004_v51  ;;  %v3044_v42 = vld [vmem:[#allocation12 + $0xb20] sm:$0xff]  ;;  %v2998_v51 = vld [vmem:[#allocation12 + $0x9b0] sm:$0xff] }
 0x4dc   : > { %2912 = vmatpush.msrb.mxu0 %v8456_v13  ;;  %2828 = vmatpush.msra.mxu1 %v2298_v53  ;;  %v2278_v13 = vld [vmem:[#allocation12 + $0x230] sm:$0xff]  ;;  %v2949_v53 = vld [vmem:[#allocation12 + $0x828] sm:$0xff] }
 0x4dd   : > { %2874 = vmatpush.msra.mxu3 %v2299_v7  ;;  %3073 = vmatpush.msra.mxu2 %v3000_v52  ;;  %v3045_v7 = vld [vmem:[#allocation12 + $0xb28] sm:$0xff]  ;;  %v3028_v52 = vld [vmem:[#allocation12 + $0xaa0] sm:$0xff] }
 0x4de   : > { %2829 = vmatpush.msra.mxu1 %v2294_v26  ;;  %3118 = vmatpush.msra.mxu0 %v3005_v59  ;;  %v2999_v59 = vld [vmem:[#allocation12 + $0x9b8] sm:$0xff] }
 0x4df   : > { %2875 = vmatpush.msra.mxu3 %v2295_v45  ;;  %v2944_v45 = vld [vmem:[#allocation12 + $0x800] sm:$0xff] }
 0x4e0   : > { %2830 = vmatpush.msra.mxu1 %v2290_v46  ;;  %3119 = vmatpush.msra.mxu0 %v3001_v55  ;;  %v3040_v46 = vld [vmem:[#allocation12 + $0xb00] sm:$0xff]  ;;  %v3029_v55 = vld [vmem:[#allocation12 + $0xaa8] sm:$0xff] }
 0x4e1   : > { %2876 = vmatpush.msra.mxu3 %v2291_v48  ;;  %2815 = vmatmul.f32.gmra.mxu0 %v8500_v1  ;;  %v2945_v48 = vld [vmem:[#allocation12 + $0x808] sm:$0xff] }
 0x4e2   : > { %2861 = vmatmul.f32.gmra.mxu2 %v8500_v1  ;;  %2831 = vmatpush.msra.mxu1 %v2286_v39  ;;  %v2890_v1 = vld [vmem:[#allocation10 + $0x28] sm:$0xff]  ;;  %v3041_v39 = vld [vmem:[#allocation12 + $0xb08] sm:$0xff] }
 0x4e3   : > { %2877 = vmatpush.msra.mxu3 %v2287_v56  ;;  %3120 = vmatpush.msra.mxu0 %v2997_v6  ;;  %v3006_v56 = vld [vmem:[#allocation12 + $0x9f0] sm:$0xff]  ;;  %v2995_v6 = vld [vmem:[#allocation12 + $0x998] sm:$0xff] }
 0x4e4   : > { %2832 = vmatpush.msra.mxu1 %v2282_v8  ;;  %v3007_v8 = vld [vmem:[#allocation12 + $0x9f8] sm:$0xff] }
 0x4e5   : > { %2878 = vmatpush.msra.mxu3 %v2283_v21  ;;  %3121 = vmatpush.msra.mxu0 %v2993_v62  ;;  %v3036_v21 = vld [vmem:[#allocation12 + $0xae0] sm:$0xff] }
 0x4e6   : > { %2833 = vmatpush.msra.mxu1 %v2278_v13  ;;  %v3037_v13 = vld [vmem:[#allocation12 + $0xae8] sm:$0xff] }
 0x4e7   : > { %2879 = vmatpush.msra.mxu3 %v2279_v40  ;;  %3122 = vmatpush.msra.mxu0 %v2989_v54  ;;  %v3002_v40 = vld [vmem:[#allocation12 + $0x9d0] sm:$0xff] }
 0x4e8   : > { %2834 = vmatpush.msra.mxu1 %v2274_v22  ;;  %v2990_v54 = vld [vmem:[#allocation12 + $0x970] sm:$0xff] }
 0x4e9   : > { %2880 = vmatpush.msra.mxu3 %v2275_v2  ;;  %2835 = vmatmul.f32.vlgmr.msra.gmra.mxu1 %v8506_v9  ;;  %v3003_v2 = vld [vmem:[#allocation12 + $0x9d8] sm:$0xff] }
 0x4ea   : > { %2881 = vmatmul.f32.vlgmr.msra.gmra.mxu3 %v8506_v9  ;;  %6955 = vmatmul.msk.f32.vlgmr.msrb.gmra.mxu0 %vm2155_vm3, %v2889_v3  ;;  %v2985_v9 = vld [vmem:[#allocation12 + $0x948] sm:$0xff] }
 0x4eb   : > { %2934 = vmatpush.msrb.mxu1 %v8472_v61  ;;  %v2996_v61 = vld [vmem:[#allocation12 + $0x9a0] sm:$0xff]  ;;  %3123 = vmatpush.msra.mxu0 %v2985_v9 }
 0x4ec   : > { %3074 = vmatpush.msra.mxu2 %v2996_v61  ;;  %3095 = vmatpush.msrb.mxu3 %v3068_v60  ;;  %v2994_v61 = vld [vmem:[#allocation12 + $0x990] sm:$0xff]  ;;  %v3020_v9 = vld [vmem:[#allocation12 + $0xa60] sm:$0xff] }
 0x4ed   : > { %2935 = vmatpush.msrb.mxu1 %v8474_v11  ;;  %v2992_v11 = vld [vmem:[#allocation12 + $0x980] sm:$0xff]  ;;  %3124 = vmatpush.msra.mxu0 %v2981_v15  ;;  %v2986_v15 = vld [vmem:[#allocation12 + $0x950] sm:$0xff] }
 0x4ee   : > { %3075 = vmatpush.msra.mxu2 %v2992_v11  ;;  %3096 = vmatpush.msrb.mxu3 %v3064_v57  ;;  %v3024_v11 = vld [vmem:[#allocation12 + $0xa80] sm:$0xff]  ;;  %v3013_v57 = vld [vmem:[#allocation12 + $0xa28] sm:$0xff] }
 0x4ef   : > { %3125 = vmatpush.msra.mxu0 %v2977_v18  ;;  %3141 = vmatpush.msra.mxu1 %v3069_v50  ;;  %v3016_v18 = vld [vmem:[#allocation12 + $0xa40] sm:$0xff]  ;;  %v2983_v50 = vld [vmem:[#allocation12 + $0x938] sm:$0xff] }
 0x4f0   : > { %3076 = vmatpush.msra.mxu2 %v2988_v63  ;;  %3097 = vmatpush.msrb.mxu3 %v3060_v24  ;;  %v3025_v63 = vld [vmem:[#allocation12 + $0xa88] sm:$0xff] }
 0x4f1   : > { %2838 = vmatmul.f32.gmra.mxu1 %v8510_v44  ;;  %3126 = vmatpush.msra.mxu0 %v2973_v10  ;;  %v2982_v10 = vld [vmem:[#allocation12 + $0x930] sm:$0xff]  ;;  %v3009_v24 = vld [vmem:[#allocation12 + $0xa08] sm:$0xff] }
 0x4f2   : > { %2884 = vmatmul.f32.gmra.mxu3 %v8510_v44  ;;  %6956 = vmatmul.msk.f32.gmra.mxu0 %vm2155_vm3, %v2890_v1  ;;  %v2960_v44 = vld [vmem:[#allocation12 + $0x880] sm:$0xff] }
 0x4f3   : > { %3077 = vmatpush.msra.mxu2 %v2984_v5  ;;  %3127 = vmatpush.msra.mxu0 %v2969_v49  ;;  %v2991_v5 = vld [vmem:[#allocation12 + $0x978] sm:$0xff]  ;;  %v2978_v49 = vld [vmem:[#allocation12 + $0x910] sm:$0xff] }
 0x4f4   : > { %3142 = vmatpush.msra.mxu1 %v3065_v20  ;;  %3098 = vmatpush.msrb.mxu3 %v3056_v25  ;;  %v2979_v20 = vld [vmem:[#allocation12 + $0x918] sm:$0xff] }
 0x4f5   : > { %3078 = vmatpush.msra.mxu2 %v2980_v12  ;;  %3128 = vmatpush.msra.mxu0 %v2965_v28  ;;  %v3021_v12 = vld [vmem:[#allocation12 + $0xa68] sm:$0xff]  ;;  %v2974_v28 = vld [vmem:[#allocation12 + $0x8f0] sm:$0xff]  ;;  %v3071_v25 = vld [vmem:[#allocation12 + $0xbf8] sm:$0xff] }
 0x4f6   : > { %3143 = vmatpush.msra.mxu1 %v3061_v29  ;;  %3099 = vmatpush.msrb.mxu3 %v3052_v36  ;;  %v3070_v29 = vld [vmem:[#allocation12 + $0xbf0] sm:$0xff]  ;;  %v2971_v36 = vld [vmem:[#allocation12 + $0x8d8] sm:$0xff] }
 0x4f7   : > { %3079 = vmatpush.msra.mxu2 %v2976_v16  ;;  %3129 = vmatpush.msra.mxu0 %v2961_v34  ;;  %v2987_v16 = vld [vmem:[#allocation12 + $0x958] sm:$0xff] }
 0x4f8   : > { %3144 = vmatpush.msra.mxu1 %v3057_v4  ;;  %3100 = vmatpush.msrb.mxu3 %v3048_v38  ;;  %v2970_v4 = vld [vmem:[#allocation12 + $0x8d0] sm:$0xff]  ;;  %v2967_v38 = vld [vmem:[#allocation12 + $0x8b8] sm:$0xff] }
 0x4f9   : > { %6957 = vmatmul.msk.f32.vlgmr.msrb.gmra.mxu1 %vm2155_vm3, %v2889_v3  ;;  %3080 = vmatpush.msra.mxu2 %v2972_v47  ;;  %v3032_v3 = vld [vmem:[#allocation12 + $0xac0] sm:$0xff]  ;;  %v3017_v47 = vld [vmem:[#allocation12 + $0xa48] sm:$0xff] }
 0x4fa   : > { %3130 = vmatpush.msra.mxu0 %v2957_v37  ;;  %3145 = vmatpush.msra.mxu1 %v3053_v14  ;;  %v3067_v37 = vld [vmem:[#allocation12 + $0xbd8] sm:$0xff]  ;;  %v2966_v14 = vld [vmem:[#allocation12 + $0x8b0] sm:$0xff] }
 0x4fb   : > { %3081 = vmatpush.msra.mxu2 %v2968_v27  ;;  %3101 = vmatpush.msrb.mxu3 %v3044_v42  ;;  %v3012_v27 = vld [vmem:[#allocation12 + $0xa20] sm:$0xff]  ;;  %v3058_v42 = vld [vmem:[#allocation12 + $0xb90] sm:$0xff] }
 0x4fc   : > { %3131 = vmatpush.msra.mxu0 %v2953_v32  ;;  %3146 = vmatpush.msra.mxu1 %v3049_v41  ;;  %v3063_v41 = vld [vmem:[#allocation12 + $0xbb8] sm:$0xff] }
 0x4fd   : > { %3082 = vmatpush.msra.mxu2 %v2964_v23  ;;  %3102 = vmatpush.msrb.mxu3 %v3040_v46  ;;  %v3008_v23 = vld [vmem:[#allocation12 + $0xa00] sm:$0xff]  ;;  %v3054_v46 = vld [vmem:[#allocation12 + $0xb70] sm:$0xff] }
 0x4fe   : > { %3132 = vmatpush.msra.mxu0 %v2949_v53  ;;  %3147 = vmatpush.msra.mxu1 %v3045_v7  ;;  %v2963_v53 = vld [vmem:[#allocation12 + $0x898] sm:$0xff] }
 0x4ff   : > { %3083 = vmatpush.msra.mxu2 %v2960_v44  ;;  %3103 = vmatpush.msrb.mxu3 %v3036_v21  ;;  %v2975_v44 = vld [vmem:[#allocation12 + $0x8f8] sm:$0xff] }
 0x500   : > { %3133 = vmatpush.msra.mxu0 %v2945_v48  ;;  %3148 = vmatpush.msra.mxu1 %v3041_v39  ;;  %v3059_v7 = vld [vmem:[#allocation12 + $0xb98] sm:$0xff] }
 0x501   : > { %6958 = vmatmul.msk.f32.gmra.mxu1 %vm2155_vm3, %v2890_v1  ;;  %3084 = vmatpush.msra.mxu2 %v2956_v35  ;;  %v3033_v1 = vld [vmem:[#allocation12 + $0xac8] sm:$0xff]  ;;  %v3066_v35 = vld [vmem:[#allocation12 + $0xbd0] sm:$0xff]  ;;  %v2959_v48 = vld [vmem:[#allocation12 + $0x878] sm:$0xff] }
 0x502   : > { %3210 = vmatpush.msrb.mxu0 %v3007_v8  ;;  %3149 = vmatpush.msra.mxu1 %v3037_v13  ;;  %v3055_v39 = vld [vmem:[#allocation12 + $0xb78] sm:$0xff]  ;;  %v3050_v8 = vld [vmem:[#allocation12 + $0xb50] sm:$0xff] }
 0x503   : > { %3085 = vmatpush.msra.mxu2 %v2952_v58  ;;  %3104 = vmatpush.msrb.mxu3 %v3032_v3  ;;  %v3062_v58 = vld [vmem:[#allocation12 + $0xbb0] sm:$0xff]  ;;  %v2955_v21 = vld [vmem:[#allocation12 + $0x858] sm:$0xff] }
 0x504   : > { %3211 = vmatpush.msrb.mxu0 %v3003_v2  ;;  %3150 = vmatpush.msra.mxu1 %v3033_v1  ;;  %v3051_v13 = vld [vmem:[#allocation12 + $0xb58] sm:$0xff]  ;;  %v2950_v2 = vld [vmem:[#allocation12 + $0x830] sm:$0xff] }
 0x505   : > { %3086 = vmatpush.msra.mxu2 %v2948_v33  ;;  %3105 = vmatpush.msrb.mxu3 %v3028_v52  ;;  %v2962_v33 = vld [vmem:[#allocation12 + $0x890] sm:$0xff]  ;;  %v2951_v1 = vld [vmem:[#allocation12 + $0x838] sm:$0xff] }
 0x506   : > { %3212 = vmatpush.msrb.mxu0 %v2999_v59  ;;  %3151 = vmatpush.msra.mxu1 %v3029_v55  ;;  %v3046_v3 = vld [vmem:[#allocation12 + $0xb30] sm:$0xff]  ;;  %v3047_v59 = vld [vmem:[#allocation12 + $0xb38] sm:$0xff] }
 0x507   : > { %3087 = vmatpush.msra.mxu2 %v2944_v45  ;;  %3106 = vmatpush.msrb.mxu3 %v3024_v11  ;;  %v2958_v45 = vld [vmem:[#allocation12 + $0x870] sm:$0xff] }
 0x508   : > { %3213 = vmatpush.msrb.mxu0 %v2995_v6  ;;  %3152 = vmatpush.msra.mxu1 %v3025_v63  ;;  %v2946_v52 = vld [vmem:[#allocation12 + $0x810] sm:$0xff]  ;;  %v3043_v6 = vld [vmem:[#allocation12 + $0xb18] sm:$0xff] }
 0x509   : > { %3164 = vmatpush.msrb.mxu2 %v3006_v56  ;;  %3107 = vmatpush.msrb.mxu3 %v3020_v9  ;;  %v2954_v56 = vld [vmem:[#allocation12 + $0x850] sm:$0xff]  ;;  %v3039_v63 = vld [vmem:[#allocation12 + $0xaf8] sm:$0xff] }
 0x50a   : > { %3214 = vmatpush.msrb.mxu0 %v2991_v5  ;;  %3153 = vmatpush.msra.mxu1 %v3021_v12  ;;  %v3042_v55 = vld [vmem:[#allocation12 + $0xb10] sm:$0xff]  ;;  %v3035_v5 = vld [vmem:[#allocation12 + $0xad8] sm:$0xff] }
 0x50b   : > { %3165 = vmatpush.msrb.mxu2 %v3002_v40  ;;  %3108 = vmatpush.msrb.mxu3 %v3016_v18  ;;  %v3038_v11 = vld [vmem:[#allocation12 + $0xaf0] sm:$0xff]  ;;  %v3031_v12 = vld [vmem:[#allocation12 + $0xab8] sm:$0xff] }
 0x50c   : > { %v8530_v43 = vpop.f32.mrf.mxu0  ;;  %3215 = vmatpush.msrb.mxu0 %v2987_v16  ;;  %3154 = vmatpush.msra.mxu1 %v3017_v47  ;;  %v3030_v9 = vld [vmem:[#allocation12 + $0xab0] sm:$0xff]  ;;  %v3027_v47 = vld [vmem:[#allocation12 + $0xa98] sm:$0xff] }
 0x50d   : > { %3166 = vmatpush.msrb.mxu2 %v2998_v51  ;;  %3109 = vmatpush.msrb.mxu3 %v3012_v27  ;;  %v3026_v18 = vld [vmem:[#allocation12 + $0xa90] sm:$0xff] }
 0x50e   : > { %3216 = vmatpush.msrb.mxu0 %v2983_v50  ;;  %3155 = vmatpush.msra.mxu1 %v3013_v57  ;;  %v3023_v50 = vld [vmem:[#allocation12 + $0xa78] sm:$0xff]  ;;  %v3018_v27 = vld [vmem:[#allocation12 + $0xa50] sm:$0xff] }
 0x50f   : > { %3167 = vmatpush.msrb.mxu2 %v2994_v61  ;;  %3110 = vmatpush.msrb.mxu3 %v3008_v23  ;;  %v2947_v61 = vld [vmem:[#allocation12 + $0x818] sm:$0xff] }
 0x510   : > { %3217 = vmatpush.msrb.mxu0 %v2979_v20  ;;  %3156 = vmatpush.msra.mxu1 %v3009_v24  ;;  %v3019_v57 = vld [vmem:[#allocation12 + $0xa58] sm:$0xff]  ;;  %v3010_v24 = vld [vmem:[#allocation12 + $0xa10] sm:$0xff] }
 0x511   : > { %3168 = vmatpush.msrb.mxu2 %v2990_v54  ;;  %3187 = vmatpush.msra.mxu3 %v3070_v29  ;;  %v3034_v54 = vld [vmem:[#allocation12 + $0xad0] sm:$0xff]  ;;  %v3015_v20 = vld [vmem:[#allocation12 + $0xa38] sm:$0xff] }
 0x512   : > { %3218 = vmatpush.msrb.mxu0 %v2975_v44  ;;  %3233 = vmatpush.msrb.mxu1 %v3071_v25 }
 0x513   : > { %3169 = vmatpush.msrb.mxu2 %v2986_v15  ;;  %3188 = vmatpush.msra.mxu3 %v3066_v35 }
 0x514   : > { %v8532_v19 = vpop.f32.mrf.mxu0  ;;  %3219 = vmatpush.msrb.mxu0 %v2971_v36  ;;  %3234 = vmatpush.msrb.mxu1 %v3067_v37  ;;  %v2583_v36 = vpop.f32.mrf.mxu2 }
 0x515   : > { %3170 = vmatpush.msrb.mxu2 %v2982_v10  ;;  %3189 = vmatpush.msra.mxu3 %v3062_v58  ;;  %v3022_v10 = vld [vmem:[#allocation12 + $0xa70] sm:$0xff] }
 0x516   : > { %3220 = vmatpush.msrb.mxu0 %v2967_v38  ;;  %3235 = vmatpush.msrb.mxu1 %v3063_v41 }
 0x517   : > { %3171 = vmatpush.msrb.mxu2 %v2978_v49  ;;  %3190 = vmatpush.msra.mxu3 %v3058_v42  ;;  %v3014_v49 = vld [vmem:[#allocation12 + $0xa30] sm:$0xff] }
 0x518   : > { %3221 = vmatpush.msrb.mxu0 %v2963_v53  ;;  %3236 = vmatpush.msrb.mxu1 %v3059_v7 }
 0x519   : > { %3172 = vmatpush.msrb.mxu2 %v2974_v28  ;;  %3191 = vmatpush.msra.mxu3 %v3054_v46  ;;  %v3011_v28 = vld [vmem:[#allocation12 + $0xa18] sm:$0xff] }
 0x51a   : > { %3222 = vmatpush.msrb.mxu0 %v2959_v48  ;;  %3237 = vmatpush.msrb.mxu1 %v3055_v39 }
 0x51b   : > { %3173 = vmatpush.msrb.mxu2 %v2970_v4  ;;  %3192 = vmatpush.msra.mxu3 %v3050_v8 }
 0x51c   : > { %v8534_v30 = vpop.f32.mrf.mxu1  ;;  %3223 = vmatpush.msrb.mxu0 %v2955_v21  ;;  %3238 = vmatpush.msrb.mxu1 %v3051_v13 }
 0x51d   : > { %v8536_v17 = vpop.f32.mrf.mxu0  ;;  %3174 = vmatpush.msrb.mxu2 %v2966_v14  ;;  %3193 = vmatpush.msra.mxu3 %v3046_v3  ;;  %v2586_v14 = vpop.f32.mrf.mxu2 }
 0x51e   : > { %3224 = vmatpush.msrb.mxu0 %v2951_v1  ;;  %3239 = vmatpush.msrb.mxu1 %v3047_v59 }
 0x51f   : > { %3175 = vmatpush.msrb.mxu2 %v2962_v33  ;;  %3194 = vmatpush.msra.mxu3 %v3042_v55 }
 0x520   : > { %3225 = vmatpush.msrb.mxu0 %v2947_v61  ;;  %3240 = vmatpush.msrb.mxu1 %v3043_v6  ;;  %v8562_v6 = vld [vmem:[#allocation13] sm:$0xf] }
 0x521   : > { %3176 = vmatpush.msrb.mxu2 %v2958_v45  ;;  %3195 = vmatpush.msra.mxu3 %v3038_v11 }
 0x522   : > { %3241 = vmatpush.msrb.mxu1 %v3039_v63  ;;  %v2606_v37 = vpop.f32.mrf.mxu3 }
 0x523   : > { %3177 = vmatpush.msrb.mxu2 %v2954_v56  ;;  %3196 = vmatpush.msra.mxu3 %v3034_v54  ;;  %v2607_v3 = vadd.f32 %v2606_v37, %v2583_v36  ;;  %v2561_v54 = vadd.f32 %v8534_v30, %v8530_v43 }
 0x524   : > { %3242 = vmatpush.msrb.mxu1 %v3035_v5 }
 0x525   : > { %3178 = vmatpush.msrb.mxu2 %v2950_v2  ;;  %3197 = vmatpush.msra.mxu3 %v3030_v9  ;;  %v2675_v38 = vpop.f32.mrf.mxu2 }
 0x526   : > { %v8538_v26 = vpop.f32.mrf.mxu1  ;;  %3243 = vmatpush.msrb.mxu1 %v3031_v12 }
 0x527   : > { %v8540_v22 = vpop.f32.mrf.mxu0  ;;  %3179 = vmatpush.msrb.mxu2 %v2946_v52  ;;  %3198 = vmatpush.msra.mxu3 %v3026_v18  ;;  %v2564_v5 = vadd.f32 %v8538_v26, %v8532_v19 }
 0x528   : > { %3244 = vmatpush.msrb.mxu1 %v3027_v47 }
 0x529   : > { %3199 = vmatpush.msra.mxu3 %v3022_v10  ;;  %v3267_v10 = vperm.slane %v8562_v6, 1 }
 0x52a   : > { %3245 = vmatpush.msrb.mxu1 %v3023_v50 }
 0x52b   : > { %3200 = vmatpush.msra.mxu3 %v3018_v27 }
 0x52c   : > { %3246 = vmatpush.msrb.mxu1 %v3019_v57  ;;  %v2609_v58 = vpop.f32.mrf.mxu3 }
 0x52d   : > { %3201 = vmatpush.msra.mxu3 %v3014_v49  ;;  %v2678_v33 = vpop.f32.mrf.mxu2  ;;  %v2610_v1 = vadd.f32 %v2609_v58, %v2586_v14  ;;  %v3290_v14 = vld [vmem:[#allocation15] sm:$0xff] }
 0x52e   : > { %3247 = vmatpush.msrb.mxu1 %v3015_v20 }
 0x52f   : > { %3202 = vmatpush.msra.mxu3 %v3010_v24 }
 0x530   : > { %v8542_v62 = vpop.f32.mrf.mxu1  ;;  %3248 = vmatpush.msrb.mxu1 %v3011_v28 }
 0x532   : > { %v8544_v60 = vpop.f32.mrf.mxu0 }
 0x533   : > { %v2722_v27 = vadd.f32 %v8544_v60, %v2561_v54 }
 0x537   : > { %v2698_v41 = vpop.f32.mrf.mxu3 }
 0x538   : > { %v2699_v58 = vadd.f32 %v2698_v41, %v2675_v38  ;;  %v2653_v38 = vadd.f32 %v8542_v62, %v8536_v17 }
 0x539   : > { %v2767_v53 = vpop.f32.mrf.mxu2 }
 0x53a   : > { %v2768_v52 = vadd.f32 %v2767_v53, %v2607_v3 }
 0x53b   : > { %v8546_v34 = vpop.f32.mrf.mxu1 }
 0x53c   : > { %v8548_v32 = vpop.f32.mrf.mxu0 }
 0x53d   : > { %v2725_v20 = vadd.f32 %v8548_v32, %v2564_v5  ;;  %v3375_v32 = vld [vmem:[#allocation15 + $0x8] sm:$0xff] }
 0x541   : > { %v2701_v42 = vpop.f32.mrf.mxu3 }
 0x543   : > { %v2770_v45 = vpop.f32.mrf.mxu2 }
 0x544   : > { %v2771_v11 = vadd.f32 %v2770_v45, %v2610_v1 }
 0x546   : > { %v8550_v40 = vpop.f32.mrf.mxu1 }
 0x547   : > { %v2745_v24 = vadd.f32 %v8550_v40, %v2722_v27 }
 0x54c   : > { %v2790_v7 = vpop.f32.mrf.mxu3 }
 0x54d   : > { %v2791_v63 = vadd.f32 %v2790_v7, %v2768_v52  ;;  %v2702_v7 = vadd.f32 %v2701_v42, %v2678_v33  ;;  %v2656_v33 = vadd.f32 %v8546_v34, %v8540_v22 }
 0x54f   : > { %v8554_v15 = vpop.f32.mrf.mxu1 }
 0x550   : > { %v2748_v30 = vadd.f32 %v8554_v15, %v2725_v20  ;;  %v3590_v20 = vld [vmem:[#allocation16 + $0x368] sm:$0xff] }
 0x555   : > { %v2793_v46 = vpop.f32.mrf.mxu3 }
 0x556   : > { %v8552_v51 = vpop.f32.mrf.mxu0  ;;  %v2794_v12 = vadd.f32 %v2793_v46, %v2771_v11  ;;  %v3269_v11 = vperm.slane %v8562_v6, 3 }
 0x557   : > { %v2814_v42 = vadd.f32 %v8552_v51, %v2653_v38  ;;  %v3569_v38 = vld [vmem:[#allocation16 + $0x2c0] sm:$0xff] }
 0x55c   : > { %v2859_v48 = vpop.f32.mrf.mxu2 }
 0x55d   : > { %v2860_v45 = vadd.f32 %v2859_v48, %v2699_v58  ;;  %v3587_v58 = vld [vmem:[#allocation16 + $0x350] sm:$0xff] }
 0x55e   : > { %v8556_v16 = vpop.f32.mrf.mxu0 }
 0x55f   : > { %v2817_v62 = vadd.f32 %v8556_v16, %v2656_v33 }
 0x565   : > { %v2862_v56 = vpop.f32.mrf.mxu2 }
 0x566   : > { %v8558_v23 = vpop.f32.mrf.mxu1 }
 0x567   : > { %v2914_v29 = vpop.f32.mrf.mxu0 }
 0x568   : > { %3088 = vmatmul.f32.vlgmr.msra.gmra.mxu2 %v2914_v29  ;;  %3134 = vmatmul.f32.vlgmr.msra.gmra.mxu0 %v2914_v29 }
 0x56d   : > { %v2882_v39 = vpop.f32.mrf.mxu3 }
 0x56e   : > { %v8560_v44 = vpop.f32.mrf.mxu1  ;;  %v2883_v3 = vadd.f32 %v2882_v39, %v2860_v45  ;;  %v2837_v39 = vadd.f32 %v8558_v23, %v2814_v42  ;;  %v3603_v45 = vld [vmem:[#allocation16 + $0x3d0] sm:$0xff] }
 0x56f   : > { %v2917_v25 = vpop.f32.mrf.mxu0  ;;  %v3551_v42 = vld [vmem:[#allocation16 + $0x230] sm:$0xff] }
 0x570   : > { %3091 = vmatmul.f32.gmra.mxu2 %v2917_v25  ;;  %3137 = vmatmul.f32.gmra.mxu0 %v2917_v25 }
 0x575   : > { %v2885_v21 = vpop.f32.mrf.mxu3 }
 0x576   : > { %v2937_v4 = vpop.f32.mrf.mxu1 }
 0x577   : > { %3111 = vmatmul.f32.vlgmr.msrb.gmra.mxu3 %v2937_v4  ;;  %3157 = vmatmul.f32.vlgmr.msra.gmra.mxu1 %v2937_v4 }
 0x578   : > { %3180 = vmatmul.f32.vlgmr.msrb.gmra.mxu2 %v2914_v29  ;;  %3226 = vmatmul.f32.vlgmr.msrb.gmra.mxu0 %v2914_v29 }
 0x57e   : > { %v2940_v35 = vpop.f32.mrf.mxu1 }
 0x57f   : > { %3114 = vmatmul.f32.gmra.mxu3 %v2940_v35  ;;  %3160 = vmatmul.f32.gmra.mxu1 %v2940_v35 }
 0x580   : > { %3183 = vmatmul.f32.gmra.mxu2 %v2917_v25  ;;  %3229 = vmatmul.f32.gmra.mxu0 %v2917_v25 }
 0x587   : > { %3203 = vmatmul.f32.vlgmr.msra.gmra.mxu3 %v2937_v4  ;;  %3249 = vmatmul.f32.vlgmr.msrb.gmra.mxu1 %v2937_v4 }
 0x58f   : > { %3206 = vmatmul.f32.gmra.mxu3 %v2940_v35  ;;  %3252 = vmatmul.f32.gmra.mxu1 %v2940_v35  ;;  %v3266_v35 = vperm.slane %v8562_v6, 0 }
 0x5e5   : > { %v3135_v8 = vpop.f32.mrf.mxu0 }
 0x5eb   : > { %v3089_v13 = vpop.f32.mrf.mxu2 }
 0x5ed   : > { %v3138_v59 = vpop.f32.mrf.mxu0 }
 0x5f3   : > { %v3092_v50 = vpop.f32.mrf.mxu2 }
 0x5f4   : > { %v3158_v2 = vpop.f32.mrf.mxu1 }
 0x5f5   : > { %v3159_v55 = vadd.f32 %v3158_v2, %v3135_v8  ;;  %v3227_v19 = vpop.f32.mrf.mxu0  ;;  %v2863_v2 = vadd.f32 %v2862_v56, %v2702_v7  ;;  %v3586_v7 = vld [vmem:[#allocation16 + $0x348] sm:$0xff] }
 0x5f7   : > { %v3257_v18 = vadd.f32 %v3159_v55, %v2791_v63  ;;  %v2886_v52 = vadd.f32 %v2885_v21, %v2863_v2  ;;  %v2840_v63 = vadd.f32 %v8560_v44, %v2817_v62  ;;  %v3585_v2 = vld [vmem:[#allocation16 + $0x340] sm:$0xff]  ;;  %v3599_v62 = vld [vmem:[#allocation16 + $0x3b0] sm:$0xff] }
 0x5f9   : > { %v3275_v43 = vadd.f32 %v3267_v10, %v3257_v18 }
 0x5fa   : > { %v3112_v61 = vpop.f32.mrf.mxu3 }
 0x5fb   : > { %v3113_v57 = vadd.f32 %v3112_v61, %v3089_v13  ;;  %v3283_v60 = vmax.f32 %v3275_v43, 0.0  ;;  %v3181_v15 = vpop.f32.mrf.mxu2  ;;  %v3575_v43 = vld [vmem:[#allocation16 + $0x2f0] sm:$0xff] }
 0x5fc   : > { %v3161_v9 = vpop.f32.mrf.mxu1 }
 0x5fd   : > { %v3162_v47 = vadd.f32 %v3161_v9, %v3138_v59  ;;  %v3256_v29 = vadd.f32 %v3113_v57, %v2745_v24  ;;  %v3230_v41 = vpop.f32.mrf.mxu0  ;;  %v3560_v57 = vld [vmem:[#allocation16 + $0x278] sm:$0xff] }
 0x5fe   : > { %v3608_v24 = vld [vmem:[#allocation16 + $0x3f8] sm:$0xff] }
 0x5ff   : > { %v3261_v49 = vadd.f32 %v3162_v47, %v2794_v12  ;;  %v3274_v53 = vadd.f32 %v3266_v35, %v3256_v29  ;;  %v3268_v12 = vperm.slane %v8562_v6, 2  ;;  %v3592_v6 = vld [vmem:[#allocation16 + $0x378] sm:$0xff]  ;;  %v3574_v29 = vld [vmem:[#allocation16 + $0x2e8] sm:$0xff] }
 0x601   : > { %v3279_v28 = vadd.f32 %v3267_v10, %v3261_v49  ;;  %v3282_v1 = vmax.f32 %v3274_v53, 0.0  ;;  %v3576_v49 = vld [vmem:[#allocation16 + $0x2f8] sm:$0xff]  ;;  %v3555_v53 = vld [vmem:[#allocation16 + $0x250] sm:$0xff] }
 0x602   : > { %v3115_v26 = vpop.f32.mrf.mxu3 }
 0x603   : > { %v3287_v25 = vmax.f32 %v3279_v28, 0.0  ;;  %v3116_v4 = vadd.f32 %v3115_v26, %v3092_v50  ;;  %v3184_v54 = vpop.f32.mrf.mxu2  ;;  %v3591_v50 = vld [vmem:[#allocation16 + $0x370] sm:$0xff]  ;;  %v3558_v26 = vld [vmem:[#allocation16 + $0x268] sm:$0xff] }
 0x604   : > { %v3250_v36 = vpop.f32.mrf.mxu1  ;;  %v3559_v28 = vld [vmem:[#allocation16 + $0x270] sm:$0xff] }
 0x605   : > { %v3260_v37 = vadd.f32 %v3116_v4, %v2748_v30  ;;  %3328 = vmatpush.msrb.mxu3 %v3287_v25  ;;  %3413 = vmatpush.msra.mxu1 %v3287_v25  ;;  %v3251_v8 = vadd.f32 %v3250_v36, %v3227_v19  ;;  %v3607_v30 = vld [vmem:[#allocation16 + $0x3f0] sm:$0xff]  ;;  %v3589_v19 = vld [vmem:[#allocation16 + $0x360] sm:$0xff]  ;;  %v3606_v25 = vld [vmem:[#allocation16 + $0x3e8] sm:$0xff] }
 0x606   : > { %v3557_v4 = vld [vmem:[#allocation16 + $0x260] sm:$0xff]  ;;  %v3588_v36 = vld [vmem:[#allocation16 + $0x358] sm:$0xff] }
 0x607   : > { %v3278_v40 = vadd.f32 %v3266_v35, %v3260_v37  ;;  %3329 = vmatpush.msrb.mxu3 %v3283_v60  ;;  %3414 = vmatpush.msra.mxu1 %v3283_v60  ;;  %v3259_v55 = vadd.f32 %v3251_v8, %v2883_v3  ;;  %v3573_v35 = vld [vmem:[#allocation16 + $0x2e0] sm:$0xff]  ;;  %v3554_v8 = vld [vmem:[#allocation16 + $0x248] sm:$0xff] }
 0x608   : > { %6960 = vmatmul.msk.f32.vlgmr.msrb.gmra.mxu3 %vm2155_vm3, %v3290_v14  ;;  %6964 = vmatmul.msk.f32.vlgmr.msra.gmra.mxu1 %vm2155_vm3, %v3375_v32  ;;  %v3605_v37 = vld [vmem:[#allocation16 + $0x3e0] sm:$0xff]  ;;  %v3602_v3 = vld [vmem:[#allocation16 + $0x3c8] sm:$0xff] }
 0x609   : > { %v3286_v46 = vmax.f32 %v3278_v40, 0.0  ;;  %v3277_v21 = vadd.f32 %v3269_v11, %v3259_v55  ;;  %3641 = vmatpush.msrb.mxu1 %v3576_v49  ;;  %v3604_v40 = vld [vmem:[#allocation16 + $0x3d8] sm:$0xff] }
 0x60a   : > { %v3204_v13 = vpop.f32.mrf.mxu3  ;;  %v3568_v55 = vld [vmem:[#allocation16 + $0x2b8] sm:$0xff] }
 0x60b   : > { %3308 = vmatpush.msra.mxu2 %v3286_v46  ;;  %3393 = vmatpush.msra.mxu0 %v3286_v46  ;;  %v3205_v48 = vadd.f32 %v3204_v13, %v3181_v15  ;;  %v3285_v51 = vmax.f32 %v3277_v21, 0.0  ;;  %v3571_v15 = vld [vmem:[#allocation16 + $0x2d0] sm:$0xff]  ;;  %v3570_v13 = vld [vmem:[#allocation16 + $0x2c8] sm:$0xff] }
 0x60c   : > { %v3253_v59 = vpop.f32.mrf.mxu1  ;;  %3642 = vmatpush.msrb.mxu1 %v3575_v43  ;;  %v3566_v21 = vld [vmem:[#allocation16 + $0x2a8] sm:$0xff]  ;;  %v3595_v43 = vld [vmem:[#allocation16 + $0x390] sm:$0xff] }
 0x60d   : > { %v3254_v61 = vadd.f32 %v3253_v59, %v3230_v41  ;;  %3309 = vmatpush.msra.mxu2 %v3282_v1  ;;  %3394 = vmatpush.msra.mxu0 %v3282_v1  ;;  %v3258_v9 = vadd.f32 %v3205_v48, %v2837_v39  ;;  %v3553_v1 = vld [vmem:[#allocation16 + $0x240] sm:$0xff]  ;;  %v3584_v41 = vld [vmem:[#allocation16 + $0x338] sm:$0xff]  ;;  %v3567_v48 = vld [vmem:[#allocation16 + $0x2b0] sm:$0xff] }
 0x60e   : > { %6959 = vmatmul.msk.f32.vlgmr.msra.gmra.mxu2 %vm2155_vm3, %v3290_v14  ;;  %6963 = vmatmul.msk.f32.vlgmr.msra.gmra.mxu0 %vm2155_vm3, %v3375_v32  ;;  %v3601_v59 = vld [vmem:[#allocation16 + $0x3c0] sm:$0xff] }
 0x60f   : > { %v3263_v17 = vadd.f32 %v3254_v61, %v2886_v52  ;;  %v3276_v10 = vadd.f32 %v3268_v12, %v3258_v9  ;;  %3621 = vmatpush.msrb.mxu0 %v3560_v57  ;;  %3643 = vmatpush.msrb.mxu1 %v3574_v29  ;;  %v3552_v52 = vld [vmem:[#allocation16 + $0x238] sm:$0xff]  ;;  %v3583_v61 = vld [vmem:[#allocation16 + $0x330] sm:$0xff]  ;;  %v3598_v9 = vld [vmem:[#allocation16 + $0x3a8] sm:$0xff] }
 0x610   : > { %v3547_v57 = vld [vmem:[#allocation16 + $0x210] sm:$0xff]  ;;  %v3814_v29 = vld [vmem:[#allocation16 + $0x778] sm:$0xff] }
 0x611   : > { %v3281_v56 = vadd.f32 %v3269_v11, %v3263_v17  ;;  %v3284_v23 = vmax.f32 %v3276_v10, 0.0  ;;  %3622 = vmatpush.msrb.mxu0 %v3559_v28  ;;  %3644 = vmatpush.msrb.mxu1 %v3573_v35  ;;  %v3600_v11 = vld [vmem:[#allocation16 + $0x3b8] sm:$0xff]  ;;  %v3582_v17 = vld [vmem:[#allocation16 + $0x328] sm:$0xff]  ;;  %v3597_v10 = vld [vmem:[#allocation16 + $0x3a0] sm:$0xff] }
 0x612   : > { %v3207_v5 = vpop.f32.mrf.mxu3  ;;  %v3563_v28 = vld [vmem:[#allocation16 + $0x290] sm:$0xff]  ;;  %v3561_v35 = vld [vmem:[#allocation16 + $0x280] sm:$0xff] }
 0x613   : > { %v3289_v22 = vmax.f32 %v3281_v56, 0.0  ;;  %v3208_v34 = vadd.f32 %v3207_v5, %v3184_v54  ;;  %3623 = vmatpush.msrb.mxu0 %v3558_v26  ;;  %v3550_v56 = vld [vmem:[#allocation16 + $0x228] sm:$0xff]  ;;  %v3581_v5 = vld [vmem:[#allocation16 + $0x320] sm:$0xff] }
 0x614   : > { %v3562_v26 = vld [vmem:[#allocation16 + $0x288] sm:$0xff] }
 0x615   : > { %v3262_v18 = vadd.f32 %v3208_v34, %v2840_v63  ;;  %3368 = vmatpush.msra.mxu3 %v3289_v22  ;;  %3624 = vmatpush.msrb.mxu0 %v3557_v4  ;;  %v3813_v4 = vld [vmem:[#allocation16 + $0x770] sm:$0xff] }
 0x617   : > { %v3280_v47 = vadd.f32 %v3268_v12, %v3262_v18  ;;  %3369 = vmatpush.msra.mxu3 %v3285_v51  ;;  %v3580_v12 = vld [vmem:[#allocation16 + $0x318] sm:$0xff]  ;;  %v3565_v18 = vld [vmem:[#allocation16 + $0x2a0] sm:$0xff] }
 0x618   : > { %6962 = vmatmul.msk.f32.vlgmr.msra.gmra.mxu3 %vm2155_vm3, %v3290_v14 }
 0x619   : > { %v3288_v16 = vmax.f32 %v3280_v47, 0.0  ;;  %3453 = vmatpush.msrb.mxu3 %v3289_v22  ;;  %v3549_v22 = vld [vmem:[#allocation16 + $0x220] sm:$0xff] }
 0x61b   : > { %3454 = vmatpush.msrb.mxu3 %v3285_v51  ;;  %3348 = vmatpush.msrb.mxu2 %v3288_v16 }
 0x61d   : > { %3349 = vmatpush.msrb.mxu2 %v3284_v23  ;;  %3681 = vmatpush.msra.mxu3 %v3608_v24  ;;  %v3578_v24 = vld [vmem:[#allocation16 + $0x308] sm:$0xff] }
 0x61e   : > { %6961 = vmatmul.msk.f32.vlgmr.msrb.gmra.mxu2 %vm2155_vm3, %v3290_v14  ;;  %v3556_v14 = vld [vmem:[#allocation16 + $0x258] sm:$0xff] }
 0x61f   : > { %3433 = vmatpush.msra.mxu2 %v3288_v16  ;;  %3682 = vmatpush.msra.mxu3 %v3607_v30  ;;  %v3548_v16 = vld [vmem:[#allocation16 + $0x218] sm:$0xff]  ;;  %v3546_v30 = vld [vmem:[#allocation16 + $0x208] sm:$0xff] }
 0x620   : > { %6966 = vmatmul.msk.f32.vlgmr.msrb.gmra.mxu3 %vm2155_vm3, %v3375_v32  ;;  %3625 = vmatpush.msrb.mxu0 %v3556_v14  ;;  %v3798_v14 = vld [vmem:[#allocation16 + $0x6f8] sm:$0xff] }
 0x621   : > { %3434 = vmatpush.msra.mxu2 %v3284_v23  ;;  %3683 = vmatpush.msra.mxu3 %v3606_v25  ;;  %v3579_v23 = vld [vmem:[#allocation16 + $0x310] sm:$0xff]  ;;  %v3545_v25 = vld [vmem:[#allocation16 + $0x200] sm:$0xff] }
 0x622   : > { %3626 = vmatpush.msrb.mxu0 %v3555_v53  ;;  %v3797_v53 = vld [vmem:[#allocation16 + $0x6f0] sm:$0xff] }
 0x623   : > { %3661 = vmatpush.msrb.mxu2 %v3592_v6  ;;  %3684 = vmatpush.msra.mxu3 %v3605_v37  ;;  %v3564_v6 = vld [vmem:[#allocation16 + $0x298] sm:$0xff] }
 0x624   : > { %3627 = vmatpush.msrb.mxu0 %v3554_v8  ;;  %v3782_v37 = vld [vmem:[#allocation16 + $0x678] sm:$0xff]  ;;  %v3828_v8 = vld [vmem:[#allocation16 + $0x7e8] sm:$0xff] }
 0x625   : > { %3662 = vmatpush.msrb.mxu2 %v3591_v50  ;;  %3685 = vmatpush.msra.mxu3 %v3604_v40  ;;  %v3596_v50 = vld [vmem:[#allocation16 + $0x398] sm:$0xff]  ;;  %v3811_v40 = vld [vmem:[#allocation16 + $0x760] sm:$0xff] }
 0x626   : > { %6965 = vmatmul.msk.f32.vlgmr.msra.gmra.mxu2 %vm2155_vm3, %v3375_v32  ;;  %v3572_v32 = vld [vmem:[#allocation16 + $0x2d8] sm:$0xff]  ;;  %3628 = vmatpush.msrb.mxu0 %v3553_v1  ;;  %v3827_v1 = vld [vmem:[#allocation16 + $0x7e0] sm:$0xff] }
 0x627   : > { %3663 = vmatpush.msrb.mxu2 %v3590_v20  ;;  %3645 = vmatpush.msrb.mxu1 %v3572_v32  ;;  %v3830_v32 = vld [vmem:[#allocation16 + $0x7f8] sm:$0xff] }
 0x628   : > { %3686 = vmatpush.msra.mxu3 %v3603_v45  ;;  %3629 = vmatpush.msrb.mxu0 %v3552_v52  ;;  %v3810_v45 = vld [vmem:[#allocation16 + $0x758] sm:$0xff] }
 0x629   : > { %3664 = vmatpush.msrb.mxu2 %v3589_v19  ;;  %3646 = vmatpush.msrb.mxu1 %v3571_v15  ;;  %v3577_v19 = vld [vmem:[#allocation16 + $0x300] sm:$0xff]  ;;  %v3829_v15 = vld [vmem:[#allocation16 + $0x7f0] sm:$0xff]  ;;  %v3826_v52 = vld [vmem:[#allocation16 + $0x7d8] sm:$0xff] }
 0x62a   : > { %3687 = vmatpush.msra.mxu3 %v3602_v3  ;;  %3630 = vmatpush.msrb.mxu0 %v3551_v42  ;;  %v3795_v3 = vld [vmem:[#allocation16 + $0x6e0] sm:$0xff]  ;;  %v3776_v42 = vld [vmem:[#allocation16 + $0x648] sm:$0xff] }
 0x62b   : > { %3665 = vmatpush.msrb.mxu2 %v3588_v36  ;;  %3647 = vmatpush.msrb.mxu1 %v3570_v13  ;;  %v3593_v36 = vld [vmem:[#allocation16 + $0x380] sm:$0xff] }
 0x62c   : > { %3688 = vmatpush.msra.mxu3 %v3601_v59  ;;  %3631 = vmatpush.msrb.mxu0 %v3550_v56  ;;  %v3779_v13 = vld [vmem:[#allocation16 + $0x660] sm:$0xff]  ;;  %v3794_v59 = vld [vmem:[#allocation16 + $0x6d8] sm:$0xff]  ;;  %v3805_v56 = vld [vmem:[#allocation16 + $0x730] sm:$0xff] }
 0x62d   : > { %3666 = vmatpush.msrb.mxu2 %v3587_v58  ;;  %3648 = vmatpush.msrb.mxu1 %v3569_v38  ;;  %v3781_v58 = vld [vmem:[#allocation16 + $0x670] sm:$0xff]  ;;  %v3778_v38 = vld [vmem:[#allocation16 + $0x658] sm:$0xff] }
 0x62e   : > { %3689 = vmatpush.msra.mxu3 %v3600_v11  ;;  %3632 = vmatpush.msrb.mxu0 %v3549_v22  ;;  %v3793_v11 = vld [vmem:[#allocation16 + $0x6d0] sm:$0xff]  ;;  %v3803_v22 = vld [vmem:[#allocation16 + $0x720] sm:$0xff] }
 0x62f   : > { %3667 = vmatpush.msrb.mxu2 %v3586_v7  ;;  %3649 = vmatpush.msrb.mxu1 %v3568_v55  ;;  %v3780_v7 = vld [vmem:[#allocation16 + $0x668] sm:$0xff]  ;;  %v3777_v55 = vld [vmem:[#allocation16 + $0x650] sm:$0xff] }
 0x630   : > { %3690 = vmatpush.msra.mxu3 %v3599_v62  ;;  %3633 = vmatpush.msrb.mxu0 %v3548_v16  ;;  %v3824_v62 = vld [vmem:[#allocation16 + $0x7c8] sm:$0xff]  ;;  %v3801_v16 = vld [vmem:[#allocation16 + $0x710] sm:$0xff] }
 0x631   : > { %3668 = vmatpush.msrb.mxu2 %v3585_v2  ;;  %3650 = vmatpush.msrb.mxu1 %v3567_v48  ;;  %v3809_v2 = vld [vmem:[#allocation16 + $0x750] sm:$0xff]  ;;  %v3806_v48 = vld [vmem:[#allocation16 + $0x738] sm:$0xff] }
 0x632   : > { %3691 = vmatpush.msra.mxu3 %v3598_v9  ;;  %3634 = vmatpush.msrb.mxu0 %v3547_v57  ;;  %v3804_v9 = vld [vmem:[#allocation16 + $0x728] sm:$0xff] }
 0x633   : > { %3669 = vmatpush.msrb.mxu2 %v3584_v41  ;;  %3651 = vmatpush.msrb.mxu1 %v3566_v21  ;;  %v3808_v41 = vld [vmem:[#allocation16 + $0x748] sm:$0xff]  ;;  %v3791_v21 = vld [vmem:[#allocation16 + $0x6c0] sm:$0xff] }
 0x634   : > { %3692 = vmatpush.msra.mxu3 %v3597_v10  ;;  %3635 = vmatpush.msrb.mxu0 %v3546_v30  ;;  %v3789_v10 = vld [vmem:[#allocation16 + $0x6b0] sm:$0xff]  ;;  %v3800_v57 = vld [vmem:[#allocation16 + $0x708] sm:$0xff]  ;;  %v3799_v30 = vld [vmem:[#allocation16 + $0x700] sm:$0xff] }
 0x635   : > { %3670 = vmatpush.msrb.mxu2 %v3583_v61  ;;  %3652 = vmatpush.msrb.mxu1 %v3565_v18  ;;  %v3807_v61 = vld [vmem:[#allocation16 + $0x740] sm:$0xff]  ;;  %v3802_v18 = vld [vmem:[#allocation16 + $0x718] sm:$0xff] }
 0x636   : > { %3693 = vmatpush.msra.mxu3 %v3596_v50  ;;  %3636 = vmatpush.msrb.mxu0 %v3545_v25  ;;  %v3788_v50 = vld [vmem:[#allocation16 + $0x6a8] sm:$0xff]  ;;  %v3785_v25 = vld [vmem:[#allocation16 + $0x690] sm:$0xff] }
 0x637   : > { %3671 = vmatpush.msrb.mxu2 %v3582_v17  ;;  %3653 = vmatpush.msrb.mxu1 %v3564_v6  ;;  %v3792_v17 = vld [vmem:[#allocation16 + $0x6c8] sm:$0xff] }
 0x638   : > { %3694 = vmatpush.msra.mxu3 %v3595_v43  ;;  %3839 = vmatpush.msra.mxu0 %v3782_v37  ;;  %v3772_v6 = vld [vmem:[#allocation16 + $0x628] sm:$0xff]  ;;  %v3787_v43 = vld [vmem:[#allocation16 + $0x6a0] sm:$0xff] }
 0x639   : > { %3672 = vmatpush.msrb.mxu2 %v3581_v5  ;;  %3654 = vmatpush.msrb.mxu1 %v3563_v28  ;;  %v3823_v5 = vld [vmem:[#allocation16 + $0x7c0] sm:$0xff]  ;;  %v3816_v37 = vld [vmem:[#allocation16 + $0x788] sm:$0xff] }
 0x63a   : > { %3840 = vmatpush.msra.mxu0 %v3781_v58  ;;  %v3771_v28 = vld [vmem:[#allocation16 + $0x620] sm:$0xff] }
 0x63b   : > { %3673 = vmatpush.msrb.mxu2 %v3580_v12  ;;  %3655 = vmatpush.msrb.mxu1 %v3562_v26  ;;  %v3790_v12 = vld [vmem:[#allocation16 + $0x6b8] sm:$0xff] }
 0x63c   : > { %3841 = vmatpush.msra.mxu0 %v3780_v7  ;;  %v3770_v26 = vld [vmem:[#allocation16 + $0x618] sm:$0xff] }
 0x63d   : > { %3674 = vmatpush.msrb.mxu2 %v3579_v23  ;;  %3656 = vmatpush.msrb.mxu1 %v3561_v35  ;;  %v3821_v23 = vld [vmem:[#allocation16 + $0x7b0] sm:$0xff]  ;;  %v3768_v35 = vld [vmem:[#allocation16 + $0x608] sm:$0xff] }
 0x63e   : > { %3842 = vmatpush.msra.mxu0 %v3779_v13  ;;  %v4031_v13 = vld [vmem:[#allocation16 + $0xb70] sm:$0xff] }
 0x63f   : > { %3675 = vmatpush.msrb.mxu2 %v3578_v24  ;;  %3859 = vmatpush.msra.mxu1 %v3798_v14  ;;  %v3820_v24 = vld [vmem:[#allocation16 + $0x7a8] sm:$0xff]  ;;  %v3783_v14 = vld [vmem:[#allocation16 + $0x680] sm:$0xff] }
 0x640   : > { %3843 = vmatpush.msra.mxu0 %v3778_v38 }
 0x641   : > { %3676 = vmatpush.msrb.mxu2 %v3577_v19  ;;  %3860 = vmatpush.msra.mxu1 %v3797_v53  ;;  %v3819_v19 = vld [vmem:[#allocation16 + $0x7a0] sm:$0xff] }
 0x642   : > { %3844 = vmatpush.msra.mxu0 %v3777_v55 }
 0x643   : > { %3879 = vmatpush.msra.mxu2 %v3814_v29  ;;  %v3786_v29 = vld [vmem:[#allocation16 + $0x698] sm:$0xff] }
 0x644   : > { %3845 = vmatpush.msra.mxu0 %v3776_v42 }
 0x645   : > { %3880 = vmatpush.msra.mxu2 %v3813_v4  ;;  %v3817_v4 = vld [vmem:[#allocation16 + $0x790] sm:$0xff] }
 0x685   : > { %v3416_v47 = vpop.f32.mrf.mxu1 }
 0x68b   : > { %v8592_v44 = vpop.f32.mrf.mxu3  ;;  %v3396_v51 = vpop.f32.mrf.mxu0 }
 0x68c   : > { %v8607_v20 = vmax.f32 %v8592_v44, %v3416_v47  ;;  %v3594_v44 = vld [vmem:[#allocation16 + $0x388] sm:$0xff]  ;;  %v3773_v47 = vld [vmem:[#allocation16 + $0x630] sm:$0xff] }
 0x68d   : > { %3695 = vmatpush.msra.mxu3 %v3594_v44  ;;  %v3769_v44 = vld [vmem:[#allocation16 + $0x610] sm:$0xff] }
 0x68f   : > { %3696 = vmatpush.msra.mxu3 %v3593_v36  ;;  %v3784_v36 = vld [vmem:[#allocation16 + $0x688] sm:$0xff] }
 0x691   : > { %v8594_v27 = vpop.f32.mrf.mxu2  ;;  %3899 = vmatpush.msrb.mxu3 %v3830_v32  ;;  %v3815_v32 = vld [vmem:[#allocation16 + $0x780] sm:$0xff] }
 0x692   : > { %v8604_v49 = vmax.f32 %v8594_v27, %v3396_v51  ;;  %v3822_v51 = vld [vmem:[#allocation16 + $0x7b8] sm:$0xff] }
 0x693   : > { %3900 = vmatpush.msrb.mxu3 %v3829_v15 }
 0x694   : > { %v7430_v27 = vpack.i.bf16 %v8607_v20, %v8604_v49 }
 0x695   : > { %3901 = vmatpush.msrb.mxu3 %v3828_v8 }
 0x697   : > { %3902 = vmatpush.msrb.mxu3 %v3827_v1  ;;  %v4030_v1 = vld [vmem:[#allocation16 + $0xb68] sm:$0xff] }
 0x699   : > { %3903 = vmatpush.msrb.mxu3 %v3826_v52 }
 0x69b   : > { %v3371_v60 = vpop.f32.mrf.mxu3 }
 0x6a1   : > { %v3351_v46 = vpop.f32.mrf.mxu2 }
 0x6a3   : > { %v3456_v33 = vpop.f32.mrf.mxu3 }
 0x6a4   : > { %v8596_v63 = vmax.f32 %v3371_v60, %v3456_v33  ;;  %v3812_v60 = vld [vmem:[#allocation16 + $0x768] sm:$0xff]  ;;  %v3825_v33 = vld [vmem:[#allocation16 + $0x7d0] sm:$0xff] }
 0x6a5   : > { %3881 = vmatpush.msra.mxu2 %v3812_v60  ;;  %3904 = vmatpush.msrb.mxu3 %v3825_v33  ;;  %v3767_v60 = vld [vmem:[#allocation16 + $0x600] sm:$0xff] }
 0x6a7   : > { %3882 = vmatpush.msra.mxu2 %v3811_v40  ;;  %3905 = vmatpush.msrb.mxu3 %v3824_v62  ;;  %v4015_v62 = vld [vmem:[#allocation16 + $0xaf0] sm:$0xff] }
 0x6a9   : > { %v3436_v39 = vpop.f32.mrf.mxu2  ;;  %3883 = vmatpush.msra.mxu2 %v3810_v45  ;;  %3906 = vmatpush.msrb.mxu3 %v3823_v5  ;;  %v4014_v5 = vld [vmem:[#allocation16 + $0xae8] sm:$0xff] }
 0x6aa   : > { %v8598_v54 = vmax.f32 %v3351_v46, %v3436_v39  ;;  %v3796_v46 = vld [vmem:[#allocation16 + $0x6e8] sm:$0xff]  ;;  %v3775_v39 = vld [vmem:[#allocation16 + $0x640] sm:$0xff] }
 0x6ab   : > { %3861 = vmatpush.msra.mxu1 %v3796_v46  ;;  %3884 = vmatpush.msra.mxu2 %v3809_v2  ;;  %v4032_v46 = vld [vmem:[#allocation16 + $0xb78] sm:$0xff] }
 0x6ac   : > { %v7425_v34 = vpack.i.bf16 %v8596_v63, %v8598_v54  ;;  %3846 = vmatpush.msra.mxu0 %v3775_v39  ;;  %3907 = vmatpush.msrb.mxu3 %v3822_v51  ;;  %v4027_v39 = vld [vmem:[#allocation16 + $0xb50] sm:$0xff]  ;;  %v4045_v51 = vld [vmem:[#allocation16 + $0xbe0] sm:$0xff] }
 0x6ad   : > { %3862 = vmatpush.msra.mxu1 %v3795_v3  ;;  %3885 = vmatpush.msra.mxu2 %v3808_v41 }
 0x6ae   : > { %7426 = vrot.lane.b32.xlu2 %v7425_v34, %s7947_s0  ;;  %v3774_v34 = vld [vmem:[#allocation16 + $0x638] sm:$0xff]  ;;  %3908 = vmatpush.msrb.mxu3 %v3821_v23 }
 0x6af   : > { %3863 = vmatpush.msra.mxu1 %v3794_v59  ;;  %3886 = vmatpush.msra.mxu2 %v3807_v61  ;;  %v4029_v61 = vld [vmem:[#allocation16 + $0xb60] sm:$0xff] }
 0x6b0   : > { %3847 = vmatpush.msra.mxu0 %v3774_v34  ;;  %3909 = vmatpush.msrb.mxu3 %v3820_v24  ;;  %v3997_v34 = vld [vmem:[#allocation16 + $0xa60] sm:$0xff]  ;;  %v3995_v24 = vld [vmem:[#allocation16 + $0xa50] sm:$0xff] }
 0x6b1   : > { %3864 = vmatpush.msra.mxu1 %v3793_v11  ;;  %3887 = vmatpush.msra.mxu2 %v3806_v48  ;;  %v4000_v48 = vld [vmem:[#allocation16 + $0xa78] sm:$0xff] }
 0x6b2   : > { %3848 = vmatpush.msra.mxu0 %v3773_v47  ;;  %3910 = vmatpush.msrb.mxu3 %v3819_v19  ;;  %v3994_v19 = vld [vmem:[#allocation16 + $0xa48] sm:$0xff] }
 0x6b3   : > { %3865 = vmatpush.msra.mxu1 %v3792_v17  ;;  %3888 = vmatpush.msra.mxu2 %v3805_v56  ;;  %v4048_v17 = vld [vmem:[#allocation16 + $0xbf8] sm:$0xff]  ;;  %v4047_v56 = vld [vmem:[#allocation16 + $0xbf0] sm:$0xff] }
 0x6b4   : > { %3849 = vmatpush.msra.mxu0 %v3772_v6  ;;  %v4012_v6 = vld [vmem:[#allocation16 + $0xad8] sm:$0xff] }
 0x6b5   : > { %3866 = vmatpush.msra.mxu1 %v3791_v21  ;;  %3889 = vmatpush.msra.mxu2 %v3804_v9  ;;  %v3998_v21 = vld [vmem:[#allocation16 + $0xa68] sm:$0xff] }
 0x6b6   : > { %7431 = vrot.lane.b32.xlu2 %v7430_v27, %s7947_s0  ;;  %3850 = vmatpush.msra.mxu0 %v3771_v28  ;;  %v3818_v27 = vld [vmem:[#allocation16 + $0x798] sm:$0xff]  ;;  %v4026_v9 = vld [vmem:[#allocation16 + $0xb48] sm:$0xff]  ;;  %v4011_v28 = vld [vmem:[#allocation16 + $0xad0] sm:$0xff]  ;;  %s8862_s0 = scalar_lea.vmem %s10116_s7, %s7236_s3 }
 0x6b7   : > { %3890 = vmatpush.msra.mxu2 %v3803_v22  ;;  %3867 = vmatpush.msra.mxu1 %v3790_v12  ;;  %v4046_v22 = vld [vmem:[#allocation16 + $0xbe8] sm:$0xff]  ;;  %v4013_v12 = vld [vmem:[#allocation16 + $0xae0] sm:$0xff] }
 0x6b8   : > { %3851 = vmatpush.msra.mxu0 %v3770_v26  ;;  %3911 = vmatpush.msrb.mxu3 %v3818_v27  ;;  %v4010_v26 = vld [vmem:[#allocation16 + $0xac8] sm:$0xff] }
 0x6b9   : > { %3891 = vmatpush.msra.mxu2 %v3802_v18  ;;  %3868 = vmatpush.msra.mxu1 %v3789_v10  ;;  %v4025_v18 = vld [vmem:[#allocation16 + $0xb40] sm:$0xff]  ;;  %v4042_v27 = vld [vmem:[#allocation16 + $0xbc8] sm:$0xff] }
 0x6ba   : > { %3852 = vmatpush.msra.mxu0 %v3769_v44  ;;  %3912 = vmatpush.msrb.mxu3 %v3817_v4  ;;  %v3993_v44 = vld [vmem:[#allocation16 + $0xa40] sm:$0xff] }
 0x6bb   : > { %3892 = vmatpush.msra.mxu2 %v3801_v16  ;;  %3869 = vmatpush.msra.mxu1 %v3788_v50  ;;  %v3996_v16 = vld [vmem:[#allocation16 + $0xa58] sm:$0xff]  ;;  %v4021_v4 = vld [vmem:[#allocation16 + $0xb20] sm:$0xff] }
 0x6bc   : > { %3853 = vmatpush.msra.mxu0 %v3768_v35  ;;  %3913 = vmatpush.msrb.mxu3 %v3816_v37  ;;  %v4024_v50 = vld [vmem:[#allocation16 + $0xb38] sm:$0xff]  ;;  %v4041_v35 = vld [vmem:[#allocation16 + $0xbc0] sm:$0xff] }
 0x6bd   : > { %3893 = vmatpush.msra.mxu2 %v3800_v57  ;;  %3870 = vmatpush.msra.mxu1 %v3787_v43  ;;  %v4044_v57 = vld [vmem:[#allocation16 + $0xbd8] sm:$0xff]  ;;  %v4023_v43 = vld [vmem:[#allocation16 + $0xb30] sm:$0xff] }
 0x6be   : > { %3854 = vmatpush.msra.mxu0 %v3767_v60  ;;  %3914 = vmatpush.msrb.mxu3 %v3815_v32  ;;  %v4008_v37 = vld [vmem:[#allocation16 + $0xab8] sm:$0xff]  ;;  %v3991_v32 = vld [vmem:[#allocation16 + $0xa30] sm:$0xff] }
 0x6bf   : > { %3894 = vmatpush.msra.mxu2 %v3799_v30  ;;  %3871 = vmatpush.msra.mxu1 %v3786_v29  ;;  %v4043_v30 = vld [vmem:[#allocation16 + $0xbd0] sm:$0xff]  ;;  %v4022_v29 = vld [vmem:[#allocation16 + $0xb28] sm:$0xff]  ;;  %v4020_v60 = vld [vmem:[#allocation16 + $0xb18] sm:$0xff] }
 0x6c1   : > { %3872 = vmatpush.msra.mxu1 %v3785_v25  ;;  %v4009_v25 = vld [vmem:[#allocation16 + $0xac0] sm:$0xff] }
 0x6c3   : > { %3873 = vmatpush.msra.mxu1 %v3784_v36  ;;  %v3992_v36 = vld [vmem:[#allocation16 + $0xa38] sm:$0xff] }
 0x6c5   : > { %3874 = vmatpush.msra.mxu1 %v3783_v14  ;;  %v4040_v14 = vld [vmem:[#allocation16 + $0xbb8] sm:$0xff] }
 0x708   : > { %v7427_v58 = vpop.permute.xlu2 %7426 }
 0x709   : > { %v7429_v40 = vunpack.i.h.bf16 %v7427_v58  ;;  %v7428_v53 = vunpack.i.l.bf16 %v7427_v58  ;;  %v4007_v58 = vld [vmem:[#allocation16 + $0xab0] sm:$0xff] }
 0x70b   : > { %v3472_v15 = vsel %vm3471_vm4, %v7428_v53, %v7429_v40 }
 0x70c   : > { %v8616_v7 = vmax.f32 %v8598_v54, %v3472_v15  ;;  %v3990_v15 = vld [vmem:[#allocation16 + $0xa28] sm:$0xff] }
 0x70e   : > { %v3615_v45 = vrot.slane %v8616_v7, 1  ;;  %v3833_v31 = vrot.slane %v8616_v7, 3 }
 0x710   : > { %v7432_v8 = vpop.permute.xlu2 %7431  ;;  %3677 = vmatmul.f32.vlgmr.msrb.gmra.mxu2 %v3615_v45  ;;  %v4006_v45 = vld [vmem:[#allocation16 + $0xaa8] sm:$0xff] }
 0x711   : > { %v7434_v2 = vunpack.i.h.bf16 %v7432_v8  ;;  %v7433_v3 = vunpack.i.l.bf16 %v7432_v8  ;;  %4097 = vmatpush.msrb.mxu2 %v4032_v46  ;;  %v4018_v46 = vld [vmem:[#allocation16 + $0xb08] sm:$0xff] }
 0x712   : > { %v4038_v8 = vld [vmem:[#allocation16 + $0xba8] sm:$0xff] }
 0x713   : > { %v3473_v38 = vsel %vm3471_vm4, %v7434_v2, %v7428_v53  ;;  %v3474_v41 = vsel %vm3471_vm4, %v7433_v3, %v7434_v2  ;;  %v3475_v54 = vsel %vm3471_vm4, %v7429_v40, %v7433_v3  ;;  %4098 = vmatpush.msrb.mxu2 %v4031_v13  ;;  %v4019_v40 = vld [vmem:[#allocation16 + $0xb10] sm:$0xff]  ;;  %v3989_v13 = vld [vmem:[#allocation16 + $0xa20] sm:$0xff] }
 0x714   : > { %v8626_v59 = vmax.f32 %v8604_v49, %v3474_v41  ;;  %v8629_v52 = vmax.f32 %v8607_v20, %v3473_v38  ;;  %v8632_v55 = vmax.f32 %v8596_v63, %v3475_v54  ;;  %v4016_v49 = vld [vmem:[#allocation16 + $0xaf8] sm:$0xff]  ;;  %v3999_v63 = vld [vmem:[#allocation16 + $0xa70] sm:$0xff]  ;;  %v4005_v2 = vld [vmem:[#allocation16 + $0xaa0] sm:$0xff]  ;;  %v4051_v38 = vrot.slane %v8616_v7, 5 }
 0x715   : > { %4099 = vmatpush.msrb.mxu2 %v4030_v1  ;;  %v4028_v20 = vld [vmem:[#allocation16 + $0xb58] sm:$0xff]  ;;  %v4039_v53 = vld [vmem:[#allocation16 + $0xbb0] sm:$0xff]  ;;  %v4017_v3 = vld [vmem:[#allocation16 + $0xb00] sm:$0xff] }
 0x716   : > { %v3613_v11 = vrot.slane %v8626_v59, 1  ;;  %v3614_v33 = vrot.slane %v8629_v52, 1  ;;  %v3616_v42 = vrot.slane %v8632_v55, 1  ;;  %v3831_v47 = vrot.slane %v8626_v59, 3  ;;  %v4037_v1 = vld [vmem:[#allocation16 + $0xba0] sm:$0xff]  ;;  %v4250_v41 = vld [vmem:[#allocation16 + $0xf78] sm:$0xff] }
 0x717   : > { %4100 = vmatpush.msrb.mxu2 %v4029_v61  ;;  %v3832_v10 = vrot.slane %v8629_v52, 3  ;;  %v3834_v23 = vrot.slane %v8632_v55, 3  ;;  %v3988_v54 = vld [vmem:[#allocation16 + $0xa18] sm:$0xff] }
 0x718   : > { %3637 = vmatmul.f32.vlgmr.msrb.gmra.mxu0 %v3613_v11  ;;  %3657 = vmatmul.f32.vlgmr.msrb.gmra.mxu1 %v3614_v33  ;;  %v4004_v61 = vld [vmem:[#allocation16 + $0xa98] sm:$0xff]  ;;  %v4249_v33 = vld [vmem:[#allocation16 + $0xf70] sm:$0xff] }
 0x719   : > { %3697 = vmatmul.f32.vlgmr.msra.gmra.mxu3 %v3616_v42  ;;  %3895 = vmatmul.f32.vlgmr.msra.gmra.mxu2 %v3833_v31  ;;  %v4036_v11 = vld [vmem:[#allocation16 + $0xb98] sm:$0xff]  ;;  %v3987_v42 = vld [vmem:[#allocation16 + $0xa10] sm:$0xff] }
 0x71a   : > { %4057 = vmatpush.msrb.mxu0 %v4000_v48  ;;  %4077 = vmatpush.msrb.mxu1 %v4016_v49  ;;  %v4003_v31 = vld [vmem:[#allocation16 + $0xa90] sm:$0xff]  ;;  %v4248_v49 = vld [vmem:[#allocation16 + $0xf68] sm:$0xff] }
 0x71b   : > { %4101 = vmatpush.msrb.mxu2 %v4028_v20  ;;  %4117 = vmatpush.msra.mxu3 %v4048_v17  ;;  %v4035_v48 = vld [vmem:[#allocation16 + $0xb90] sm:$0xff]  ;;  %v3986_v20 = vld [vmem:[#allocation16 + $0xa08] sm:$0xff] }
 0x71c   : > { %4058 = vmatpush.msrb.mxu0 %v3999_v63  ;;  %4078 = vmatpush.msrb.mxu1 %v4015_v62  ;;  %v4002_v17 = vld [vmem:[#allocation16 + $0xa88] sm:$0xff]  ;;  %v4247_v62 = vld [vmem:[#allocation16 + $0xf60] sm:$0xff] }
 0x71d   : > { %4102 = vmatpush.msrb.mxu2 %v4027_v39  ;;  %4118 = vmatpush.msra.mxu3 %v4047_v56  ;;  %v4034_v63 = vld [vmem:[#allocation16 + $0xb88] sm:$0xff]  ;;  %v3985_v39 = vld [vmem:[#allocation16 + $0xa00] sm:$0xff] }
 0x71e   : > { %4059 = vmatpush.msrb.mxu0 %v3998_v21  ;;  %4079 = vmatpush.msrb.mxu1 %v4014_v5  ;;  %v4001_v56 = vld [vmem:[#allocation16 + $0xa80] sm:$0xff]  ;;  %v4049_v5 = vrot.slane %v8626_v59, 5 }
 0x71f   : > { %4103 = vmatpush.msrb.mxu2 %v4026_v9  ;;  %4119 = vmatpush.msra.mxu3 %v4046_v22  ;;  %v4033_v21 = vld [vmem:[#allocation16 + $0xb80] sm:$0xff]  ;;  %v4050_v9 = vrot.slane %v8629_v52, 5  ;;  %v4218_v22 = vld [vmem:[#allocation16 + $0xe78] sm:$0xff] }
 0x720   : > { %4060 = vmatpush.msrb.mxu0 %v3997_v34  ;;  %4080 = vmatpush.msrb.mxu1 %v4013_v12  ;;  %v4052_v34 = vrot.slane %v8632_v55, 5  ;;  %v4234_v12 = vld [vmem:[#allocation16 + $0xef8] sm:$0xff] }
 0x721   : > { %4104 = vmatpush.msrb.mxu2 %v4025_v18  ;;  %4120 = vmatpush.msra.mxu3 %v4045_v51  ;;  %v4246_v18 = vld [vmem:[#allocation16 + $0xf58] sm:$0xff] }
 0x722   : > { %3855 = vmatmul.f32.vlgmr.msra.gmra.mxu0 %v3831_v47  ;;  %3875 = vmatmul.f32.vlgmr.msra.gmra.mxu1 %v3832_v10  ;;  %v4266_v51 = vld [vmem:[#allocation16 + $0xff8] sm:$0xff]  ;;  %v4217_v47 = vld [vmem:[#allocation16 + $0xe70] sm:$0xff] }
 0x723   : > { %3915 = vmatmul.f32.vlgmr.msrb.gmra.mxu3 %v3834_v23  ;;  %4061 = vmatpush.msrb.mxu0 %v3996_v16  ;;  %v4233_v10 = vld [vmem:[#allocation16 + $0xef0] sm:$0xff] }
 0x724   : > { %4081 = vmatpush.msrb.mxu1 %v4012_v6  ;;  %4105 = vmatpush.msrb.mxu2 %v4024_v50  ;;  %v4245_v16 = vld [vmem:[#allocation16 + $0xf50] sm:$0xff]  ;;  %v4216_v6 = vld [vmem:[#allocation16 + $0xe68] sm:$0xff] }
 0x725   : > { %4121 = vmatpush.msra.mxu3 %v4044_v57  ;;  %4062 = vmatpush.msrb.mxu0 %v3995_v24  ;;  %v4265_v23 = vld [vmem:[#allocation16 + $0xff0] sm:$0xff]  ;;  %v4232_v50 = vld [vmem:[#allocation16 + $0xee8] sm:$0xff] }
 0x726   : > { %4082 = vmatpush.msrb.mxu1 %v4011_v28  ;;  %4106 = vmatpush.msrb.mxu2 %v4023_v43  ;;  %v4244_v57 = vld [vmem:[#allocation16 + $0xf48] sm:$0xff]  ;;  %v4215_v28 = vld [vmem:[#allocation16 + $0xe60] sm:$0xff] }
 0x727   : > { %4122 = vmatpush.msra.mxu3 %v4043_v30  ;;  %4063 = vmatpush.msrb.mxu0 %v3994_v19  ;;  %v4264_v24 = vld [vmem:[#allocation16 + $0xfe8] sm:$0xff]  ;;  %v4231_v43 = vld [vmem:[#allocation16 + $0xee0] sm:$0xff] }
 0x728   : > { %4083 = vmatpush.msrb.mxu1 %v4010_v26  ;;  %4107 = vmatpush.msrb.mxu2 %v4022_v29  ;;  %v4243_v30 = vld [vmem:[#allocation16 + $0xf40] sm:$0xff]  ;;  %v4214_v26 = vld [vmem:[#allocation16 + $0xe58] sm:$0xff] }
 0x729   : > { %4123 = vmatpush.msra.mxu3 %v4042_v27  ;;  %4064 = vmatpush.msrb.mxu0 %v3993_v44  ;;  %v4263_v19 = vld [vmem:[#allocation16 + $0xfe0] sm:$0xff]  ;;  %v4230_v29 = vld [vmem:[#allocation16 + $0xed8] sm:$0xff] }
 0x72a   : > { %4084 = vmatpush.msrb.mxu1 %v4009_v25  ;;  %4108 = vmatpush.msrb.mxu2 %v4021_v4  ;;  %v4242_v27 = vld [vmem:[#allocation16 + $0xf38] sm:$0xff]  ;;  %v4213_v25 = vld [vmem:[#allocation16 + $0xe50] sm:$0xff] }
 0x72b   : > { %4124 = vmatpush.msra.mxu3 %v4041_v35  ;;  %4065 = vmatpush.msrb.mxu0 %v3992_v36  ;;  %v4262_v44 = vld [vmem:[#allocation16 + $0xfd8] sm:$0xff]  ;;  %v4229_v4 = vld [vmem:[#allocation16 + $0xed0] sm:$0xff] }
 0x72c   : > { %4085 = vmatpush.msrb.mxu1 %v4008_v37  ;;  %4109 = vmatpush.msrb.mxu2 %v4020_v60  ;;  %v4241_v35 = vld [vmem:[#allocation16 + $0xf30] sm:$0xff]  ;;  %v4212_v37 = vld [vmem:[#allocation16 + $0xe48] sm:$0xff] }
 0x72d   : > { %4125 = vmatpush.msra.mxu3 %v4040_v14  ;;  %4066 = vmatpush.msrb.mxu0 %v3991_v32  ;;  %v4261_v36 = vld [vmem:[#allocation16 + $0xfd0] sm:$0xff]  ;;  %v4228_v60 = vld [vmem:[#allocation16 + $0xec8] sm:$0xff] }
 0x72e   : > { %4086 = vmatpush.msrb.mxu1 %v4007_v58  ;;  %4110 = vmatpush.msrb.mxu2 %v4019_v40  ;;  %v4240_v14 = vld [vmem:[#allocation16 + $0xf28] sm:$0xff]  ;;  %v4211_v58 = vld [vmem:[#allocation16 + $0xe40] sm:$0xff] }
 0x72f   : > { %4126 = vmatpush.msra.mxu3 %v4039_v53  ;;  %4067 = vmatpush.msrb.mxu0 %v3990_v15  ;;  %v4260_v32 = vld [vmem:[#allocation16 + $0xfc8] sm:$0xff]  ;;  %v4227_v40 = vld [vmem:[#allocation16 + $0xec0] sm:$0xff] }
 0x730   : > { %4087 = vmatpush.msrb.mxu1 %v4006_v45  ;;  %4111 = vmatpush.msrb.mxu2 %v4018_v46  ;;  %v4239_v53 = vld [vmem:[#allocation16 + $0xf20] sm:$0xff]  ;;  %v4210_v45 = vld [vmem:[#allocation16 + $0xe38] sm:$0xff] }
 0x731   : > { %4127 = vmatpush.msra.mxu3 %v4038_v8  ;;  %4068 = vmatpush.msrb.mxu0 %v3989_v13  ;;  %v4259_v15 = vld [vmem:[#allocation16 + $0xfc0] sm:$0xff]  ;;  %v4226_v46 = vld [vmem:[#allocation16 + $0xeb8] sm:$0xff] }
 0x732   : > { %4088 = vmatpush.msrb.mxu1 %v4005_v2  ;;  %4112 = vmatpush.msrb.mxu2 %v4017_v3  ;;  %v4238_v8 = vld [vmem:[#allocation16 + $0xf18] sm:$0xff]  ;;  %v4209_v2 = vld [vmem:[#allocation16 + $0xe30] sm:$0xff] }
 0x733   : > { %4128 = vmatpush.msra.mxu3 %v4037_v1  ;;  %4113 = vmatmul.f32.vlgmr.msrb.gmra.mxu2 %v4051_v38  ;;  %v4258_v13 = vld [vmem:[#allocation16 + $0xfb8] sm:$0xff]  ;;  %v4225_v3 = vld [vmem:[#allocation16 + $0xeb0] sm:$0xff] }
 0x734   : > { %4315 = vmatpush.msra.mxu2 %v4250_v41  ;;  %4069 = vmatpush.msrb.mxu0 %v3988_v54  ;;  %v4237_v1 = vld [vmem:[#allocation16 + $0xf10] sm:$0xff]  ;;  %v4208_v41 = vld [vmem:[#allocation16 + $0xe28] sm:$0xff] }
 0x735   : > { %4089 = vmatpush.msrb.mxu1 %v4004_v61  ;;  %4129 = vmatpush.msra.mxu3 %v4036_v11  ;;  %v4257_v38 = vld [vmem:[#allocation16 + $0xfb0] sm:$0xff]  ;;  %v4224_v54 = vld [vmem:[#allocation16 + $0xea8] sm:$0xff] }
 0x736   : > { %4316 = vmatpush.msra.mxu2 %v4249_v33  ;;  %4070 = vmatpush.msrb.mxu0 %v3987_v42  ;;  %v4236_v61 = vld [vmem:[#allocation16 + $0xf08] sm:$0xff]  ;;  %v4207_v33 = vld [vmem:[#allocation16 + $0xe20] sm:$0xff] }
 0x737   : > { %4090 = vmatpush.msrb.mxu1 %v4003_v31  ;;  %4130 = vmatpush.msra.mxu3 %v4035_v48  ;;  %v4256_v11 = vld [vmem:[#allocation16 + $0xfa8] sm:$0xff]  ;;  %v4223_v42 = vld [vmem:[#allocation16 + $0xea0] sm:$0xff] }
 0x738   : > { %4317 = vmatpush.msra.mxu2 %v4248_v49  ;;  %4071 = vmatpush.msrb.mxu0 %v3986_v20  ;;  %v4235_v31 = vld [vmem:[#allocation16 + $0xf00] sm:$0xff]  ;;  %v4269_v49 = vrot.slane %v8616_v7, 7  ;;  %v3527_v20 = vld [vmem:[#allocation16 + $0x178] sm:$0xff] }
 0x739   : > { %4091 = vmatpush.msrb.mxu1 %v4002_v17  ;;  %4131 = vmatpush.msra.mxu3 %v4034_v63  ;;  %v4255_v48 = vld [vmem:[#allocation16 + $0xfa0] sm:$0xff]  ;;  %v4206_v17 = vld [vmem:[#allocation16 + $0xe18] sm:$0xff] }
 0x73a   : > { %4318 = vmatpush.msra.mxu2 %v4247_v62  ;;  %4072 = vmatpush.msrb.mxu0 %v3985_v39  ;;  %v4222_v63 = vld [vmem:[#allocation16 + $0xe98] sm:$0xff]  ;;  %v3526_v39 = vld [vmem:[#allocation16 + $0x170] sm:$0xff] }
 0x73b   : > { %4092 = vmatpush.msrb.mxu1 %v4001_v56  ;;  %4132 = vmatpush.msra.mxu3 %v4033_v21  ;;  %v4254_v62 = vld [vmem:[#allocation16 + $0xf98] sm:$0xff]  ;;  %v4205_v56 = vld [vmem:[#allocation16 + $0xe10] sm:$0xff] }
 0x73c   : > { %4073 = vmatmul.f32.vlgmr.msrb.gmra.mxu0 %v4049_v5  ;;  %4093 = vmatmul.f32.vlgmr.msrb.gmra.mxu1 %v4050_v9  ;;  %v4221_v21 = vld [vmem:[#allocation16 + $0xe90] sm:$0xff]  ;;  %v3525_v9 = vld [vmem:[#allocation16 + $0x168] sm:$0xff] }
 0x73d   : > { %4133 = vmatmul.f32.vlgmr.msra.gmra.mxu3 %v4052_v34  ;;  %4275 = vmatpush.msra.mxu0 %v4218_v22  ;;  %v4253_v5 = vld [vmem:[#allocation16 + $0xf90] sm:$0xff]  ;;  %v4204_v22 = vld [vmem:[#allocation16 + $0xe08] sm:$0xff] }
 0x73e   : > { %4295 = vmatpush.msra.mxu1 %v4234_v12  ;;  %4319 = vmatpush.msra.mxu2 %v4246_v18  ;;  %v4220_v34 = vld [vmem:[#allocation16 + $0xe88] sm:$0xff]  ;;  %v3524_v18 = vld [vmem:[#allocation16 + $0x160] sm:$0xff] }
 0x73f   : > { %4335 = vmatpush.msrb.mxu3 %v4266_v51  ;;  %4276 = vmatpush.msra.mxu0 %v4217_v47  ;;  %v4252_v12 = vld [vmem:[#allocation16 + $0xf88] sm:$0xff]  ;;  %v4203_v51 = vld [vmem:[#allocation16 + $0xe00] sm:$0xff] }
 0x740   : > { %4296 = vmatpush.msra.mxu1 %v4233_v10  ;;  %4320 = vmatpush.msra.mxu2 %v4245_v16  ;;  %v4219_v47 = vld [vmem:[#allocation16 + $0xe80] sm:$0xff]  ;;  %v4267_v16 = vrot.slane %v8626_v59, 7 }
 0x741   : > { %4336 = vmatpush.msrb.mxu3 %v4265_v23  ;;  %4277 = vmatpush.msra.mxu0 %v4216_v6  ;;  %v4251_v10 = vld [vmem:[#allocation16 + $0xf80] sm:$0xff]  ;;  %v4268_v23 = vrot.slane %v8629_v52, 7  ;;  %v3495_v6 = vld [vmem:[#allocation16 + $0x78] sm:$0xff] }
 0x742   : > { %4297 = vmatpush.msra.mxu1 %v4232_v50  ;;  %4321 = vmatpush.msra.mxu2 %v4244_v57  ;;  %v4270_v50 = vrot.slane %v8632_v55, 7  ;;  %v3511_v57 = vld [vmem:[#allocation16 + $0xf8] sm:$0xff] }
 0x743   : > { %4337 = vmatpush.msrb.mxu3 %v4264_v24  ;;  %4278 = vmatpush.msra.mxu0 %v4215_v28  ;;  %v3523_v24 = vld [vmem:[#allocation16 + $0x158] sm:$0xff] }
 0x744   : > { %4298 = vmatpush.msra.mxu1 %v4231_v43  ;;  %4322 = vmatpush.msra.mxu2 %v4243_v30  ;;  %v3543_v28 = vld [vmem:[#allocation16 + $0x1f8] sm:$0xff]  ;;  %v3494_v43 = vld [vmem:[#allocation16 + $0x70] sm:$0xff] }
 0x745   : > { %4338 = vmatpush.msrb.mxu3 %v4263_v19  ;;  %4279 = vmatpush.msra.mxu0 %v4214_v26  ;;  %v3510_v30 = vld [vmem:[#allocation16 + $0xf0] sm:$0xff] }
 0x746   : > { %4299 = vmatpush.msra.mxu1 %v4230_v29  ;;  %4323 = vmatpush.msra.mxu2 %v4242_v27  ;;  %v3522_v19 = vld [vmem:[#allocation16 + $0x150] sm:$0xff]  ;;  %v3493_v29 = vld [vmem:[#allocation16 + $0x68] sm:$0xff] }
 0x747   : > { %4339 = vmatpush.msrb.mxu3 %v4262_v44  ;;  %4280 = vmatpush.msra.mxu0 %v4213_v25  ;;  %v3542_v26 = vld [vmem:[#allocation16 + $0x1f0] sm:$0xff]  ;;  %v3509_v27 = vld [vmem:[#allocation16 + $0xe8] sm:$0xff] }
 0x748   : > { %4300 = vmatpush.msra.mxu1 %v4229_v4  ;;  %4324 = vmatpush.msra.mxu2 %v4241_v35  ;;  %v3521_v44 = vld [vmem:[#allocation16 + $0x148] sm:$0xff]  ;;  %v3492_v4 = vld [vmem:[#allocation16 + $0x60] sm:$0xff] }
 0x749   : > { %4340 = vmatpush.msrb.mxu3 %v4261_v36  ;;  %4281 = vmatpush.msra.mxu0 %v4212_v37  ;;  %v3541_v25 = vld [vmem:[#allocation16 + $0x1e8] sm:$0xff]  ;;  %v3508_v35 = vld [vmem:[#allocation16 + $0xe0] sm:$0xff] }
 0x74a   : > { %4301 = vmatpush.msra.mxu1 %v4228_v60  ;;  %4325 = vmatpush.msra.mxu2 %v4240_v14  ;;  %v3520_v36 = vld [vmem:[#allocation16 + $0x140] sm:$0xff]  ;;  %v3491_v60 = vld [vmem:[#allocation16 + $0x58] sm:$0xff] }
 0x74b   : > { %4341 = vmatpush.msrb.mxu3 %v4260_v32  ;;  %4282 = vmatpush.msra.mxu0 %v4211_v58  ;;  %v3540_v37 = vld [vmem:[#allocation16 + $0x1e0] sm:$0xff]  ;;  %v3507_v14 = vld [vmem:[#allocation16 + $0xd8] sm:$0xff] }
 0x74c   : > { %4302 = vmatpush.msra.mxu1 %v4227_v40  ;;  %4326 = vmatpush.msra.mxu2 %v4239_v53  ;;  %v3519_v32 = vld [vmem:[#allocation16 + $0x138] sm:$0xff]  ;;  %v3490_v40 = vld [vmem:[#allocation16 + $0x50] sm:$0xff] }
 0x74d   : > { %4342 = vmatpush.msrb.mxu3 %v4259_v15  ;;  %4283 = vmatpush.msra.mxu0 %v4210_v45  ;;  %v3539_v58 = vld [vmem:[#allocation16 + $0x1d8] sm:$0xff]  ;;  %v3506_v53 = vld [vmem:[#allocation16 + $0xd0] sm:$0xff] }
 0x74e   : > { %4303 = vmatpush.msra.mxu1 %v4226_v46  ;;  %4327 = vmatpush.msra.mxu2 %v4238_v8  ;;  %v3518_v15 = vld [vmem:[#allocation16 + $0x130] sm:$0xff]  ;;  %v3489_v46 = vld [vmem:[#allocation16 + $0x48] sm:$0xff] }
 0x74f   : > { %4343 = vmatpush.msrb.mxu3 %v4258_v13  ;;  %4284 = vmatpush.msra.mxu0 %v4209_v2  ;;  %v3538_v45 = vld [vmem:[#allocation16 + $0x1d0] sm:$0xff]  ;;  %v3505_v8 = vld [vmem:[#allocation16 + $0xc8] sm:$0xff] }
 0x750   : > { %4304 = vmatpush.msra.mxu1 %v4225_v3  ;;  %4328 = vmatpush.msra.mxu2 %v4237_v1  ;;  %v3517_v13 = vld [vmem:[#allocation16 + $0x128] sm:$0xff]  ;;  %v3488_v3 = vld [vmem:[#allocation16 + $0x40] sm:$0xff] }
 0x751   : > { %4344 = vmatpush.msrb.mxu3 %v4257_v38  ;;  %4285 = vmatpush.msra.mxu0 %v4208_v41  ;;  %v3537_v2 = vld [vmem:[#allocation16 + $0x1c8] sm:$0xff]  ;;  %v3504_v1 = vld [vmem:[#allocation16 + $0xc0] sm:$0xff] }
 0x752   : > { %4305 = vmatpush.msra.mxu1 %v4224_v54  ;;  %4329 = vmatpush.msra.mxu2 %v4236_v61  ;;  %v3516_v38 = vld [vmem:[#allocation16 + $0x120] sm:$0xff]  ;;  %v3487_v54 = vld [vmem:[#allocation16 + $0x38] sm:$0xff] }
 0x753   : > { %4345 = vmatpush.msrb.mxu3 %v4256_v11  ;;  %4286 = vmatpush.msra.mxu0 %v4207_v33  ;;  %v3536_v41 = vld [vmem:[#allocation16 + $0x1c0] sm:$0xff]  ;;  %v3503_v61 = vld [vmem:[#allocation16 + $0xb8] sm:$0xff] }
 0x754   : > { %4306 = vmatpush.msra.mxu1 %v4223_v42  ;;  %4330 = vmatpush.msra.mxu2 %v4235_v31  ;;  %v3515_v11 = vld [vmem:[#allocation16 + $0x118] sm:$0xff]  ;;  %v3486_v42 = vld [vmem:[#allocation16 + $0x30] sm:$0xff] }
 0x755   : > { %4346 = vmatpush.msrb.mxu3 %v4255_v48  ;;  %4331 = vmatmul.f32.vlgmr.msra.gmra.mxu2 %v4269_v49  ;;  %v3535_v33 = vld [vmem:[#allocation16 + $0x1b8] sm:$0xff]  ;;  %v3502_v31 = vld [vmem:[#allocation16 + $0xb0] sm:$0xff] }
 0x756   : > { %4396 = vmatpush.msrb.mxu2 %v3527_v20  ;;  %4287 = vmatpush.msra.mxu0 %v4206_v17  ;;  %v3514_v48 = vld [vmem:[#allocation16 + $0x110] sm:$0xff]  ;;  %v3485_v20 = vld [vmem:[#allocation16 + $0x28] sm:$0xff] }
 0x757   : > { %4307 = vmatpush.msra.mxu1 %v4222_v63  ;;  %4347 = vmatpush.msrb.mxu3 %v4254_v62  ;;  %v3534_v49 = vld [vmem:[#allocation16 + $0x1b0] sm:$0xff]  ;;  %v3501_v17 = vld [vmem:[#allocation16 + $0xa8] sm:$0xff] }
 0x758   : > { %4397 = vmatpush.msrb.mxu2 %v3526_v39  ;;  %4288 = vmatpush.msra.mxu0 %v4205_v56  ;;  %v3513_v63 = vld [vmem:[#allocation16 + $0x108] sm:$0xff]  ;;  %v3484_v39 = vld [vmem:[#allocation16 + $0x20] sm:$0xff] }
 0x759   : > { %4308 = vmatpush.msra.mxu1 %v4221_v21  ;;  %4348 = vmatpush.msrb.mxu3 %v4253_v5  ;;  %v3533_v62 = vld [vmem:[#allocation16 + $0x1a8] sm:$0xff]  ;;  %v3500_v56 = vld [vmem:[#allocation16 + $0xa0] sm:$0xff] }
 0x75a   : > { %4398 = vmatpush.msrb.mxu2 %v3525_v9  ;;  %4289 = vmatpush.msra.mxu0 %v4204_v22  ;;  %v3512_v21 = vld [vmem:[#allocation16 + $0x100] sm:$0xff]  ;;  %v3749_v9 = vld [vmem:[#allocation16 + $0x578] sm:$0xff] }
 0x75b   : > { %4309 = vmatpush.msra.mxu1 %v4220_v34  ;;  %4349 = vmatpush.msrb.mxu3 %v4252_v12  ;;  %v3532_v5 = vld [vmem:[#allocation16 + $0x1a0] sm:$0xff]  ;;  %v3483_v22 = vld [vmem:[#allocation16 + $0x18] sm:$0xff] }
 0x75c   : > { %4399 = vmatpush.msrb.mxu2 %v3524_v18  ;;  %4290 = vmatpush.msra.mxu0 %v4203_v51  ;;  %v3499_v34 = vld [vmem:[#allocation16 + $0x98] sm:$0xff]  ;;  %v3748_v18 = vld [vmem:[#allocation16 + $0x570] sm:$0xff] }
 0x75d   : > { %4310 = vmatpush.msra.mxu1 %v4219_v47  ;;  %4350 = vmatpush.msrb.mxu3 %v4251_v10  ;;  %v3531_v12 = vld [vmem:[#allocation16 + $0x198] sm:$0xff]  ;;  %v3482_v51 = vld [vmem:[#allocation16 + $0x10] sm:$0xff] }
 0x75e   : > { %4291 = vmatmul.f32.vlgmr.msra.gmra.mxu0 %v4267_v16  ;;  %4311 = vmatmul.f32.vlgmr.msra.gmra.mxu1 %v4268_v23  ;;  %v3498_v47 = vld [vmem:[#allocation16 + $0x90] sm:$0xff]  ;;  %v3747_v16 = vld [vmem:[#allocation16 + $0x568] sm:$0xff] }
 0x75f   : > { %4351 = vmatmul.f32.vlgmr.msrb.gmra.mxu3 %v4270_v50  ;;  %4356 = vmatpush.msrb.mxu0 %v3495_v6  ;;  %v3530_v10 = vld [vmem:[#allocation16 + $0x190] sm:$0xff]  ;;  %v3481_v23 = vld [vmem:[#allocation16 + $0x8] sm:$0xff] }
 0x760   : > { %4376 = vmatpush.msrb.mxu1 %v3511_v57  ;;  %4400 = vmatpush.msrb.mxu2 %v3523_v24  ;;  %v3497_v6 = vld [vmem:[#allocation16 + $0x88] sm:$0xff]  ;;  %v3746_v57 = vld [vmem:[#allocation16 + $0x560] sm:$0xff] }
 0x761   : > { %4416 = vmatpush.msra.mxu3 %v3543_v28  ;;  %4357 = vmatpush.msrb.mxu0 %v3494_v43  ;;  %v3529_v50 = vld [vmem:[#allocation16 + $0x188] sm:$0xff]  ;;  %v3480_v24 = vld [vmem:[#allocation16] sm:$0xff] }
 0x762   : > { %4377 = vmatpush.msrb.mxu1 %v3510_v30  ;;  %4401 = vmatpush.msrb.mxu2 %v3522_v19  ;;  %v3496_v28 = vld [vmem:[#allocation16 + $0x80] sm:$0xff]  ;;  %v3717_v30 = vld [vmem:[#allocation16 + $0x478] sm:$0xff] }
 0x763   : > { %4417 = vmatpush.msra.mxu3 %v3542_v26  ;;  %4358 = vmatpush.msrb.mxu0 %v3493_v29  ;;  %v3528_v43 = vld [vmem:[#allocation16 + $0x180] sm:$0xff]  ;;  %v3733_v19 = vld [vmem:[#allocation16 + $0x4f8] sm:$0xff] }
 0x764   : > { %4378 = vmatpush.msrb.mxu1 %v3509_v27  ;;  %4402 = vmatpush.msrb.mxu2 %v3521_v44  ;;  %v3745_v26 = vld [vmem:[#allocation16 + $0x558] sm:$0xff]  ;;  %v3716_v27 = vld [vmem:[#allocation16 + $0x470] sm:$0xff] }
 0x765   : > { %4418 = vmatpush.msra.mxu3 %v3541_v25  ;;  %4359 = vmatpush.msrb.mxu0 %v3492_v4  ;;  %v3765_v29 = vld [vmem:[#allocation16 + $0x5f8] sm:$0xff]  ;;  %v3732_v44 = vld [vmem:[#allocation16 + $0x4f0] sm:$0xff] }
 0x766   : > { %4379 = vmatpush.msrb.mxu1 %v3508_v35  ;;  %4403 = vmatpush.msrb.mxu2 %v3520_v36  ;;  %v3744_v25 = vld [vmem:[#allocation16 + $0x550] sm:$0xff]  ;;  %v3715_v35 = vld [vmem:[#allocation16 + $0x468] sm:$0xff] }
 0x767   : > { %4419 = vmatpush.msra.mxu3 %v3540_v37  ;;  %4360 = vmatpush.msrb.mxu0 %v3491_v60  ;;  %v3764_v4 = vld [vmem:[#allocation16 + $0x5f0] sm:$0xff]  ;;  %v3731_v36 = vld [vmem:[#allocation16 + $0x4e8] sm:$0xff] }
 0x768   : > { %4380 = vmatpush.msrb.mxu1 %v3507_v14  ;;  %4404 = vmatpush.msrb.mxu2 %v3519_v32  ;;  %v3743_v37 = vld [vmem:[#allocation16 + $0x548] sm:$0xff]  ;;  %v3714_v14 = vld [vmem:[#allocation16 + $0x460] sm:$0xff] }
 0x769   : > { %4420 = vmatpush.msra.mxu3 %v3539_v58  ;;  %4361 = vmatpush.msrb.mxu0 %v3490_v40  ;;  %v3763_v60 = vld [vmem:[#allocation16 + $0x5e8] sm:$0xff]  ;;  %v3730_v32 = vld [vmem:[#allocation16 + $0x4e0] sm:$0xff] }
 0x76a   : > { %4381 = vmatpush.msrb.mxu1 %v3506_v53  ;;  %4405 = vmatpush.msrb.mxu2 %v3518_v15  ;;  %v3742_v58 = vld [vmem:[#allocation16 + $0x540] sm:$0xff]  ;;  %v3713_v53 = vld [vmem:[#allocation16 + $0x458] sm:$0xff] }
 0x76b   : > { %4421 = vmatpush.msra.mxu3 %v3538_v45  ;;  %4362 = vmatpush.msrb.mxu0 %v3489_v46  ;;  %v3762_v40 = vld [vmem:[#allocation16 + $0x5e0] sm:$0xff]  ;;  %v3729_v15 = vld [vmem:[#allocation16 + $0x4d8] sm:$0xff] }
 0x76c   : > { %4382 = vmatpush.msrb.mxu1 %v3505_v8  ;;  %4406 = vmatpush.msrb.mxu2 %v3517_v13  ;;  %v3741_v45 = vld [vmem:[#allocation16 + $0x538] sm:$0xff]  ;;  %v3712_v8 = vld [vmem:[#allocation16 + $0x450] sm:$0xff] }
 0x76d   : > { %4422 = vmatpush.msra.mxu3 %v3537_v2  ;;  %4363 = vmatpush.msrb.mxu0 %v3488_v3  ;;  %v3761_v46 = vld [vmem:[#allocation16 + $0x5d8] sm:$0xff]  ;;  %v3728_v13 = vld [vmem:[#allocation16 + $0x4d0] sm:$0xff] }
 0x76e   : > { %4383 = vmatpush.msrb.mxu1 %v3504_v1  ;;  %4407 = vmatpush.msrb.mxu2 %v3516_v38  ;;  %v3740_v2 = vld [vmem:[#allocation16 + $0x530] sm:$0xff]  ;;  %v3711_v1 = vld [vmem:[#allocation16 + $0x448] sm:$0xff] }
 0x76f   : > { %4423 = vmatpush.msra.mxu3 %v3536_v41  ;;  %4364 = vmatpush.msrb.mxu0 %v3487_v54  ;;  %v3760_v3 = vld [vmem:[#allocation16 + $0x5d0] sm:$0xff]  ;;  %v3727_v38 = vld [vmem:[#allocation16 + $0x4c8] sm:$0xff] }
 0x770   : > { %4384 = vmatpush.msrb.mxu1 %v3503_v61  ;;  %4408 = vmatpush.msrb.mxu2 %v3515_v11  ;;  %v3739_v41 = vld [vmem:[#allocation16 + $0x528] sm:$0xff]  ;;  %v3710_v61 = vld [vmem:[#allocation16 + $0x440] sm:$0xff] }
 0x771   : > { %4424 = vmatpush.msra.mxu3 %v3535_v33  ;;  %4365 = vmatpush.msrb.mxu0 %v3486_v42  ;;  %v3759_v54 = vld [vmem:[#allocation16 + $0x5c8] sm:$0xff]  ;;  %v3726_v11 = vld [vmem:[#allocation16 + $0x4c0] sm:$0xff] }
 0x772   : > { %4385 = vmatpush.msrb.mxu1 %v3502_v31  ;;  %4409 = vmatpush.msrb.mxu2 %v3514_v48  ;;  %v3738_v33 = vld [vmem:[#allocation16 + $0x520] sm:$0xff]  ;;  %v3709_v31 = vld [vmem:[#allocation16 + $0x438] sm:$0xff] }
 0x773   : > { %4425 = vmatpush.msra.mxu3 %v3534_v49  ;;  %4366 = vmatpush.msrb.mxu0 %v3485_v20  ;;  %v3758_v42 = vld [vmem:[#allocation16 + $0x5c0] sm:$0xff]  ;;  %v3725_v48 = vld [vmem:[#allocation16 + $0x4b8] sm:$0xff] }
 0x774   : > { %4386 = vmatpush.msrb.mxu1 %v3501_v17  ;;  %4410 = vmatpush.msrb.mxu2 %v3513_v63  ;;  %v3737_v49 = vld [vmem:[#allocation16 + $0x518] sm:$0xff]  ;;  %v3708_v17 = vld [vmem:[#allocation16 + $0x430] sm:$0xff] }
 0x775   : > { %4426 = vmatpush.msra.mxu3 %v3533_v62  ;;  %4367 = vmatpush.msrb.mxu0 %v3484_v39  ;;  %v3757_v20 = vld [vmem:[#allocation16 + $0x5b8] sm:$0xff]  ;;  %v3724_v63 = vld [vmem:[#allocation16 + $0x4b0] sm:$0xff] }
 0x776   : > { %4387 = vmatpush.msrb.mxu1 %v3500_v56  ;;  %4411 = vmatpush.msrb.mxu2 %v3512_v21  ;;  %v3736_v62 = vld [vmem:[#allocation16 + $0x510] sm:$0xff]  ;;  %v3707_v56 = vld [vmem:[#allocation16 + $0x428] sm:$0xff] }
 0x777   : > { %4427 = vmatpush.msra.mxu3 %v3532_v5  ;;  %4412 = vmatmul.f32.vlgmr.msrb.gmra.mxu2 %v8616_v7  ;;  %v3756_v39 = vld [vmem:[#allocation16 + $0x5b0] sm:$0xff]  ;;  %v3723_v21 = vld [vmem:[#allocation16 + $0x4a8] sm:$0xff] }
 0x778   : > { %4484 = vmatpush.msra.mxu2 %v3749_v9  ;;  %4368 = vmatpush.msrb.mxu0 %v3483_v22  ;;  %v3735_v5 = vld [vmem:[#allocation16 + $0x508] sm:$0xff]  ;;  %v3706_v22 = vld [vmem:[#allocation16 + $0x420] sm:$0xff] }
 0x779   : > { %4388 = vmatpush.msrb.mxu1 %v3499_v34  ;;  %4428 = vmatpush.msra.mxu3 %v3531_v12  ;;  %v3755_v9 = vld [vmem:[#allocation16 + $0x5a8] sm:$0xff]  ;;  %v3722_v34 = vld [vmem:[#allocation16 + $0x4a0] sm:$0xff] }
 0x77a   : > { %4485 = vmatpush.msra.mxu2 %v3748_v18  ;;  %4369 = vmatpush.msrb.mxu0 %v3482_v51  ;;  %v3734_v12 = vld [vmem:[#allocation16 + $0x500] sm:$0xff]  ;;  %v4438_v51 = vrot.slane %v8616_v7, 2 }
 0x77b   : > { %4389 = vmatpush.msrb.mxu1 %v3498_v47  ;;  %4429 = vmatpush.msra.mxu3 %v3530_v10  ;;  %v3754_v18 = vld [vmem:[#allocation16 + $0x5a0] sm:$0xff]  ;;  %v3967_v47 = vld [vmem:[#allocation16 + $0x978] sm:$0xff] }
 0x77c   : > { %4486 = vmatpush.msra.mxu2 %v3747_v16  ;;  %4370 = vmatpush.msrb.mxu0 %v3481_v23  ;;  %v3705_v10 = vld [vmem:[#allocation16 + $0x418] sm:$0xff] }
 0x77d   : > { %4390 = vmatpush.msrb.mxu1 %v3497_v6  ;;  %4430 = vmatpush.msra.mxu3 %v3529_v50  ;;  %v3721_v16 = vld [vmem:[#allocation16 + $0x498] sm:$0xff]  ;;  %v3966_v6 = vld [vmem:[#allocation16 + $0x970] sm:$0xff] }
 0x77e   : > { %4487 = vmatpush.msra.mxu2 %v3746_v57  ;;  %4371 = vmatpush.msrb.mxu0 %v3480_v24  ;;  %v3753_v23 = vld [vmem:[#allocation16 + $0x598] sm:$0xff]  ;;  %v3704_v50 = vld [vmem:[#allocation16 + $0x410] sm:$0xff] }
 0x77f   : > { %4391 = vmatpush.msrb.mxu1 %v3496_v28  ;;  %4431 = vmatpush.msra.mxu3 %v3528_v43  ;;  %v3720_v57 = vld [vmem:[#allocation16 + $0x490] sm:$0xff]  ;;  %v3965_v28 = vld [vmem:[#allocation16 + $0x968] sm:$0xff] }
 0x780   : > { %4372 = vmatmul.f32.vlgmr.msrb.gmra.mxu0 %v8626_v59  ;;  %4392 = vmatmul.f32.vlgmr.msrb.gmra.mxu1 %v8629_v52  ;;  %v3752_v24 = vld [vmem:[#allocation16 + $0x590] sm:$0xff]  ;;  %v3703_v43 = vld [vmem:[#allocation16 + $0x408] sm:$0xff] }
 0x781   : > { %4432 = vmatmul.f32.vlgmr.msra.gmra.mxu3 %v8632_v55  ;;  %4444 = vmatpush.msra.mxu0 %v3717_v30  ;;  %v3719_v30 = vld [vmem:[#allocation16 + $0x488] sm:$0xff] }
 0x782   : > { %4464 = vmatpush.msra.mxu1 %v3733_v19  ;;  %4488 = vmatpush.msra.mxu2 %v3745_v26  ;;  %v3751_v19 = vld [vmem:[#allocation16 + $0x588] sm:$0xff]  ;;  %v3964_v26 = vld [vmem:[#allocation16 + $0x960] sm:$0xff] }
 0x783   : > { %4504 = vmatpush.msrb.mxu3 %v3765_v29  ;;  %4445 = vmatpush.msra.mxu0 %v3716_v27  ;;  %v3702_v29 = vld [vmem:[#allocation16 + $0x400] sm:$0xff] }
 0x784   : > { %4465 = vmatpush.msra.mxu1 %v3732_v44  ;;  %4489 = vmatpush.msra.mxu2 %v3744_v25  ;;  %v3718_v27 = vld [vmem:[#allocation16 + $0x480] sm:$0xff]  ;;  %v4436_v25 = vrot.slane %v8626_v59, 2 }
 0x785   : > { %4505 = vmatpush.msrb.mxu3 %v3764_v4  ;;  %4446 = vmatpush.msra.mxu0 %v3715_v35  ;;  %v3750_v44 = vld [vmem:[#allocation16 + $0x580] sm:$0xff]  ;;  %v4437_v4 = vrot.slane %v8629_v52, 2  ;;  %v3935_v35 = vld [vmem:[#allocation16 + $0x878] sm:$0xff] }
 0x786   : > { %4466 = vmatpush.msra.mxu1 %v3731_v36  ;;  %4490 = vmatpush.msra.mxu2 %v3743_v37  ;;  %v4439_v36 = vrot.slane %v8632_v55, 2  ;;  %v3951_v37 = vld [vmem:[#allocation16 + $0x8f8] sm:$0xff] }
 0x787   : > { %4506 = vmatpush.msrb.mxu3 %v3763_v60  ;;  %4447 = vmatpush.msra.mxu0 %v3714_v14  ;;  %v3963_v60 = vld [vmem:[#allocation16 + $0x958] sm:$0xff] }
 0x788   : > { %4467 = vmatpush.msra.mxu1 %v3730_v32  ;;  %4491 = vmatpush.msra.mxu2 %v3742_v58  ;;  %v3983_v14 = vld [vmem:[#allocation16 + $0x9f8] sm:$0xff]  ;;  %v3934_v32 = vld [vmem:[#allocation16 + $0x870] sm:$0xff] }
 0x789   : > { %4507 = vmatpush.msrb.mxu3 %v3762_v40  ;;  %4448 = vmatpush.msra.mxu0 %v3713_v53  ;;  %v3950_v58 = vld [vmem:[#allocation16 + $0x8f0] sm:$0xff] }
 0x78a   : > { %4468 = vmatpush.msra.mxu1 %v3729_v15  ;;  %4492 = vmatpush.msra.mxu2 %v3741_v45  ;;  %v3962_v40 = vld [vmem:[#allocation16 + $0x950] sm:$0xff]  ;;  %v3933_v15 = vld [vmem:[#allocation16 + $0x868] sm:$0xff] }
 0x78b   : > { %4508 = vmatpush.msrb.mxu3 %v3761_v46  ;;  %4449 = vmatpush.msra.mxu0 %v3712_v8  ;;  %v3982_v53 = vld [vmem:[#allocation16 + $0x9f0] sm:$0xff]  ;;  %v3949_v45 = vld [vmem:[#allocation16 + $0x8e8] sm:$0xff] }
 0x78c   : > { %4469 = vmatpush.msra.mxu1 %v3728_v13  ;;  %4493 = vmatpush.msra.mxu2 %v3740_v2  ;;  %v3961_v46 = vld [vmem:[#allocation16 + $0x948] sm:$0xff]  ;;  %v3932_v13 = vld [vmem:[#allocation16 + $0x860] sm:$0xff] }
 0x78d   : > { %4509 = vmatpush.msrb.mxu3 %v3760_v3  ;;  %4450 = vmatpush.msra.mxu0 %v3711_v1  ;;  %v3981_v8 = vld [vmem:[#allocation16 + $0x9e8] sm:$0xff]  ;;  %v3948_v2 = vld [vmem:[#allocation16 + $0x8e0] sm:$0xff] }
 0x78e   : > { %4470 = vmatpush.msra.mxu1 %v3727_v38  ;;  %4494 = vmatpush.msra.mxu2 %v3739_v41  ;;  %v3960_v3 = vld [vmem:[#allocation16 + $0x940] sm:$0xff]  ;;  %v3931_v38 = vld [vmem:[#allocation16 + $0x858] sm:$0xff] }
 0x78f   : > { %4510 = vmatpush.msrb.mxu3 %v3759_v54  ;;  %4451 = vmatpush.msra.mxu0 %v3710_v61  ;;  %v3980_v1 = vld [vmem:[#allocation16 + $0x9e0] sm:$0xff]  ;;  %v3947_v41 = vld [vmem:[#allocation16 + $0x8d8] sm:$0xff] }
 0x790   : > { %4471 = vmatpush.msra.mxu1 %v3726_v11  ;;  %4495 = vmatpush.msra.mxu2 %v3738_v33  ;;  %v3959_v54 = vld [vmem:[#allocation16 + $0x938] sm:$0xff]  ;;  %v3930_v11 = vld [vmem:[#allocation16 + $0x850] sm:$0xff] }
 0x791   : > { %4511 = vmatpush.msrb.mxu3 %v3758_v42  ;;  %4452 = vmatpush.msra.mxu0 %v3709_v31  ;;  %v3979_v61 = vld [vmem:[#allocation16 + $0x9d8] sm:$0xff]  ;;  %v3946_v33 = vld [vmem:[#allocation16 + $0x8d0] sm:$0xff] }
 0x792   : > { %4472 = vmatpush.msra.mxu1 %v3725_v48  ;;  %4496 = vmatpush.msra.mxu2 %v3737_v49  ;;  %v3958_v42 = vld [vmem:[#allocation16 + $0x930] sm:$0xff]  ;;  %v3929_v48 = vld [vmem:[#allocation16 + $0x848] sm:$0xff] }
 0x793   : > { %4512 = vmatpush.msrb.mxu3 %v3757_v20  ;;  %4453 = vmatpush.msra.mxu0 %v3708_v17  ;;  %v3978_v31 = vld [vmem:[#allocation16 + $0x9d0] sm:$0xff]  ;;  %v3945_v49 = vld [vmem:[#allocation16 + $0x8c8] sm:$0xff] }
 0x794   : > { %4473 = vmatpush.msra.mxu1 %v3724_v63  ;;  %4497 = vmatpush.msra.mxu2 %v3736_v62  ;;  %v3957_v20 = vld [vmem:[#allocation16 + $0x928] sm:$0xff]  ;;  %v3928_v63 = vld [vmem:[#allocation16 + $0x840] sm:$0xff] }
 0x795   : > { %4513 = vmatpush.msrb.mxu3 %v3756_v39  ;;  %4454 = vmatpush.msra.mxu0 %v3707_v56  ;;  %v3977_v17 = vld [vmem:[#allocation16 + $0x9c8] sm:$0xff]  ;;  %v3944_v62 = vld [vmem:[#allocation16 + $0x8c0] sm:$0xff] }
 0x796   : > { %4474 = vmatpush.msra.mxu1 %v3723_v21  ;;  %4498 = vmatpush.msra.mxu2 %v3735_v5  ;;  %v3956_v39 = vld [vmem:[#allocation16 + $0x920] sm:$0xff]  ;;  %v3927_v21 = vld [vmem:[#allocation16 + $0x838] sm:$0xff] }
 0x797   : > { %4514 = vmatpush.msrb.mxu3 %v3755_v9  ;;  %4455 = vmatpush.msra.mxu0 %v3706_v22  ;;  %v3976_v56 = vld [vmem:[#allocation16 + $0x9c0] sm:$0xff]  ;;  %v3943_v5 = vld [vmem:[#allocation16 + $0x8b8] sm:$0xff] }
 0x798   : > { %4475 = vmatpush.msra.mxu1 %v3722_v34  ;;  %4499 = vmatpush.msra.mxu2 %v3734_v12  ;;  %v3955_v9 = vld [vmem:[#allocation16 + $0x918] sm:$0xff]  ;;  %v3926_v34 = vld [vmem:[#allocation16 + $0x830] sm:$0xff] }
 0x799   : > { %4515 = vmatpush.msrb.mxu3 %v3754_v18  ;;  %4500 = vmatmul.f32.vlgmr.msra.gmra.mxu2 %v4438_v51  ;;  %v3975_v22 = vld [vmem:[#allocation16 + $0x9b8] sm:$0xff]  ;;  %v3942_v12 = vld [vmem:[#allocation16 + $0x8b0] sm:$0xff] }
 0x79a   : > { %4573 = vmatpush.msrb.mxu2 %v3967_v47  ;;  %4456 = vmatpush.msra.mxu0 %v3705_v10  ;;  %v3954_v18 = vld [vmem:[#allocation16 + $0x910] sm:$0xff]  ;;  %v3925_v47 = vld [vmem:[#allocation16 + $0x828] sm:$0xff] }
 0x79b   : > { %4476 = vmatpush.msra.mxu1 %v3721_v16  ;;  %4516 = vmatpush.msrb.mxu3 %v3753_v23  ;;  %v3974_v51 = vld [vmem:[#allocation16 + $0x9b0] sm:$0xff]  ;;  %v3941_v10 = vld [vmem:[#allocation16 + $0x8a8] sm:$0xff] }
 0x79c   : > { %4574 = vmatpush.msrb.mxu2 %v3966_v6  ;;  %4457 = vmatpush.msra.mxu0 %v3704_v50  ;;  %v3953_v16 = vld [vmem:[#allocation16 + $0x908] sm:$0xff]  ;;  %v3924_v6 = vld [vmem:[#allocation16 + $0x820] sm:$0xff] }
 0x79d   : > { %4477 = vmatpush.msra.mxu1 %v3720_v57  ;;  %4517 = vmatpush.msrb.mxu3 %v3752_v24  ;;  %v3973_v23 = vld [vmem:[#allocation16 + $0x9a8] sm:$0xff]  ;;  %v3940_v50 = vld [vmem:[#allocation16 + $0x8a0] sm:$0xff] }
 0x79e   : > { %4575 = vmatpush.msrb.mxu2 %v3965_v28  ;;  %4458 = vmatpush.msra.mxu0 %v3703_v43  ;;  %v3952_v57 = vld [vmem:[#allocation16 + $0x900] sm:$0xff]  ;;  %v4527_v28 = vrot.slane %v8616_v7, 4  ;;  %v4185_v43 = vld [vmem:[#allocation16 + $0xd78] sm:$0xff] }
 0x79f   : > { %4478 = vmatpush.msra.mxu1 %v3719_v30  ;;  %4518 = vmatpush.msrb.mxu3 %v3751_v19  ;;  %v3972_v24 = vld [vmem:[#allocation16 + $0x9a0] sm:$0xff]  ;;  %v3923_v30 = vld [vmem:[#allocation16 + $0x818] sm:$0xff] }
 0x7a0   : > { %4576 = vmatpush.msrb.mxu2 %v3964_v26  ;;  %4459 = vmatpush.msra.mxu0 %v3702_v29  ;;  %v3939_v19 = vld [vmem:[#allocation16 + $0x898] sm:$0xff]  ;;  %v4184_v29 = vld [vmem:[#allocation16 + $0xd70] sm:$0xff] }
 0x7a1   : > { %4479 = vmatpush.msra.mxu1 %v3718_v27  ;;  %4519 = vmatpush.msrb.mxu3 %v3750_v44  ;;  %v3971_v26 = vld [vmem:[#allocation16 + $0x998] sm:$0xff]  ;;  %v3922_v27 = vld [vmem:[#allocation16 + $0x810] sm:$0xff] }
 0x7a2   : > { %4460 = vmatmul.f32.vlgmr.msra.gmra.mxu0 %v4436_v25  ;;  %4480 = vmatmul.f32.vlgmr.msra.gmra.mxu1 %v4437_v4  ;;  %v3938_v44 = vld [vmem:[#allocation16 + $0x890] sm:$0xff]  ;;  %v4183_v4 = vld [vmem:[#allocation16 + $0xd68] sm:$0xff] }
 0x7a3   : > { %4520 = vmatmul.f32.vlgmr.msrb.gmra.mxu3 %v4439_v36  ;;  %4533 = vmatpush.msrb.mxu0 %v3935_v35  ;;  %v3970_v25 = vld [vmem:[#allocation16 + $0x990] sm:$0xff]  ;;  %v3921_v35 = vld [vmem:[#allocation16 + $0x808] sm:$0xff] }
 0x7a4   : > { %4553 = vmatpush.msrb.mxu1 %v3951_v37  ;;  %4577 = vmatpush.msrb.mxu2 %v3963_v60  ;;  %v3937_v36 = vld [vmem:[#allocation16 + $0x888] sm:$0xff]  ;;  %v4182_v60 = vld [vmem:[#allocation16 + $0xd60] sm:$0xff] }
 0x7a5   : > { %4593 = vmatpush.msra.mxu3 %v3983_v14  ;;  %4534 = vmatpush.msrb.mxu0 %v3934_v32  ;;  %v3969_v37 = vld [vmem:[#allocation16 + $0x988] sm:$0xff]  ;;  %v3920_v14 = vld [vmem:[#allocation16 + $0x800] sm:$0xff] }
 0x7a6   : > { %4554 = vmatpush.msrb.mxu1 %v3950_v58  ;;  %4578 = vmatpush.msrb.mxu2 %v3962_v40  ;;  %v3936_v32 = vld [vmem:[#allocation16 + $0x880] sm:$0xff]  ;;  %v4525_v40 = vrot.slane %v8626_v59, 4 }
 0x7a7   : > { %4594 = vmatpush.msra.mxu3 %v3982_v53  ;;  %4535 = vmatpush.msrb.mxu0 %v3933_v15  ;;  %v3968_v58 = vld [vmem:[#allocation16 + $0x980] sm:$0xff]  ;;  %v4526_v53 = vrot.slane %v8629_v52, 4  ;;  %v4153_v15 = vld [vmem:[#allocation16 + $0xc78] sm:$0xff] }
 0x7a8   : > { %4555 = vmatpush.msrb.mxu1 %v3949_v45  ;;  %4579 = vmatpush.msrb.mxu2 %v3961_v46  ;;  %v4528_v45 = vrot.slane %v8632_v55, 4  ;;  %v4169_v46 = vld [vmem:[#allocation16 + $0xcf8] sm:$0xff] }
 0x7a9   : > { %4595 = vmatpush.msra.mxu3 %v3981_v8  ;;  %4536 = vmatpush.msrb.mxu0 %v3932_v13  ;;  %v4181_v8 = vld [vmem:[#allocation16 + $0xd58] sm:$0xff] }
 0x7aa   : > { %4556 = vmatpush.msrb.mxu1 %v3948_v2  ;;  %4580 = vmatpush.msrb.mxu2 %v3960_v3  ;;  %v4201_v13 = vld [vmem:[#allocation16 + $0xdf8] sm:$0xff]  ;;  %v4152_v2 = vld [vmem:[#allocation16 + $0xc70] sm:$0xff] }
 0x7ab   : > { %4596 = vmatpush.msra.mxu3 %v3980_v1  ;;  %4537 = vmatpush.msrb.mxu0 %v3931_v38  ;;  %v4168_v3 = vld [vmem:[#allocation16 + $0xcf0] sm:$0xff] }
 0x7ac   : > { %4557 = vmatpush.msrb.mxu1 %v3947_v41  ;;  %4581 = vmatpush.msrb.mxu2 %v3959_v54  ;;  %v4180_v1 = vld [vmem:[#allocation16 + $0xd50] sm:$0xff]  ;;  %v4151_v41 = vld [vmem:[#allocation16 + $0xc68] sm:$0xff] }
 0x7ad   : > { %4597 = vmatpush.msra.mxu3 %v3979_v61  ;;  %4538 = vmatpush.msrb.mxu0 %v3930_v11  ;;  %v4200_v38 = vld [vmem:[#allocation16 + $0xdf0] sm:$0xff]  ;;  %v4167_v54 = vld [vmem:[#allocation16 + $0xce8] sm:$0xff] }
 0x7ae   : > { %4558 = vmatpush.msrb.mxu1 %v3946_v33  ;;  %4582 = vmatpush.msrb.mxu2 %v3958_v42  ;;  %v4179_v61 = vld [vmem:[#allocation16 + $0xd48] sm:$0xff]  ;;  %v4150_v33 = vld [vmem:[#allocation16 + $0xc60] sm:$0xff] }
 0x7af   : > { %4598 = vmatpush.msra.mxu3 %v3978_v31  ;;  %4539 = vmatpush.msrb.mxu0 %v3929_v48  ;;  %v4199_v11 = vld [vmem:[#allocation16 + $0xde8] sm:$0xff]  ;;  %v4166_v42 = vld [vmem:[#allocation16 + $0xce0] sm:$0xff] }
 0x7b0   : > { %4559 = vmatpush.msrb.mxu1 %v3945_v49  ;;  %4583 = vmatpush.msrb.mxu2 %v3957_v20  ;;  %v4178_v31 = vld [vmem:[#allocation16 + $0xd40] sm:$0xff]  ;;  %v4149_v49 = vld [vmem:[#allocation16 + $0xc58] sm:$0xff] }
 0x7b1   : > { %4599 = vmatpush.msra.mxu3 %v3977_v17  ;;  %4540 = vmatpush.msrb.mxu0 %v3928_v63  ;;  %v4198_v48 = vld [vmem:[#allocation16 + $0xde0] sm:$0xff]  ;;  %v4165_v20 = vld [vmem:[#allocation16 + $0xcd8] sm:$0xff] }
 0x7b2   : > { %4560 = vmatpush.msrb.mxu1 %v3944_v62  ;;  %4584 = vmatpush.msrb.mxu2 %v3956_v39  ;;  %v4177_v17 = vld [vmem:[#allocation16 + $0xd38] sm:$0xff]  ;;  %v4148_v62 = vld [vmem:[#allocation16 + $0xc50] sm:$0xff] }
 0x7b3   : > { %4600 = vmatpush.msra.mxu3 %v3976_v56  ;;  %4541 = vmatpush.msrb.mxu0 %v3927_v21  ;;  %v4197_v63 = vld [vmem:[#allocation16 + $0xdd8] sm:$0xff]  ;;  %v4164_v39 = vld [vmem:[#allocation16 + $0xcd0] sm:$0xff] }
 0x7b4   : > { %4561 = vmatpush.msrb.mxu1 %v3943_v5  ;;  %4585 = vmatpush.msrb.mxu2 %v3955_v9  ;;  %v4176_v56 = vld [vmem:[#allocation16 + $0xd30] sm:$0xff]  ;;  %v4147_v5 = vld [vmem:[#allocation16 + $0xc48] sm:$0xff] }
 0x7b5   : > { %4601 = vmatpush.msra.mxu3 %v3975_v22  ;;  %4542 = vmatpush.msrb.mxu0 %v3926_v34  ;;  %v4196_v21 = vld [vmem:[#allocation16 + $0xdd0] sm:$0xff]  ;;  %v4163_v9 = vld [vmem:[#allocation16 + $0xcc8] sm:$0xff] }
 0x7b6   : > { %4562 = vmatpush.msrb.mxu1 %v3942_v12  ;;  %4586 = vmatpush.msrb.mxu2 %v3954_v18  ;;  %v4175_v22 = vld [vmem:[#allocation16 + $0xd28] sm:$0xff]  ;;  %v4146_v12 = vld [vmem:[#allocation16 + $0xc40] sm:$0xff] }
 0x7b7   : > { %4602 = vmatpush.msra.mxu3 %v3974_v51  ;;  %4543 = vmatpush.msrb.mxu0 %v3925_v47  ;;  %v4195_v34 = vld [vmem:[#allocation16 + $0xdc8] sm:$0xff]  ;;  %v4162_v18 = vld [vmem:[#allocation16 + $0xcc0] sm:$0xff] }
 0x7b8   : > { %4563 = vmatpush.msrb.mxu1 %v3941_v10  ;;  %4587 = vmatpush.msrb.mxu2 %v3953_v16  ;;  %v4174_v51 = vld [vmem:[#allocation16 + $0xd20] sm:$0xff]  ;;  %v4145_v10 = vld [vmem:[#allocation16 + $0xc38] sm:$0xff] }
 0x7b9   : > { %4603 = vmatpush.msra.mxu3 %v3973_v23  ;;  %4544 = vmatpush.msrb.mxu0 %v3924_v6  ;;  %v4194_v47 = vld [vmem:[#allocation16 + $0xdc0] sm:$0xff]  ;;  %v4161_v16 = vld [vmem:[#allocation16 + $0xcb8] sm:$0xff] }
 0x7ba   : > { %4564 = vmatpush.msrb.mxu1 %v3940_v50  ;;  %4588 = vmatpush.msrb.mxu2 %v3952_v57  ;;  %v4173_v23 = vld [vmem:[#allocation16 + $0xd18] sm:$0xff]  ;;  %v4144_v50 = vld [vmem:[#allocation16 + $0xc30] sm:$0xff] }
 0x7bb   : > { %4604 = vmatpush.msra.mxu3 %v3972_v24  ;;  %4589 = vmatmul.f32.vlgmr.msrb.gmra.mxu2 %v4527_v28  ;;  %v4193_v6 = vld [vmem:[#allocation16 + $0xdb8] sm:$0xff]  ;;  %v4160_v57 = vld [vmem:[#allocation16 + $0xcb0] sm:$0xff] }
 0x7bc   : > { %4661 = vmatpush.msra.mxu2 %v4185_v43  ;;  %4545 = vmatpush.msrb.mxu0 %v3923_v30  ;;  %v4172_v24 = vld [vmem:[#allocation16 + $0xd10] sm:$0xff]  ;;  %v4143_v43 = vld [vmem:[#allocation16 + $0xc28] sm:$0xff] }
 0x7bd   : > { %4565 = vmatpush.msrb.mxu1 %v3939_v19  ;;  %4605 = vmatpush.msra.mxu3 %v3971_v26  ;;  %v4192_v28 = vld [vmem:[#allocation16 + $0xdb0] sm:$0xff]  ;;  %v4159_v30 = vld [vmem:[#allocation16 + $0xca8] sm:$0xff] }
 0x7be   : > { %4662 = vmatpush.msra.mxu2 %v4184_v29  ;;  %4546 = vmatpush.msrb.mxu0 %v3922_v27  ;;  %v4171_v19 = vld [vmem:[#allocation16 + $0xd08] sm:$0xff]  ;;  %v4142_v29 = vld [vmem:[#allocation16 + $0xc20] sm:$0xff] }
 0x7bf   : > { %4566 = vmatpush.msrb.mxu1 %v3938_v44  ;;  %4606 = vmatpush.msra.mxu3 %v3970_v25  ;;  %v4191_v26 = vld [vmem:[#allocation16 + $0xda8] sm:$0xff]  ;;  %v4158_v27 = vld [vmem:[#allocation16 + $0xca0] sm:$0xff] }
 0x7c0   : > { %4663 = vmatpush.msra.mxu2 %v4183_v4  ;;  %4547 = vmatpush.msrb.mxu0 %v3921_v35  ;;  %v4170_v44 = vld [vmem:[#allocation16 + $0xd00] sm:$0xff]  ;;  %v4615_v4 = vrot.slane %v8616_v7, 6  ;;  %v4141_v35 = vld [vmem:[#allocation16 + $0xc18] sm:$0xff] }
 0x7c1   : > { %4567 = vmatpush.msrb.mxu1 %v3937_v36  ;;  %4607 = vmatpush.msra.mxu3 %v3969_v37  ;;  %v4190_v25 = vld [vmem:[#allocation16 + $0xda0] sm:$0xff]  ;;  %v4157_v36 = vld [vmem:[#allocation16 + $0xc98] sm:$0xff] }
 0x7c2   : > { %4664 = vmatpush.msra.mxu2 %v4182_v60  ;;  %4548 = vmatpush.msrb.mxu0 %v3920_v14  ;;  %v4189_v37 = vld [vmem:[#allocation16 + $0xd98] sm:$0xff]  ;;  %v4140_v60 = vld [vmem:[#allocation16 + $0xc10] sm:$0xff]  ;;  %v4138_v7 = vld [vmem:[#allocation16 + $0xc00] sm:$0xff] }
 0x7c3   : > { %4568 = vmatpush.msrb.mxu1 %v3936_v32  ;;  %4608 = vmatpush.msra.mxu3 %v3968_v58  ;;  %v4156_v14 = vld [vmem:[#allocation16 + $0xc90] sm:$0xff]  ;;  %v4139_v58 = vld [vmem:[#allocation16 + $0xc08] sm:$0xff] }
 0x7c4   : > { %4549 = vmatmul.f32.vlgmr.msrb.gmra.mxu0 %v4525_v40  ;;  %4569 = vmatmul.f32.vlgmr.msrb.gmra.mxu1 %v4526_v53  ;;  %v4188_v32 = vld [vmem:[#allocation16 + $0xd90] sm:$0xff]  ;;  %v4155_v40 = vld [vmem:[#allocation16 + $0xc88] sm:$0xff] }
 0x7c5   : > { %4609 = vmatmul.f32.vlgmr.msra.gmra.mxu3 %v4528_v45  ;;  %4621 = vmatpush.msra.mxu0 %v4153_v15  ;;  %v4187_v53 = vld [vmem:[#allocation16 + $0xd88] sm:$0xff]  ;;  %v4154_v15 = vld [vmem:[#allocation16 + $0xc80] sm:$0xff] }
 0x7c6   : > { %4641 = vmatpush.msra.mxu1 %v4169_v46  ;;  %4665 = vmatpush.msra.mxu2 %v4181_v8  ;;  %v4186_v45 = vld [vmem:[#allocation16 + $0xd80] sm:$0xff]  ;;  %v4613_v46 = vrot.slane %v8626_v59, 6  ;;  %v4614_v8 = vrot.slane %v8629_v52, 6 }
 0x7c7   : > { %4681 = vmatpush.msrb.mxu3 %v4201_v13  ;;  %4622 = vmatpush.msra.mxu0 %v4152_v2  ;;  %v4616_v13 = vrot.slane %v8632_v55, 6  ;;  %v3638_v2 = vpop.f32.mrf.mxu0 }
 0x7c8   : > { %4642 = vmatpush.msra.mxu1 %v4168_v3  ;;  %4666 = vmatpush.msra.mxu2 %v4180_v1  ;;  %v3658_v3 = vpop.f32.mrf.mxu1  ;;  %v3678_v1 = vpop.f32.mrf.mxu2 }
 0x7c9   : > { %4682 = vmatpush.msrb.mxu3 %v4200_v38  ;;  %4623 = vmatpush.msra.mxu0 %v4151_v41  ;;  %v3698_v38 = vpop.f32.mrf.mxu3 }
 0x7ca   : > { %4643 = vmatpush.msra.mxu1 %v4167_v54  ;;  %4667 = vmatpush.msra.mxu2 %v4179_v61 }
 0x7cb   : > { %4683 = vmatpush.msrb.mxu3 %v4199_v11  ;;  %4624 = vmatpush.msra.mxu0 %v4150_v33 }
 0x7cc   : > { %4644 = vmatpush.msra.mxu1 %v4166_v42  ;;  %4668 = vmatpush.msra.mxu2 %v4178_v31 }
 0x7cd   : > { %4684 = vmatpush.msrb.mxu3 %v4198_v48  ;;  %4625 = vmatpush.msra.mxu0 %v4149_v49 }
 0x7ce   : > { %4645 = vmatpush.msra.mxu1 %v4165_v20  ;;  %4669 = vmatpush.msra.mxu2 %v4177_v17 }
 0x7cf   : > { %4685 = vmatpush.msrb.mxu3 %v4197_v63  ;;  %4626 = vmatpush.msra.mxu0 %v4148_v62  ;;  %v3856_v41 = vpop.f32.mrf.mxu0  ;;  %v4708_v63 = vld [vmem:[%s10081_s13 + $0x18] sm:$0xff] }
 0x7d0   : > { %4646 = vmatpush.msra.mxu1 %v4164_v39  ;;  %4670 = vmatpush.msra.mxu2 %v4176_v56  ;;  %v3876_v54 = vpop.f32.mrf.mxu1  ;;  %v3896_v61 = vpop.f32.mrf.mxu2  ;;  %v4707_v39 = vld [vmem:[%s10081_s13 + $0x10] sm:$0xff]  ;;  %v4706_v56 = vld [vmem:[%s10081_s13 + $0x8] sm:$0xff] }
 0x7d1   : > { %4686 = vmatpush.msrb.mxu3 %v4196_v21  ;;  %4627 = vmatpush.msra.mxu0 %v4147_v5  ;;  %v3916_v11 = vpop.f32.mrf.mxu3 }
 0x7d2   : > { %4647 = vmatpush.msra.mxu1 %v4163_v9  ;;  %4671 = vmatpush.msra.mxu2 %v4175_v22  ;;  %v4705_v9 = vld [vmem:[%s10081_s13] sm:$0xff]  ;;  %v3877_v22 = vadd.f32 %v3876_v54, %v3856_v41  ;;  %v4355_v54 = vld [vmem:[#allocation18] sm:$0x1] }
 0x7d3   : > { %4687 = vmatpush.msrb.mxu3 %v4195_v34  ;;  %4628 = vmatpush.msra.mxu0 %v4146_v12  ;;  %v4736_v12 = vld [vmem:[#allocation21 + $0x8] sm:$0x3f] }
 0x7d4   : > { %4648 = vmatpush.msra.mxu1 %v4162_v18  ;;  %4672 = vmatpush.msra.mxu2 %v4174_v51  ;;  %v4737_v18 = vld [vmem:[#allocation21 + $0x10] sm:$0x3f]  ;;  %v3659_v51 = vadd.f32 %v3658_v3, %v3638_v2 }
 0x7d5   : > { %4688 = vmatpush.msrb.mxu3 %v4194_v47  ;;  %4629 = vmatpush.msra.mxu0 %v4145_v10 }
 0x7d6   : > { %4649 = vmatpush.msra.mxu1 %v4161_v16  ;;  %4673 = vmatpush.msra.mxu2 %v4173_v23  ;;  %v3897_v16 = vadd.f32 %v3896_v61, %v3877_v22  ;;  %v4939_v22 = vld [vmem:[#allocation22 + $0x38] sm:$0x3f] }
 0x7d7   : > { %4689 = vmatpush.msrb.mxu3 %v4193_v6  ;;  %4630 = vmatpush.msra.mxu0 %v4144_v50  ;;  %v4074_v33 = vpop.f32.mrf.mxu0  ;;  %v3679_v6 = vadd.f32 %v3678_v1, %v3659_v51 }
 0x7d8   : > { %4650 = vmatpush.msra.mxu1 %v4160_v57  ;;  %4674 = vmatpush.msra.mxu2 %v4172_v24  ;;  %v4094_v59 = vpop.f32.mrf.mxu1  ;;  %v4114_v42 = vpop.f32.mrf.mxu2  ;;  %v3917_v50 = vadd.f32 %v3916_v11, %v3897_v16 }
 0x7d9   : > { %4690 = vmatpush.msrb.mxu3 %v4192_v28  ;;  %4631 = vmatpush.msra.mxu0 %v4143_v43  ;;  %v4134_v31 = vpop.f32.mrf.mxu3  ;;  %v4095_v47 = vadd.f32 %v4094_v59, %v4074_v33  ;;  %v3699_v43 = vadd.f32 %v3698_v38, %v3679_v6  ;;  %v4735_v59 = vld [vmem:[#allocation21] sm:$0x3f] }
 0x7da   : > { %4651 = vmatpush.msra.mxu1 %v4159_v30  ;;  %4675 = vmatpush.msra.mxu2 %v4171_v19 }
 0x7db   : > { %4691 = vmatpush.msrb.mxu3 %v4191_v26  ;;  %4632 = vmatpush.msra.mxu0 %v4142_v29  ;;  %v4115_v57 = vadd.f32 %v4114_v42, %v4095_v47  ;;  %v4738_v42 = vld [vmem:[#allocation21 + $0x18] sm:$0x3f] }
 0x7dc   : > { %4652 = vmatpush.msra.mxu1 %v4158_v27  ;;  %4676 = vmatpush.msra.mxu2 %v4170_v44 }
 0x7dd   : > { %4692 = vmatpush.msrb.mxu3 %v4190_v25  ;;  %4677 = vmatmul.f32.vlgmr.msra.gmra.mxu2 %v4615_v4  ;;  %v4135_v30 = vadd.f32 %v4134_v31, %v4115_v57  ;;  %v4740_v31 = vld [vmem:[#allocation21 + $0x28] sm:$0x3f] }
 0x7de   : > { %4633 = vmatpush.msra.mxu0 %v4141_v35  ;;  %4653 = vmatpush.msra.mxu1 %v4157_v36 }
 0x7df   : > { %4693 = vmatpush.msrb.mxu3 %v4189_v37  ;;  %v4292_v48 = vpop.f32.mrf.mxu0  ;;  %6970 = vmatpush.msk.msrb.mxu2 %vm4747_vm5, %v4736_v12 }
 0x7e0   : > { %4634 = vmatpush.msra.mxu0 %v4140_v60  ;;  %4654 = vmatpush.msra.mxu1 %v4156_v14  ;;  %v4312_v52 = vpop.f32.mrf.mxu1  ;;  %v4332_v49 = vpop.f32.mrf.mxu2 }
 0x7e1   : > { %4694 = vmatpush.msrb.mxu3 %v4188_v32  ;;  %v4313_v28 = vadd.f32 %v4312_v52, %v4292_v48  ;;  %v4741_v48 = vld [vmem:[#allocation21 + $0x30] sm:$0x3f]  ;;  %v4739_v52 = vld [vmem:[#allocation21 + $0x20] sm:$0x3f]  ;;  %6978 = vmatpush.msk.msra.mxu2 %vm4747_vm5, %v4740_v31 }
 0x7e2   : > { %4635 = vmatpush.msra.mxu0 %v4139_v58  ;;  %4655 = vmatpush.msra.mxu1 %v4155_v40  ;;  %v4352_v55 = vpop.f32.mrf.mxu3 }
 0x7e3   : > { %4695 = vmatpush.msrb.mxu3 %v4187_v53  ;;  %v4333_v25 = vadd.f32 %v4332_v49, %v4313_v28  ;;  %v4742_v49 = vld [vmem:[#allocation21 + $0x38] sm:$0x3f] }
 0x7e4   : > { %4636 = vmatpush.msra.mxu0 %v4138_v7  ;;  %4656 = vmatpush.msra.mxu1 %v4154_v15 }
 0x7e5   : > { %4696 = vmatpush.msrb.mxu3 %v4186_v45  ;;  %4637 = vmatmul.f32.vlgmr.msra.gmra.mxu0 %v4613_v46  ;;  %v4353_v35 = vadd.f32 %v4352_v55, %v4333_v25  ;;  %v4709_v55 = vld [vmem:[#allocation19] sm:$0x1] }
 0x7e6   : > { %4657 = vmatmul.f32.vlgmr.msra.gmra.mxu1 %v4614_v8  ;;  %4697 = vmatmul.f32.vlgmr.msrb.gmra.mxu3 %v4616_v13 }
 0x7e7   : > { %4725 = vmatpush.msrb.mxu0 %v4708_v63  ;;  %6972 = vmatpush.msk.msra.mxu3 %vm4747_vm5, %v4737_v18  ;;  %v4933_v63 = vld [vmem:[#allocation22 + $0x8] sm:$0x3f] }
 0x7e8   : > { %6968 = vmatpush.msk.msrb.mxu1 %vm4747_vm5, %v4735_v59 }
 0x7e9   : > { %4726 = vmatpush.msrb.mxu0 %v4707_v39  ;;  %6980 = vmatpush.msk.msrb.mxu3 %vm4747_vm5, %v4741_v48  ;;  %v4932_v39 = vld [vmem:[#allocation22] sm:$0x3f] }
 0x7ea   : > { %6976 = vmatpush.msk.msra.mxu1 %vm4747_vm5, %v4739_v52 }
 0x7eb   : > { %4727 = vmatpush.msrb.mxu0 %v4706_v56  ;;  %v4935_v56 = vld [vmem:[#allocation22 + $0x18] sm:$0x3f] }
 0x7ed   : > { %4728 = vmatpush.msrb.mxu0 %v4705_v9  ;;  %v4938_v9 = vld [vmem:[#allocation22 + $0x30] sm:$0x3f] }
 0x7ef   : > { %6974 = vmatpush.msk.msra.mxu0 %vm4747_vm5, %v4738_v42 }
 0x7fa   : > { %v4413_v62 = vpop.f32.mrf.mxu2 }
 0x7fd   : > { %v4373_v20 = vpop.f32.mrf.mxu0  ;;  %v4393_v17 = vpop.f32.mrf.mxu1 }
 0x7fe   : > { %v4374_v29 = vadd.f32 %v4373_v20, %v3699_v43 }
 0x800   : > { %v4394_v37 = vadd.f32 %v4393_v17, %v4374_v29 }
 0x802   : > { %v4414_v7 = vadd.f32 %v4413_v62, %v4394_v37  ;;  %v4934_v62 = vld [vmem:[#allocation22 + $0x10] sm:$0x3f] }
 0x804   : > { %v4433_v21 = vpop.f32.mrf.mxu3 }
 0x805   : > { %v4434_v2 = vadd.f32 %v4433_v21, %v4414_v7  ;;  %v4936_v21 = vld [vmem:[#allocation22 + $0x20] sm:$0x3f] }
 0x81c   : > { %v4501_v10 = vpop.f32.mrf.mxu2 }
 0x81f   : > { %v4461_v5 = vpop.f32.mrf.mxu0  ;;  %v4481_v34 = vpop.f32.mrf.mxu1 }
 0x820   : > { %v4462_v19 = vadd.f32 %v4461_v5, %v3917_v50  ;;  %v4937_v5 = vld [vmem:[#allocation22 + $0x28] sm:$0x3f] }
 0x822   : > { %v4482_v4 = vadd.f32 %v4481_v34, %v4462_v19 }
 0x824   : > { %v4502_v58 = vadd.f32 %v4501_v10, %v4482_v4 }
 0x826   : > { %v4521_v23 = vpop.f32.mrf.mxu3 }
 0x827   : > { %v4522_v8 = vadd.f32 %v4521_v23, %v4502_v58  ;;  %v5173_v23 = vshrl.u32 %v1822_v0, 7 }
 0x829   : > { %v4524_v38 = vadd.f32 %v4522_v8, %v4434_v2  ;;  %v5174_v28 = vadd.s32 8, %v5173_v23  ;;  %v5175_v43 = vadd.s32 16, %v5173_v23  ;;  %v5176_v19 = vadd.s32 24, %v5173_v23 }
 0x82b   : > { %v8733_v25 = vcvt.s32.f32 %v5174_v28 }
 0x83e   : > { %v4590_v27 = vpop.f32.mrf.mxu2 }
 0x841   : > { %v4550_v24 = vpop.f32.mrf.mxu0  ;;  %v4570_v26 = vpop.f32.mrf.mxu1 }
 0x842   : > { %v4551_v44 = vadd.f32 %v4550_v24, %v4135_v30 }
 0x844   : > { %v4571_v60 = vadd.f32 %v4570_v26, %v4551_v44  ;;  %v8731_v44 = vcvt.s32.f32 %v5173_v23 }
 0x846   : > { %v4591_v15 = vadd.f32 %v4590_v27, %v4571_v60 }
 0x848   : > { %v4610_v36 = vpop.f32.mrf.mxu3 }
 0x849   : > { %v4611_v3 = vadd.f32 %v4610_v36, %v4591_v15 }
 0x860   : > { %v4678_v45 = vpop.f32.mrf.mxu2 }
 0x862   : > { %v4638_v14 = vpop.f32.mrf.mxu0 }
 0x863   : > { %v4639_v32 = vadd.f32 %v4638_v14, %v4353_v35  ;;  %v4658_v40 = vpop.f32.mrf.mxu1  ;;  %v8735_v35 = vcvt.s32.f32 %v5175_v43  ;;  %v8739_v14 = vcvt.s32.f32 %v5176_v19 }
 0x865   : > { %v4659_v53 = vadd.f32 %v4658_v40, %v4639_v32 }
 0x867   : > { %v4679_v46 = vadd.f32 %v4678_v45, %v4659_v53 }
 0x869   : > { %v4698_v13 = vpop.f32.mrf.mxu3 }
 0x86a   : > { %v4699_v1 = vadd.f32 %v4698_v13, %v4679_v46 }
 0x86c   : > { %v4701_v41 = vadd.f32 %v4699_v1, %v4611_v3 }
 0x86e   : > { %v4702_v61 = vadd.f32 %v4701_v41, %v4524_v38 }
 0x870   : > { %v4703_v11 = vadd.f32 %v4702_v61, %v4355_v54 }
 0x872   : > { %v4704_v33 = vmax.f32 %v4703_v11, 0.0 }
 0x874   : > { %6967 = vmatmul.msk.f32.vlgmr.msrb.gmra.mxu0 %vm874_vm0, %v4704_v33 }
 0x875   : > { %6982 = vmatpush.msk.msrb.mxu0 %vm4747_vm5, %v4742_v49 }
 0x8f1   : > { %v4730_v20 = vpop.f32.mrf.mxu0 }
 0x8f2   : > { %v4731_v17 = vadd.f32 %v4730_v20, %v4709_v55 }
 0x8f4   : > { %4734 = vst.msk [vmem:[%s865_s25] sm:$0x1] %vm4733_vm6, %v4731_v17  ;;  %6969 = vmatmul.msk.f32.vlgmr.msrb.gmra.mxu1 %vm4743_vm7, %v4731_v17  ;;  %6971 = vmatmul.msk.f32.vlgmr.msrb.gmra.mxu2 %vm4743_vm7, %v4731_v17 }
 0x8f5   : > { %6973 = vmatmul.msk.f32.vlgmr.msra.gmra.mxu3 %vm4743_vm7, %v4731_v17  ;;  %6975 = vmatmul.msk.f32.vlgmr.msra.gmra.mxu0 %vm4743_vm7, %v4731_v17 }
 0x8f6   : > { %6986 = vmatpush.msk.msrb.mxu2 %vm4747_vm5, %v4933_v63  ;;  %6988 = vmatpush.msk.msra.mxu3 %vm4747_vm5, %v4934_v62 }
 0x8f7   : > { %6984 = vmatpush.msk.msrb.mxu1 %vm4747_vm5, %v4932_v39  ;;  %6990 = vmatpush.msk.msra.mxu0 %vm4747_vm5, %v4935_v56 }
 0x8fc   : > { %6977 = vmatmul.msk.f32.vlgmr.msra.gmra.mxu1 %vm4743_vm7, %v4731_v17  ;;  %6979 = vmatmul.msk.f32.vlgmr.msra.gmra.mxu2 %vm4743_vm7, %v4731_v17 }
 0x8fd   : > { %6981 = vmatmul.msk.f32.vlgmr.msrb.gmra.mxu3 %vm4743_vm7, %v4731_v17  ;;  %6983 = vmatmul.msk.f32.vlgmr.msrb.gmra.mxu0 %vm4743_vm7, %v4731_v17 }
 0x8fe   : > { %6992 = vmatpush.msk.msra.mxu1 %vm4747_vm5, %v4936_v21  ;;  %6994 = vmatpush.msk.msra.mxu2 %vm4747_vm5, %v4937_v5 }
 0x8ff   : > { %6996 = vmatpush.msk.msrb.mxu3 %vm4747_vm5, %v4938_v9  ;;  %6998 = vmatpush.msk.msrb.mxu0 %vm4747_vm5, %v4939_v22 }
 0x904   : > { %6985 = vmatmul.msk.f32.vlgmr.msrb.gmra.mxu1 %vm4743_vm7, %v4731_v17  ;;  %6987 = vmatmul.msk.f32.vlgmr.msrb.gmra.mxu2 %vm4743_vm7, %v4731_v17 }
 0x905   : > { %6989 = vmatmul.msk.f32.vlgmr.msra.gmra.mxu3 %vm4743_vm7, %v4731_v17  ;;  %6991 = vmatmul.msk.f32.vlgmr.msra.gmra.mxu0 %vm4743_vm7, %v4731_v17 }
 0x90c   : > { %6993 = vmatmul.msk.f32.vlgmr.msra.gmra.mxu1 %vm4743_vm7, %v4731_v17  ;;  %6995 = vmatmul.msk.f32.vlgmr.msra.gmra.mxu2 %vm4743_vm7, %v4731_v17 }
 0x90d   : > { %6997 = vmatmul.msk.f32.vlgmr.msrb.gmra.mxu3 %vm4743_vm7, %v4731_v17  ;;  %6999 = vmatmul.msk.f32.vlgmr.msrb.gmra.mxu0 %vm4743_vm7, %v4731_v17 }
 0x971   : > { %v8714_v34 = vpop.f32.mrf.mxu1 }
 0x972   : > { %v8716_v12 = vpop.f32.mrf.mxu0 }
 0x977   : > { %v8718_v18 = vpop.f32.mrf.mxu2 }
 0x978   : > { %v8720_v51 = vpop.f32.mrf.mxu3 }
 0x979   : > { %v8722_v47 = vpop.f32.mrf.mxu1 }
 0x97a   : > { %10112 = vst [vmem:[#allocation34_spill] sm:$0xff] %v8722_v47  ;;  %v8724_v10 = vpop.f32.mrf.mxu0 }
 0x97b   : > { %10113 = vst [vmem:[#allocation35_spill] sm:$0xff] %v8724_v10 }
 0x97f   : > { %v8726_v16 = vpop.f32.mrf.mxu2 }
 0x980   : > { %10114 = vst [vmem:[#allocation36_spill] sm:$0xff] %v8726_v16  ;;  %v8729_v6 = vpop.f32.mrf.mxu3 }
 0x981   : > { %10115 = vst [vmem:[#allocation37_spill] sm:$0xff] %v8729_v6  ;;  %v4981_v50 = vpop.f32.mrf.mxu1 }
 0x982   : > { %v5041_v57 = vpop.f32.mrf.mxu0  ;;  %v4982_v24 = vadd.f32 15.5, %v4981_v50 }
 0x983   : > { %v5042_v26 = vadd.f32 15.5, %v5041_v57 }
 0x984   : > { %v5132_v30 = vfloor.f32 %v4982_v24 }
 0x985   : > { %v5135_v58 = vfloor.f32 %v5042_v26 }
 0x986   : > { %v5156_v29 = vsub.f32 %v4982_v24, %v5132_v30  ;;  %v8737_v36 = vperm.slane %v5132_v30, 0  ;;  %v5325_v37 = vadd.f32 1.0, %v5132_v30 }
 0x987   : > { %v5001_v27 = vpop.f32.mrf.mxu2  ;;  %v5159_v46 = vsub.f32 %v5042_v26, %v5135_v58  ;;  %v8747_v8 = vperm.slane %v5135_v58, 0  ;;  %v5328_v13 = vadd.f32 1.0, %v5135_v58 }
 0x988   : > { %v5021_v4 = vpop.f32.mrf.mxu3  ;;  %v5164_v0 = vsub.f32 1.0, %v5156_v29  ;;  %v8741_v32 = vperm.slane %v5156_v29, 0  ;;  %v8745_v7 = vperm.slane %v5325_v37, 0  ;;  %v5002_v15 = vadd.f32 15.5, %v5001_v27 }
 0x989   : > { %v5061_v60 = vpop.f32.mrf.mxu1  ;;  %v5022_v45 = vadd.f32 15.5, %v5021_v4  ;;  %vm5213_vm8 = vcmp.eq.f32.partialorder %v8739_v14, %v8737_v36  ;;  %v5167_v41 = vsub.f32 1.0, %v5159_v46  ;;  %v8751_v54 = vperm.slane %v5328_v13, 0 }
 0x98a   : > { %v5121_v40 = vpop.f32.mrf.mxu0  ;;  %v8743_v53 = vperm.slane %v5164_v0, 0  ;;  %v5062_v2 = vadd.f32 15.5, %v5061_v60  ;;  %v5133_v3 = vfloor.f32 %v5002_v15  ;;  %v8753_v61 = vperm.slane %v5159_v46, 0 }
 0x98b   : > { %v5134_v1 = vfloor.f32 %v5022_v45  ;;  %v5122_v38 = vadd.f32 15.5, %v5121_v40  ;;  %v8757_v48 = vperm.slane %v5167_v41, 0  ;;  %v7948_v29 = vmov 0.0  }
 0x98c   : > { %v5136_v11 = vfloor.f32 %v5062_v2  ;;  %v5157_v33 = vsub.f32 %v5002_v15, %v5133_v3  ;;  %v8755_v59 = vperm.slane %v5133_v3, 0  ;;  %v5326_v42 = vadd.f32 1.0, %v5133_v3 }
 0x98d   : > { %v5158_v31 = vsub.f32 %v5022_v45, %v5134_v1  ;;  %v8759_v52 = vperm.slane %v5134_v1, 0  ;;  %v5327_v49 = vadd.f32 1.0, %v5134_v1  ;;  %v5139_v43 = vfloor.f32 %v5122_v38 }
 0x98e   : > { %v5160_v55 = vsub.f32 %v5062_v2, %v5136_v11  ;;  %v5165_v20 = vsub.f32 1.0, %v5157_v33  ;;  %v8761_v17 = vperm.slane %v5326_v42, 0  ;;  %v8763_v63 = vperm.slane %v5157_v33, 0 }
 0x98f   : > { %v5166_v62 = vsub.f32 1.0, %v5158_v31  ;;  %v5081_v39 = vpop.f32.mrf.mxu2  ;;  %v8765_v21 = vperm.slane %v5327_v49, 0  ;;  %v8767_v5 = vperm.slane %v5158_v31, 0  ;;  %v8769_v22 = vperm.slane %v5136_v11, 0 }
 0x990   : > { %v5101_v56 = vpop.f32.mrf.mxu3  ;;  %v5168_v9 = vsub.f32 1.0, %v5160_v55  ;;  %v8771_v23 = vperm.slane %v5165_v20, 0  ;;  %v5329_v57 = vadd.f32 1.0, %v5136_v11  ;;  %v8775_v24 = vperm.slane %v5160_v55, 0 }
 0x991   : > { %v8773_v50 = vperm.slane %v5166_v62, 0  ;;  %v5082_v30 = vadd.f32 15.5, %v5081_v39  ;;  %v5102_v19 = vadd.f32 15.5, %v5101_v56  ;;  %v7024_v27 = vsel %vm5213_vm8, 1.0, %v7948_v29 }
 0x992   : > { %v8777_v28 = vperm.slane %v5168_v9, 0  ;;  %v8779_v26 = vperm.slane %v5329_v57, 0  ;;  %vm5365_vm9 = vcmp.eq.f32.partialorder %v8739_v14, %v8745_v7  ;;  %vm5216_vm10 = vcmp.eq.f32.partialorder %v8739_v14, %v8747_v8 }
 0x993   : > { %v5163_v4 = vsub.f32 %v5122_v38, %v5139_v43  ;;  %v8789_v0 = vperm.slane %v5139_v43, 0  ;;  %v5332_v37 = vadd.f32 1.0, %v5139_v43  ;;  %v5137_v60 = vfloor.f32 %v5082_v30 }
 0x994   : > { %v5138_v58 = vfloor.f32 %v5102_v19  ;;  %v5317_v40 = vmul.f32 %v7024_v27, %v8743_v53  ;;  %v7056_v15 = vsel %vm5365_vm9, 1.0, %v7948_v29  ;;  %v7027_v45 = vsel %vm5216_vm10, 1.0, %v7948_v29 }
 0x995   : > { %v5171_v46 = vsub.f32 1.0, %v5163_v4  ;;  %v8794_v13 = vperm.slane %v5332_v37, 0  ;;  %v8796_v2 = vperm.slane %v5163_v4, 0  ;;  %v5161_v3 = vsub.f32 %v5082_v30, %v5137_v60 }
 0x996   : > { %v8798_v1 = vperm.slane %v5137_v60, 0  ;;  %v5330_v38 = vadd.f32 1.0, %v5137_v60  ;;  %v5162_v41 = vsub.f32 %v5102_v19, %v5138_v58  ;;  %v8800_v11 = vperm.slane %v5138_v58, 0 }
 0x997   : > { %v8802_v33 = vperm.slane %v5171_v46, 0  ;;  %v5169_v42 = vsub.f32 1.0, %v5161_v3  ;;  %v8804_v31 = vperm.slane %v5161_v3, 0  ;;  %v5331_v49 = vadd.f32 1.0, %v5138_v58 }
 0x998   : > { %v8806_v55 = vperm.slane %v5330_v38, 0  ;;  %v5170_v20 = vsub.f32 1.0, %v5162_v41  ;;  %v8808_v62 = vperm.slane %v5162_v41, 0  ;;  %v5469_v39 = vmul.f32 %v7056_v15, %v8741_v32 }
 0x999   : > { %v8811_v56 = vperm.slane %v5169_v42, 0  ;;  %v8813_v9 = vperm.slane %v5331_v49, 0  ;;  %v5320_v57 = vmul.f32 %v7027_v45, %v8757_v48  ;;  %vm5368_vm11 = vcmp.eq.f32.partialorder %v8739_v14, %v8751_v54 }
 0x99a   : > { %v8818_v43 = vperm.slane %v5170_v20, 0  ;;  %v5501_v30 = vadd.f32 %v5469_v39, %v5317_v40  ;;  %v7059_v19 = vsel %vm5368_vm11, 1.0, %v7948_v29  ;;  %vm5205_vm12 = vcmp.eq.f32.partialorder %v8735_v35, %v8737_v36 }
 0x99b   : > { %v5472_v27 = vmul.f32 %v7059_v19, %v8753_v61  ;;  %v7016_v4 = vsel %vm5205_vm12, 1.0, %v7948_v29  ;;  %vm5357_vm13 = vcmp.eq.f32.partialorder %v8735_v35, %v8745_v7  ;;  %vm5208_vm14 = vcmp.eq.f32.partialorder %v8735_v35, %v8747_v8 }
 0x99c   : > { %5569 = vmatpush.msrb.mxu1 %v5501_v30  ;;  %v5309_v37 = vmul.f32 %v7016_v4, %v8743_v53  ;;  %v7048_v60 = vsel %vm5357_vm13, 1.0, %v7948_v29  ;;  %v7019_v58 = vsel %vm5208_vm14, 1.0, %v7948_v29  ;;  %vm5360_vm15 = vcmp.eq.f32.partialorder %v8735_v35, %v8751_v54 }
 0x99d   : > { %v5504_v40 = vadd.f32 %v5472_v27, %v5320_v57  ;;  %v5461_v15 = vmul.f32 %v7048_v60, %v8741_v32  ;;  %v5312_v45 = vmul.f32 %v7019_v58, %v8757_v48  ;;  %v7051_v46 = vsel %vm5360_vm15, 1.0, %v7948_v29 }
 0x99e   : > { %v5464_v3 = vmul.f32 %v7051_v46, %v8753_v61  ;;  %vm5197_vm2 = vcmp.eq.f32.partialorder %v8733_v25, %v8737_v36  ;;  %vm5349_vm3 = vcmp.eq.f32.partialorder %v8733_v25, %v8745_v7  ;;  %vm5200_vm4 = vcmp.eq.f32.partialorder %v8733_v25, %v8747_v8  ;;  %v8881_v46 = vld [vmem:[%s8862_s0] sm:$0xff] }
 0x99f   : > { %5728 = vmatpush.msra.mxu0 %v5504_v40  ;;  %v5493_v38 = vadd.f32 %v5461_v15, %v5309_v37  ;;  %v7008_v41 = vsel %vm5197_vm2, 1.0, %v7948_v29  ;;  %v7040_v42 = vsel %vm5349_vm3, 1.0, %v7948_v29  ;;  %v7011_v49 = vsel %vm5200_vm4, 1.0, %v7948_v29 }
 0x9a0   : > { %v5496_v20 = vadd.f32 %v5464_v3, %v5312_v45  ;;  %v5301_v39 = vmul.f32 %v7008_v41, %v8743_v53  ;;  %v5453_v57 = vmul.f32 %v7040_v42, %v8741_v32  ;;  %v5304_v30 = vmul.f32 %v7011_v49, %v8757_v48 }
 0x9a1   : > { %5570 = vmatpush.msrb.mxu1 %v5493_v38  ;;  %vm5352_vm5 = vcmp.eq.f32.partialorder %v8733_v25, %v8751_v54  ;;  %vm5189_vm6 = vcmp.eq.f32.partialorder %v8731_v44, %v8737_v36  ;;  %vm5341_vm7 = vcmp.eq.f32.partialorder %v8731_v44, %v8745_v7  ;;  %vm5214_vm8 = vcmp.eq.f32.partialorder %v8739_v14, %v8755_v59 }
 0x9a2   : > { %5729 = vmatpush.msra.mxu0 %v5496_v20  ;;  %v5485_v19 = vadd.f32 %v5453_v57, %v5301_v39  ;;  %v7043_v27 = vsel %vm5352_vm5, 1.0, %v7948_v29  ;;  %v7000_v4 = vsel %vm5189_vm6, 1.0, %v7948_v29  ;;  %v7032_v36 = vsel %vm5341_vm7, 1.0, %v7948_v29 }
 0x9a3   : > { %v5456_v37 = vmul.f32 %v7043_v27, %v8753_v61  ;;  %v5293_v7 = vmul.f32 %v7000_v4, %v8743_v53  ;;  %v5445_v60 = vmul.f32 %v7032_v36, %v8741_v32  ;;  %v7025_v58 = vsel %vm5214_vm8, 1.0, %v7948_v29 }
 0x9a4   : > { %5571 = vmatpush.msrb.mxu1 %v5485_v19  ;;  %v5318_v40 = vmul.f32 %v7025_v58, %v8771_v23  ;;  %vm5366_vm9 = vcmp.eq.f32.partialorder %v8739_v14, %v8761_v17  ;;  %vm5215_vm10 = vcmp.eq.f32.partialorder %v8739_v14, %v8759_v52  ;;  %vm5367_vm11 = vcmp.eq.f32.partialorder %v8739_v14, %v8765_v21 }
 0x9a5   : > { %v5488_v15 = vadd.f32 %v5456_v37, %v5304_v30  ;;  %v5477_v45 = vadd.f32 %v5445_v60, %v5293_v7  ;;  %v7057_v53 = vsel %vm5366_vm9, 1.0, %v7948_v29  ;;  %v7026_v32 = vsel %vm5215_vm10, 1.0, %v7948_v29 }
 0x9a6   : > { %v5470_v3 = vmul.f32 %v7057_v53, %v8763_v63  ;;  %v5319_v38 = vmul.f32 %v7026_v32, %v8773_v50  ;;  %v7058_v41 = vsel %vm5367_vm11, 1.0, %v7948_v29  ;;  %vm5192_vm12 = vcmp.eq.f32.partialorder %v8731_v44, %v8747_v8 }
 0x9a7   : > { %5730 = vmatpush.msra.mxu0 %v5488_v15  ;;  %5572 = vmatpush.msrb.mxu1 %v5477_v45  ;;  %v5471_v42 = vmul.f32 %v7058_v41, %v8767_v5  ;;  %v7003_v49 = vsel %vm5192_vm12, 1.0, %v7948_v29  ;;  %vm5344_vm13 = vcmp.eq.f32.partialorder %v8731_v44, %v8751_v54  ;;  %vm5206_vm14 = vcmp.eq.f32.partialorder %v8735_v35, %v8755_v59  ;;  %v8923_v45 = vld [vmem:[%s8862_s0 + $0x8] sm:$0xff] }
 0x9a8   : > { %v5502_v20 = vadd.f32 %v5470_v3, %v5318_v40  ;;  %v5296_v39 = vmul.f32 %v7003_v49, %v8757_v48  ;;  %v7035_v57 = vsel %vm5344_vm13, 1.0, %v7948_v29  ;;  %7064 = vmatmul.msk.f32.vlgmr.msrb.gmra.mxu1 %vm874_vm0, %v8881_v46  ;;  %v7017_v8 = vsel %vm5206_vm14, 1.0, %v7948_v29 }
 0x9a9   : > { %v5503_v30 = vadd.f32 %v5471_v42, %v5319_v38  ;;  %v5448_v19 = vmul.f32 %v7035_v57, %v8753_v61  ;;  %v5310_v27 = vmul.f32 %v7017_v8, %v8771_v23  ;;  %vm5358_vm15 = vcmp.eq.f32.partialorder %v8735_v35, %v8761_v17 }
 0x9aa   : > { %5622 = vmatpush.msrb.mxu2 %v5502_v20  ;;  %v7049_v54 = vsel %vm5358_vm15, 1.0, %v7948_v29  ;;  %vm5207_vm2 = vcmp.eq.f32.partialorder %v8735_v35, %v8759_v52  ;;  %vm5359_vm3 = vcmp.eq.f32.partialorder %v8735_v35, %v8765_v21  ;;  %vm5217_vm4 = vcmp.eq.f32.partialorder %v8739_v14, %v8769_v22 }
 0x9ab   : > { %5675 = vmatpush.msra.mxu3 %v5503_v30  ;;  %v5480_v61 = vadd.f32 %v5448_v19, %v5296_v39  ;;  %v5462_v48 = vmul.f32 %v7049_v54, %v8763_v63  ;;  %v7018_v4 = vsel %vm5207_vm2, 1.0, %v7948_v29  ;;  %v7050_v36 = vsel %vm5359_vm3, 1.0, %v7948_v29 }
 0x9ac   : > { %v5311_v37 = vmul.f32 %v7018_v4, %v8773_v50  ;;  %v5463_v7 = vmul.f32 %v7050_v36, %v8767_v5  ;;  %v7028_v60 = vsel %vm5217_vm4, 1.0, %v7948_v29  ;;  %vm5369_vm5 = vcmp.eq.f32.partialorder %v8739_v14, %v8779_v26 }
 0x9ad   : > { %5731 = vmatpush.msra.mxu0 %v5480_v61  ;;  %v5494_v58 = vadd.f32 %v5462_v48, %v5310_v27  ;;  %v5321_v40 = vmul.f32 %v7028_v60, %v8777_v28  ;;  %v7060_v15 = vsel %vm5369_vm5, 1.0, %v7948_v29  ;;  %vm5220_vm6 = vcmp.eq.f32.partialorder %v8739_v14, %v8789_v0 }
 0x9ae   : > { %7100 = vmatmul.msk.f32.vlgmr.msra.gmra.mxu0 %vm874_vm0, %v8881_v46  ;;  %v5495_v53 = vadd.f32 %v5463_v7, %v5311_v37  ;;  %v5473_v32 = vmul.f32 %v7060_v15, %v8775_v24  ;;  %v7031_v3 = vsel %vm5220_vm6, 1.0, %v7948_v29  ;;  %vm5372_vm7 = vcmp.eq.f32.partialorder %v8739_v14, %v8794_v13 }
 0x9af   : > { %5623 = vmatpush.msrb.mxu2 %v5494_v58  ;;  %v5324_v38 = vmul.f32 %v7031_v3, %v8802_v33  ;;  %v7063_v41 = vsel %vm5372_vm7, 1.0, %v7948_v29  ;;  %vm5198_vm8 = vcmp.eq.f32.partialorder %v8733_v25, %v8755_v59  ;;  %vm5350_vm9 = vcmp.eq.f32.partialorder %v8733_v25, %v8761_v17 }
 0x9b0   : > { %5676 = vmatpush.msra.mxu3 %v5495_v53  ;;  %v5505_v42 = vadd.f32 %v5473_v32, %v5321_v40  ;;  %v5476_v49 = vmul.f32 %v7063_v41, %v8796_v2  ;;  %v7009_v20 = vsel %vm5198_vm8, 1.0, %v7948_v29  ;;  %v7041_v39 = vsel %vm5350_vm9, 1.0, %v7948_v29  ;;  %7065 = vmatmul.msk.f32.gmra.mxu1 %vm874_vm0, %v8923_v45  ;;  %v8966_v40 = vld [vmem:[%s8862_s0 + $0x10] sm:$0xff] }
 0x9b1   : > { %v5302_v57 = vmul.f32 %v7009_v20, %v8771_v23  ;;  %v5454_v8 = vmul.f32 %v7041_v39, %v8763_v63  ;;  %vm5199_vm10 = vcmp.eq.f32.partialorder %v8733_v25, %v8759_v52  ;;  %vm5351_vm11 = vcmp.eq.f32.partialorder %v8733_v25, %v8765_v21 }
 0x9b2   : > { %5781 = vmatpush.msra.mxu1 %v5505_v42  ;;  %v5508_v30 = vadd.f32 %v5476_v49, %v5324_v38  ;;  %v7010_v19 = vsel %vm5199_vm10, 1.0, %v7948_v29  ;;  %v7042_v27 = vsel %vm5351_vm11, 1.0, %v7948_v29  ;;  %vm5209_vm12 = vcmp.eq.f32.partialorder %v8735_v35, %v8769_v22 }
 0x9b3   : > { %v5486_v54 = vadd.f32 %v5454_v8, %v5302_v57  ;;  %v5303_v61 = vmul.f32 %v7010_v19, %v8773_v50  ;;  %v5455_v48 = vmul.f32 %v7042_v27, %v8767_v5  ;;  %v7020_v4 = vsel %vm5209_vm12, 1.0, %v7948_v29 }
 0x9b4   : > { %5940 = vmatpush.msrb.mxu0 %v5508_v30  ;;  %v5313_v36 = vmul.f32 %v7020_v4, %v8777_v28  ;;  %vm5361_vm13 = vcmp.eq.f32.partialorder %v8735_v35, %v8779_v26  ;;  %vm5212_vm14 = vcmp.eq.f32.partialorder %v8735_v35, %v8789_v0  ;;  %vm5364_vm15 = vcmp.eq.f32.partialorder %v8735_v35, %v8794_v13  ;;  %v9016_v4 = vld [vmem:[%s8862_s0 + $0x18] sm:$0xff] }
 0x9b5   : > { %5624 = vmatpush.msrb.mxu2 %v5486_v54  ;;  %v5487_v37 = vadd.f32 %v5455_v48, %v5303_v61  ;;  %v7052_v7 = vsel %vm5361_vm13, 1.0, %v7948_v29  ;;  %v7023_v60 = vsel %vm5212_vm14, 1.0, %v7948_v29  ;;  %v7055_v58 = vsel %vm5364_vm15, 1.0, %v7948_v29 }
 0x9b6   : > { %v5465_v15 = vmul.f32 %v7052_v7, %v8775_v24  ;;  %v5316_v53 = vmul.f32 %v7023_v60, %v8802_v33  ;;  %v5468_v32 = vmul.f32 %v7055_v58, %v8796_v2  ;;  %vm5190_vm2 = vcmp.eq.f32.partialorder %v8731_v44, %v8755_v59  ;;  %7101 = vmatmul.msk.f32.gmra.mxu0 %vm874_vm0, %v8923_v45 }
 0x9b7   : > { %5677 = vmatpush.msra.mxu3 %v5487_v37  ;;  %v7001_v3 = vsel %vm5190_vm2, 1.0, %v7948_v29  ;;  %vm5342_vm3 = vcmp.eq.f32.partialorder %v8731_v44, %v8761_v17  ;;  %vm5191_vm4 = vcmp.eq.f32.partialorder %v8731_v44, %v8759_v52  ;;  %vm5343_vm5 = vcmp.eq.f32.partialorder %v8731_v44, %v8765_v21 }
 0x9b8   : > { %v5497_v38 = vadd.f32 %v5465_v15, %v5313_v36  ;;  %v5500_v41 = vadd.f32 %v5468_v32, %v5316_v53  ;;  %v5294_v42 = vmul.f32 %v7001_v3, %v8771_v23  ;;  %v7033_v59 = vsel %vm5342_vm3, 1.0, %v7948_v29  ;;  %7066 = vmatmul.msk.f32.gmra.mxu1 %vm874_vm0, %v8966_v40 }
 0x9b9   : > { %v5446_v49 = vmul.f32 %v7033_v59, %v8763_v63  ;;  %v7002_v20 = vsel %vm5191_vm4, 1.0, %v7948_v29  ;;  %v7034_v17 = vsel %vm5343_vm5, 1.0, %v7948_v29  ;;  %vm5201_vm6 = vcmp.eq.f32.partialorder %v8733_v25, %v8769_v22 }
 0x9ba   : > { %5782 = vmatpush.msra.mxu1 %v5497_v38  ;;  %5941 = vmatpush.msrb.mxu0 %v5500_v41  ;;  %v5295_v52 = vmul.f32 %v7002_v20, %v8773_v50  ;;  %v5447_v21 = vmul.f32 %v7034_v17, %v8767_v5  ;;  %v7012_v23 = vsel %vm5201_vm6, 1.0, %v7948_v29  ;;  %vm5353_vm7 = vcmp.eq.f32.partialorder %v8733_v25, %v8779_v26  ;;  %v9064_v20 = vld [vmem:[%s8862_s0 + $0x20] sm:$0xff] }
 0x9bb   : > { %v5478_v39 = vadd.f32 %v5446_v49, %v5294_v42  ;;  %v5305_v63 = vmul.f32 %v7012_v23, %v8777_v28  ;;  %v7044_v57 = vsel %vm5353_vm7, 1.0, %v7948_v29  ;;  %vm5204_vm8 = vcmp.eq.f32.partialorder %v8733_v25, %v8789_v0 }
 0x9bc   : > { %v5479_v8 = vadd.f32 %v5447_v21, %v5295_v52  ;;  %v5457_v30 = vmul.f32 %v7044_v57, %v8775_v24  ;;  %v7015_v50 = vsel %vm5204_vm8, 1.0, %v7948_v29  ;;  %vm5356_vm9 = vcmp.eq.f32.partialorder %v8733_v25, %v8794_v13 }
 0x9bd   : > { %5625 = vmatpush.msrb.mxu2 %v5478_v39  ;;  %v5308_v5 = vmul.f32 %v7015_v50, %v8802_v33  ;;  %v7047_v19 = vsel %vm5356_vm9, 1.0, %v7948_v29  ;;  %vm5193_vm10 = vcmp.eq.f32.partialorder %v8731_v44, %v8769_v22  ;;  %vm5345_vm11 = vcmp.eq.f32.partialorder %v8731_v44, %v8779_v26 }
 0x9be   : > { %5678 = vmatpush.msra.mxu3 %v5479_v8  ;;  %v5489_v27 = vadd.f32 %v5457_v30, %v5305_v63  ;;  %v5460_v54 = vmul.f32 %v7047_v19, %v8796_v2  ;;  %7076 = vmatmul.msk.f32.vlgmr.msrb.gmra.mxu2 %vm874_vm0, %v8881_v46  ;;  %v7004_v61 = vsel %vm5193_vm10, 1.0, %v7948_v29  ;;  %v7036_v48 = vsel %vm5345_vm11, 1.0, %v7948_v29 }
 0x9bf   : > { %7088 = vmatmul.msk.f32.vlgmr.msra.gmra.mxu3 %vm874_vm0, %v8881_v46  ;;  %v5297_v22 = vmul.f32 %v7004_v61, %v8777_v28  ;;  %v5449_v26 = vmul.f32 %v7036_v48, %v8775_v24  ;;  %vm5218_vm12 = vcmp.eq.f32.partialorder %v8739_v14, %v8798_v1  ;;  %vm5370_vm13 = vcmp.eq.f32.partialorder %v8739_v14, %v8806_v55 }
 0x9c0   : > { %5783 = vmatpush.msra.mxu1 %v5489_v27  ;;  %v5492_v36 = vadd.f32 %v5460_v54, %v5308_v5  ;;  %v7029_v37 = vsel %vm5218_vm12, 1.0, %v7948_v29  ;;  %v7061_v7 = vsel %vm5370_vm13, 1.0, %v7948_v29  ;;  %vm5219_vm14 = vcmp.eq.f32.partialorder %v8739_v14, %v8800_v11  ;;  %7102 = vmatmul.msk.f32.gmra.mxu0 %vm874_vm0, %v8966_v40 }
 0x9c1   : > { %v5481_v28 = vadd.f32 %v5449_v26, %v5297_v22  ;;  %v5322_v24 = vmul.f32 %v7029_v37, %v8811_v56  ;;  %v5474_v60 = vmul.f32 %v7061_v7, %v8804_v31  ;;  %v7030_v58 = vsel %vm5219_vm14, 1.0, %v7948_v29  ;;  %7067 = vmatmul.msk.f32.gmra.mxu1 %vm874_vm0, %v9016_v4 }
 0x9c2   : > { %5942 = vmatpush.msrb.mxu0 %v5492_v36  ;;  %v5323_v15 = vmul.f32 %v7030_v58, %v8818_v43  ;;  %vm5371_vm15 = vcmp.eq.f32.partialorder %v8739_v14, %v8813_v9  ;;  %vm5196_vm2 = vcmp.eq.f32.partialorder %v8731_v44, %v8789_v0  ;;  %vm5348_vm3 = vcmp.eq.f32.partialorder %v8731_v44, %v8794_v13  ;;  %v9169_v58 = vld [vmem:[%s8862_s0 + $0x50] sm:$0xff] }
 0x9c3   : > { %5784 = vmatpush.msra.mxu1 %v5481_v28  ;;  %v5506_v53 = vadd.f32 %v5474_v60, %v5322_v24  ;;  %v7062_v32 = vsel %vm5371_vm15, 1.0, %v7948_v29  ;;  %v7007_v3 = vsel %vm5196_vm2, 1.0, %v7948_v29  ;;  %v7039_v38 = vsel %vm5348_vm3, 1.0, %v7948_v29  ;;  %v9158_v60 = vld [vmem:[%s8862_s0 + $0x48] sm:$0xff] }
 0x9c4   : > { %v5475_v41 = vmul.f32 %v7062_v32, %v8808_v62  ;;  %v5300_v42 = vmul.f32 %v7007_v3, %v8802_v33  ;;  %v5452_v59 = vmul.f32 %v7039_v38, %v8796_v2  ;;  %vm5210_vm4 = vcmp.eq.f32.partialorder %v8735_v35, %v8798_v1 }
 0x9c5   : > { %5834 = vmatpush.msra.mxu2 %v5506_v53  ;;  %v7021_v0 = vsel %vm5210_vm4, 1.0, %v7948_v29  ;;  %vm5362_vm5 = vcmp.eq.f32.partialorder %v8735_v35, %v8806_v55  ;;  %vm5211_vm6 = vcmp.eq.f32.partialorder %v8735_v35, %v8800_v11  ;;  %vm5363_vm7 = vcmp.eq.f32.partialorder %v8735_v35, %v8813_v9 }
 0x9c6   : > { %v5507_v13 = vadd.f32 %v5475_v41, %v5323_v15  ;;  %v5484_v49 = vadd.f32 %v5452_v59, %v5300_v42  ;;  %v5314_v33 = vmul.f32 %v7021_v0, %v8811_v56  ;;  %v7053_v2 = vsel %vm5362_vm5, 1.0, %v7948_v29  ;;  %7077 = vmatmul.msk.f32.gmra.mxu2 %vm874_vm0, %v8923_v45  ;;  %v9180_v15 = vld [vmem:[%s8862_s0 + $0x58] sm:$0xff] }
 0x9c7   : > { %v5466_v17 = vmul.f32 %v7053_v2, %v8804_v31  ;;  %v7022_v52 = vsel %vm5211_vm6, 1.0, %v7948_v29  ;;  %v7054_v21 = vsel %vm5363_vm7, 1.0, %v7948_v29  ;;  %vm5202_vm8 = vcmp.eq.f32.partialorder %v8733_v25, %v8798_v1  ;;  %7089 = vmatmul.msk.f32.gmra.mxu3 %vm874_vm0, %v8923_v45 }
 0x9c8   : > { %5887 = vmatpush.msrb.mxu3 %v5507_v13  ;;  %5943 = vmatpush.msrb.mxu0 %v5484_v49  ;;  %v5315_v23 = vmul.f32 %v7022_v52, %v8818_v43  ;;  %v5467_v39 = vmul.f32 %v7054_v21, %v8808_v62  ;;  %v7013_v63 = vsel %vm5202_vm8, 1.0, %v7948_v29  ;;  %vm5354_vm9 = vcmp.eq.f32.partialorder %v8733_v25, %v8806_v55 }
 0x9c9   : > { %v5498_v57 = vadd.f32 %v5466_v17, %v5314_v33  ;;  %v5306_v8 = vmul.f32 %v7013_v63, %v8811_v56  ;;  %v7045_v30 = vsel %vm5354_vm9, 1.0, %v7948_v29  ;;  %vm5203_vm10 = vcmp.eq.f32.partialorder %v8733_v25, %v8800_v11  ;;  %7103 = vmatmul.msk.f32.gmra.mxu0 %vm874_vm0, %v9016_v4  ;;  %7068 = vmatmul.msk.f32.gmra.mxu1 %vm874_vm0, %v9064_v20 }
 0x9ca   : > { %v5499_v50 = vadd.f32 %v5467_v39, %v5315_v23  ;;  %v5458_v5 = vmul.f32 %v7045_v30, %v8804_v31  ;;  %v7014_v19 = vsel %vm5203_vm10, 1.0, %v7948_v29  ;;  %vm5355_vm11 = vcmp.eq.f32.partialorder %v8733_v25, %v8813_v9 }
 0x9cb   : > { %5835 = vmatpush.msra.mxu2 %v5498_v57  ;;  %v5307_v27 = vmul.f32 %v7014_v19, %v8818_v43  ;;  %v7046_v54 = vsel %vm5355_vm11, 1.0, %v7948_v29  ;;  %vm5194_vm12 = vcmp.eq.f32.partialorder %v8731_v44, %v8798_v1  ;;  %vm5346_vm13 = vcmp.eq.f32.partialorder %v8731_v44, %v8806_v55 }
 0x9cc   : > { %5888 = vmatpush.msrb.mxu3 %v5499_v50  ;;  %v5490_v61 = vadd.f32 %v5458_v5, %v5306_v8  ;;  %v5459_v48 = vmul.f32 %v7046_v54, %v8808_v62  ;;  %v7005_v22 = vsel %vm5194_vm12, 1.0, %v7948_v29  ;;  %v7037_v26 = vsel %vm5346_vm13, 1.0, %v7948_v29 }
 0x9cd   : > { %v5298_v36 = vmul.f32 %v7005_v22, %v8811_v56  ;;  %v5450_v37 = vmul.f32 %v7037_v26, %v8804_v31  ;;  %vm5195_vm14 = vcmp.eq.f32.partialorder %v8731_v44, %v8800_v11  ;;  %vm5347_vm15 = vcmp.eq.f32.partialorder %v8731_v44, %v8813_v9  ;;  %v9114_v11 = vld [vmem:[%s8862_s0 + $0x28] sm:$0xff]  ;;  %v9136_v9 = vld [vmem:[%s8862_s0 + $0x38] sm:$0xff] }
 0x9ce   : > { %5836 = vmatpush.msra.mxu2 %v5490_v61  ;;  %v5491_v1 = vadd.f32 %v5459_v48, %v5307_v27  ;;  %v7006_v55 = vsel %vm5195_vm14, 1.0, %v7948_v29  ;;  %v7038_v7 = vsel %vm5347_vm15, 1.0, %v7948_v29  ;;  %v4790_v30 = vadd.f32 15.5, %v8714_v34 }
 0x9cf   : > { %v5482_v28 = vadd.f32 %v5450_v37, %v5298_v36  ;;  %v5299_v24 = vmul.f32 %v7006_v55, %v8818_v43  ;;  %v5451_v56 = vmul.f32 %v7038_v7, %v8808_v62  ;;  %7078 = vmatmul.msk.f32.gmra.mxu2 %vm874_vm0, %v8966_v40  ;;  %7090 = vmatmul.msk.f32.gmra.mxu3 %vm874_vm0, %v8966_v40  ;;  %v9125_v62 = vld [vmem:[%s8862_s0 + $0x30] sm:$0xff]  ;;  %v9147_v43 = vld [vmem:[%s8862_s0 + $0x40] sm:$0xff]  ;;  %v4850_v5 = vadd.f32 15.5, %v8716_v12 }
 0x9d0   : > { %5889 = vmatpush.msrb.mxu3 %v5491_v1  ;;  %v5124_v27 = vfloor.f32 %v4790_v30  ;;  %v4810_v1 = vadd.f32 15.5, %v8718_v18 }
 0x9d1   : > { %5837 = vmatpush.msra.mxu2 %v5482_v28  ;;  %v5483_v31 = vadd.f32 %v5451_v56, %v5299_v24  ;;  %7104 = vmatmul.msk.f32.gmra.mxu0 %vm874_vm0, %v9064_v20  ;;  %v5127_v34 = vfloor.f32 %v4850_v5 }
 0x9d2   : > { %7069 = vmatmul.msk.f32.gmra.mxu1 %vm874_vm0, %v9114_v11  ;;  %v6125_v48 = vadd.f32 1.0, %v5124_v27  ;;  %v5140_v22 = vsub.f32 %v4790_v30, %v5124_v27  ;;  %v5981_v7 = vperm.slane %v5124_v27, 0 }
 0x9d3   : > { %5890 = vmatpush.msrb.mxu3 %v5483_v31  ;;  %v5143_v26 = vsub.f32 %v4850_v5, %v5127_v34  ;;  %v5125_v31 = vfloor.f32 %v4810_v1 }
 0x9d4   : > { %v6133_v37 = vperm.slane %v6125_v48, 0  ;;  %v5148_v55 = vsub.f32 1.0, %v5140_v22  ;;  %vm6013_vm4 = vcmp.eq.f32.partialorder %v8739_v14, %v5981_v7  ;;  %vm6005_vm6 = vcmp.eq.f32.partialorder %v8735_v35, %v5981_v7 }
 0x9d5   : > { %v5151_v56 = vsub.f32 1.0, %v5143_v26  ;;  %v9375_v5 = vperm.slane %v5143_v26, 0  ;;  %vm5997_vm8 = vcmp.eq.f32.partialorder %v8733_v25, %v5981_v7  ;;  %v6126_v6 = vadd.f32 1.0, %v5125_v31 }
 0x9d6   : > { %vm6165_vm2 = vcmp.eq.f32.partialorder %v8739_v14, %v6133_v37  ;;  %vm6157_vm3 = vcmp.eq.f32.partialorder %v8735_v35, %v6133_v37  ;;  %vm6149_vm5 = vcmp.eq.f32.partialorder %v8733_v25, %v6133_v37  ;;  %vm6141_vm7 = vcmp.eq.f32.partialorder %v8731_v44, %v6133_v37 }
 0x9d7   : > { %7079 = vmatmul.msk.f32.gmra.mxu2 %vm874_vm0, %v9016_v4  ;;  %7091 = vmatmul.msk.f32.gmra.mxu3 %vm874_vm0, %v9016_v4  ;;  %v7208_v26 = vsel %vm6157_vm3, 1.0, %v7948_v29  ;;  %v7200_v16 = vsel %vm6149_vm5, 1.0, %v7948_v29  ;;  %v7176_v37 = vsel %vm6005_vm6, 1.0, %v7948_v29  ;;  %v7192_v47 = vsel %vm6141_vm7, 1.0, %v7948_v29 }
 0x9d9   : > { %7105 = vmatmul.msk.f32.gmra.mxu0 %vm874_vm0, %v9114_v11 }
 0x9da   : > { %7070 = vmatmul.msk.f32.gmra.mxu1 %vm874_vm0, %v9125_v62 }
 0x9df   : > { %7080 = vmatmul.msk.f32.gmra.mxu2 %vm874_vm0, %v9064_v20  ;;  %7092 = vmatmul.msk.f32.gmra.mxu3 %vm874_vm0, %v9064_v20 }
 0x9e1   : > { %7106 = vmatmul.msk.f32.gmra.mxu0 %vm874_vm0, %v9125_v62 }
 0x9e2   : > { %7071 = vmatmul.msk.f32.gmra.mxu1 %vm874_vm0, %v9136_v9 }
 0x9e7   : > { %7081 = vmatmul.msk.f32.gmra.mxu2 %vm874_vm0, %v9114_v11  ;;  %7093 = vmatmul.msk.f32.gmra.mxu3 %vm874_vm0, %v9114_v11 }
 0x9e9   : > { %7107 = vmatmul.msk.f32.gmra.mxu0 %vm874_vm0, %v9136_v9 }
 0x9ea   : > { %7072 = vmatmul.msk.f32.gmra.mxu1 %vm874_vm0, %v9147_v43 }
 0x9ef   : > { %7082 = vmatmul.msk.f32.gmra.mxu2 %vm874_vm0, %v9125_v62  ;;  %7094 = vmatmul.msk.f32.gmra.mxu3 %vm874_vm0, %v9125_v62 }
 0x9f1   : > { %7108 = vmatmul.msk.f32.gmra.mxu0 %vm874_vm0, %v9147_v43 }
 0x9f2   : > { %7073 = vmatmul.msk.f32.gmra.mxu1 %vm874_vm0, %v9158_v60 }
 0x9f7   : > { %7083 = vmatmul.msk.f32.gmra.mxu2 %vm874_vm0, %v9136_v9  ;;  %7095 = vmatmul.msk.f32.gmra.mxu3 %vm874_vm0, %v9136_v9 }
 0x9f9   : > { %7109 = vmatmul.msk.f32.gmra.mxu0 %vm874_vm0, %v9158_v60 }
 0x9fa   : > { %7074 = vmatmul.msk.f32.gmra.mxu1 %vm874_vm0, %v9169_v58 }
 0x9ff   : > { %7084 = vmatmul.msk.f32.gmra.mxu2 %vm874_vm0, %v9147_v43  ;;  %7096 = vmatmul.msk.f32.gmra.mxu3 %vm874_vm0, %v9147_v43 }
 0xa01   : > { %7110 = vmatmul.msk.f32.gmra.mxu0 %vm874_vm0, %v9169_v58 }
 0xa02   : > { %7075 = vmatmul.msk.f32.gmra.mxu1 %vm874_vm0, %v9180_v15 }
 0xa07   : > { %7085 = vmatmul.msk.f32.gmra.mxu2 %vm874_vm0, %v9158_v60  ;;  %7097 = vmatmul.msk.f32.gmra.mxu3 %vm874_vm0, %v9158_v60 }
 0xa09   : > { %7111 = vmatmul.msk.f32.gmra.mxu0 %vm874_vm0, %v9180_v15 }
 0xa0a   : > { %7112 = vmatmul.msk.f32.vlgmr.msra.gmra.mxu1 %vm874_vm0, %v8881_v46 }
 0xa0f   : > { %7086 = vmatmul.msk.f32.gmra.mxu2 %vm874_vm0, %v9169_v58  ;;  %7098 = vmatmul.msk.f32.gmra.mxu3 %vm874_vm0, %v9169_v58 }
 0xa11   : > { %7148 = vmatmul.msk.f32.vlgmr.msrb.gmra.mxu0 %vm874_vm0, %v8881_v46 }
 0xa12   : > { %7113 = vmatmul.msk.f32.gmra.mxu1 %vm874_vm0, %v8923_v45 }
 0xa17   : > { %7087 = vmatmul.msk.f32.gmra.mxu2 %vm874_vm0, %v9180_v15  ;;  %7099 = vmatmul.msk.f32.gmra.mxu3 %vm874_vm0, %v9180_v15 }
 0xa19   : > { %7149 = vmatmul.msk.f32.gmra.mxu0 %vm874_vm0, %v8923_v45 }
 0xa1a   : > { %7114 = vmatmul.msk.f32.gmra.mxu1 %vm874_vm0, %v8966_v40 }
 0xa1f   : > { %7124 = vmatmul.msk.f32.vlgmr.msra.gmra.mxu2 %vm874_vm0, %v8881_v46  ;;  %7136 = vmatmul.msk.f32.vlgmr.msrb.gmra.mxu3 %vm874_vm0, %v8881_v46 }
 0xa21   : > { %7150 = vmatmul.msk.f32.gmra.mxu0 %vm874_vm0, %v8966_v40 }
 0xa22   : > { %7115 = vmatmul.msk.f32.gmra.mxu1 %vm874_vm0, %v9016_v4 }
 0xa25   : > { %v9218_v53 = vpop.f32.mrf.mxu1 }
 0xa27   : > { %7125 = vmatmul.msk.f32.gmra.mxu2 %vm874_vm0, %v8923_v45  ;;  %7137 = vmatmul.msk.f32.gmra.mxu3 %vm874_vm0, %v8923_v45 }
 0xa29   : > { %7151 = vmatmul.msk.f32.gmra.mxu0 %vm874_vm0, %v9016_v4 }
 0xa2a   : > { %7116 = vmatmul.msk.f32.gmra.mxu1 %vm874_vm0, %v9064_v20 }
 0xa2b   : > { %v9228_v46 = vpop.f32.mrf.mxu0 }
 0xa2d   : > { %v9230_v32 = vpop.f32.mrf.mxu1 }
 0xa2f   : > { %7126 = vmatmul.msk.f32.gmra.mxu2 %vm874_vm0, %v8966_v40  ;;  %7138 = vmatmul.msk.f32.gmra.mxu3 %vm874_vm0, %v8966_v40 }
 0xa31   : > { %7152 = vmatmul.msk.f32.gmra.mxu0 %vm874_vm0, %v9064_v20 }
 0xa32   : > { %7117 = vmatmul.msk.f32.gmra.mxu1 %vm874_vm0, %v9114_v11 }
 0xa33   : > { %v9240_v45 = vpop.f32.mrf.mxu0 }
 0xa35   : > { %v9242_v3 = vpop.f32.mrf.mxu1 }
 0xa37   : > { %7127 = vmatmul.msk.f32.gmra.mxu2 %vm874_vm0, %v9016_v4  ;;  %7139 = vmatmul.msk.f32.gmra.mxu3 %vm874_vm0, %v9016_v4 }
 0xa39   : > { %7153 = vmatmul.msk.f32.gmra.mxu0 %vm874_vm0, %v9114_v11 }
 0xa3a   : > { %7118 = vmatmul.msk.f32.gmra.mxu1 %vm874_vm0, %v9125_v62 }
 0xa3d   : > { %v9252_v40 = vpop.f32.mrf.mxu0 }
 0xa3e   : > { %v9254_v38 = vpop.f32.mrf.mxu1 }
 0xa3f   : > { %7128 = vmatmul.msk.f32.gmra.mxu2 %vm874_vm0, %v9064_v20  ;;  %7140 = vmatmul.msk.f32.gmra.mxu3 %vm874_vm0, %v9064_v20 }
 0xa41   : > { %v9260_v41 = vpop.f32.mrf.mxu2  ;;  %7154 = vmatmul.msk.f32.gmra.mxu0 %vm874_vm0, %v9125_v62 }
 0xa42   : > { %10117 = vst [vmem:[#allocation38_spill] sm:$0xff] %v9260_v41  ;;  %v9264_v4 = vpop.f32.mrf.mxu3  ;;  %7119 = vmatmul.msk.f32.gmra.mxu1 %vm874_vm0, %v9136_v9 }
 0xa43   : > { %10118 = vst [vmem:[#allocation39_spill] sm:$0xff] %v9264_v4 }
 0xa46   : > { %v9268_v42 = vpop.f32.mrf.mxu0  ;;  %v9270_v59 = vpop.f32.mrf.mxu1 }
 0xa47   : > { %7129 = vmatmul.msk.f32.gmra.mxu2 %vm874_vm0, %v9114_v11  ;;  %7141 = vmatmul.msk.f32.gmra.mxu3 %vm874_vm0, %v9114_v11  ;;  %v6128_v11 = vadd.f32 1.0, %v5127_v34 }
 0xa49   : > { %v9276_v0 = vpop.f32.mrf.mxu2  ;;  %7155 = vmatmul.msk.f32.gmra.mxu0 %vm874_vm0, %v9136_v9  ;;  %v9373_v30 = vperm.slane %v6128_v11, 0 }
 0xa4a   : > { %10119 = vst [vmem:[#allocation40_spill] sm:$0xff] %v9276_v0  ;;  %v9280_v13 = vpop.f32.mrf.mxu3  ;;  %7120 = vmatmul.msk.f32.gmra.mxu1 %vm874_vm0, %v9147_v43 }
 0xa4b   : > { %10120 = vst [vmem:[#allocation41_spill] sm:$0xff] %v9280_v13  ;;  %vm6168_vm9 = vcmp.eq.f32.partialorder %v8739_v14, %v9373_v30  ;;  %vm6160_vm10 = vcmp.eq.f32.partialorder %v8735_v35, %v9373_v30  ;;  %vm6152_vm12 = vcmp.eq.f32.partialorder %v8733_v25, %v9373_v30  ;;  %vm6144_vm14 = vcmp.eq.f32.partialorder %v8731_v44, %v9373_v30 }
 0xa4c   : > { %v7219_v0 = vsel %vm6168_vm9, 1.0, %v7948_v29 }
 0xa4e   : > { %v9284_v49 = vpop.f32.mrf.mxu0 }
 0xa4f   : > { %7130 = vmatmul.msk.f32.gmra.mxu2 %vm874_vm0, %v9125_v62  ;;  %7142 = vmatmul.msk.f32.gmra.mxu3 %vm874_vm0, %v9125_v62  ;;  %v9290_v33 = vpop.f32.mrf.mxu1  ;;  %v9362_v62 = vadd.f32 15.5, %v8720_v51  ;;  %v7216_v51 = vsel %vm6165_vm2, 1.0, %v7948_v29 }
 0xa51   : > { %7156 = vmatmul.msk.f32.gmra.mxu0 %vm874_vm0, %v9147_v43  ;;  %v9385_v48 = vfloor.f32 %v9362_v62 }
 0xa52   : > { %v9294_v2 = vpop.f32.mrf.mxu2  ;;  %v9296_v20 = vpop.f32.mrf.mxu3  ;;  %7121 = vmatmul.msk.f32.gmra.mxu1 %vm874_vm0, %v9158_v60 }
 0xa53   : > { %10121 = vst [vmem:[#allocation42_spill] sm:$0xff] %v9294_v2  ;;  %v6127_v10 = vadd.f32 1.0, %v9385_v48 }
 0xa54   : > { %10122 = vst [vmem:[#allocation43_spill] sm:$0xff] %v9296_v20 }
 0xa56   : > { %v9300_v17 = vpop.f32.mrf.mxu0 }
 0xa57   : > { %7131 = vmatmul.msk.f32.gmra.mxu2 %vm874_vm0, %v9136_v9  ;;  %7143 = vmatmul.msk.f32.gmra.mxu3 %vm874_vm0, %v9136_v9  ;;  %v9306_v52 = vpop.f32.mrf.mxu1  ;;  %v9365_v9 = vperm.slane %v5127_v34, 0  ;;  %v9382_v34 = vsub.f32 %v4810_v1, %v5125_v31 }
 0xa59   : > { %7157 = vmatmul.msk.f32.gmra.mxu0 %vm874_vm0, %v9158_v60  ;;  %vm6016_vm11 = vcmp.eq.f32.partialorder %v8739_v14, %v9365_v9  ;;  %vm6008_vm13 = vcmp.eq.f32.partialorder %v8735_v35, %v9365_v9  ;;  %vm6000_vm15 = vcmp.eq.f32.partialorder %v8733_v25, %v9365_v9  ;;  %vm5992_vm2 = vcmp.eq.f32.partialorder %v8731_v44, %v9365_v9 }
 0xa5a   : > { %v9310_v21 = vpop.f32.mrf.mxu2  ;;  %v9312_v23 = vpop.f32.mrf.mxu3  ;;  %7122 = vmatmul.msk.f32.gmra.mxu1 %vm874_vm0, %v9169_v58  ;;  %v5149_v30 = vsub.f32 1.0, %v9382_v34 }
 0xa5b   : > { %10123 = vst [vmem:[#allocation44_spill] sm:$0xff] %v9310_v21  ;;  %v7211_v21 = vsel %vm6160_vm10, 1.0, %v7948_v29 }
 0xa5c   : > { %10124 = vst [vmem:[#allocation45_spill] sm:$0xff] %v9312_v23 }
 0xa5e   : > { %v9316_v39 = vpop.f32.mrf.mxu0 }
 0xa5f   : > { %7132 = vmatmul.msk.f32.gmra.mxu2 %vm874_vm0, %v9147_v43  ;;  %7144 = vmatmul.msk.f32.gmra.mxu3 %vm874_vm0, %v9147_v43  ;;  %v9322_v63 = vpop.f32.mrf.mxu1  ;;  %v6085_v43 = vperm.slane %v5148_v55, 0 }
 0xa61   : > { %7158 = vmatmul.msk.f32.gmra.mxu0 %vm874_vm0, %v9169_v58  ;;  %v6109_v4 = vmul.f32 %v7176_v37, %v6085_v43 }
 0xa62   : > { %v9326_v57 = vpop.f32.mrf.mxu2  ;;  %v9328_v8 = vpop.f32.mrf.mxu3  ;;  %7123 = vmatmul.msk.f32.gmra.mxu1 %vm874_vm0, %v9180_v15 }
 0xa63   : > { %10125 = vst [vmem:[#allocation46_spill] sm:$0xff] %v9326_v57 }
 0xa64   : > { %10126 = vst [vmem:[#allocation47_spill] sm:$0xff] %v9328_v8  ;;  %v7163_v8 = vsel %vm5992_vm2, 1.0, %v7948_v29 }
 0xa66   : > { %v9333_v50 = vpop.f32.mrf.mxu0 }
 0xa67   : > { %7133 = vmatmul.msk.f32.gmra.mxu2 %vm874_vm0, %v9158_v60  ;;  %7145 = vmatmul.msk.f32.gmra.mxu3 %vm874_vm0, %v9158_v60  ;;  %v9340_v19 = vpop.f32.mrf.mxu1  ;;  %v6237_v60 = vperm.slane %v5140_v22, 0  ;;  %v9389_v22 = vperm.slane %v5125_v31, 0 }
 0xa69   : > { %7159 = vmatmul.msk.f32.gmra.mxu0 %vm874_vm0, %v9180_v15  ;;  %v6269_v55 = vmul.f32 %v7216_v51, %v6237_v60  ;;  %v6253_v41 = vmul.f32 %v7200_v16, %v6237_v60  ;;  %v6245_v37 = vmul.f32 %v7192_v47, %v6237_v60  ;;  %v7187_v16 = vsel %vm6016_vm11, 1.0, %v7948_v29 }
 0xa6a   : > { %v9344_v54 = vpop.f32.mrf.mxu2  ;;  %v9346_v61 = vpop.f32.mrf.mxu3  ;;  %vm5990_vm3 = vcmp.eq.f32.partialorder %v8731_v44, %v9389_v22  ;;  %vm5998_vm6 = vcmp.eq.f32.partialorder %v8733_v25, %v9389_v22  ;;  %vm6006_vm10 = vcmp.eq.f32.partialorder %v8735_v35, %v9389_v22 }
 0xa6e   : > { %v9348_v12 = vpop.f32.mrf.mxu0 }
 0xa6f   : > { %7134 = vmatmul.msk.f32.gmra.mxu2 %vm874_vm0, %v9169_v58  ;;  %7146 = vmatmul.msk.f32.gmra.mxu3 %vm874_vm0, %v9169_v58  ;;  %v9354_v36 = vpop.f32.mrf.mxu1  ;;  %v9371_v58 = vperm.slane %v5151_v56, 0 }
 0xa71   : > { %v6120_v47 = vmul.f32 %v7187_v16, %v9371_v58  ;;  %v7195_v16 = vsel %vm6144_vm14, 1.0, %v7948_v29  ;;  %vm6014_vm14 = vcmp.eq.f32.partialorder %v8739_v14, %v9389_v22 }
 0xa72   : > { %v9357_v28 = vpop.f32.mrf.mxu2  ;;  %v9359_v24 = vpop.f32.mrf.mxu3 }
 0xa76   : > { %v9369_v18 = vpop.f32.mrf.mxu0 }
 0xa77   : > { %7135 = vmatmul.msk.f32.gmra.mxu2 %vm874_vm0, %v9180_v15  ;;  %7147 = vmatmul.msk.f32.gmra.mxu3 %vm874_vm0, %v9180_v15  ;;  %v5604_v27 = vpop.f32.mrf.mxu1  ;;  %v7184_v15 = vsel %vm6013_vm4, 1.0, %v7948_v29  ;;  %vm5989_vm0 = vcmp.eq.f32.partialorder %v8731_v44, %v5981_v7  ;;  %v6261_v7 = vmul.f32 %v7208_v26, %v6237_v60 }
 0xa78   : > { %v6117_v1 = vmul.f32 %v7184_v15, %v6085_v43  ;;  %v7160_v51 = vsel %vm5989_vm0, 1.0, %v7948_v29  ;;  %v7168_v15 = vsel %vm5997_vm8, 1.0, %v7948_v29 }
 0xa79   : > { %v6101_v31 = vmul.f32 %v7168_v15, %v6085_v43  ;;  %v6093_v2 = vmul.f32 %v7160_v51, %v6085_v43  ;;  %v9423_v23 = vadd.f32 %v6261_v7, %v6109_v4  ;;  %v6272_v43 = vmul.f32 %v7219_v0, %v9375_v5 }
 0xa7a   : > { %v9400_v56 = vpop.f32.mrf.mxu2  ;;  %v9402_v11 = vpop.f32.mrf.mxu3  ;;  %v9416_v13 = vadd.f32 %v6269_v55, %v6117_v1  ;;  %v7203_v4 = vsel %vm6152_vm12, 1.0, %v7948_v29  ;;  %v7179_v55 = vsel %vm6008_vm13, 1.0, %v7948_v29  ;;  %v6264_v0 = vmul.f32 %v7211_v21, %v9375_v5 }
 0xa7b   : > { %v9434_v60 = vadd.f32 %v6253_v41, %v6101_v31  ;;  %v6390_v15 = vmul.f32 %v9423_v23, %v5604_v27  ;;  %v6112_v41 = vmul.f32 %v7179_v55, %v9371_v58  ;;  %v9449_v31 = vadd.f32 %v6245_v37, %v6093_v2 }
 0xa7c   : > { %v7171_v27 = vsel %vm6000_vm15, 1.0, %v7948_v29  ;;  %v6256_v2 = vmul.f32 %v7203_v4, %v9375_v5  ;;  %v9465_v37 = vadd.f32 %v6272_v43, %v6120_v47  ;;  %v9468_v55 = vperm.slane %v6127_v10, 0 }
 0xa7d   : > { %v6104_v21 = vmul.f32 %v7171_v27, %v9371_v58  ;;  %v6374_v9 = vmul.f32 %v9449_v31, %v9340_v19  ;;  %v9481_v10 = vperm.slane %v9385_v48, 0  ;;  %v6366_v27 = vmul.f32 %v9416_v13, %v9322_v63 }
 0xa7e   : > { %v5763_v20 = vpop.f32.mrf.mxu0  ;;  %vm6143_vm5 = vcmp.eq.f32.partialorder %v8731_v44, %v9468_v55  ;;  %v6358_v63 = vmul.f32 %v9423_v23, %v9306_v52  ;;  %v9519_v52 = vsel %vm5990_vm3, 1.0, %v7948_v29  ;;  %vm6151_vm9 = vcmp.eq.f32.partialorder %v8733_v25, %v9468_v55 }
 0xa7f   : > { %v5607_v26 = vpop.f32.mrf.mxu1  ;;  %v9485_v19 = vadd.f32 %v6256_v2, %v6104_v21  ;;  %vm5991_vm7 = vcmp.eq.f32.partialorder %v8731_v44, %v9481_v10  ;;  %v7169_v21 = vsel %vm5998_vm6, 1.0, %v7948_v29  ;;  %vm5999_vm8 = vcmp.eq.f32.partialorder %v8733_v25, %v9481_v10 }
 0xa80   : > { %v6398_v1 = vmul.f32 %v9416_v13, %v5607_v26  ;;  %v5142_v26 = vsub.f32 %v9362_v62, %v9385_v48  ;;  %v6382_v62 = vmul.f32 %v9434_v60, %v9354_v36  ;;  %v6248_v36 = vmul.f32 %v7195_v16, %v9375_v5 }
 0xa81   : > { %v6350_v16 = vmul.f32 %v9434_v60, %v9290_v33  ;;  %v6342_v33 = vmul.f32 %v9449_v31, %v9270_v59  ;;  %vm6167_vm12 = vcmp.eq.f32.partialorder %v8739_v14, %v9468_v55  ;;  %vm6159_vm15 = vcmp.eq.f32.partialorder %v8735_v35, %v9468_v55 }
 0xa82   : > { %v9438_v7 = vpop.f32.mrf.mxu2  ;;  %v9440_v51 = vpop.f32.mrf.mxu3  ;;  %6413 = vmatpush.msrb.mxu1 %v6398_v1  ;;  %v9461_v1 = vperm.slane %v6126_v6, 0  ;;  %v6096_v6 = vmul.f32 %v7163_v8, %v9371_v58  ;;  %v5150_v4 = vsub.f32 1.0, %v5142_v26  ;;  %v9493_v8 = vperm.slane %v9382_v34, 0 }
 0xa83   : > { %v9495_v58 = vperm.slane %v5142_v26, 0  ;;  %v6385_v34 = vmul.f32 %v9485_v19, %v9369_v18  ;;  %v9535_v18 = vsel %vm6143_vm5, 1.0, %v7948_v29  ;;  %vm6015_vm2 = vcmp.eq.f32.partialorder %v8739_v14, %v9481_v10 }
 0xa84   : > { %6414 = vmatpush.msrb.mxu1 %v6390_v15  ;;  %v9475_v15 = vadd.f32 %v6264_v0, %v6112_v41  ;;  %vm6142_vm4 = vcmp.eq.f32.partialorder %v8731_v44, %v9461_v1  ;;  %v9505_v41 = vperm.slane %v5149_v30, 0  ;;  %v9513_v26 = vperm.slane %v5150_v4, 0 }
 0xa85   : > { %v9525_v0 = vsel %vm6142_vm4, 1.0, %v7948_v29  ;;  %vm6150_vm0 = vcmp.eq.f32.partialorder %v8733_v25, %v9461_v1  ;;  %vm6166_vm11 = vcmp.eq.f32.partialorder %v8739_v14, %v9461_v1  ;;  %vm6158_vm13 = vcmp.eq.f32.partialorder %v8735_v35, %v9461_v1 }
 0xa86   : > { %v5766_v57 = vpop.f32.mrf.mxu0  ;;  %6415 = vmatpush.msrb.mxu1 %v6382_v62  ;;  %v7201_v59 = vsel %vm6150_vm0, 1.0, %v7948_v29  ;;  %vm6007_vm3 = vcmp.eq.f32.partialorder %v8735_v35, %v9481_v10  ;;  %v6353_v1 = vmul.f32 %v9485_v19, %v9300_v17  ;;  %v7186_v22 = vsel %vm6015_vm2, 1.0, %v7948_v29 }
 0xa87   : > { %v6401_v47 = vmul.f32 %v9465_v37, %v5766_v57  ;;  %v9478_v43 = vpop.f32.mrf.mxu1  ;;  %v6393_v57 = vmul.f32 %v9475_v15, %v5763_v20  ;;  %v9507_v20 = vadd.f32 %v6248_v36, %v6096_v6  ;;  %v7177_v6 = vsel %vm6006_vm10, 1.0, %v7948_v29 }
 0xa88   : > { %6416 = vmatpush.msrb.mxu1 %v6374_v9  ;;  %v6334_v9 = vmul.f32 %v9416_v13, %v9254_v38  ;;  %v6361_v38 = vmul.f32 %v9475_v15, %v9316_v39  ;;  %v6326_v13 = vmul.f32 %v9423_v23, %v9242_v3  ;;  %v7217_v36 = vsel %vm6166_vm11, 1.0, %v7948_v29 }
 0xa89   : > { %6473 = vmatpush.msra.mxu0 %v6401_v47  ;;  %v6377_v62 = vmul.f32 %v9507_v20, %v9348_v12  ;;  %v6369_v12 = vmul.f32 %v9465_v37, %v9333_v50  ;;  %v7170_v50 = vsel %vm5999_vm8, 1.0, %v7948_v29  ;;  %v7218_v47 = vsel %vm6167_vm12, 1.0, %v7948_v29 }
 0xa8a   : > { %v9501_v5 = vpop.f32.mrf.mxu2  ;;  %v9503_v48 = vpop.f32.mrf.mxu3  ;;  %6417 = vmatpush.msrb.mxu1 %v6366_v27  ;;  %v7209_v3 = vsel %vm6158_vm13, 1.0, %v7948_v29  ;;  %v7185_v23 = vsel %vm6014_vm14, 1.0, %v7948_v29  ;;  %v6318_v27 = vmul.f32 %v9434_v60, %v9230_v32  ;;  %v6345_v17 = vmul.f32 %v9507_v20, %v9284_v49 }
 0xa8b   : > { %6474 = vmatpush.msra.mxu0 %v6393_v57  ;;  %v7210_v57 = vsel %vm6159_vm15, 1.0, %v7948_v29  ;;  %v6119_v32 = vmul.f32 %v7186_v22, %v9513_v26  ;;  %v6271_v60 = vmul.f32 %v7218_v47, %v9495_v58  ;;  %v7178_v49 = vsel %vm6007_vm3, 1.0, %v7948_v29 }
 0xa8c   : > { %6418 = vmatpush.msrb.mxu1 %v6358_v63  ;;  %v6118_v63 = vmul.f32 %v7185_v23, %v9505_v41  ;;  %v6263_v55 = vmul.f32 %v7210_v57, %v9495_v58  ;;  %v6246_v10 = vmul.f32 %v9525_v0, %v9493_v8 }
 0xa8d   : > { %6475 = vmatpush.msra.mxu0 %v6385_v34  ;;  %v6270_v34 = vmul.f32 %v7217_v36, %v9493_v8  ;;  %v6254_v36 = vmul.f32 %v7201_v59, %v9493_v8  ;;  %v6303_v23 = vadd.f32 %v6271_v60, %v6119_v32  ;;  %v6247_v59 = vmul.f32 %v9535_v18, %v9495_v58 }
 0xa8e   : > { %v9548_v2 = vpop.f32.mrf.mxu0  ;;  %6419 = vmatpush.msrb.mxu1 %v6350_v16  ;;  %v6310_v16 = vmul.f32 %v9449_v31, %v9218_v53  ;;  %v6262_v53 = vmul.f32 %v7209_v3, %v9493_v8  ;;  %v6111_v31 = vmul.f32 %v7178_v49, %v9513_v26  ;;  %v6313_v8 = vmul.f32 %v9507_v20, %v9228_v46 }
 0xa8f   : > { %6476 = vmatpush.msra.mxu0 %v6377_v62  ;;  %v9558_v30 = vpop.f32.mrf.mxu1  ;;  %v7202_v62 = vsel %vm6151_vm9, 1.0, %v7948_v29  ;;  %v6302_v3 = vadd.f32 %v6270_v34, %v6118_v63  ;;  %v6321_v63 = vmul.f32 %v9485_v19, %v9240_v45 }
 0xa90   : > { %6420 = vmatpush.msrb.mxu1 %v6342_v33  ;;  %v6110_v33 = vmul.f32 %v7177_v6, %v9505_v41  ;;  %v6102_v6 = vmul.f32 %v7169_v21, %v9505_v41  ;;  %v6255_v47 = vmul.f32 %v7202_v62, %v9495_v58 }
 0xa91   : > { %6477 = vmatpush.msra.mxu0 %v6369_v12 }
 0xa92   : > { %v5657_v39 = vpop.f32.mrf.mxu2  ;;  %v5710_v4 = vpop.f32.mrf.mxu3  ;;  %6421 = vmatpush.msrb.mxu1 %v6334_v9  ;;  %v6337_v9 = vmul.f32 %v9465_v37, %v9268_v42  ;;  %v6103_v42 = vmul.f32 %v7170_v50, %v9513_v26  ;;  %v6329_v37 = vmul.f32 %v9475_v15, %v9252_v40  ;;  %v6294_v57 = vadd.f32 %v6262_v53, %v6110_v33  ;;  %v10130_v33 = vld [vmem:[#allocation47_spill] sm:$0xff] }
 0xa93   : > { %6478 = vmatpush.msra.mxu0 %v6361_v38  ;;  %v6295_v40 = vadd.f32 %v6263_v55, %v6111_v31  ;;  %v10134_v31 = vld [vmem:[#allocation45_spill] sm:$0xff] }
 0xa94   : > { %6422 = vmatpush.msrb.mxu1 %v6326_v13  ;;  %v7162_v13 = vsel %vm5991_vm7, 1.0, %v7948_v29 }
 0xa95   : > { %6479 = vmatpush.msra.mxu0 %v6353_v1  ;;  %v6094_v1 = vmul.f32 %v9519_v52, %v9505_v41  ;;  %v6095_v21 = vmul.f32 %v7162_v13, %v9513_v26  ;;  %v6287_v41 = vadd.f32 %v6255_v47, %v6103_v42  ;;  %v6391_v52 = vmul.f32 %v6294_v57, %v5657_v39  ;;  %v10136_v13 = vld [vmem:[#allocation43_spill] sm:$0xff]  ;;  %v10137_v42 = vld [vmem:[#allocation40_spill] sm:$0xff]  ;;  %v10138_v47 = vld [vmem:[#allocation41_spill] sm:$0xff] }
 0xa96   : > { %v9627_v12 = vpop.f32.mrf.mxu0  ;;  %6423 = vmatpush.msrb.mxu1 %v6318_v27  ;;  %v6392_v34 = vmul.f32 %v6295_v40, %v5710_v4  ;;  %v6367_v4 = vmul.f32 %v6302_v3, %v9400_v56  ;;  %v6360_v60 = vmul.f32 %v6295_v40, %v9359_v24  ;;  %v10129_v56 = vld [vmem:[#allocation46_spill] sm:$0xff] }
 0xa97   : > { %6480 = vmatpush.msra.mxu0 %v6345_v17  ;;  %v9634_v38 = vpop.f32.mrf.mxu1  ;;  %v6286_v17 = vadd.f32 %v6254_v36, %v6102_v6  ;;  %v6278_v58 = vadd.f32 %v6246_v10, %v6094_v1  ;;  %v6279_v0 = vadd.f32 %v6247_v59, %v6095_v21  ;;  %v6384_v32 = vmul.f32 %v6287_v41, %v9503_v48  ;;  %v10140_v21 = vld [vmem:[#allocation39_spill] sm:$0xff] }
 0xa98   : > { %6424 = vmatpush.msrb.mxu1 %v6310_v16  ;;  %v6359_v48 = vmul.f32 %v6294_v57, %v9357_v28  ;;  %v6352_v16 = vmul.f32 %v6287_v41, %v9346_v61  ;;  %v10135_v61 = vld [vmem:[#allocation42_spill] sm:$0xff]  ;;  %v6328_v6 = vmul.f32 %v6295_v40, %v10136_v13  ;;  %v6320_v1 = vmul.f32 %v6287_v41, %v10138_v47  ;;  %v10149_v13 = vld [vmem:[#allocation37_spill] sm:$0xff] }
 0xa99   : > { %6481 = vmatpush.msra.mxu0 %v6337_v9  ;;  %v6383_v18 = vmul.f32 %v6286_v17, %v9501_v5  ;;  %v6375_v19 = vmul.f32 %v6278_v58, %v9438_v7  ;;  %v6376_v39 = vmul.f32 %v6279_v0, %v9440_v51  ;;  %v6368_v5 = vmul.f32 %v6303_v23, %v9402_v11  ;;  %v10133_v9 = vld [vmem:[#allocation44_spill] sm:$0xff] }
 0xa9a   : > { %v5660_v50 = vpop.f32.mrf.mxu2  ;;  %v5713_v27 = vpop.f32.mrf.mxu3  ;;  %v6351_v51 = vmul.f32 %v6286_v17, %v9344_v54  ;;  %v6343_v11 = vmul.f32 %v6278_v58, %v10129_v56  ;;  %v6344_v49 = vmul.f32 %v6279_v0, %v10130_v33  ;;  %v6335_v53 = vmul.f32 %v6302_v3, %v10133_v9  ;;  %v10148_v33 = vld [vmem:[#allocation36_spill] sm:$0xff] }
 0xa9b   : > { %v6399_v15 = vmul.f32 %v6302_v3, %v5660_v50  ;;  %v6400_v22 = vmul.f32 %v6303_v23, %v5713_v27  ;;  %6482 = vmatpush.msra.mxu0 %v6329_v37  ;;  %v6336_v54 = vmul.f32 %v6303_v23, %v10134_v31  ;;  %v6327_v55 = vmul.f32 %v6294_v57, %v10135_v61  ;;  %v10139_v3 = vld [vmem:[#allocation38_spill] sm:$0xff] }
 0xa9c   : > { %v6319_v37 = vmul.f32 %v6286_v17, %v10137_v42  ;;  %v6311_v23 = vmul.f32 %v6278_v58, %v10139_v3  ;;  %v6312_v59 = vmul.f32 %v6279_v0, %v10140_v21 }
 0xa9d   : > { %6433 = vmatpush.msrb.mxu2 %v6399_v15  ;;  %6453 = vmatpush.msra.mxu3 %v6400_v22 }
 0xa9e   : > { %6483 = vmatpush.msra.mxu0 %v6321_v63  ;;  %v9657_v26 = vpop.f32.mrf.mxu0 }
 0xa9f   : > { %6434 = vmatpush.msrb.mxu2 %v6391_v52  ;;  %6454 = vmatpush.msra.mxu3 %v6392_v34  ;;  %v9661_v45 = vpop.f32.mrf.mxu1  ;;  %v10146_v34 = vld [vmem:[#allocation34_spill] sm:$0xff] }
 0xaa0   : > { %6484 = vmatpush.msra.mxu0 %v6313_v8  ;;  %v4870_v8 = vadd.f32 15.5, %v10146_v34 }
 0xaa1   : > { %6435 = vmatpush.msrb.mxu2 %v6383_v18  ;;  %6455 = vmatpush.msra.mxu3 %v6384_v32  ;;  %v10147_v32 = vld [vmem:[#allocation35_spill] sm:$0xff] }
 0xaa2   : > { %v9665_v46 = vpop.f32.mrf.mxu2  ;;  %v9667_v20 = vpop.f32.mrf.mxu3  ;;  %v5128_v18 = vfloor.f32 %v4870_v8 }
 0xaa3   : > { %10127 = vst [vmem:[#allocation48_spill] sm:$0xff] %v9665_v46  ;;  %6436 = vmatpush.msrb.mxu2 %v6375_v19  ;;  %6456 = vmatpush.msra.mxu3 %v6376_v39  ;;  %v4930_v19 = vadd.f32 15.5, %v10147_v32 }
 0xaa4   : > { %10128 = vst [vmem:[#allocation49_spill] sm:$0xff] %v9667_v20 }
 0xaa5   : > { %6437 = vmatpush.msrb.mxu2 %v6367_v4  ;;  %6457 = vmatpush.msra.mxu3 %v6368_v5  ;;  %v6129_v5 = vadd.f32 1.0, %v5128_v18 }
 0xaa6   : > { %v9673_v7 = vpop.f32.mrf.mxu0 }
 0xaa7   : > { %6438 = vmatpush.msrb.mxu2 %v6359_v48  ;;  %6458 = vmatpush.msra.mxu3 %v6360_v60  ;;  %v9677_v62 = vpop.f32.mrf.mxu1  ;;  %v5131_v48 = vfloor.f32 %v4930_v19  ;;  %v5144_v60 = vsub.f32 %v4870_v8, %v5128_v18  ;;  %v6137_v56 = vperm.slane %v6129_v5, 0 }
 0xaa9   : > { %6439 = vmatpush.msrb.mxu2 %v6351_v51  ;;  %6459 = vmatpush.msra.mxu3 %v6352_v16  ;;  %v5152_v9 = vsub.f32 1.0, %v5144_v60  ;;  %v6132_v61 = vadd.f32 1.0, %v5131_v48  ;;  %vm6169_vm4 = vcmp.eq.f32.partialorder %v8739_v14, %v6137_v56  ;;  %v6241_v47 = vperm.slane %v5144_v60, 0 }
 0xaaa   : > { %v9681_v28 = vpop.f32.mrf.mxu2  ;;  %v9683_v24 = vpop.f32.mrf.mxu3  ;;  %vm6161_vm5 = vcmp.eq.f32.partialorder %v8735_v35, %v6137_v56  ;;  %v9746_v3 = vperm.slane %v5131_v48, 0  ;;  %vm6153_vm7 = vcmp.eq.f32.partialorder %v8733_v25, %v6137_v56  ;;  %vm6145_vm8 = vcmp.eq.f32.partialorder %v8731_v44, %v6137_v56 }
 0xaab   : > { %10131 = vst [vmem:[#allocation46_spill] sm:$0xff] %v9681_v28  ;;  %6440 = vmatpush.msrb.mxu2 %v6343_v11  ;;  %6460 = vmatpush.msra.mxu3 %v6344_v49  ;;  %v5147_v11 = vsub.f32 %v4930_v19, %v5131_v48  ;;  %v4890_v49 = vadd.f32 15.5, %v10148_v33  ;;  %v7212_v19 = vsel %vm6161_vm5, 1.0, %v7948_v29 }
 0xaac   : > { %10132 = vst [vmem:[#allocation47_spill] sm:$0xff] %v9683_v24  ;;  %vm6020_vm13 = vcmp.eq.f32.partialorder %v8739_v14, %v9746_v3  ;;  %vm6012_vm15 = vcmp.eq.f32.partialorder %v8735_v35, %v9746_v3  ;;  %vm6004_vm3 = vcmp.eq.f32.partialorder %v8733_v25, %v9746_v3 }
 0xaad   : > { %6441 = vmatpush.msrb.mxu2 %v6335_v53  ;;  %6461 = vmatpush.msra.mxu3 %v6336_v54  ;;  %v5985_v53 = vperm.slane %v5128_v18, 0  ;;  %v9740_v42 = vfloor.f32 %v4890_v49  ;;  %v9748_v21 = vperm.slane %v5147_v11, 0 }
 0xaae   : > { %v9689_v36 = vpop.f32.mrf.mxu0 }
 0xaaf   : > { %6442 = vmatpush.msrb.mxu2 %v6327_v55  ;;  %6462 = vmatpush.msra.mxu3 %v6328_v6  ;;  %v9693_v10 = vpop.f32.mrf.mxu1  ;;  %v5155_v55 = vsub.f32 1.0, %v5147_v11  ;;  %v9737_v6 = vadd.f32 15.5, %v10149_v13  ;;  %vm6017_vm6 = vcmp.eq.f32.partialorder %v8739_v14, %v5985_v53  ;;  %vm6009_vm0 = vcmp.eq.f32.partialorder %v8735_v35, %v5985_v53 }
 0xab0   : > { %v9759_v32 = vsub.f32 %v4890_v49, %v9740_v42  ;;  %v7188_v5 = vsel %vm6017_vm6, 1.0, %v7948_v29  ;;  %vm5993_vm9 = vcmp.eq.f32.partialorder %v8731_v44, %v5985_v53  ;;  %vm6001_vm10 = vcmp.eq.f32.partialorder %v8733_v25, %v5985_v53 }
 0xab1   : > { %6443 = vmatpush.msrb.mxu2 %v6319_v37  ;;  %6463 = vmatpush.msra.mxu3 %v6320_v1  ;;  %v6089_v37 = vperm.slane %v5152_v9, 0  ;;  %v9751_v8 = vperm.slane %v5155_v55, 0  ;;  %v9754_v18 = vfloor.f32 %v9737_v6  ;;  %v6130_v9 = vadd.f32 1.0, %v9740_v42 }
 0xab2   : > { %v9697_v50 = vpop.f32.mrf.mxu2  ;;  %v9699_v27 = vpop.f32.mrf.mxu3  ;;  %v7204_v49 = vsel %vm6153_vm7, 1.0, %v7948_v29  ;;  %v7180_v56 = vsel %vm6009_vm0, 1.0, %v7948_v29  ;;  %v7196_v55 = vsel %vm6145_vm8, 1.0, %v7948_v29  ;;  %v6265_v53 = vmul.f32 %v7212_v19, %v6241_v47 }
 0xab3   : > { %10141 = vst [vmem:[#allocation44_spill] sm:$0xff] %v9697_v50  ;;  %6444 = vmatpush.msrb.mxu2 %v6311_v23  ;;  %6464 = vmatpush.msra.mxu3 %v6312_v59  ;;  %v6140_v23 = vperm.slane %v6132_v61, 0  ;;  %v7220_v59 = vsel %vm6169_vm4, 1.0, %v7948_v29  ;;  %v6121_v48 = vmul.f32 %v7188_v5, %v6089_v37  ;;  %v6131_v61 = vadd.f32 1.0, %v9754_v18 }
 0xab4   : > { %10142 = vst [vmem:[#allocation45_spill] sm:$0xff] %v9699_v27  ;;  %v6273_v60 = vmul.f32 %v7220_v59, %v6241_v47  ;;  %v6113_v13 = vmul.f32 %v7180_v56, %v6089_v37  ;;  %v7164_v59 = vsel %vm5993_vm9, 1.0, %v7948_v29  ;;  %v7172_v5 = vsel %vm6001_vm10, 1.0, %v7948_v29 }
 0xab5   : > { %vm6172_vm11 = vcmp.eq.f32.partialorder %v8739_v14, %v6140_v23  ;;  %vm6164_vm12 = vcmp.eq.f32.partialorder %v8735_v35, %v6140_v23  ;;  %v6105_v20 = vmul.f32 %v7172_v5, %v6089_v37  ;;  %v6257_v46 = vmul.f32 %v7204_v49, %v6241_v47 }
 0xab6   : > { %v9701_v57 = vpop.f32.mrf.mxu0  ;;  %v9781_v24 = vadd.f32 %v6273_v60, %v6121_v48  ;;  %v7223_v28 = vsel %vm6172_vm11, 1.0, %v7948_v29  ;;  %v6097_v50 = vmul.f32 %v7164_v59, %v6089_v37  ;;  %vm6156_vm14 = vcmp.eq.f32.partialorder %v8733_v25, %v6140_v23 }
 0xab7   : > { %v9703_v40 = vpop.f32.mrf.mxu1  ;;  %v9787_v56 = vadd.f32 %v6265_v53, %v6113_v13  ;;  %v7191_v5 = vsel %vm6020_vm13, 1.0, %v7948_v29  ;;  %vm6148_vm2 = vcmp.eq.f32.partialorder %v8731_v44, %v6140_v23  ;;  %v9797_v60 = vadd.f32 %v6257_v46, %v6105_v20 }
 0xab8   : > { %v6124_v37 = vmul.f32 %v7191_v5, %v9751_v8  ;;  %v7207_v49 = vsel %vm6156_vm14, 1.0, %v7948_v29  ;;  %vm5996_vm4 = vcmp.eq.f32.partialorder %v8731_v44, %v9746_v3  ;;  %v7199_v5 = vsel %vm6148_vm2, 1.0, %v7948_v29 }
 0xab9   : > { %v9830_v23 = vperm.slane %v6130_v9, 0  ;;  %v7167_v3 = vsel %vm5996_vm4, 1.0, %v7948_v29  ;;  %v5153_v9 = vsub.f32 1.0, %v9759_v32 }
 0xaba   : > { %v9705_v15 = vpop.f32.mrf.mxu2  ;;  %v9707_v22 = vpop.f32.mrf.mxu3 }
 0xabb   : > { %10143 = vst [vmem:[#allocation42_spill] sm:$0xff] %v9705_v15  ;;  %v7215_v15 = vsel %vm6164_vm12, 1.0, %v7948_v29  ;;  %vm6146_vm6 = vcmp.eq.f32.partialorder %v8731_v44, %v9830_v23  ;;  %vm6154_vm8 = vcmp.eq.f32.partialorder %v8733_v25, %v9830_v23  ;;  %vm6170_vm12 = vcmp.eq.f32.partialorder %v8739_v14, %v9830_v23 }
 0xabc   : > { %10144 = vst [vmem:[#allocation43_spill] sm:$0xff] %v9707_v22  ;;  %v6249_v22 = vmul.f32 %v7196_v55, %v6241_v47  ;;  %v6276_v47 = vmul.f32 %v7223_v28, %v9748_v21  ;;  %v7183_v55 = vsel %vm6012_vm15, 1.0, %v7948_v29  ;;  %v6268_v20 = vmul.f32 %v7215_v15, %v9748_v21 }
 0xabd   : > { %v6116_v46 = vmul.f32 %v7183_v55, %v9751_v8  ;;  %v9832_v55 = vperm.slane %v6131_v61, 0  ;;  %vm6162_vm15 = vcmp.eq.f32.partialorder %v8735_v35, %v9830_v23 }
 0xabe   : > { %v9709_v63 = vpop.f32.mrf.mxu0  ;;  %v9812_v28 = vadd.f32 %v6249_v22, %v6097_v50  ;;  %v6260_v50 = vmul.f32 %v7207_v49, %v9748_v21  ;;  %v9828_v22 = vadd.f32 %v6276_v47, %v6124_v37  ;;  %v9846_v49 = vperm.slane %v9759_v32, 0 }
 0xabf   : > { %v9711_v17 = vpop.f32.mrf.mxu1  ;;  %vm6147_vm7 = vcmp.eq.f32.partialorder %v8731_v44, %v9832_v55  ;;  %vm6155_vm11 = vcmp.eq.f32.partialorder %v8733_v25, %v9832_v55  ;;  %vm6171_vm13 = vcmp.eq.f32.partialorder %v8739_v14, %v9832_v55 }
 0xac0   : > { %v6370_v61 = vmul.f32 %v9781_v24, %v9711_v17  ;;  %v6362_v17 = vmul.f32 %v9787_v56, %v9703_v40 }
 0xac2   : > { %v9713_v41 = vpop.f32.mrf.mxu2  ;;  %v9715_v52 = vpop.f32.mrf.mxu3 }
 0xac3   : > { %10145 = vst [vmem:[#allocation40_spill] sm:$0xff] %v9715_v52 }
 0xac6   : > { %v9718_v58 = vpop.f32.mrf.mxu0 }
 0xac7   : > { %v9720_v0 = vpop.f32.mrf.mxu1 }
 0xac8   : > { %v6378_v52 = vmul.f32 %v9812_v28, %v9720_v0  ;;  %v9849_v0 = vperm.slane %v9754_v18, 0 }
 0xaca   : > { %v9723_v39 = vpop.f32.mrf.mxu2  ;;  %v9725_v4 = vpop.f32.mrf.mxu3  ;;  %vm5995_vm9 = vcmp.eq.f32.partialorder %v8731_v44, %v9849_v0  ;;  %vm6003_vm10 = vcmp.eq.f32.partialorder %v8733_v25, %v9849_v0  ;;  %vm6019_vm4 = vcmp.eq.f32.partialorder %v8739_v14, %v9849_v0 }
 0xace   : > { %v9727_v51 = vpop.f32.mrf.mxu0 }
 0xacf   : > { %v9729_v16 = vpop.f32.mrf.mxu1 }
 0xad2   : > { %v9732_v31 = vpop.f32.mrf.mxu2  ;;  %v9734_v54 = vpop.f32.mrf.mxu3 }
 0xad6   : > { %v9744_v1 = vpop.f32.mrf.mxu0 }
 0xad7   : > { %v5816_v34 = vpop.f32.mrf.mxu1 }
 0xad8   : > { %v6394_v59 = vmul.f32 %v9787_v56, %v5816_v34  ;;  %v7175_v34 = vsel %vm6004_vm3, 1.0, %v7948_v29  ;;  %vm6163_vm3 = vcmp.eq.f32.partialorder %v8735_v35, %v9832_v55  ;;  %v6314_v55 = vmul.f32 %v9812_v28, %v9478_v43 }
 0xad9   : > { %v6108_v15 = vmul.f32 %v7175_v34, %v9751_v8  ;;  %v9839_v34 = vadd.f32 %v6268_v20, %v6116_v46  ;;  %v9874_v20 = vld [vmem:[#allocation24] sm:$0x7] }
 0xada   : > { %v9766_v11 = vpop.f32.mrf.mxu2  ;;  %v9768_v33 = vpop.f32.mrf.mxu3  ;;  %7225 = vmatmul.msk.f32.vlgmr.msrb.gmra.mxu2 %vm1059_vm1, %v9874_v20  ;;  %7226 = vmatmul.msk.f32.vlgmr.msra.gmra.mxu3 %vm1059_vm1, %v9874_v20 }
 0xadb   : > { %7227 = vmatmul.msk.f32.vlgmr.msra.gmra.mxu0 %vm1059_vm1, %v9874_v20  ;;  %7224 = vmatmul.msk.f32.vlgmr.msrb.gmra.mxu1 %vm1059_vm1, %v9874_v20 }
 0xade   : > { %v5975_v27 = vpop.f32.mrf.mxu0 }
 0xadf   : > { %v5819_v19 = vpop.f32.mrf.mxu1 }
 0xae0   : > { %v6402_v48 = vmul.f32 %v9781_v24, %v5819_v19  ;;  %v5146_v19 = vsub.f32 %v9737_v6, %v9754_v18  ;;  %v6386_v6 = vmul.f32 %v9797_v60, %v9729_v16 }
 0xae2   : > { %v9801_v13 = vpop.f32.mrf.mxu2  ;;  %v9803_v53 = vpop.f32.mrf.mxu3  ;;  %6493 = vmatpush.msra.mxu1 %v6402_v48  ;;  %v9824_v48 = vperm.slane %v9740_v42, 0  ;;  %v6100_v42 = vmul.f32 %v7167_v3, %v9751_v8  ;;  %v5154_v47 = vsub.f32 1.0, %v5146_v19  ;;  %v9851_v8 = vadd.f32 %v6260_v50, %v6108_v15 }
 0xae3   : > { %v9866_v32 = vperm.slane %v5146_v19, 0  ;;  %v6354_v19 = vmul.f32 %v9797_v60, %v9693_v10  ;;  %v9902_v10 = vsel %vm6147_vm7, 1.0, %v7948_v29  ;;  %v7205_v3 = vsel %vm6154_vm8, 1.0, %v7948_v29 }
 0xae4   : > { %6494 = vmatpush.msra.mxu1 %v6394_v59  ;;  %v6252_v59 = vmul.f32 %v7199_v5, %v9748_v21  ;;  %v6397_v21 = vmul.f32 %v9839_v34, %v5975_v27  ;;  %vm5994_vm5 = vcmp.eq.f32.partialorder %v8731_v44, %v9824_v48  ;;  %vm6002_vm0 = vcmp.eq.f32.partialorder %v8733_v25, %v9824_v48 }
 0xae5   : > { %v6389_v46 = vmul.f32 %v9851_v8, %v9744_v1  ;;  %v9876_v5 = vperm.slane %v5153_v9, 0  ;;  %v9878_v40 = vperm.slane %v5154_v47, 0  ;;  %v9890_v1 = vsel %vm5994_vm5, 1.0, %v7948_v29 }
 0xae6   : > { %v5978_v16 = vpop.f32.mrf.mxu0  ;;  %6495 = vmatpush.msra.mxu1 %v6386_v6  ;;  %v9868_v27 = vadd.f32 %v6252_v59, %v6100_v42  ;;  %v9896_v6 = vsel %vm6146_vm6, 1.0, %v7948_v29  ;;  %v7173_v50 = vsel %vm6002_vm0, 1.0, %v7948_v29  ;;  %vm6010_vm14 = vcmp.eq.f32.partialorder %v8735_v35, %v9824_v48 }
 0xae7   : > { %v6405_v37 = vmul.f32 %v9828_v22, %v5978_v16  ;;  %v6373_v16 = vmul.f32 %v9828_v22, %v9718_v58  ;;  %vm6018_vm2 = vcmp.eq.f32.partialorder %v8739_v14, %v9824_v48  ;;  %v7206_v42 = vsel %vm6155_vm11, 1.0, %v7948_v29 }
 0xae8   : > { %6496 = vmatpush.msra.mxu1 %v6378_v52  ;;  %v6381_v15 = vmul.f32 %v9868_v27, %v9727_v51  ;;  %v6346_v51 = vmul.f32 %v9812_v28, %v9677_v62  ;;  %v6338_v62 = vmul.f32 %v9781_v24, %v9661_v45  ;;  %v6365_v45 = vmul.f32 %v9839_v34, %v9709_v63 }
 0xae9   : > { %6553 = vmatpush.msrb.mxu0 %v6405_v37  ;;  %v6330_v24 = vmul.f32 %v9787_v56, %v9634_v38  ;;  %vm6011_vm5 = vcmp.eq.f32.partialorder %v8735_v35, %v9849_v0  ;;  %v7221_v58 = vsel %vm6170_vm12, 1.0, %v7948_v29  ;;  %v7222_v59 = vsel %vm6171_vm13, 1.0, %v7948_v29 }
 0xaea   : > { %v9862_v52 = vpop.f32.mrf.mxu2  ;;  %v9864_v18 = vpop.f32.mrf.mxu3  ;;  %6497 = vmatpush.msra.mxu1 %v6370_v61  ;;  %v7181_v38 = vsel %vm6010_vm14, 1.0, %v7948_v29  ;;  %v7213_v63 = vsel %vm6162_vm15, 1.0, %v7948_v29  ;;  %v7189_v56 = vsel %vm6018_vm2, 1.0, %v7948_v29  ;;  %v6357_v47 = vmul.f32 %v9851_v8, %v9701_v57 }
 0xaeb   : > { %6554 = vmatpush.msrb.mxu0 %v6397_v21  ;;  %v6322_v61 = vmul.f32 %v9797_v60, %v9558_v30  ;;  %v7214_v21 = vsel %vm6163_vm3, 1.0, %v7948_v29  ;;  %v6122_v23 = vmul.f32 %v7189_v56, %v9876_v5  ;;  %v7190_v48 = vsel %vm6019_vm4, 1.0, %v7948_v29 }
 0xaec   : > { %6498 = vmatpush.msra.mxu1 %v6362_v17  ;;  %v6349_v57 = vmul.f32 %v9868_v27, %v9689_v36  ;;  %v6274_v17 = vmul.f32 %v7221_v58, %v9846_v49  ;;  %v6123_v30 = vmul.f32 %v7190_v48, %v9878_v40  ;;  %v6275_v60 = vmul.f32 %v7222_v59, %v9866_v32 }
 0xaed   : > { %6555 = vmatpush.msrb.mxu0 %v6389_v46  ;;  %v7174_v14 = vsel %vm6003_vm10, 1.0, %v7948_v29  ;;  %v6114_v46 = vmul.f32 %v7181_v38, %v9876_v5  ;;  %v7182_v36 = vsel %vm6011_vm5, 1.0, %v7948_v29  ;;  %v6267_v28 = vmul.f32 %v7214_v21, %v9866_v32  ;;  %v10154_v21 = vld [vmem:[#allocation45_spill] sm:$0xff] }
 0xaee   : > { %6499 = vmatpush.msra.mxu1 %v6354_v19  ;;  %v6341_v19 = vmul.f32 %v9828_v22, %v9673_v7  ;;  %v6115_v43 = vmul.f32 %v7182_v36, %v9878_v40  ;;  %v6106_v25 = vmul.f32 %v7173_v50, %v9876_v5  ;;  %v6259_v35 = vmul.f32 %v7206_v42, %v9866_v32 }
 0xaef   : > { %6556 = vmatpush.msrb.mxu0 %v6381_v15  ;;  %v6266_v15 = vmul.f32 %v7213_v63, %v9846_v49  ;;  %v7166_v7 = vsel %vm5995_vm9, 1.0, %v7948_v29  ;;  %v6333_v22 = vmul.f32 %v9839_v34, %v9657_v26  ;;  %v6098_v50 = vmul.f32 %v9890_v1, %v9876_v5 }
 0xaf0   : > { %6500 = vmatpush.msra.mxu1 %v6346_v51  ;;  %v6258_v51 = vmul.f32 %v7205_v3, %v9846_v49  ;;  %v6250_v3 = vmul.f32 %v9896_v6, %v9846_v49  ;;  %v6099_v42 = vmul.f32 %v7166_v7, %v9878_v40  ;;  %v6251_v44 = vmul.f32 %v9902_v10, %v9866_v32 }
 0xaf1   : > { %6557 = vmatpush.msrb.mxu0 %v6373_v16  ;;  %v6107_v16 = vmul.f32 %v7174_v14, %v9878_v40  ;;  %v6298_v26 = vadd.f32 %v6266_v15, %v6114_v46  ;;  %v6299_v34 = vadd.f32 %v6267_v28, %v6115_v43  ;;  %v6325_v59 = vmul.f32 %v9851_v8, %v9627_v12 }
 0xaf2   : > { %v5869_v37 = vpop.f32.mrf.mxu2  ;;  %v5922_v9 = vpop.f32.mrf.mxu3  ;;  %6501 = vmatpush.msra.mxu1 %v6338_v62  ;;  %v6306_v62 = vadd.f32 %v6274_v17, %v6122_v23  ;;  %v6290_v38 = vadd.f32 %v6258_v51, %v6106_v25  ;;  %v6317_v49 = vmul.f32 %v9868_v27, %v9548_v2  ;;  %v6282_v32 = vadd.f32 %v6250_v3, %v6098_v50 }
 0xaf3   : > { %6558 = vmatpush.msrb.mxu0 %v6365_v45  ;;  %v6307_v45 = vadd.f32 %v6275_v60, %v6123_v30  ;;  %v6291_v5 = vadd.f32 %v6259_v35, %v6107_v16  ;;  %v6395_v1 = vmul.f32 %v6298_v26, %v5869_v37  ;;  %v6396_v63 = vmul.f32 %v6299_v34, %v5922_v9  ;;  %v10150_v9 = vld [vmem:[#allocation40_spill] sm:$0xff]  ;;  %v10158_v30 = vld [vmem:[#allocation49_spill] sm:$0xff] }
 0xaf4   : > { %6502 = vmatpush.msra.mxu1 %v6330_v24  ;;  %v6283_v40 = vadd.f32 %v6251_v44, %v6099_v42  ;;  %v6387_v6 = vmul.f32 %v6290_v38, %v9862_v52  ;;  %v6379_v12 = vmul.f32 %v6282_v32, %v9801_v13  ;;  %v6371_v2 = vmul.f32 %v6306_v62, %v9766_v11 }
 0xaf5   : > { %6559 = vmatpush.msrb.mxu0 %v6357_v47  ;;  %v6388_v10 = vmul.f32 %v6291_v5, %v9864_v18  ;;  %v6372_v27 = vmul.f32 %v6307_v45, %v9768_v33  ;;  %v6363_v52 = vmul.f32 %v6298_v26, %v9732_v31  ;;  %v6364_v18 = vmul.f32 %v6299_v34, %v9734_v54  ;;  %v10151_v33 = vld [vmem:[#allocation42_spill] sm:$0xff]  ;;  %v10152_v47 = vld [vmem:[#allocation43_spill] sm:$0xff]  ;;  %v10153_v54 = vld [vmem:[#allocation44_spill] sm:$0xff] }
 0xaf6   : > { %6503 = vmatpush.msra.mxu1 %v6322_v61  ;;  %v6380_v8 = vmul.f32 %v6283_v40, %v9803_v53  ;;  %v6355_v13 = vmul.f32 %v6290_v38, %v9723_v39  ;;  %v6356_v53 = vmul.f32 %v6291_v5, %v9725_v4  ;;  %v6347_v37 = vmul.f32 %v6282_v32, %v9713_v41  ;;  %v10155_v4 = vld [vmem:[#allocation46_spill] sm:$0xff]  ;;  %v10156_v41 = vld [vmem:[#allocation47_spill] sm:$0xff] }
 0xaf7   : > { %6560 = vmatpush.msrb.mxu0 %v6349_v57  ;;  %v6348_v11 = vmul.f32 %v6283_v40, %v10150_v9  ;;  %v6339_v56 = vmul.f32 %v6306_v62, %v10151_v33  ;;  %v6340_v31 = vmul.f32 %v6307_v45, %v10152_v47  ;;  %v6331_v61 = vmul.f32 %v6298_v26, %v10153_v54  ;;  %v10157_v57 = vld [vmem:[#allocation48_spill] sm:$0xff] }
 0xaf8   : > { %6504 = vmatpush.msra.mxu1 %v6314_v55  ;;  %v6332_v39 = vmul.f32 %v6299_v34, %v10154_v21  ;;  %v6323_v23 = vmul.f32 %v6290_v38, %v10155_v4  ;;  %v6324_v48 = vmul.f32 %v6291_v5, %v10156_v41  ;;  %v6315_v17 = vmul.f32 %v6282_v32, %v10157_v57 }
 0xaf9   : > { %6561 = vmatpush.msrb.mxu0 %v6341_v19  ;;  %7228 = vmatmul.msk.f32.vlgmr.msra.gmra.mxu1 %vm1059_vm1, %v9874_v20  ;;  %v6316_v60 = vmul.f32 %v6283_v40, %v10158_v30  ;;  %vm6581_vm6 = vcmask 1043456  }
 0xafa   : > { %v5872_v29 = vpop.f32.mrf.mxu2  ;;  %v5925_v0 = vpop.f32.mrf.mxu3 }
 0xafb   : > { %v6403_v24 = vmul.f32 %v6306_v62, %v5872_v29  ;;  %v6404_v58 = vmul.f32 %v6307_v45, %v5925_v0  ;;  %6562 = vmatpush.msrb.mxu0 %v6333_v22 }
 0xafd   : > { %6513 = vmatpush.msra.mxu2 %v6403_v24  ;;  %6533 = vmatpush.msrb.mxu3 %v6404_v58 }
 0xafe   : > { %6563 = vmatpush.msrb.mxu0 %v6325_v59 }
 0xaff   : > { %6514 = vmatpush.msra.mxu2 %v6395_v1  ;;  %6534 = vmatpush.msrb.mxu3 %v6396_v63 }
 0xb00   : > { %6564 = vmatpush.msrb.mxu0 %v6317_v49 }
 0xb01   : > { %6515 = vmatpush.msra.mxu2 %v6387_v6  ;;  %6535 = vmatpush.msrb.mxu3 %v6388_v10 }
 0xb02   : > { %7231 = vmatmul.msk.f32.vlgmr.msrb.gmra.mxu0 %vm1059_vm1, %v9874_v20 }
 0xb03   : > { %6516 = vmatpush.msra.mxu2 %v6379_v12  ;;  %6536 = vmatpush.msrb.mxu3 %v6380_v8 }
 0xb05   : > { %6517 = vmatpush.msra.mxu2 %v6371_v2  ;;  %6537 = vmatpush.msrb.mxu3 %v6372_v27 }
 0xb07   : > { %6518 = vmatpush.msra.mxu2 %v6363_v52  ;;  %6538 = vmatpush.msrb.mxu3 %v6364_v18 }
 0xb09   : > { %6519 = vmatpush.msra.mxu2 %v6355_v13  ;;  %6539 = vmatpush.msrb.mxu3 %v6356_v53 }
 0xb0b   : > { %6520 = vmatpush.msra.mxu2 %v6347_v37  ;;  %6540 = vmatpush.msrb.mxu3 %v6348_v11 }
 0xb0d   : > { %6521 = vmatpush.msra.mxu2 %v6339_v56  ;;  %6541 = vmatpush.msrb.mxu3 %v6340_v31 }
 0xb0f   : > { %6522 = vmatpush.msra.mxu2 %v6331_v61  ;;  %6542 = vmatpush.msrb.mxu3 %v6332_v39 }
 0xb11   : > { %6523 = vmatpush.msra.mxu2 %v6323_v23  ;;  %6543 = vmatpush.msrb.mxu3 %v6324_v48 }
 0xb13   : > { %6524 = vmatpush.msra.mxu2 %v6315_v17  ;;  %6544 = vmatpush.msrb.mxu3 %v6316_v60 }
 0xb14   : > { %7229 = vmatmul.msk.f32.vlgmr.msra.gmra.mxu2 %vm1059_vm1, %v9874_v20  ;;  %7230 = vmatmul.msk.f32.vlgmr.msrb.gmra.mxu3 %vm1059_vm1, %v9874_v20 }
 0xb58   : > { %v6486_v55 = vpop.f32.mrf.mxu0  ;;  %v6426_v36 = vpop.f32.mrf.mxu1 }
 0xb59   : > { %v6578_v14 = vrot.slane %v6486_v55, 4 }
 0xb5d   : > { %v6446_v46 = vpop.f32.mrf.mxu2  ;;  %v6466_v15 = vpop.f32.mrf.mxu3 }
 0xb5e   : > { %v6577_v19 = vrot.slane %v6446_v46, 4  ;;  %v6583_v43 = vsel %vm6581_vm6, %v6466_v15, %v6578_v14 }
 0xb5f   : > { %6591 = vst [vmem:[%s862_s19 + $0x8] sm:$0x77] %v6583_v43 }
 0xb60   : > { %v6582_v28 = vsel %vm6581_vm6, %v6426_v36, %v6577_v19 }
 0xb61   : > { %6590 = vst [vmem:[%s862_s19] sm:$0x77] %v6582_v28 }
 0xb76   : > { %v6506_v51 = vpop.f32.mrf.mxu1 }
 0xb7f   : > { %v6566_v25 = vpop.f32.mrf.mxu0 }
 0xb80   : > { %v6580_v20 = vrot.slane %v6566_v25, 4 }
 0xb97   : > { %v6526_v16 = vpop.f32.mrf.mxu2  ;;  %v6546_v35 = vpop.f32.mrf.mxu3 }
 0xb98   : > { %v6579_v7 = vrot.slane %v6526_v16, 4  ;;  %v6585_v22 = vsel %vm6581_vm6, %v6546_v35, %v6580_v20 }
 0xb99   : > { %6593 = vst [vmem:[%s862_s19 + $0x18] sm:$0x77] %v6585_v22 }
 0xb9a   : > { %v6584_v62 = vsel %vm6581_vm6, %v6506_v51, %v6579_v7 }
 0xb9b   : > { %6592 = vst [vmem:[%s862_s19 + $0x10] sm:$0x77] %v6584_v62 }
 0xb9c PF: > { %s10160_s22 = sld [smem:[#allocation33_spill]] }
 0xba2   : > { %s38_s0 = sadd.s32 1, %s10160_s22  }
 0xba3   : > { %p35_p7 = scmp.ge.s32.totalorder %s38_s0, 4  }
 0xba5   :  { %37 = sbr.rel (!%p35_p7) target bundleno = 17 (0x11), region = 215 }
 0xbaa   :  { %6627 = vsyncpa [#allocation3], 1 }
 0xbab   :  { %6629 = vsyncpa [#allocation3 + $0x1], 1 }
 0xbac   :  { %6630 = vsyncpa [#allocation5], 1 }
 0xbad   :  { %6631 = vsyncpa [#allocation8], 1 }
 0xbae   :  { %6632 = vsyncpa [#allocation11], 1 }
 0xbaf   :  { %6633 = vsyncpa [#allocation14], 1 }
 0xbb0   :  { %6634 = vsyncpa [#allocation17], 1 }
 0xbb1   :  { %6635 = vsyncpa [#allocation20], 1 }
 0xbb2   :  { %6636 = vsyncpa [#allocation23], 1 }

</bundles_post_ra>
